<compile_context>
chip_gen: v7x
topology: tpu7x:2x2x1
jax: 0.10.0
libtpu: 0.0.40
codegen_flags: <defaults>
</compile_context>

<pallas_src>
import jax
import jax.numpy as jnp
from jax import lax
from jax.experimental import pallas as pl
from jax.experimental.pallas import tpu as pltpu

C_HID = 64  # internal channel width of FTN_Resnet


# ----------------------------------------------------------------------------
# In-kernel helper: build a 3x3 im2col buffer from an activation ref.
#   src_ref : (B_T, H, W, C)       activations (f32)
#   col_ref : (B_T, H, W, 9*C)     bf16 column buffer; halo entries must be 0
# Only the in-bounds sub-rectangle of each tap is written, so pre-zeroed halo
# entries remain zero (implements SAME zero padding without a padded scratch).
# ----------------------------------------------------------------------------
def _im2col_3x3(src_ref, col_ref, c):
    _, H, W, _ = src_ref.shape
    for kh in range(3):
        for kw in range(3):
            dh, dw = kh - 1, kw - 1
            t = kh * 3 + kw
            dh0, dh1 = max(0, -dh), H - max(0, dh)   # dest rows
            dw0, dw1 = max(0, -dw), W - max(0, dw)   # dest cols
            sh0, sh1 = max(0, dh), H - max(0, -dh)   # src rows
            sw0, sw1 = max(0, dw), W - max(0, -dw)   # src cols
            col_ref[:, dh0:dh1, dw0:dw1, t * c:(t + 1) * c] = (
                src_ref[:, sh0:sh1, sw0:sw1, :].astype(col_ref.dtype))


# ----------------------------------------------------------------------------
# Pallas kernel: fused FTN_Resnet forward for one batch tile
# ----------------------------------------------------------------------------
def _ftn_resnet_kernel(x_ref, w1_ref, b1_ref, wk_ref, scale_ref, shift_ref,
                       w2_ref, b2_ref, out_ref, col1_ref, col_ref, act_ref):
    """
    x_ref    : (B_T, H, W, Cin)  f32     input image tile
    w1_ref   : (9*Cin, 64)       bf16    conv1_primary weight (im2col layout)
    b1_ref   : (1, 64)           f32     conv1_primary bias
    wk_ref   : (L, 9*64, 64)     bf16    FTN-transformed block conv weights
    scale_ref/shift_ref : (L,1,64) f32   folded BatchNorm (inference) scale/shift
    w2_ref   : (9*64, Cpad)      bf16    conv2_primary weight, out-ch zero-padded
    b2_ref   : (1, Cpad)         f32     conv2_primary bias, zero-padded
    out_ref  : (B_T, H*W, Cpad)  f32     lane-dense output (wrapper slices :Cin)
    col1_ref : VMEM (B_T,H,W,9*Cin) bf16 im2col buffer for conv1
    col_ref  : VMEM (B_T,H,W,9*64)  bf16 im2col buffer for block convs / conv2
    act_ref  : VMEM (B_T,H,W,64)    f32  running hidden activation
    """
    B_T, H, W, Cin = x_ref.shape
    L = wk_ref.shape[0]
    C = act_ref.shape[-1]
    M = B_T * H * W

    # Zero the im2col buffers once per grid step; only their halo entries rely
    # on this (interiors are fully overwritten by every _im2col_3x3 call).
    col1_ref[...] = jnp.zeros_like(col1_ref)
    col_ref[...] = jnp.zeros_like(col_ref)

    # ---- conv1_primary: im2col (M, 9*Cin) @ (9*Cin, 64) + bias + ReLU --------
    _im2col_3x3(x_ref, col1_ref, Cin)
    acc1 = jnp.dot(col1_ref[...].reshape(M, 9 * Cin), w1_ref[...],
                   preferred_element_type=jnp.float32)
    act_ref[...] = jnp.maximum(acc1 + b1_ref[...], 0.0).reshape(act_ref.shape)

    # ---- residual conv_ftn_blocks: relu(BN(conv3x3(x, Wk))) + x --------------
    # TODO(synk): BatchNorm implemented in inference mode (folded running
    # stats); training-mode batch statistics are not reproduced here.
    def layer_body(i, carry):
        _im2col_3x3(act_ref, col_ref, C)
        acc = jnp.dot(col_ref[...].reshape(M, 9 * C), wk_ref[i],
                      preferred_element_type=jnp.float32)
        y = acc * scale_ref[i] + shift_ref[i]
        act_ref[...] = act_ref[...] + jnp.maximum(y, 0.0).reshape(act_ref.shape)
        return carry

    lax.fori_loop(0, L, layer_body, 0)

    # ---- conv2_primary: im2col @ padded weight, bias; lane-dense store -------
    _im2col_3x3(act_ref, col_ref, C)
    acc2 = jnp.dot(col_ref[...].reshape(M, 9 * C), w2_ref[...],
                   preferred_element_type=jnp.float32) + b2_ref[...]
    out_ref[...] = acc2.reshape(out_ref.shape)


# ----------------------------------------------------------------------------
# Wrapper
# ----------------------------------------------------------------------------
def ftn_resnet_forward(x_nchw, params):
    N, Cin, H, W = x_nchw.shape
    x = jnp.transpose(x_nchw, (0, 2, 3, 1)).astype(jnp.float32)    # NCHW -> NHWC

    w1, b1 = params["w1"], params["b1"]            # (9*Cin, 64) bf16 / (1, 64) f32
    wk = params["wk"]                              # (L, 576, 64) bf16
    scale, shift = params["bn_scale"], params["bn_shift"]          # (L, 1, 64) f32
    w2, b2 = params["w2"], params["b2"]            # (576, Cin) bf16 / (1, Cin) f32
    L = wk.shape[0]

    # Lane-dense output: pad conv2 output channels to a multiple of 128
    # (extra MXU columns are free; stores become unmasked dense vst).
    c_out = max(128, ((Cin + 127) // 128) * 128)
    w2p = jnp.zeros((9 * C_HID, c_out), jnp.bfloat16).at[:, :Cin].set(w2)
    b2p = jnp.zeros((1, c_out), jnp.float32).at[:, :Cin].set(b2)

    # Batch tile: amortize per-step overhead while keeping >=2 grid steps when
    # possible so the "parallel" batch axis can split across TensorCores (v7x).
    bt = 1
    for cand in (8, 4, 2):
        if N % cand == 0 and (N // cand) >= 2:
            bt = cand
            break
    grid_n = N // bt

    flops = 2 * N * H * W * 9 * (Cin * C_HID + L * C_HID * C_HID + C_HID * c_out)
    bytes_accessed = int(x.size * 4 + N * H * W * c_out * 4
                         + (w1.size + wk.size + w2p.size) * 2
                         + (b1.size + b2p.size + scale.size + shift.size) * 4)

    out = pl.pallas_call(
        _ftn_resnet_kernel,
        out_shape=jax.ShapeDtypeStruct((N, H * W, c_out), jnp.float32),
        grid_spec=pltpu.PrefetchScalarGridSpec(
            num_scalar_prefetch=0,
            grid=(grid_n,),
            in_specs=[
                pl.BlockSpec((bt, H, W, Cin), lambda n: (n, 0, 0, 0)),
                pl.BlockSpec((9 * Cin, C_HID), lambda n: (0, 0)),
                pl.BlockSpec((1, C_HID), lambda n: (0, 0)),
                pl.BlockSpec((L, 9 * C_HID, C_HID), lambda n: (0, 0, 0)),
                pl.BlockSpec((L, 1, C_HID), lambda n: (0, 0, 0)),
                pl.BlockSpec((L, 1, C_HID), lambda n: (0, 0, 0)),
                pl.BlockSpec((9 * C_HID, c_out), lambda n: (0, 0)),
                pl.BlockSpec((1, c_out), lambda n: (0, 0)),
            ],
            out_specs=pl.BlockSpec((bt, H * W, c_out), lambda n: (n, 0, 0)),
            scratch_shapes=[
                pltpu.VMEM((bt, H, W, 9 * Cin), jnp.bfloat16),   # conv1 im2col
                pltpu.VMEM((bt, H, W, 9 * C_HID), jnp.bfloat16), # block im2col
                pltpu.VMEM((bt, H, W, C_HID), jnp.float32),      # activation
            ],
        ),
        compiler_params=pltpu.CompilerParams(
            dimension_semantics=("parallel",),
            vmem_limit_bytes=48 * 1024 * 1024,
        ),
        cost_estimate=pl.CostEstimate(
            flops=flops, transcendentals=0, bytes_accessed=bytes_accessed),
    )(x, w1, b1, wk, scale, shift, w2p, b2p)

    # drop channel padding, add the global identity skip, back to NCHW
    y = out[:, :, :Cin].reshape(N, H, W, Cin) + x
    return jnp.transpose(y, (0, 3, 1, 2))


# ----------------------------------------------------------------------------
# Parameter construction (deterministic, synthetic)
# ----------------------------------------------------------------------------
def _ftn_transform(kp, w1, b1, prelu_a, w2, b2, alpha, groups=16):
    """FTN block applied to a (64, 64, 3, 3) kernel tensor (treated as NCHW data)."""
    # TODO(synk): FTN.FTNBlock source is not in the provided snippet; this uses
    # the standard FTN form (two grouped 1x1 convs + PReLU, alpha-interpolated).
    N, C, Hk, Wk = kp.shape
    cg = C // groups
    w1g = w1.reshape(groups, cg, cg)
    w2g = w2.reshape(groups, cg, cg)
    xg = kp.reshape(N, groups, cg, Hk, Wk)
    y = jnp.einsum("ngchw,goc->ngohw", xg, w1g).reshape(N, C, Hk, Wk)
    y = y + b1[None, :, None, None]
    y = jnp.where(y >= 0, y, prelu_a * y)
    yg = y.reshape(N, groups, cg, Hk, Wk)
    y2 = jnp.einsum("ngchw,goc->ngohw", yg, w2g).reshape(N, C, Hk, Wk)
    y2 = y2 + b2[None, :, None, None]
    return (1.0 - alpha) * kp + alpha * y2


def _torch_oihw_to_im2col(w):
    """(Cout, Cin, 3, 3) -> (9*Cin, Cout) with row index (kh*3+kw)*Cin + ci."""
    co, ci = w.shape[0], w.shape[1]
    return jnp.transpose(w, (2, 3, 1, 0)).reshape(9 * ci, co)


def make_params(key, input_channels=4, num_layers=1, alpha=0.5):
    std = (2.0 / (9.0 * 64.0)) ** 0.5
    keys = jax.random.split(key, 4 + 6 * num_layers)
    kit = iter(keys)

    # conv1_primary / conv2_primary
    w1_t = std * jax.random.normal(next(kit), (C_HID, input_channels, 3, 3), jnp.float32)
    b1 = 0.01 * jax.random.normal(next(kit), (C_HID,), jnp.float32)
    w2_t = std * jax.random.normal(next(kit), (input_channels, C_HID, 3, 3), jnp.float32)
    b2 = 0.01 * jax.random.normal(next(kit), (input_channels,), jnp.float32)

    wk_list, scale_list, shift_list = [], [], []
    clip_b, eps, running_var = 0.025, 1e-5, 0.01
    for _ in range(num_layers):
        # Kernels(): a (64, 64, 3, 3) learnable kernel tensor
        kp = std * jax.random.normal(next(kit), (C_HID, C_HID, 3, 3), jnp.float32)
        # FTNBlock params: two grouped (groups=16) 1x1 convs + PReLU
        fw1 = 0.1 * jax.random.normal(next(kit), (C_HID, C_HID // 16), jnp.float32)
        fb1 = jnp.zeros((C_HID,), jnp.float32)
        fw2 = 0.1 * jax.random.normal(next(kit), (C_HID, C_HID // 16), jnp.float32)
        fb2 = jnp.zeros((C_HID,), jnp.float32)
        prelu_a = jnp.float32(0.25)
        _ = next(kit)  # reserved
        tk = _ftn_transform(kp, fw1, fb1, prelu_a, fw2, fb2, alpha)
        wk_list.append(_torch_oihw_to_im2col(tk))

        # BatchNorm2d, initialized as in FTN_Resnet._init_weights, eval mode.
        g = std * jax.random.normal(next(kit), (C_HID,), jnp.float32)
        g = jnp.where((g >= 0) & (g < clip_b), clip_b,
                      jnp.where((g > -clip_b) & (g < 0), -clip_b, g))
        beta = jnp.zeros((C_HID,), jnp.float32)
        running_mean = jnp.zeros((C_HID,), jnp.float32)
        s = g / jnp.sqrt(running_var + eps)
        scale_list.append(s.reshape(1, C_HID))
        shift_list.append((beta - running_mean * s).reshape(1, C_HID))

    return {
        "w1": _torch_oihw_to_im2col(w1_t).astype(jnp.bfloat16),
        "b1": b1.reshape(1, C_HID),
        "wk": jnp.stack(wk_list, axis=0).astype(jnp.bfloat16),
        "bn_scale": jnp.stack(scale_list, axis=0),
        "bn_shift": jnp.stack(shift_list, axis=0),
        "w2": _torch_oihw_to_im2col(w2_t).astype(jnp.bfloat16),
        "b2": b2.reshape(1, input_channels),
    }


# ----------------------------------------------------------------------------
# Pure-JAX reference (for validation); uses the same (bf16-stored) weights.
# ----------------------------------------------------------------------------
def _ref_forward(x_nchw, params):
    x = jnp.transpose(x_nchw, (0, 2, 3, 1)).astype(jnp.float32)

    def conv3x3(a, wflat):
        w = wflat.astype(jnp.float32)
        k = w.reshape(3, 3, w.shape[0] // 9, w.shape[1])
        return lax.conv_general_dilated(
            a, k, (1, 1), "SAME",
            dimension_numbers=("NHWC", "HWIO", "NHWC"),
            precision=lax.Precision.HIGHEST)

    h = jnp.maximum(conv3x3(x, params["w1"]) + params["b1"][0], 0.0)
    for i in range(params["wk"].shape[0]):
        y = conv3x3(h, params["wk"][i]) * params["bn_scale"][i, 0] + params["bn_shift"][i, 0]
        h = jnp.maximum(y, 0.0) + h
    out = conv3x3(h, params["w2"]) + params["b2"][0] + x
    return jnp.transpose(out, (0, 3, 1, 2))


# ----------------------------------------------------------------------------
if __name__ == "__main__":
    key = jax.random.PRNGKey(0)
    k_param, k_x = jax.random.split(key)

    N, Cin, H, W = 2, 4, 16, 16
    num_layers = 1
    alpha = 0.5

    params = make_params(k_param, input_channels=Cin, num_layers=num_layers, alpha=alpha)
    x = jax.random.normal(k_x, (N, Cin, H, W), jnp.float32)

    out = ftn_resnet_forward(x, params)
    out = jax.block_until_ready(out)

    ref = jax.block_until_ready(_ref_forward(x, params))
    assert out.shape == (N, Cin, H, W), out.shape
    max_err = float(jnp.max(jnp.abs(out - ref)))
    assert max_err < 2e-2, f"mismatch vs reference: max abs err = {max_err}"

    print("KERNEL_OK")
</pallas_src>

<mosaic_0001>
module attributes {stable_mosaic.version = 11 : i64} {
  func.func @_ftn_resnet_kernel(%arg0: i32, %arg1: memref<1x16x16x4xf32, #tpu.memory_space<vmem>>, %arg2: memref<36x64xbf16, #tpu.memory_space<vmem>>, %arg3: memref<1x64xf32, #tpu.memory_space<vmem>>, %arg4: memref<1x576x64xbf16, #tpu.memory_space<vmem>>, %arg5: memref<1x1x64xf32, #tpu.memory_space<vmem>>, %arg6: memref<1x1x64xf32, #tpu.memory_space<vmem>>, %arg7: memref<576x128xbf16, #tpu.memory_space<vmem>>, %arg8: memref<1x128xf32, #tpu.memory_space<vmem>>, %arg9: memref<1x256x128xf32, #tpu.memory_space<vmem>>, %arg10: memref<1x16x16x36xbf16, #tpu.memory_space<vmem>>, %arg11: memref<1x16x16x576xbf16, #tpu.memory_space<vmem>>, %arg12: memref<1x16x16x64xf32, #tpu.memory_space<vmem>>) attributes {dimension_semantics = [#tpu.dimension_semantics<parallel>], iteration_bounds = array<i64: 2>, scalar_prefetch = 0 : i64, scratch_operands = 3 : i64, tpu.core_type = #tpu.core_type<tc>, window_params = [{transform_indices = @transform_0, window_bounds = array<i64: 1, 16, 16, 4>}, {pipeline_mode = #tpu.pipeline_mode<synchronous>, transform_indices = @transform_1, window_bounds = array<i64: 36, 64>}, {pipeline_mode = #tpu.pipeline_mode<synchronous>, transform_indices = @transform_2, window_bounds = array<i64: 1, 64>}, {pipeline_mode = #tpu.pipeline_mode<synchronous>, transform_indices = @transform_3, window_bounds = array<i64: 1, 576, 64>}, {pipeline_mode = #tpu.pipeline_mode<synchronous>, transform_indices = @transform_4, window_bounds = array<i64: 1, 1, 64>}, {pipeline_mode = #tpu.pipeline_mode<synchronous>, transform_indices = @transform_5, window_bounds = array<i64: 1, 1, 64>}, {pipeline_mode = #tpu.pipeline_mode<synchronous>, transform_indices = @transform_6, window_bounds = array<i64: 576, 128>}, {pipeline_mode = #tpu.pipeline_mode<synchronous>, transform_indices = @transform_7, window_bounds = array<i64: 1, 128>}, {transform_indices = @transform_8, window_bounds = array<i64: 1, 256, 128>}]} {
    %cst = arith.constant 0.000000e+00 : bf16
    %0 = vector.broadcast %cst : bf16 to vector<1x16x16x36xbf16>
    %c0 = arith.constant 0 : index
    %c0_0 = arith.constant 0 : index
    %c0_1 = arith.constant 0 : index
    %c0_2 = arith.constant 0 : index
    %1 = vector.load %arg10[%c0, %c0_0, %c0_1, %c0_2] : memref<1x16x16x36xbf16, #tpu.memory_space<vmem>>, vector<1x16x16x36xbf16>
    tpu.vector_store %arg10[%c0, %c0_0, %c0_1, %c0_2], %0 {strides = array<i32>} : memref<1x16x16x36xbf16, #tpu.memory_space<vmem>>, vector<1x16x16x36xbf16>,
    %cst_3 = arith.constant 0.000000e+00 : bf16
    %2 = vector.broadcast %cst_3 : bf16 to vector<1x16x16x576xbf16>
    %c0_4 = arith.constant 0 : index
    %c0_5 = arith.constant 0 : index
    %c0_6 = arith.constant 0 : index
    %c0_7 = arith.constant 0 : index
    %3 = vector.load %arg11[%c0_4, %c0_5, %c0_6, %c0_7] : memref<1x16x16x576xbf16, #tpu.memory_space<vmem>>, vector<1x16x16x576xbf16>
    tpu.vector_store %arg11[%c0_4, %c0_5, %c0_6, %c0_7], %2 {strides = array<i32>} : memref<1x16x16x576xbf16, #tpu.memory_space<vmem>>, vector<1x16x16x576xbf16>,
    %c0_8 = arith.constant 0 : index
    %c0_9 = arith.constant 0 : index
    %c0_10 = arith.constant 0 : index
    %c0_11 = arith.constant 0 : index
    %4 = vector.load %arg1[%c0_8, %c0_9, %c0_10, %c0_11] : memref<1x16x16x4xf32, #tpu.memory_space<vmem>>, vector<1x15x15x4xf32>
    %5 = arith.truncf %4 : vector<1x15x15x4xf32> to vector<1x15x15x4xbf16>
    %c0_12 = arith.constant 0 : index
    %c1 = arith.constant 1 : index
    %c1_13 = arith.constant 1 : index
    %c0_14 = arith.constant 0 : index
    %6 = vector.load %arg10[%c0_12, %c1, %c1_13, %c0_14] : memref<1x16x16x36xbf16, #tpu.memory_space<vmem>>, vector<1x15x15x4xbf16>
    tpu.vector_store %arg10[%c0_12, %c1, %c1_13, %c0_14], %5 {strides = array<i32>} : memref<1x16x16x36xbf16, #tpu.memory_space<vmem>>, vector<1x15x15x4xbf16>,
    %c0_15 = arith.constant 0 : index
    %c0_16 = arith.constant 0 : index
    %c0_17 = arith.constant 0 : index
    %c0_18 = arith.constant 0 : index
    %7 = vector.load %arg1[%c0_15, %c0_16, %c0_17, %c0_18] : memref<1x16x16x4xf32, #tpu.memory_space<vmem>>, vector<1x15x16x4xf32>
    %8 = arith.truncf %7 : vector<1x15x16x4xf32> to vector<1x15x16x4xbf16>
    %c0_19 = arith.constant 0 : index
    %c1_20 = arith.constant 1 : index
    %c0_21 = arith.constant 0 : index
    %c4 = arith.constant 4 : index
    %9 = vector.load %arg10[%c0_19, %c1_20, %c0_21, %c4] : memref<1x16x16x36xbf16, #tpu.memory_space<vmem>>, vector<1x15x16x4xbf16>
    tpu.vector_store %arg10[%c0_19, %c1_20, %c0_21, %c4], %8 {strides = array<i32>} : memref<1x16x16x36xbf16, #tpu.memory_space<vmem>>, vector<1x15x16x4xbf16>,
    %c0_22 = arith.constant 0 : index
    %c0_23 = arith.constant 0 : index
    %c1_24 = arith.constant 1 : index
    %c0_25 = arith.constant 0 : index
    %10 = vector.load %arg1[%c0_22, %c0_23, %c1_24, %c0_25] : memref<1x16x16x4xf32, #tpu.memory_space<vmem>>, vector<1x15x15x4xf32>
    %11 = arith.truncf %10 : vector<1x15x15x4xf32> to vector<1x15x15x4xbf16>
    %c0_26 = arith.constant 0 : index
    %c1_27 = arith.constant 1 : index
    %c0_28 = arith.constant 0 : index
    %c8 = arith.constant 8 : index
    %12 = vector.load %arg10[%c0_26, %c1_27, %c0_28, %c8] : memref<1x16x16x36xbf16, #tpu.memory_space<vmem>>, vector<1x15x15x4xbf16>
    tpu.vector_store %arg10[%c0_26, %c1_27, %c0_28, %c8], %11 {strides = array<i32>} : memref<1x16x16x36xbf16, #tpu.memory_space<vmem>>, vector<1x15x15x4xbf16>,
    %c0_29 = arith.constant 0 : index
    %c0_30 = arith.constant 0 : index
    %c0_31 = arith.constant 0 : index
    %c0_32 = arith.constant 0 : index
    %13 = vector.load %arg1[%c0_29, %c0_30, %c0_31, %c0_32] : memref<1x16x16x4xf32, #tpu.memory_space<vmem>>, vector<1x16x15x4xf32>
    %14 = arith.truncf %13 : vector<1x16x15x4xf32> to vector<1x16x15x4xbf16>
    %c0_33 = arith.constant 0 : index
    %c0_34 = arith.constant 0 : index
    %c1_35 = arith.constant 1 : index
    %c12 = arith.constant 12 : index
    %15 = vector.load %arg10[%c0_33, %c0_34, %c1_35, %c12] : memref<1x16x16x36xbf16, #tpu.memory_space<vmem>>, vector<1x16x15x4xbf16>
    tpu.vector_store %arg10[%c0_33, %c0_34, %c1_35, %c12], %14 {strides = array<i32>} : memref<1x16x16x36xbf16, #tpu.memory_space<vmem>>, vector<1x16x15x4xbf16>,
    %c0_36 = arith.constant 0 : index
    %c0_37 = arith.constant 0 : index
    %c0_38 = arith.constant 0 : index
    %c0_39 = arith.constant 0 : index
    %16 = vector.load %arg1[%c0_36, %c0_37, %c0_38, %c0_39] : memref<1x16x16x4xf32, #tpu.memory_space<vmem>>, vector<1x16x16x4xf32>
    %17 = arith.truncf %16 : vector<1x16x16x4xf32> to vector<1x16x16x4xbf16>
    %c0_40 = arith.constant 0 : index
    %c0_41 = arith.constant 0 : index
    %c0_42 = arith.constant 0 : index
    %c16 = arith.constant 16 : index
    %18 = vector.load %arg10[%c0_40, %c0_41, %c0_42, %c16] : memref<1x16x16x36xbf16, #tpu.memory_space<vmem>>, vector<1x16x16x4xbf16>
    tpu.vector_store %arg10[%c0_40, %c0_41, %c0_42, %c16], %17 {strides = array<i32>} : memref<1x16x16x36xbf16, #tpu.memory_space<vmem>>, vector<1x16x16x4xbf16>,
    %c0_43 = arith.constant 0 : index
    %c0_44 = arith.constant 0 : index
    %c1_45 = arith.constant 1 : index
    %c0_46 = arith.constant 0 : index
    %19 = vector.load %arg1[%c0_43, %c0_44, %c1_45, %c0_46] : memref<1x16x16x4xf32, #tpu.memory_space<vmem>>, vector<1x16x15x4xf32>
    %20 = arith.truncf %19 : vector<1x16x15x4xf32> to vector<1x16x15x4xbf16>
    %c0_47 = arith.constant 0 : index
    %c0_48 = arith.constant 0 : index
    %c0_49 = arith.constant 0 : index
    %c20 = arith.constant 20 : index
    %21 = vector.load %arg10[%c0_47, %c0_48, %c0_49, %c20] : memref<1x16x16x36xbf16, #tpu.memory_space<vmem>>, vector<1x16x15x4xbf16>
    tpu.vector_store %arg10[%c0_47, %c0_48, %c0_49, %c20], %20 {strides = array<i32>} : memref<1x16x16x36xbf16, #tpu.memory_space<vmem>>, vector<1x16x15x4xbf16>,
    %c0_50 = arith.constant 0 : index
    %c1_51 = arith.constant 1 : index
    %c0_52 = arith.constant 0 : index
    %c0_53 = arith.constant 0 : index
    %22 = vector.load %arg1[%c0_50, %c1_51, %c0_52, %c0_53] : memref<1x16x16x4xf32, #tpu.memory_space<vmem>>, vector<1x15x15x4xf32>
    %23 = arith.truncf %22 : vector<1x15x15x4xf32> to vector<1x15x15x4xbf16>
    %c0_54 = arith.constant 0 : index
    %c0_55 = arith.constant 0 : index
    %c1_56 = arith.constant 1 : index
    %c24 = arith.constant 24 : index
    %24 = vector.load %arg10[%c0_54, %c0_55, %c1_56, %c24] : memref<1x16x16x36xbf16, #tpu.memory_space<vmem>>, vector<1x15x15x4xbf16>
    tpu.vector_store %arg10[%c0_54, %c0_55, %c1_56, %c24], %23 {strides = array<i32>} : memref<1x16x16x36xbf16, #tpu.memory_space<vmem>>, vector<1x15x15x4xbf16>,
    %c0_57 = arith.constant 0 : index
    %c1_58 = arith.constant 1 : index
    %c0_59 = arith.constant 0 : index
    %c0_60 = arith.constant 0 : index
    %25 = vector.load %arg1[%c0_57, %c1_58, %c0_59, %c0_60] : memref<1x16x16x4xf32, #tpu.memory_space<vmem>>, vector<1x15x16x4xf32>
    %26 = arith.truncf %25 : vector<1x15x16x4xf32> to vector<1x15x16x4xbf16>
    %c0_61 = arith.constant 0 : index
    %c0_62 = arith.constant 0 : index
    %c0_63 = arith.constant 0 : index
    %c28 = arith.constant 28 : index
    %27 = vector.load %arg10[%c0_61, %c0_62, %c0_63, %c28] : memref<1x16x16x36xbf16, #tpu.memory_space<vmem>>, vector<1x15x16x4xbf16>
    tpu.vector_store %arg10[%c0_61, %c0_62, %c0_63, %c28], %26 {strides = array<i32>} : memref<1x16x16x36xbf16, #tpu.memory_space<vmem>>, vector<1x15x16x4xbf16>,
    %c0_64 = arith.constant 0 : index
    %c1_65 = arith.constant 1 : index
    %c1_66 = arith.constant 1 : index
    %c0_67 = arith.constant 0 : index
    %28 = vector.load %arg1[%c0_64, %c1_65, %c1_66, %c0_67] : memref<1x16x16x4xf32, #tpu.memory_space<vmem>>, vector<1x15x15x4xf32>
    %29 = arith.truncf %28 : vector<1x15x15x4xf32> to vector<1x15x15x4xbf16>
    %c0_68 = arith.constant 0 : index
    %c0_69 = arith.constant 0 : index
    %c0_70 = arith.constant 0 : index
    %c32 = arith.constant 32 : index
    %30 = vector.load %arg10[%c0_68, %c0_69, %c0_70, %c32] : memref<1x16x16x36xbf16, #tpu.memory_space<vmem>>, vector<1x15x15x4xbf16>
    tpu.vector_store %arg10[%c0_68, %c0_69, %c0_70, %c32], %29 {strides = array<i32>} : memref<1x16x16x36xbf16, #tpu.memory_space<vmem>>, vector<1x15x15x4xbf16>,
    %c0_71 = arith.constant 0 : index
    %c0_72 = arith.constant 0 : index
    %c0_73 = arith.constant 0 : index
    %c0_74 = arith.constant 0 : index
    %31 = vector.load %arg10[%c0_71, %c0_72, %c0_73, %c0_74] : memref<1x16x16x36xbf16, #tpu.memory_space<vmem>>, vector<1x16x16x36xbf16>
    %32 = vector.shape_cast %31 : vector<1x16x16x36xbf16> to vector<256x36xbf16>
    %c0_75 = arith.constant 0 : index
    %c0_76 = arith.constant 0 : index
    %33 = vector.load %arg2[%c0_75, %c0_76] : memref<36x64xbf16, #tpu.memory_space<vmem>>, vector<36x64xbf16>
    %cst_77 = arith.constant dense<0.000000e+00> : vector<256x64xf32>
    %34 = tpu.matmul %32, %33, %cst_77 {dimension_numbers = #tpu.dot_dimension_numbers<[1], [0], [0], [1], [0, 0, 1, 1], [], []>} : vector<256x36xbf16>, vector<36x64xbf16>, vector<256x64xf32> -> vector<256x64xf32>
    %c0_78 = arith.constant 0 : index
    %c0_79 = arith.constant 0 : index
    %35 = vector.load %arg3[%c0_78, %c0_79] : memref<1x64xf32, #tpu.memory_space<vmem>>, vector<1x64xf32>
    %36 = vector.broadcast %35 : vector<1x64xf32> to vector<256x64xf32>
    %37 = arith.addf %34, %36 : vector<256x64xf32>
    %cst_80 = arith.constant 0.000000e+00 : f32
    %38 = vector.broadcast %cst_80 : f32 to vector<256x64xf32>
    %39 = arith.maximumf %37, %38 : vector<256x64xf32>
    %40 = vector.shape_cast %39 : vector<256x64xf32> to vector<1x16x16x64xf32>
    %c0_81 = arith.constant 0 : index
    %c0_82 = arith.constant 0 : index
    %c0_83 = arith.constant 0 : index
    %c0_84 = arith.constant 0 : index
    %41 = vector.load %arg12[%c0_81, %c0_82, %c0_83, %c0_84] : memref<1x16x16x64xf32, #tpu.memory_space<vmem>>, vector<1x16x16x64xf32>
    tpu.vector_store %arg12[%c0_81, %c0_82, %c0_83, %c0_84], %40 {strides = array<i32>} : memref<1x16x16x64xf32, #tpu.memory_space<vmem>>, vector<1x16x16x64xf32>,
    %c0_i32 = arith.constant 0 : i32
    %c0_85 = arith.constant 0 : index
    %c0_86 = arith.constant 0 : index
    %c0_87 = arith.constant 0 : index
    %c0_88 = arith.constant 0 : index
    %42 = vector.load %arg12[%c0_85, %c0_86, %c0_87, %c0_88] : memref<1x16x16x64xf32, #tpu.memory_space<vmem>>, vector<1x15x15x64xf32>
    %43 = arith.truncf %42 : vector<1x15x15x64xf32> to vector<1x15x15x64xbf16>
    %c0_89 = arith.constant 0 : index
    %c1_90 = arith.constant 1 : index
    %c1_91 = arith.constant 1 : index
    %c0_92 = arith.constant 0 : index
    %44 = vector.load %arg11[%c0_89, %c1_90, %c1_91, %c0_92] : memref<1x16x16x576xbf16, #tpu.memory_space<vmem>>, vector<1x15x15x64xbf16>
    tpu.vector_store %arg11[%c0_89, %c1_90, %c1_91, %c0_92], %43 {strides = array<i32>} : memref<1x16x16x576xbf16, #tpu.memory_space<vmem>>, vector<1x15x15x64xbf16>,
    %c0_93 = arith.constant 0 : index
    %c0_94 = arith.constant 0 : index
    %c0_95 = arith.constant 0 : index
    %c0_96 = arith.constant 0 : index
    %45 = vector.load %arg12[%c0_93, %c0_94, %c0_95, %c0_96] : memref<1x16x16x64xf32, #tpu.memory_space<vmem>>, vector<1x15x16x64xf32>
    %46 = arith.truncf %45 : vector<1x15x16x64xf32> to vector<1x15x16x64xbf16>
    %c0_97 = arith.constant 0 : index
    %c1_98 = arith.constant 1 : index
    %c0_99 = arith.constant 0 : index
    %c64 = arith.constant 64 : index
    %47 = vector.load %arg11[%c0_97, %c1_98, %c0_99, %c64] : memref<1x16x16x576xbf16, #tpu.memory_space<vmem>>, vector<1x15x16x64xbf16>
    tpu.vector_store %arg11[%c0_97, %c1_98, %c0_99, %c64], %46 {strides = array<i32>} : memref<1x16x16x576xbf16, #tpu.memory_space<vmem>>, vector<1x15x16x64xbf16>,
    %c0_100 = arith.constant 0 : index
    %c0_101 = arith.constant 0 : index
    %c1_102 = arith.constant 1 : index
    %c0_103 = arith.constant 0 : index
    %48 = vector.load %arg12[%c0_100, %c0_101, %c1_102, %c0_103] : memref<1x16x16x64xf32, #tpu.memory_space<vmem>>, vector<1x15x15x64xf32>
    %49 = arith.truncf %48 : vector<1x15x15x64xf32> to vector<1x15x15x64xbf16>
    %c0_104 = arith.constant 0 : index
    %c1_105 = arith.constant 1 : index
    %c0_106 = arith.constant 0 : index
    %c128 = arith.constant 128 : index
    %50 = vector.load %arg11[%c0_104, %c1_105, %c0_106, %c128] : memref<1x16x16x576xbf16, #tpu.memory_space<vmem>>, vector<1x15x15x64xbf16>
    tpu.vector_store %arg11[%c0_104, %c1_105, %c0_106, %c128], %49 {strides = array<i32>} : memref<1x16x16x576xbf16, #tpu.memory_space<vmem>>, vector<1x15x15x64xbf16>,
    %c0_107 = arith.constant 0 : index
    %c0_108 = arith.constant 0 : index
    %c0_109 = arith.constant 0 : index
    %c0_110 = arith.constant 0 : index
    %51 = vector.load %arg12[%c0_107, %c0_108, %c0_109, %c0_110] : memref<1x16x16x64xf32, #tpu.memory_space<vmem>>, vector<1x16x15x64xf32>
    %52 = arith.truncf %51 : vector<1x16x15x64xf32> to vector<1x16x15x64xbf16>
    %c0_111 = arith.constant 0 : index
    %c0_112 = arith.constant 0 : index
    %c1_113 = arith.constant 1 : index
    %c192 = arith.constant 192 : index
    %53 = vector.load %arg11[%c0_111, %c0_112, %c1_113, %c192] : memref<1x16x16x576xbf16, #tpu.memory_space<vmem>>, vector<1x16x15x64xbf16>
    tpu.vector_store %arg11[%c0_111, %c0_112, %c1_113, %c192], %52 {strides = array<i32>} : memref<1x16x16x576xbf16, #tpu.memory_space<vmem>>, vector<1x16x15x64xbf16>,
    %c0_114 = arith.constant 0 : index
    %c0_115 = arith.constant 0 : index
    %c0_116 = arith.constant 0 : index
    %c0_117 = arith.constant 0 : index
    %54 = vector.load %arg12[%c0_114, %c0_115, %c0_116, %c0_117] : memref<1x16x16x64xf32, #tpu.memory_space<vmem>>, vector<1x16x16x64xf32>
    %55 = arith.truncf %54 : vector<1x16x16x64xf32> to vector<1x16x16x64xbf16>
    %c0_118 = arith.constant 0 : index
    %c0_119 = arith.constant 0 : index
    %c0_120 = arith.constant 0 : index
    %c256 = arith.constant 256 : index
    %56 = vector.load %arg11[%c0_118, %c0_119, %c0_120, %c256] : memref<1x16x16x576xbf16, #tpu.memory_space<vmem>>, vector<1x16x16x64xbf16>
    tpu.vector_store %arg11[%c0_118, %c0_119, %c0_120, %c256], %55 {strides = array<i32>} : memref<1x16x16x576xbf16, #tpu.memory_space<vmem>>, vector<1x16x16x64xbf16>,
    %c0_121 = arith.constant 0 : index
    %c0_122 = arith.constant 0 : index
    %c1_123 = arith.constant 1 : index
    %c0_124 = arith.constant 0 : index
    %57 = vector.load %arg12[%c0_121, %c0_122, %c1_123, %c0_124] : memref<1x16x16x64xf32, #tpu.memory_space<vmem>>, vector<1x16x15x64xf32>
    %58 = arith.truncf %57 : vector<1x16x15x64xf32> to vector<1x16x15x64xbf16>
    %c0_125 = arith.constant 0 : index
    %c0_126 = arith.constant 0 : index
    %c0_127 = arith.constant 0 : index
    %c320 = arith.constant 320 : index
    %59 = vector.load %arg11[%c0_125, %c0_126, %c0_127, %c320] : memref<1x16x16x576xbf16, #tpu.memory_space<vmem>>, vector<1x16x15x64xbf16>
    tpu.vector_store %arg11[%c0_125, %c0_126, %c0_127, %c320], %58 {strides = array<i32>} : memref<1x16x16x576xbf16, #tpu.memory_space<vmem>>, vector<1x16x15x64xbf16>,
    %c0_128 = arith.constant 0 : index
    %c1_129 = arith.constant 1 : index
    %c0_130 = arith.constant 0 : index
    %c0_131 = arith.constant 0 : index
    %60 = vector.load %arg12[%c0_128, %c1_129, %c0_130, %c0_131] : memref<1x16x16x64xf32, #tpu.memory_space<vmem>>, vector<1x15x15x64xf32>
    %61 = arith.truncf %60 : vector<1x15x15x64xf32> to vector<1x15x15x64xbf16>
    %c0_132 = arith.constant 0 : index
    %c0_133 = arith.constant 0 : index
    %c1_134 = arith.constant 1 : index
    %c384 = arith.constant 384 : index
    %62 = vector.load %arg11[%c0_132, %c0_133, %c1_134, %c384] : memref<1x16x16x576xbf16, #tpu.memory_space<vmem>>, vector<1x15x15x64xbf16>
    tpu.vector_store %arg11[%c0_132, %c0_133, %c1_134, %c384], %61 {strides = array<i32>} : memref<1x16x16x576xbf16, #tpu.memory_space<vmem>>, vector<1x15x15x64xbf16>,
    %c0_135 = arith.constant 0 : index
    %c1_136 = arith.constant 1 : index
    %c0_137 = arith.constant 0 : index
    %c0_138 = arith.constant 0 : index
    %63 = vector.load %arg12[%c0_135, %c1_136, %c0_137, %c0_138] : memref<1x16x16x64xf32, #tpu.memory_space<vmem>>, vector<1x15x16x64xf32>
    %64 = arith.truncf %63 : vector<1x15x16x64xf32> to vector<1x15x16x64xbf16>
    %c0_139 = arith.constant 0 : index
    %c0_140 = arith.constant 0 : index
    %c0_141 = arith.constant 0 : index
    %c448 = arith.constant 448 : index
    %65 = vector.load %arg11[%c0_139, %c0_140, %c0_141, %c448] : memref<1x16x16x576xbf16, #tpu.memory_space<vmem>>, vector<1x15x16x64xbf16>
    tpu.vector_store %arg11[%c0_139, %c0_140, %c0_141, %c448], %64 {strides = array<i32>} : memref<1x16x16x576xbf16, #tpu.memory_space<vmem>>, vector<1x15x16x64xbf16>,
    %c0_142 = arith.constant 0 : index
    %c1_143 = arith.constant 1 : index
    %c1_144 = arith.constant 1 : index
    %c0_145 = arith.constant 0 : index
    %66 = vector.load %arg12[%c0_142, %c1_143, %c1_144, %c0_145] : memref<1x16x16x64xf32, #tpu.memory_space<vmem>>, vector<1x15x15x64xf32>
    %67 = arith.truncf %66 : vector<1x15x15x64xf32> to vector<1x15x15x64xbf16>
    %c0_146 = arith.constant 0 : index
    %c0_147 = arith.constant 0 : index
    %c0_148 = arith.constant 0 : index
    %c512 = arith.constant 512 : index
    %68 = vector.load %arg11[%c0_146, %c0_147, %c0_148, %c512] : memref<1x16x16x576xbf16, #tpu.memory_space<vmem>>, vector<1x15x15x64xbf16>
    tpu.vector_store %arg11[%c0_146, %c0_147, %c0_148, %c512], %67 {strides = array<i32>} : memref<1x16x16x576xbf16, #tpu.memory_space<vmem>>, vector<1x15x15x64xbf16>,
    %c0_149 = arith.constant 0 : index
    %c0_150 = arith.constant 0 : index
    %c0_151 = arith.constant 0 : index
    %c0_152 = arith.constant 0 : index
    %69 = vector.load %arg11[%c0_149, %c0_150, %c0_151, %c0_152] : memref<1x16x16x576xbf16, #tpu.memory_space<vmem>>, vector<1x16x16x576xbf16>
    %70 = vector.shape_cast %69 : vector<1x16x16x576xbf16> to vector<256x576xbf16>
    %71 = arith.index_cast %c0_i32 : i32 to index
    %c0_153 = arith.constant 0 : index
    %c0_154 = arith.constant 0 : index
    %72 = vector.load %arg4[%71, %c0_153, %c0_154] : memref<1x576x64xbf16, #tpu.memory_space<vmem>>, vector<1x576x64xbf16>
    %73 = vector.shape_cast %72 : vector<1x576x64xbf16> to vector<576x64xbf16>
    %cst_155 = arith.constant dense<0.000000e+00> : vector<256x64xf32>
    %74 = tpu.matmul %70, %73, %cst_155 {dimension_numbers = #tpu.dot_dimension_numbers<[1], [0], [0], [1], [0, 0, 1, 1], [], []>} : vector<256x576xbf16>, vector<576x64xbf16>, vector<256x64xf32> -> vector<256x64xf32>
    %75 = arith.index_cast %c0_i32 : i32 to index
    %c0_156 = arith.constant 0 : index
    %c0_157 = arith.constant 0 : index
    %76 = vector.load %arg5[%75, %c0_156, %c0_157] : memref<1x1x64xf32, #tpu.memory_space<vmem>>, vector<1x1x64xf32>
    %77 = vector.shape_cast %76 : vector<1x1x64xf32> to vector<1x64xf32>
    %78 = vector.broadcast %77 : vector<1x64xf32> to vector<256x64xf32>
    %79 = arith.mulf %74, %78 : vector<256x64xf32>
    %80 = arith.index_cast %c0_i32 : i32 to index
    %c0_158 = arith.constant 0 : index
    %c0_159 = arith.constant 0 : index
    %81 = vector.load %arg6[%80, %c0_158, %c0_159] : memref<1x1x64xf32, #tpu.memory_space<vmem>>, vector<1x1x64xf32>
    %82 = vector.shape_cast %81 : vector<1x1x64xf32> to vector<1x64xf32>
    %83 = vector.broadcast %82 : vector<1x64xf32> to vector<256x64xf32>
    %84 = arith.addf %79, %83 : vector<256x64xf32>
    %c0_160 = arith.constant 0 : index
    %c0_161 = arith.constant 0 : index
    %c0_162 = arith.constant 0 : index
    %c0_163 = arith.constant 0 : index
    %85 = vector.load %arg12[%c0_160, %c0_161, %c0_162, %c0_163] : memref<1x16x16x64xf32, #tpu.memory_space<vmem>>, vector<1x16x16x64xf32>
    %cst_164 = arith.constant 0.000000e+00 : f32
    %86 = vector.broadcast %cst_164 : f32 to vector<256x64xf32>
    %87 = arith.maximumf %84, %86 : vector<256x64xf32>
    %88 = vector.shape_cast %87 : vector<256x64xf32> to vector<1x16x16x64xf32>
    %89 = arith.addf %85, %88 : vector<1x16x16x64xf32>
    %c0_165 = arith.constant 0 : index
    %c0_166 = arith.constant 0 : index
    %c0_167 = arith.constant 0 : index
    %c0_168 = arith.constant 0 : index
    %90 = vector.load %arg12[%c0_165, %c0_166, %c0_167, %c0_168] : memref<1x16x16x64xf32, #tpu.memory_space<vmem>>, vector<1x16x16x64xf32>
    tpu.vector_store %arg12[%c0_165, %c0_166, %c0_167, %c0_168], %89 {strides = array<i32>} : memref<1x16x16x64xf32, #tpu.memory_space<vmem>>, vector<1x16x16x64xf32>,
    %c1_i32 = arith.constant 1 : i32
    %c0_169 = arith.constant 0 : index
    %c0_170 = arith.constant 0 : index
    %c0_171 = arith.constant 0 : index
    %c0_172 = arith.constant 0 : index
    %91 = vector.load %arg12[%c0_169, %c0_170, %c0_171, %c0_172] : memref<1x16x16x64xf32, #tpu.memory_space<vmem>>, vector<1x15x15x64xf32>
    %92 = arith.truncf %91 : vector<1x15x15x64xf32> to vector<1x15x15x64xbf16>
    %c0_173 = arith.constant 0 : index
    %c1_174 = arith.constant 1 : index
    %c1_175 = arith.constant 1 : index
    %c0_176 = arith.constant 0 : index
    %93 = vector.load %arg11[%c0_173, %c1_174, %c1_175, %c0_176] : memref<1x16x16x576xbf16, #tpu.memory_space<vmem>>, vector<1x15x15x64xbf16>
    tpu.vector_store %arg11[%c0_173, %c1_174, %c1_175, %c0_176], %92 {strides = array<i32>} : memref<1x16x16x576xbf16, #tpu.memory_space<vmem>>, vector<1x15x15x64xbf16>,
    %c0_177 = arith.constant 0 : index
    %c0_178 = arith.constant 0 : index
    %c0_179 = arith.constant 0 : index
    %c0_180 = arith.constant 0 : index
    %94 = vector.load %arg12[%c0_177, %c0_178, %c0_179, %c0_180] : memref<1x16x16x64xf32, #tpu.memory_space<vmem>>, vector<1x15x16x64xf32>
    %95 = arith.truncf %94 : vector<1x15x16x64xf32> to vector<1x15x16x64xbf16>
    %c0_181 = arith.constant 0 : index
    %c1_182 = arith.constant 1 : index
    %c0_183 = arith.constant 0 : index
    %c64_184 = arith.constant 64 : index
    %96 = vector.load %arg11[%c0_181, %c1_182, %c0_183, %c64_184] : memref<1x16x16x576xbf16, #tpu.memory_space<vmem>>, vector<1x15x16x64xbf16>
    tpu.vector_store %arg11[%c0_181, %c1_182, %c0_183, %c64_184], %95 {strides = array<i32>} : memref<1x16x16x576xbf16, #tpu.memory_space<vmem>>, vector<1x15x16x64xbf16>,
    %c0_185 = arith.constant 0 : index
    %c0_186 = arith.constant 0 : index
    %c1_187 = arith.constant 1 : index
    %c0_188 = arith.constant 0 : index
    %97 = vector.load %arg12[%c0_185, %c0_186, %c1_187, %c0_188] : memref<1x16x16x64xf32, #tpu.memory_space<vmem>>, vector<1x15x15x64xf32>
    %98 = arith.truncf %97 : vector<1x15x15x64xf32> to vector<1x15x15x64xbf16>
    %c0_189 = arith.constant 0 : index
    %c1_190 = arith.constant 1 : index
    %c0_191 = arith.constant 0 : index
    %c128_192 = arith.constant 128 : index
    %99 = vector.load %arg11[%c0_189, %c1_190, %c0_191, %c128_192] : memref<1x16x16x576xbf16, #tpu.memory_space<vmem>>, vector<1x15x15x64xbf16>
    tpu.vector_store %arg11[%c0_189, %c1_190, %c0_191, %c128_192], %98 {strides = array<i32>} : memref<1x16x16x576xbf16, #tpu.memory_space<vmem>>, vector<1x15x15x64xbf16>,
    %c0_193 = arith.constant 0 : index
    %c0_194 = arith.constant 0 : index
    %c0_195 = arith.constant 0 : index
    %c0_196 = arith.constant 0 : index
    %100 = vector.load %arg12[%c0_193, %c0_194, %c0_195, %c0_196] : memref<1x16x16x64xf32, #tpu.memory_space<vmem>>, vector<1x16x15x64xf32>
    %101 = arith.truncf %100 : vector<1x16x15x64xf32> to vector<1x16x15x64xbf16>
    %c0_197 = arith.constant 0 : index
    %c0_198 = arith.constant 0 : index
    %c1_199 = arith.constant 1 : index
    %c192_200 = arith.constant 192 : index
    %102 = vector.load %arg11[%c0_197, %c0_198, %c1_199, %c192_200] : memref<1x16x16x576xbf16, #tpu.memory_space<vmem>>, vector<1x16x15x64xbf16>
    tpu.vector_store %arg11[%c0_197, %c0_198, %c1_199, %c192_200], %101 {strides = array<i32>} : memref<1x16x16x576xbf16, #tpu.memory_space<vmem>>, vector<1x16x15x64xbf16>,
    %c0_201 = arith.constant 0 : index
    %c0_202 = arith.constant 0 : index
    %c0_203 = arith.constant 0 : index
    %c0_204 = arith.constant 0 : index
    %103 = vector.load %arg12[%c0_201, %c0_202, %c0_203, %c0_204] : memref<1x16x16x64xf32, #tpu.memory_space<vmem>>, vector<1x16x16x64xf32>
    %104 = arith.truncf %103 : vector<1x16x16x64xf32> to vector<1x16x16x64xbf16>
    %c0_205 = arith.constant 0 : index
    %c0_206 = arith.constant 0 : index
    %c0_207 = arith.constant 0 : index
    %c256_208 = arith.constant 256 : index
    %105 = vector.load %arg11[%c0_205, %c0_206, %c0_207, %c256_208] : memref<1x16x16x576xbf16, #tpu.memory_space<vmem>>, vector<1x16x16x64xbf16>
    tpu.vector_store %arg11[%c0_205, %c0_206, %c0_207, %c256_208], %104 {strides = array<i32>} : memref<1x16x16x576xbf16, #tpu.memory_space<vmem>>, vector<1x16x16x64xbf16>,
    %c0_209 = arith.constant 0 : index
    %c0_210 = arith.constant 0 : index
    %c1_211 = arith.constant 1 : index
    %c0_212 = arith.constant 0 : index
    %106 = vector.load %arg12[%c0_209, %c0_210, %c1_211, %c0_212] : memref<1x16x16x64xf32, #tpu.memory_space<vmem>>, vector<1x16x15x64xf32>
    %107 = arith.truncf %106 : vector<1x16x15x64xf32> to vector<1x16x15x64xbf16>
    %c0_213 = arith.constant 0 : index
    %c0_214 = arith.constant 0 : index
    %c0_215 = arith.constant 0 : index
    %c320_216 = arith.constant 320 : index
    %108 = vector.load %arg11[%c0_213, %c0_214, %c0_215, %c320_216] : memref<1x16x16x576xbf16, #tpu.memory_space<vmem>>, vector<1x16x15x64xbf16>
    tpu.vector_store %arg11[%c0_213, %c0_214, %c0_215, %c320_216], %107 {strides = array<i32>} : memref<1x16x16x576xbf16, #tpu.memory_space<vmem>>, vector<1x16x15x64xbf16>,
    %c0_217 = arith.constant 0 : index
    %c1_218 = arith.constant 1 : index
    %c0_219 = arith.constant 0 : index
    %c0_220 = arith.constant 0 : index
    %109 = vector.load %arg12[%c0_217, %c1_218, %c0_219, %c0_220] : memref<1x16x16x64xf32, #tpu.memory_space<vmem>>, vector<1x15x15x64xf32>
    %110 = arith.truncf %109 : vector<1x15x15x64xf32> to vector<1x15x15x64xbf16>
    %c0_221 = arith.constant 0 : index
    %c0_222 = arith.constant 0 : index
    %c1_223 = arith.constant 1 : index
    %c384_224 = arith.constant 384 : index
    %111 = vector.load %arg11[%c0_221, %c0_222, %c1_223, %c384_224] : memref<1x16x16x576xbf16, #tpu.memory_space<vmem>>, vector<1x15x15x64xbf16>
    tpu.vector_store %arg11[%c0_221, %c0_222, %c1_223, %c384_224], %110 {strides = array<i32>} : memref<1x16x16x576xbf16, #tpu.memory_space<vmem>>, vector<1x15x15x64xbf16>,
    %c0_225 = arith.constant 0 : index
    %c1_226 = arith.constant 1 : index
    %c0_227 = arith.constant 0 : index
    %c0_228 = arith.constant 0 : index
    %112 = vector.load %arg12[%c0_225, %c1_226, %c0_227, %c0_228] : memref<1x16x16x64xf32, #tpu.memory_space<vmem>>, vector<1x15x16x64xf32>
    %113 = arith.truncf %112 : vector<1x15x16x64xf32> to vector<1x15x16x64xbf16>
    %c0_229 = arith.constant 0 : index
    %c0_230 = arith.constant 0 : index
    %c0_231 = arith.constant 0 : index
    %c448_232 = arith.constant 448 : index
    %114 = vector.load %arg11[%c0_229, %c0_230, %c0_231, %c448_232] : memref<1x16x16x576xbf16, #tpu.memory_space<vmem>>, vector<1x15x16x64xbf16>
    tpu.vector_store %arg11[%c0_229, %c0_230, %c0_231, %c448_232], %113 {strides = array<i32>} : memref<1x16x16x576xbf16, #tpu.memory_space<vmem>>, vector<1x15x16x64xbf16>,
    %c0_233 = arith.constant 0 : index
    %c1_234 = arith.constant 1 : index
    %c1_235 = arith.constant 1 : index
    %c0_236 = arith.constant 0 : index
    %115 = vector.load %arg12[%c0_233, %c1_234, %c1_235, %c0_236] : memref<1x16x16x64xf32, #tpu.memory_space<vmem>>, vector<1x15x15x64xf32>
    %116 = arith.truncf %115 : vector<1x15x15x64xf32> to vector<1x15x15x64xbf16>
    %c0_237 = arith.constant 0 : index
    %c0_238 = arith.constant 0 : index
    %c0_239 = arith.constant 0 : index
    %c512_240 = arith.constant 512 : index
    %117 = vector.load %arg11[%c0_237, %c0_238, %c0_239, %c512_240] : memref<1x16x16x576xbf16, #tpu.memory_space<vmem>>, vector<1x15x15x64xbf16>
    tpu.vector_store %arg11[%c0_237, %c0_238, %c0_239, %c512_240], %116 {strides = array<i32>} : memref<1x16x16x576xbf16, #tpu.memory_space<vmem>>, vector<1x15x15x64xbf16>,
    %c0_241 = arith.constant 0 : index
    %c0_242 = arith.constant 0 : index
    %c0_243 = arith.constant 0 : index
    %c0_244 = arith.constant 0 : index
    %118 = vector.load %arg11[%c0_241, %c0_242, %c0_243, %c0_244] : memref<1x16x16x576xbf16, #tpu.memory_space<vmem>>, vector<1x16x16x576xbf16>
    %119 = vector.shape_cast %118 : vector<1x16x16x576xbf16> to vector<256x576xbf16>
    %c0_245 = arith.constant 0 : index
    %c0_246 = arith.constant 0 : index
    %120 = vector.load %arg7[%c0_245, %c0_246] : memref<576x128xbf16, #tpu.memory_space<vmem>>, vector<576x128xbf16>
    %cst_247 = arith.constant dense<0.000000e+00> : vector<256x128xf32>
    %121 = tpu.matmul %119, %120, %cst_247 {dimension_numbers = #tpu.dot_dimension_numbers<[1], [0], [0], [1], [0, 0, 1, 1], [], []>} : vector<256x576xbf16>, vector<576x128xbf16>, vector<256x128xf32> -> vector<256x128xf32>
    %c0_248 = arith.constant 0 : index
    %c0_249 = arith.constant 0 : index
    %122 = vector.load %arg8[%c0_248, %c0_249] : memref<1x128xf32, #tpu.memory_space<vmem>>, vector<1x128xf32>
    %123 = vector.broadcast %122 : vector<1x128xf32> to vector<256x128xf32>
    %124 = arith.addf %121, %123 : vector<256x128xf32>
    %125 = vector.shape_cast %124 : vector<256x128xf32> to vector<1x256x128xf32>
    %c0_250 = arith.constant 0 : index
    %c0_251 = arith.constant 0 : index
    %c0_252 = arith.constant 0 : index
    %126 = vector.load %arg9[%c0_250, %c0_251, %c0_252] : memref<1x256x128xf32, #tpu.memory_space<vmem>>, vector<1x256x128xf32>
    tpu.vector_store %arg9[%c0_250, %c0_251, %c0_252], %125 {strides = array<i32>} : memref<1x256x128xf32, #tpu.memory_space<vmem>>, vector<1x256x128xf32>,
    return
  }
  func.func @transform_0(%arg0: i32) -> (i32, i32, i32, i32) {
    %c0_i32 = arith.constant 0 : i32
    %c0_i32_0 = arith.constant 0 : i32
    %c0_i32_1 = arith.constant 0 : i32
    %c0_i32_2 = arith.constant 0 : i32
    return %arg0, %c0_i32, %c0_i32_0, %c0_i32_1 : i32, i32, i32, i32
  }
  func.func @transform_1(%arg0: i32) -> (i32, i32) {
    %c0_i32 = arith.constant 0 : i32
    %c0_i32_0 = arith.constant 0 : i32
    %c0_i32_1 = arith.constant 0 : i32
    return %c0_i32, %c0_i32_0 : i32, i32
  }
  func.func @transform_2(%arg0: i32) -> (i32, i32) {
    %c0_i32 = arith.constant 0 : i32
    %c0_i32_0 = arith.constant 0 : i32
    %c0_i32_1 = arith.constant 0 : i32
    return %c0_i32, %c0_i32_0 : i32, i32
  }
  func.func @transform_3(%arg0: i32) -> (i32, i32, i32) {
    %c0_i32 = arith.constant 0 : i32
    %c0_i32_0 = arith.constant 0 : i32
    %c0_i32_1 = arith.constant 0 : i32
    %c0_i32_2 = arith.constant 0 : i32
    return %c0_i32, %c0_i32_0, %c0_i32_1 : i32, i32, i32
  }
  func.func @transform_4(%arg0: i32) -> (i32, i32, i32) {
    %c0_i32 = arith.constant 0 : i32
    %c0_i32_0 = arith.constant 0 : i32
    %c0_i32_1 = arith.constant 0 : i32
    %c0_i32_2 = arith.constant 0 : i32
    return %c0_i32, %c0_i32_0, %c0_i32_1 : i32, i32, i32
  }
  func.func @transform_5(%arg0: i32) -> (i32, i32, i32) {
    %c0_i32 = arith.constant 0 : i32
    %c0_i32_0 = arith.constant 0 : i32
    %c0_i32_1 = arith.constant 0 : i32
    %c0_i32_2 = arith.constant 0 : i32
    return %c0_i32, %c0_i32_0, %c0_i32_1 : i32, i32, i32
  }
  func.func @transform_6(%arg0: i32) -> (i32, i32) {
    %c0_i32 = arith.constant 0 : i32
    %c0_i32_0 = arith.constant 0 : i32
    %c0_i32_1 = arith.constant 0 : i32
    return %c0_i32, %c0_i32_0 : i32, i32
  }
  func.func @transform_7(%arg0: i32) -> (i32, i32) {
    %c0_i32 = arith.constant 0 : i32
    %c0_i32_0 = arith.constant 0 : i32
    %c0_i32_1 = arith.constant 0 : i32
    return %c0_i32, %c0_i32_0 : i32, i32
  }
  func.func @transform_8(%arg0: i32) -> (i32, i32, i32) {
    %c0_i32 = arith.constant 0 : i32
    %c0_i32_0 = arith.constant 0 : i32
    %c0_i32_1 = arith.constant 0 : i32
    return %arg0, %c0_i32, %c0_i32_0 : i32, i32, i32
  }
}

</mosaic_0001>

<bundles_post_ra>
// kernel: tpu_custom_call.1
= control target key start
LH: loop header
LB: loop body
LE: loop exit
PB: predicated region body
PF: predicated region fallthrough
CT: control target
= control target key end

     0   :  { %13 = vsyncpa [#allocation6], 0  ;;  %s11241_s0 = inlined_call_operand.vmem [shape: f32[2,16,16,4], index: 0, kind: input, shape index: {}]   ;;  %s11242_s1 = inlined_call_operand.vmem [shape: bf16[36,64], index: 1, kind: input, shape index: {}]   ;;  %s11243_s2 = inlined_call_operand.vmem [shape: f32[1,64], index: 2, kind: input, shape index: {}]   ;;  %s11244_s3 = inlined_call_operand.vmem [shape: bf16[1,576,64], index: 3, kind: input, shape index: {}]   ;;  %s11245_s4 = inlined_call_operand.vmem [shape: f32[1,1,64], index: 4, kind: input, shape index: {}]   ;;  %s11246_s5 = inlined_call_operand.vmem [shape: f32[1,1,64], index: 5, kind: input, shape index: {}]   ;;  %s11247_s6 = inlined_call_operand.vmem [shape: bf16[576,128], index: 6, kind: input, shape index: {}]   ;;  %s11248_s7 = inlined_call_operand.vmem [shape: f32[1,128], index: 7, kind: input, shape index: {}]   ;;  %s11249_s8 = inlined_call_operand.hbm [shape: f32[2,256,128], index: 8, kind: output, shape index: {}]  }
   0x1   :  { %15 = vsyncpa [#allocation6 + $0x1], 0  ;;  %s8179_s27 = smov 0   ;;  %s8181_s28 = smov 0  }
   0x2   :  { %s8183_s29 = smov 0   ;;  %s8185_s30 = smov 0  }
   0x3 LB: > { %s8200_s9 = sadd.s32 4294967295, %s8120_s30   ;;  %s7044_s10 = sadd.s32 4294967294, %s8120_s30   ;;  %s8120_s30 = sphi %s8185_s30, %s11291_s30   ;;  %s8116_s29 = sphi %s8183_s29, %s11290_s29   ;;  %s8112_s28 = sphi %s8181_s28, %s11289_s28   ;;  %s8108_s27 = sphi %s8179_s27, %s11288_s27  }
   0x4   : > { %s8204_s11 = sadd.s32 1, %s8120_s30   ;;  %s201_s12 = sadd.s32 1, %s8116_s29 }
   0x5   : > { %s198_s13 = ssub.s32 %s8120_s30, %s8204_s11  ;;  %p211_p0 = scmp.ne.s32.totalorder %s8116_s29, %s8112_s28 }
   0x6   : > { %p199_p1 = scmp.eq.s32.totalorder %s198_s13, 0  ;;  %p212_p2 = scmp.eq.s32.totalorder %s8200_s9, 1 }
   0x7   : > { %p217_p3 = scmp.ne.s32.totalorder %s8112_s28, %s8108_s27  ;;  %p218_p4 = scmp.eq.s32.totalorder %s7044_s10, 1 }
   0x8   : > { %s8215_s14 = scalar_select %p199_p1, %s8116_s29, %s201_s12  }
   0x9   : > { %p8217_p5 = por %p212_p2, %p211_p0  ;;  %p8221_p6 = por %p218_p4, %p217_p3 }
   0xa   : > { %p7047_p7 = scmp.ge.s32.totalorder %s8120_s30, 1  ;;  %p265_p8 = scmp.lt.s32.totalorder %s8120_s30, 3 }
   0xc   : > { %p266_p9 = pnand %p7047_p7, %p265_p8 }
   0xe   : > { %269 = sbr.rel (%p266_p9) target bundleno = 1548 (0x60c), region = 52 }
  0x15   : > { %p299_p10 = scmp.lt.s32.totalorder %s8200_s9, 1  ;;  %vm305_vm0 = vcmask 293888   ;;  %v8122_v0 = vmov 0   ;;  %s8123_s22 = smov 4   ;;  %vm569_vm1 = vcmask 31744   ;;  %vm326_vm4 = vcmask 523264  }
  0x16   : > { %308 = vst.msk [vmem:[#allocation2 + $0x10] sm:$0xff] %vm305_vm0, %v8122_v0  ;;  %306 = vst.msk [vmem:[#allocation2] sm:$0xff] %vm305_vm0, %v8122_v0  ;;  %s8124_s23 = smov 8   ;;  %s8125_s24 = smov 16   ;;  %vm570_vm2 = vsmask.f32 7938 }
  0x17   : > { %307 = vst.msk [vmem:[#allocation2 + $0x8] sm:$0xff] %vm305_vm0, %v8122_v0  ;;  %309 = vst.msk [vmem:[#allocation2 + $0x18] sm:$0xff] %vm305_vm0, %v8122_v0  ;;  %s300_s17 = scalar_select %p299_p10, %s8200_s9, 1  ;;  %vm2047_vm5 = vcmask 1041408   ;;  %vm722_vm6 = vcmask 64544   ;;  %vm843_vm7 = vcmask 97344  }
  0x18   : > { %310 = vst.msk [vmem:[#allocation2 + $0x20] sm:$0xff] %vm305_vm0, %v8122_v0  ;;  %311 = vst.msk [vmem:[#allocation2 + $0x28] sm:$0xff] %vm305_vm0, %v8122_v0  ;;  %s8126_s25 = smov 12   ;;  %s8127_s26 = smov 20   ;;  %vm844_vm8 = vsmask.f32 7424 }
  0x19   : > { %312 = vst.msk [vmem:[#allocation2 + $0x30] sm:$0xff] %vm305_vm0, %v8122_v0  ;;  %313 = vst.msk [vmem:[#allocation2 + $0x38] sm:$0xff] %vm305_vm0, %v8122_v0  ;;  %s7273_s18 = sshll.u32 %s300_s17, 8  ;;  %s8128_s10 = smov 24   ;;  %vm1099_vm9 = vcmask 130144   ;;  %vm1261_vm12 = vcmask 162944  }
  0x1a   : > { %314 = vst.msk [vmem:[#allocation2 + $0x40] sm:$0xff] %vm305_vm0, %v8122_v0  ;;  %315 = vst.msk [vmem:[#allocation2 + $0x48] sm:$0xff] %vm305_vm0, %v8122_v0  ;;  %s8283_s21 = scalar_lea.vmem %s11241_s0, %s7273_s18  ;;  %s8129_s19 = smov 28   ;;  %vm1390_vm13 = vcmask 195744   ;;  %vm1636_vm14 = vcmask 228544  }
  0x1b   : > { %316 = vst.msk [vmem:[#allocation2 + $0x50] sm:$0xff] %vm305_vm0, %v8122_v0  ;;  %317 = vst.msk [vmem:[#allocation2 + $0x58] sm:$0xff] %vm305_vm0, %v8122_v0  ;;  %v8286_v1 = vld [vmem:[%s8283_s21 + $0x10] sm:$0xff]  ;;  %v620_v2 = vld [vmem:[%s8283_s21 + $0x18] sm:$0xff]  ;;  %s8130_s13 = smov 32   ;;  %s8131_s12 = smov 64  }
  0x1c   : > { %318 = vst.msk [vmem:[#allocation2 + $0x60] sm:$0xff] %vm305_vm0, %v8122_v0  ;;  %319 = vst.msk [vmem:[#allocation2 + $0x68] sm:$0xff] %vm305_vm0, %v8122_v0  ;;  %v8290_v3 = vld [vmem:[%s8283_s21] sm:$0xff]  ;;  %v8293_v4 = vpack.c.bf16 %v620_v2, %v8286_v1  ;;  %v618_v5 = vld [vmem:[%s8283_s21 + $0x8] sm:$0xff]  ;;  %s7274_s17 = sshll.u32 %s8200_s9, 12 }
  0x1d   : > { %320 = vst.msk [vmem:[#allocation2 + $0x70] sm:$0xff] %vm305_vm0, %v8122_v0  ;;  %321 = vst.msk [vmem:[#allocation2 + $0x78] sm:$0xff] %vm305_vm0, %v8122_v0  ;;  %v8297_v6 = vld [vmem:[%s8283_s21 + $0x20] sm:$0xff]  ;;  %v622_v7 = vld [vmem:[%s8283_s21 + $0x28] sm:$0xff]  ;;  %v647_v8 = vpack.c.bf16 %v618_v5, %v8290_v3 }
  0x1e   : > { %322 = vst [vmem:[#allocation3] sm:$0xff] %v8122_v0  ;;  %324 = vst [vmem:[#allocation3 + $0x10] sm:$0xff] %v8122_v0  ;;  %v738_v9 = vld [vmem:[%s8283_s21 + $0x1] sm:$0xff]  ;;  %v739_v10 = vld [vmem:[%s8283_s21 + $0x9] sm:$0x7f]  ;;  %679 = vrot.lane.b32.xlu1 %v8293_v4, %s8123_s22  ;;  %v8307_v12 = vpack.c.bf16 %v622_v7, %v8297_v6 }
  0x1f   : > { %330 = vst [vmem:[#allocation3 + $0x38] sm:$0xff] %v8122_v0  ;;  %335 = vst [vmem:[#allocation3 + $0x60] sm:$0xff] %v8122_v0  ;;  %v894_v11 = vld [vmem:[%s8283_s21 + $0x18] sm:$0x7f]  ;;  %v892_v14 = vld [vmem:[%s8283_s21 + $0x8] sm:$0x7f]  ;;  %677 = vrot.lane.b32.xlu0 %v647_v8, %s8123_s22  ;;  %v768_v15 = vpack.c.bf16 %v739_v10, %v738_v9 }
  0x20   : > { %340 = vst [vmem:[#allocation3 + $0x88] sm:$0xff] %v8122_v0  ;;  %345 = vst [vmem:[#allocation3 + $0xb0] sm:$0xff] %v8122_v0  ;;  %v924_v13 = vpack.c.bf16 %v894_v11, %v8286_v1  ;;  %v923_v16 = vpack.c.bf16 %v892_v14, %v8290_v3  ;;  %v8319_v24 = vld [vmem:[%s8283_s21 + $0x21] sm:$0xff]  ;;  %v743_v26 = vld [vmem:[%s8283_s21 + $0x29] sm:$0x7f] }
  0x21   : > { %350 = vst [vmem:[#allocation3 + $0xd8] sm:$0xff] %v8122_v0  ;;  %355 = vst [vmem:[#allocation3 + $0x100] sm:$0xff] %v8122_v0  ;;  %v8324_v27 = vld [vmem:[%s8283_s21 + $0x30] sm:$0xff]  ;;  %v898_v28 = vld [vmem:[%s8283_s21 + $0x38] sm:$0x7f]  ;;  %v770_v32 = vpack.c.bf16 %v743_v26, %v8319_v24 }
  0x22   : > { %360 = vst [vmem:[#allocation3 + $0x128] sm:$0xff] %v8122_v0  ;;  %365 = vst [vmem:[#allocation3 + $0x150] sm:$0xff] %v8122_v0  ;;  %v947_v17 = vshrl.u32 %v924_v13, 16  ;;  %v940_v18 = vshrl.u32 %v923_v16, 16  ;;  %681 = vrot.lane.b32.xlu1 %v8307_v12, %s8123_s22  ;;  %v950_v20 = vshll.u32 %v924_v13, 16  ;;  %v943_v22 = vshll.u32 %v923_v16, 16 }
  0x23   : > { %370 = vst [vmem:[#allocation3 + $0x178] sm:$0xff] %v8122_v0  ;;  %375 = vst [vmem:[#allocation3 + $0x1a0] sm:$0xff] %v8122_v0  ;;  %798 = vrot.lane.b32.xlu0 %v768_v15, %s8124_s23  ;;  %v8328_v29 = vld [vmem:[%s8283_s21 + $0x11] sm:$0xff]  ;;  %v741_v30 = vld [vmem:[%s8283_s21 + $0x19] sm:$0x7f]  ;;  %v926_v33 = vpack.c.bf16 %v898_v28, %v8324_v27 }
  0x24   : > { %380 = vst [vmem:[#allocation3 + $0x1c8] sm:$0xff] %v8122_v0  ;;  %385 = vst [vmem:[#allocation3 + $0x1f0] sm:$0xff] %v8122_v0  ;;  %v949_v19 = vrot.slane %v947_v17, 7  ;;  %v942_v21 = vrot.slane %v940_v18, 7  ;;  %v896_v31 = vld [vmem:[%s8283_s21 + $0x28] sm:$0x7f]  ;;  %v769_v34 = vpack.c.bf16 %v741_v30, %v8328_v29 }
  0x25   : > { %390 = vst [vmem:[#allocation3 + $0x218] sm:$0xff] %v8122_v0  ;;  %395 = vst [vmem:[#allocation3 + $0x240] sm:$0xff] %v8122_v0  ;;  %v1281_v35 = vld [vmem:[%s8283_s21 + $0x19] sm:$0x7f]  ;;  %v925_v36 = vpack.c.bf16 %v896_v31, %v8297_v6  ;;  %v1279_v37 = vld [vmem:[%s8283_s21 + $0x9] sm:$0x7f] }
  0x26   : > { %400 = vst [vmem:[#allocation3 + $0x268] sm:$0xff] %v8122_v0  ;;  %1215 = vrot.lane.b32.xlu1 %v8293_v4, %s8125_s24  ;;  %v952_v23 = vor.u32 %v950_v20, %v949_v19  ;;  %v945_v25 = vor.u32 %v943_v22, %v942_v21  ;;  %v1311_v38 = vpack.c.bf16 %v1281_v35, %v8328_v29  ;;  %v961_v39 = vshrl.u32 %v926_v33, 16  ;;  %v8344_v41 = vld [vmem:[%s8283_s21 + $0x40] sm:$0xff]  ;;  %v626_v42 = vld [vmem:[%s8283_s21 + $0x48] sm:$0xff]  ;;  %v624_v45 = vld [vmem:[%s8283_s21 + $0x38] sm:$0xff] }
  0x27   : > { %1213 = vrot.lane.b32.xlu0 %v647_v8, %s8125_s24  ;;  %v1310_v40 = vpack.c.bf16 %v1279_v37, %v738_v9  ;;  %v954_v43 = vshrl.u32 %v925_v36, 16  ;;  %v7054_v44 = vld [vmem:[%s8283_s21 + $0x28] sm:$0x7f]  ;;  %v7052_v46 = vld [vmem:[%s8283_s21 + $0x18] sm:$0x7f]  ;;  %v8352_v47 = vpack.c.bf16 %v626_v42, %v8344_v41  ;;  %v964_v49 = vshll.u32 %v926_v33, 16  ;;  %vm8374_vm3 = vmand %vm569_vm1, %vm570_vm2 }
  0x28   : > { %v963_v48 = vrot.slane %v961_v39, 7  ;;  %v1472_v50 = vpack.c.bf16 %v7054_v44, %v8297_v6  ;;  %v8357_v51 = vpack.c.bf16 %v624_v45, %v8324_v27  ;;  %v957_v53 = vshll.u32 %v925_v36, 16  ;;  %v406_v55 = vld [vmem:[%s8283_s21 + $0x18] sm:$0x7f]  ;;  %v404_v56 = vld [vmem:[%s8283_s21 + $0x8] sm:$0x7f]  ;;  %vm8648_vm10 = vmand %vm843_vm7, %vm844_vm8 }
  0x29   : > { %v956_v52 = vrot.slane %v954_v43, 7  ;;  %v1471_v54 = vpack.c.bf16 %v7052_v46, %v8286_v1  ;;  %v434_v59 = vpack.c.bf16 %v406_v55, %v8286_v1  ;;  %v408_v60 = vld [vmem:[%s8283_s21 + $0x28] sm:$0x7f]  ;;  %v433_v63 = vpack.c.bf16 %v404_v56, %v8290_v3  ;;  %v575_v15 = vld [vmem:[#allocation2 + $0x10] sm:$0xff]  ;;  %v578_v26 = vld [vmem:[#allocation2 + $0x18] sm:$0xff]  ;;  %327 = vst.msk [vmem:[#allocation3 + $0x20] sm:$0xff] %vm326_vm4, %v8122_v0 }
  0x2a   : > { %1053 = vrot.lane.b32.xlu1 %v952_v23, %s8126_s25  ;;  %v966_v57 = vor.u32 %v964_v49, %v963_v48  ;;  %v1494_v58 = vshrl.u32 %v1472_v50, 16  ;;  %v435_v9 = vpack.c.bf16 %v408_v60, %v8297_v6  ;;  %v1497_v10 = vshll.u32 %v1472_v50, 16  ;;  %v572_v19 = vld [vmem:[#allocation2 + $0x8] sm:$0xff]  ;;  %v8405_v43 = vld [vmem:[%s8283_s21 + $0x31] sm:$0xff]  ;;  %v745_v44 = vld [vmem:[%s8283_s21 + $0x39] sm:$0x7f] }
  0x2b   : > { %1051 = vrot.lane.b32.xlu0 %v945_v25, %s8126_s25  ;;  %v959_v61 = vor.u32 %v957_v53, %v956_v52  ;;  %v1487_v62 = vshrl.u32 %v1471_v54, 16  ;;  %v456_v2 = vshrl.u32 %v434_v59, 16  ;;  %v459_v5 = vshll.u32 %v434_v59, 16  ;;  %v412_v22 = vld [vmem:[%s8283_s21 + $0x48] sm:$0x7f]  ;;  %v8413_v53 = vld [vmem:[%s8283_s21 + $0x50] sm:$0xff]  ;;  %vm8654_vm11 = vmand %vm1099_vm9, %vm570_vm2 }
  0x2c   : > { %v449_v7 = vshrl.u32 %v433_v63, 16  ;;  %v452_v8 = vshll.u32 %v433_v63, 16  ;;  %v1496_v1 = vrot.slane %v1494_v58, 7  ;;  %v1490_v11 = vshll.u32 %v1471_v54, 16  ;;  %v7959_v39 = vld [vmem:[%s11242_s1 + $0x8] sm:$0xff]   ;;  %v581_v58 = vld [vmem:[#allocation2 + $0x20] sm:$0xff]  ;;  %vm8737_vm15 = vmand %vm1390_vm13, %vm844_vm8 }
  0x2d   : > { %v458_v13 = vrot.slane %v456_v2, 7  ;;  %v1489_v14 = vrot.slane %v1487_v62, 7  ;;  %v463_v16 = vshrl.u32 %v435_v9, 16  ;;  %v466_v17 = vshll.u32 %v435_v9, 16  ;;  %v747_v42 = vld [vmem:[%s8283_s21 + $0x49] sm:$0x7f]  ;;  %vm8746_vm1 = vmand %vm1636_vm14, %vm570_vm2 }
  0x2e   : > { %802 = vrot.lane.b32.xlu1 %v770_v32, %s8124_s23  ;;  %v451_v3 = vrot.slane %v449_v7, 7  ;;  %v1499_v23 = vor.u32 %v1497_v10, %v1496_v1  ;;  %v410_v32 = vld [vmem:[%s8283_s21 + $0x38] sm:$0x7f]  ;;  %v437_v33 = vpack.c.bf16 %v412_v22, %v8344_v41  ;;  %v584_v50 = vld [vmem:[#allocation2 + $0x28] sm:$0xff]  ;;  %v771_v56 = vpack.c.bf16 %v745_v44, %v8405_v43  ;;  %332 = vst.msk [vmem:[#allocation3 + $0x48] sm:$0xff] %vm326_vm4, %v8122_v0 }
  0x2f   : > { %800 = vrot.lane.b32.xlu0 %v769_v34, %s8124_s23  ;;  %v461_v6 = vor.u32 %v459_v5, %v458_v13  ;;  %v465_v21 = vrot.slane %v463_v16, 7  ;;  %v1492_v28 = vor.u32 %v1490_v11, %v1489_v14  ;;  %v436_v37 = vpack.c.bf16 %v410_v32, %v8324_v27  ;;  %v1285_v49 = vld [vmem:[%s8283_s21 + $0x39] sm:$0x7f]  ;;  %v1283_v59 = vld [vmem:[%s8283_s21 + $0x29] sm:$0x7f]  ;;  %337 = vst.msk [vmem:[#allocation3 + $0x70] sm:$0xff] %vm326_vm4, %v8122_v0 }
  0x30   : > { %v454_v20 = vor.u32 %v452_v8, %v451_v3  ;;  %v477_v35 = vshrl.u32 %v437_v33, 16  ;;  %v480_v36 = vshll.u32 %v437_v33, 16  ;;  %v900_v60 = vld [vmem:[%s8283_s21 + $0x48] sm:$0x7f]  ;;  %342 = vst.msk [vmem:[#allocation3 + $0x98] sm:$0xff] %vm326_vm4, %v8122_v0  ;;  %347 = vst.msk [vmem:[#allocation3 + $0xc0] sm:$0xff] %vm326_vm4, %v8122_v0  ;;  %v1313_v2 = vpack.c.bf16 %v1285_v49, %v8405_v43 }
  0x31   : > { %v576_v25 = vsel %vm8374_vm3, %v461_v6, %v575_v15  ;;  %v468_v31 = vor.u32 %v466_v17, %v465_v21  ;;  %v470_v46 = vshrl.u32 %v436_v37, 16  ;;  %v473_v48 = vshll.u32 %v436_v37, 16  ;;  %v8424_v62 = vld [vmem:[%s8283_s21 + $0x29] sm:$0x7f]  ;;  %352 = vst.msk [vmem:[#allocation3 + $0xe8] sm:$0xff] %vm326_vm4, %v8122_v0  ;;  %357 = vst.msk [vmem:[#allocation3 + $0x110] sm:$0xff] %vm326_vm4, %v8122_v0 }
  0x32   : > { %1344 = vrot.lane.b32.xlu1 %v1311_v38, %s8127_s26  ;;  %577 = vst [vmem:[#allocation2 + $0x10] sm:$0xff] %v576_v25  ;;  %v573_v30 = vsel %vm8374_vm3, %v454_v20, %v572_v19  ;;  %v7958_v38 = vld [vmem:[%s11242_s1] sm:$0xff]   ;;  %v479_v45 = vrot.slane %v477_v35, 7  ;;  %362 = vst.msk [vmem:[#allocation3 + $0x138] sm:$0xff] %vm326_vm4, %v8122_v0  ;;  %v416_v63 = vld [vmem:[%s8283_s21 + $0x68] sm:$0x7f]  ;;  %v927_v10 = vpack.c.bf16 %v900_v60, %v8344_v41 }
  0x33   : > { %1342 = vrot.lane.b32.xlu0 %v1310_v40, %s8127_s26  ;;  %574 = vst [vmem:[#allocation2 + $0x8] sm:$0xff] %v573_v30  ;;  %v579_v34 = vsel %vm8374_vm3, %v468_v31, %v578_v26  ;;  %v8401_v40 = vld [vmem:[%s8283_s21 + $0x41] sm:$0xff]  ;;  %7782 = vmatprep.subr.bf16.mxu0 %v7958_v38  ;;  %v472_v55 = vrot.slane %v470_v46, 7  ;;  %367 = vst.msk [vmem:[#allocation3 + $0x160] sm:$0xff] %vm326_vm4, %v8122_v0  ;;  %v413_v8 = vld [vmem:[%s8283_s21 + $0x50] sm:$0xff]  ;;  %v1835_v15 = vpack.c.bf16 %v8424_v62, %v8319_v24  ;;  %vm1909_vm7 = vcmask 294144  }
  0x34   : > { %580 = vst [vmem:[#allocation2 + $0x18] sm:$0xff] %v579_v34  ;;  %7900 = vmatprep.subr.bf16.mxu1 %v7958_v38  ;;  %7783 = vmatpush3.bf16.msra.mxu0 %v7958_v38  ;;  %v772_v52 = vpack.c.bf16 %v747_v42, %v8401_v40  ;;  %v482_v54 = vor.u32 %v480_v36, %v479_v45  ;;  %372 = vst.msk [vmem:[#allocation3 + $0x188] sm:$0xff] %vm326_vm4, %v8122_v0  ;;  %v414_v9 = vld [vmem:[%s8283_s21 + $0x58] sm:$0x7f]  ;;  %v8472_v11 = vld [vmem:[%s8283_s21 + $0x60] sm:$0xff]  ;;  %v971_v42 = vshll.u32 %v927_v10, 16 }
  0x35   : > { %7903 = vmatpush3.bf16.msra.mxu1 %v7958_v38  ;;  %7784 = vmatprep.subr.bf16.mxu0 %v7959_v39  ;;  %377 = vst.msk [vmem:[#allocation3 + $0x1b0] sm:$0xff] %vm326_vm4, %v8122_v0  ;;  %382 = vst.msk [vmem:[#allocation3 + $0x1d8] sm:$0xff] %vm326_vm4, %v8122_v0  ;;  %v7112_v1 = vld [vmem:[%s8283_s21 + $0x19] sm:$0x7f]  ;;  %v630_v3 = vld [vmem:[%s8283_s21 + $0x68] sm:$0xff]  ;;  %v438_v17 = vpack.c.bf16 %v414_v9, %v413_v8 }
  0x36   : > { %685 = vrot.lane.b32.xlu1 %v8352_v47, %s8123_s22  ;;  %7901 = vmatprep.subr.bf16.mxu1 %v7959_v39  ;;  %387 = vst.msk [vmem:[#allocation3 + $0x200] sm:$0xff] %vm326_vm4, %v8122_v0  ;;  %392 = vst.msk [vmem:[#allocation3 + $0x228] sm:$0xff] %vm326_vm4, %v8122_v0  ;;  %v7960_v14 = vld [vmem:[%s11242_s1 + $0x10] ss:$0 sps:$4 sm:$0x33]   ;;  %v1834_v6 = vpack.c.bf16 %v7112_v1, %v8328_v29  ;;  %v628_v19 = vld [vmem:[%s8283_s21 + $0x58] sm:$0xff]  ;;  %v8487_v31 = vpack.c.bf16 %v630_v3, %v8472_v11 }
  0x37   : > { %683 = vrot.lane.b32.xlu0 %v8357_v51, %s8123_s22  ;;  %397 = vst.msk [vmem:[#allocation3 + $0x250] sm:$0xff] %vm326_vm4, %v8122_v0  ;;  %402 = vst.msk [vmem:[#allocation3 + $0x278] sm:$0xff] %vm326_vm4, %v8122_v0  ;;  %v1312_v0 = vpack.c.bf16 %v1283_v59, %v8319_v24  ;;  %v7058_v16 = vld [vmem:[%s8283_s21 + $0x48] sm:$0x7f]  ;;  %v484_v25 = vshrl.u32 %v438_v17, 16  ;;  %v487_v26 = vshll.u32 %v438_v17, 16  ;;  %v8490_v29 = vpack.c.bf16 %v628_v19, %v8413_v53 }
  0x38   : > { %7785 = vmatpush3.bf16.msra.mxu0 %v7959_v39  ;;  %v2049_v24 = vsel %vm2047_vm5, %v7960_v14, 0  ;;  %v590_v32 = vld [vmem:[#allocation2 + $0x38] sm:$0xff]  ;;  %v1474_v36 = vpack.c.bf16 %v7058_v16, %v8344_v41  ;;  %v587_v38 = vld [vmem:[#allocation2 + $0x30] sm:$0xff]  ;;  %v751_v62 = vld [vmem:[%s8283_s21 + $0x69] sm:$0x7f] }
  0x39   : > { %7904 = vmatpush3.bf16.msra.mxu1 %v7959_v39  ;;  %7906 = vmatprep.subr.msk.bf16.mxu0 %vm2047_vm5, %v7960_v14  ;;  %v486_v33 = vrot.slane %v484_v25, 7  ;;  %v417_v59 = vld [vmem:[%s8283_s21 + $0x70] sm:$0xff]  ;;  %v418_v60 = vld [vmem:[%s8283_s21 + $0x78] sm:$0x7f]  ;;  %v7118_v25 = vld [vmem:[%s8283_s21 + $0x49] sm:$0x7f] }
  0x3a   : > { %1057 = vrot.lane.b32.xlu1 %v966_v57, %s8126_s25  ;;  %v902_v57 = vld [vmem:[%s8283_s21 + $0x58] sm:$0x7f]  ;;  %7907 = vmatprep.subr.msk.bf16.mxu1 %vm2047_vm5, %v7960_v14  ;;  %v1508_v49 = vshrl.u32 %v1474_v36, 16  ;;  %v8534_v17 = vld [vmem:[%s8283_s21 + $0x70] sm:$0xff]  ;;  %vm1788_vm5 = vcmask 261344   ;;  %vm8796_vm9 = vmand %vm1909_vm7, %vm844_vm8 }
  0x3b   : > { %1055 = vrot.lane.b32.xlu0 %v959_v61, %s8126_s25  ;;  %v475_v61 = vor.u32 %v473_v48, %v472_v55  ;;  %v928_v5 = vpack.c.bf16 %v902_v57, %v8413_v53  ;;  %v489_v45 = vor.u32 %v487_v26, %v486_v33  ;;  %v749_v8 = vld [vmem:[%s8283_s21 + $0x59] sm:$0x7f] }
  0x3c   : > { %7787 = vmatpush3.bf16.msra.mxu0 %v2049_v24  ;;  %v1289_v1 = vld [vmem:[%s8283_s21 + $0x59] sm:$0x7f] }
  0x3d   : > { %v582_v7 = vsel %vm8374_vm3, %v475_v61, %v581_v58  ;;  %v975_v20 = vshrl.u32 %v928_v5, 16  ;;  %7905 = vmatpush3.bf16.msra.mxu1 %v2049_v24  ;;  %v978_v35 = vshll.u32 %v928_v5, 16  ;;  %v588_v48 = vsel %vm8374_vm3, %v489_v45, %v587_v38  ;;  %v8513_v61 = vld [vmem:[%s8283_s21 + $0x61] sm:$0xff]  ;;  %v7116_v33 = vld [vmem:[%s8283_s21 + $0x39] sm:$0x7f] }
  0x3e   : > { %1219 = vrot.lane.b32.xlu1 %v8357_v51, %s8125_s24  ;;  %583 = vst [vmem:[#allocation2 + $0x20] sm:$0xff] %v582_v7  ;;  %589 = vst [vmem:[#allocation2 + $0x30] sm:$0xff] %v588_v48  ;;  %v8521_v7 = vld [vmem:[%s8283_s21 + $0x51] sm:$0xff]  ;;  %v774_v14 = vpack.c.bf16 %v751_v62, %v8513_v61 }
  0x3f   : > { %1217 = vrot.lane.b32.xlu0 %v8307_v12, %s8125_s24  ;;  %v977_v34 = vrot.slane %v975_v20, 7  ;;  %v773_v16 = vpack.c.bf16 %v749_v8, %v8521_v7  ;;  %v593_v20 = vld [vmem:[#allocation2 + $0x40] sm:$0xff]  ;;  %v8592_v8 = vld [vmem:[%s8283_s21 + $0x90] sm:$0xff] }
  0x41   : > { %v980_v41 = vor.u32 %v978_v35, %v977_v34  ;;  %v7060_v34 = vld [vmem:[%s8283_s21 + $0x58] sm:$0x7f]  ;;  %v1837_v35 = vpack.c.bf16 %v7118_v25, %v8401_v40 }
  0x42   : > { %1593 = vrot.lane.b32.xlu1 %v1499_v23, %s8128_s10  ;;  %v968_v23 = vshrl.u32 %v927_v10, 16  ;;  %v906_v10 = vld [vmem:[%s8283_s21 + $0x78] sm:$0x7f]  ;;  %v1475_v45 = vpack.c.bf16 %v7060_v34, %v8413_v53 }
  0x43   : > { %1591 = vrot.lane.b32.xlu0 %v1492_v28, %s8128_s10  ;;  %v7056_v28 = vld [vmem:[%s8283_s21 + $0x38] sm:$0x7f]  ;;  %v930_v26 = vpack.c.bf16 %v906_v10, %v8534_v17 }
  0x44   : > { %v970_v39 = vrot.slane %v968_v23, 7  ;;  %v1473_v44 = vpack.c.bf16 %v7056_v28, %v8324_v27  ;;  %v7062_v28 = vld [vmem:[%s8283_s21 + $0x68] sm:$0x7f]  ;;  %v910_v10 = vld [vmem:[%s8283_s21 + $0x98] sm:$0x7f] }
  0x45   : > { %v1476_v38 = vpack.c.bf16 %v7062_v28, %v8472_v11  ;;  %v992_v48 = vshll.u32 %v930_v26, 16 }
  0x46   : > { %1745 = vrot.lane.b32.xlu1 %v8307_v12, %s8129_s19  ;;  %v585_v12 = vsel %vm8374_vm3, %v482_v54, %v584_v50  ;;  %v973_v27 = vor.u32 %v971_v42, %v970_v39  ;;  %v1501_v50 = vshrl.u32 %v1473_v44, 16  ;;  %v1511_v54 = vshll.u32 %v1474_v36, 16  ;;  %v8554_v36 = vld [vmem:[%s8283_s21 + $0x80] sm:$0xff]  ;;  %v634_v42 = vld [vmem:[%s8283_s21 + $0x88] sm:$0xff] }
  0x47   : > { %1743 = vrot.lane.b32.xlu0 %v8293_v4, %s8129_s19  ;;  %586 = vst [vmem:[#allocation2 + $0x28] sm:$0xff] %v585_v12  ;;  %v415_v4 = vld [vmem:[%s8283_s21 + $0x60] sm:$0xff]  ;;  %v440_v12 = vpack.c.bf16 %v418_v60, %v417_v59  ;;  %v1836_v39 = vpack.c.bf16 %v7116_v33, %v8405_v43  ;;  %v1525_v53 = vshll.u32 %v1476_v38, 16  ;;  %v421_v60 = vld [vmem:[%s8283_s21 + $0x90] sm:$0xff] }
  0x48   : > { %v439_v13 = vpack.c.bf16 %v416_v63, %v415_v4  ;;  %v1503_v55 = vrot.slane %v1501_v50, 7  ;;  %v419_v4 = vld [vmem:[%s8283_s21 + $0x80] sm:$0xff]  ;;  %v420_v63 = vld [vmem:[%s8283_s21 + $0x88] sm:$0x7f]  ;;  %v1515_v50 = vshrl.u32 %v1475_v45, 16 }
  0x49   : > { %v441_v5 = vpack.c.bf16 %v420_v63, %v419_v4  ;;  %v8583_v4 = vld [vmem:[%s8283_s21 + $0x81] sm:$0xff]  ;;  %v755_v63 = vld [vmem:[%s8283_s21 + $0x89] sm:$0x7f] }
  0x4a   : > { %806 = vrot.lane.b32.xlu1 %v772_v52, %s8124_s23  ;;  %v491_v21 = vshrl.u32 %v439_v13, 16  ;;  %v494_v22 = vshll.u32 %v439_v13, 16  ;;  %v1510_v52 = vrot.slane %v1508_v49, 7 }
  0x4b   : > { %804 = vrot.lane.b32.xlu0 %v771_v56, %s8124_s23  ;;  %v1504_v56 = vshll.u32 %v1473_v44, 16  ;;  %v505_v13 = vshrl.u32 %v441_v5, 16  ;;  %v508_v19 = vshll.u32 %v441_v5, 16  ;;  %v753_v5 = vld [vmem:[%s8283_s21 + $0x79] sm:$0x7f] }
  0x4c   : > { %v493_v30 = vrot.slane %v491_v21, 7  ;;  %v1513_v57 = vor.u32 %v1511_v54, %v1510_v52  ;;  %v904_v21 = vld [vmem:[%s8283_s21 + $0x68] sm:$0x7f]  ;;  %v1518_v52 = vshll.u32 %v1475_v45, 16 }
  0x4d   : > { %v1506_v58 = vor.u32 %v1504_v56, %v1503_v55  ;;  %v929_v24 = vpack.c.bf16 %v904_v21, %v8472_v11 }
  0x4e   : > { %1348 = vrot.lane.b32.xlu1 %v1313_v2, %s8127_s26  ;;  %v496_v37 = vor.u32 %v494_v22, %v493_v30  ;;  %v498_v2 = vshrl.u32 %v440_v12, 16 }
  0x4f   : > { %1346 = vrot.lane.b32.xlu0 %v1312_v0, %s8127_s26  ;;  %v501_v0 = vshll.u32 %v440_v12, 16  ;;  %v982_v44 = vshrl.u32 %v929_v24, 16  ;;  %v422_v12 = vld [vmem:[%s8283_s21 + $0x98] sm:$0x7f] }
  0x50   : > { %v591_v46 = vsel %vm8374_vm3, %v496_v37, %v590_v32  ;;  %v500_v9 = vrot.slane %v498_v2, 7  ;;  %v989_v37 = vshrl.u32 %v930_v26, 16  ;;  %v442_v62 = vpack.c.bf16 %v422_v12, %v421_v60  ;;  %v8587_v2 = vld [vmem:[%s8283_s21 + $0x71] sm:$0xff] }
  0x51   : > { %592 = vst [vmem:[#allocation2 + $0x38] sm:$0xff] %v591_v46  ;;  %v632_v46 = vld [vmem:[%s8283_s21 + $0x78] sm:$0xff]  ;;  %v984_v43 = vrot.slane %v982_v44, 7 }
  0x52   : > { %1866 = vrot.lane.b32.xlu1 %v1835_v15, %s8130_s13  ;;  %v1287_v15 = vld [vmem:[%s8283_s21 + $0x49] sm:$0x7f]  ;;  %v503_v3 = vor.u32 %v501_v0, %v500_v9  ;;  %v991_v49 = vrot.slane %v989_v37, 7  ;;  %v8568_v11 = vpack.c.bf16 %v632_v46, %v8534_v17  ;;  %v423_v9 = vld [vmem:[%s8283_s21 + $0xa0] sm:$0xff] }
  0x53   : > { %1864 = vrot.lane.b32.xlu0 %v1834_v6, %s8130_s13  ;;  %v507_v6 = vrot.slane %v505_v13, 7  ;;  %v1314_v30 = vpack.c.bf16 %v1287_v15, %v8401_v40  ;;  %v8564_v40 = vpack.c.bf16 %v634_v42, %v8554_v36  ;;  %v424_v0 = vld [vmem:[%s8283_s21 + $0xa8] sm:$0x7f] }
  0x54   : > { %v594_v22 = vsel %vm8374_vm3, %v503_v3, %v593_v20  ;;  %v994_v54 = vor.u32 %v992_v48, %v991_v49  ;;  %v443_v13 = vpack.c.bf16 %v424_v0, %v423_v9  ;;  %v515_v3 = vshll.u32 %v442_v62, 16  ;;  %v7066_v42 = vld [vmem:[%s8283_s21 + $0x88] sm:$0x7f]  ;;  %v636_v48 = vld [vmem:[%s8283_s21 + $0x98] sm:$0xff]  ;;  %v1101_v0 = vld [vmem:[#allocation2] sm:$0xff] }
  0x55   : > { %v510_v23 = vor.u32 %v508_v19, %v507_v6  ;;  %595 = vst [vmem:[#allocation2 + $0x40] sm:$0xff] %v594_v22  ;;  %v776_v19 = vpack.c.bf16 %v755_v63, %v8583_v4  ;;  %v775_v20 = vpack.c.bf16 %v753_v5, %v8587_v2  ;;  %v932_v22 = vpack.c.bf16 %v910_v10, %v8592_v8  ;;  %v7962_v63 = vld [vmem:[%s11244_s3] sm:$0xff]  }
  0x56   : > { %689 = vrot.lane.b32.xlu1 %v8487_v31, %s8123_s22  ;;  %v519_v6 = vshrl.u32 %v443_v13, 16  ;;  %v522_v26 = vshll.u32 %v443_v13, 16 }
  0x57   : > { %687 = vrot.lane.b32.xlu0 %v8490_v29, %s8123_s22  ;;  %v1003_v34 = vshrl.u32 %v932_v22, 16 }
  0x58   : > { %v521_v25 = vrot.slane %v519_v6, 7 }
  0x5a   : > { %1061 = vrot.lane.b32.xlu1 %v980_v41, %s8126_s25  ;;  %v985_v41 = vshll.u32 %v929_v24, 16  ;;  %v524_v24 = vor.u32 %v522_v26, %v521_v25  ;;  %v428_v25 = vld [vmem:[%s8283_s21 + $0xc8] sm:$0x7f] }
  0x5b   : > { %1059 = vrot.lane.b32.xlu0 %v973_v27, %s8126_s25  ;;  %v1522_v27 = vshrl.u32 %v1476_v38, 16  ;;  %v8620_v38 = vld [vmem:[%s8283_s21 + $0xa0] sm:$0xff] }
  0x5c   : > { %v987_v55 = vor.u32 %v985_v41, %v984_v43  ;;  %v7064_v41 = vld [vmem:[%s8283_s21 + $0x78] sm:$0x7f]  ;;  %v1005_v43 = vrot.slane %v1003_v34, 7 }
  0x5d   : > { %v1524_v56 = vrot.slane %v1522_v27, 7 }
  0x5e   : > { %1223 = vrot.lane.b32.xlu1 %v8490_v29, %s8125_s24 }
  0x5f   : > { %1221 = vrot.lane.b32.xlu0 %v8352_v47, %s8125_s24 }
  0x62   : > { %1597 = vrot.lane.b32.xlu1 %v1513_v57, %s8128_s10  ;;  %v1517_v57 = vrot.slane %v1515_v50, 7  ;;  %v1006_v50 = vshll.u32 %v932_v22, 16 }
  0x63   : > { %1595 = vrot.lane.b32.xlu0 %v1506_v58, %s8128_s10  ;;  %v1527_v58 = vor.u32 %v1525_v53, %v1524_v56 }
  0x64   : > { %v1520_v59 = vor.u32 %v1518_v52, %v1517_v57  ;;  %v1008_v57 = vor.u32 %v1006_v50, %v1005_v43  ;;  %v605_v43 = vld [vmem:[#allocation2 + $0x60] sm:$0xff] }
  0x66   : > { %1749 = vrot.lane.b32.xlu1 %v8352_v47, %s8129_s19  ;;  %v596_v47 = vld [vmem:[#allocation2 + $0x48] sm:$0xff] }
  0x67   : > { %1747 = vrot.lane.b32.xlu0 %v8357_v51, %s8129_s19  ;;  %v1315_v51 = vpack.c.bf16 %v1289_v1, %v8521_v7  ;;  %v597_v32 = vsel %vm8374_vm3, %v510_v23, %v596_v47  ;;  %v512_v1 = vshrl.u32 %v442_v62, 16  ;;  %v1291_v47 = vld [vmem:[%s8283_s21 + $0x69] sm:$0x7f] }
  0x68   : > { %598 = vst [vmem:[#allocation2 + $0x48] sm:$0xff] %v597_v32  ;;  %v7120_v32 = vld [vmem:[%s8283_s21 + $0x59] sm:$0x7f]  ;;  %v1316_v33 = vpack.c.bf16 %v1291_v47, %v8513_v61 }
  0x69   : > { %v514_v15 = vrot.slane %v512_v1, 7  ;;  %v1838_v45 = vpack.c.bf16 %v7120_v32, %v8521_v7  ;;  %v8639_v7 = vpack.c.bf16 %v636_v48, %v8592_v8  ;;  %v757_v32 = vld [vmem:[%s8283_s21 + $0x99] sm:$0x7f] }
  0x6a   : > { %810 = vrot.lane.b32.xlu1 %v774_v14, %s8124_s23  ;;  %v908_v14 = vld [vmem:[%s8283_s21 + $0x88] sm:$0x7f]  ;;  %v914_v48 = vld [vmem:[%s8283_s21 + $0xb8] sm:$0x7f] }
  0x6b   : > { %808 = vrot.lane.b32.xlu0 %v773_v16, %s8124_s23  ;;  %v1293_v16 = vld [vmem:[%s8283_s21 + $0x79] sm:$0x7f]  ;;  %v517_v21 = vor.u32 %v515_v3, %v514_v15  ;;  %v931_v23 = vpack.c.bf16 %v908_v14, %v8554_v36 }
  0x6d   : > { %v999_v52 = vshll.u32 %v931_v23, 16 }
  0x6e   : > { %1352 = vrot.lane.b32.xlu1 %v1315_v51, %s8127_s26  ;;  %v602_v51 = vld [vmem:[#allocation2 + $0x58] sm:$0xff] }
  0x6f   : > { %1350 = vrot.lane.b32.xlu0 %v1314_v30, %s8127_s26  ;;  %v7122_v30 = vld [vmem:[%s8283_s21 + $0x69] sm:$0x7f]  ;;  %v603_v37 = vsel %vm8374_vm3, %v524_v24, %v602_v51  ;;  %v427_v51 = vld [vmem:[%s8283_s21 + $0xc0] sm:$0xff] }
  0x70   : > { %604 = vst [vmem:[#allocation2 + $0x58] sm:$0xff] %v603_v37  ;;  %v1839_v44 = vpack.c.bf16 %v7122_v30, %v8513_v61  ;;  %v1478_v61 = vpack.c.bf16 %v7066_v42, %v8554_v36  ;;  %v445_v30 = vpack.c.bf16 %v428_v25, %v427_v51  ;;  %v1297_v42 = vld [vmem:[%s8283_s21 + $0x99] sm:$0x7f] }
  0x72   : > { %1870 = vrot.lane.b32.xlu1 %v1837_v35, %s8130_s13  ;;  %v996_v35 = vshrl.u32 %v931_v23, 16  ;;  %v1536_v36 = vshrl.u32 %v1478_v61, 16  ;;  %v1539_v9 = vshll.u32 %v1478_v61, 16  ;;  %v533_v37 = vshrl.u32 %v445_v30, 16  ;;  %v1295_v61 = vld [vmem:[%s8283_s21 + $0x89] sm:$0x7f] }
  0x73   : > { %1868 = vrot.lane.b32.xlu0 %v1836_v39, %s8130_s13  ;;  %v638_v39 = vld [vmem:[%s8283_s21 + $0xa8] sm:$0xff] }
  0x74   : > { %v8634_v27 = vpack.c.bf16 %v638_v39, %v8620_v38  ;;  %v998_v53 = vrot.slane %v996_v35, 7  ;;  %v1538_v5 = vrot.slane %v1536_v36, 7  ;;  %v1318_v36 = vpack.c.bf16 %v1295_v61, %v8583_v4 }
  0x76   : > { %693 = vrot.lane.b32.xlu1 %v8564_v40, %s8123_s22  ;;  %v1541_v6 = vor.u32 %v1539_v9, %v1538_v5  ;;  %v7124_v9 = vld [vmem:[%s8283_s21 + $0x79] sm:$0x7f] }
  0x77   : > { %691 = vrot.lane.b32.xlu0 %v8568_v11, %s8123_s22 }
  0x7a   : > { %1065 = vrot.lane.b32.xlu1 %v994_v54, %s8126_s25  ;;  %v1477_v54 = vpack.c.bf16 %v7064_v41, %v8534_v17  ;;  %v535_v41 = vrot.slane %v533_v37, 7 }
  0x7b   : > { %1063 = vrot.lane.b32.xlu0 %v987_v55, %s8126_s25 }
  0x7c   : > { %v1532_v10 = vshll.u32 %v1477_v54, 16 }
  0x7e   : > { %1227 = vrot.lane.b32.xlu1 %v8568_v11, %s8125_s24 }
  0x7f   : > { %1225 = vrot.lane.b32.xlu0 %v8487_v31, %s8125_s24 }
  0x82   : > { %1601 = vrot.lane.b32.xlu1 %v1527_v58, %s8128_s10  ;;  %v1001_v58 = vor.u32 %v999_v52, %v998_v53  ;;  %v912_v53 = vld [vmem:[%s8283_s21 + $0xa8] sm:$0x7f] }
  0x83   : > { %1599 = vrot.lane.b32.xlu0 %v1520_v59, %s8128_s10  ;;  %v1529_v59 = vshrl.u32 %v1477_v54, 16 }
  0x85   : > { %v1531_v1 = vrot.slane %v1529_v59, 7  ;;  %v933_v59 = vpack.c.bf16 %v912_v53, %v8620_v38 }
  0x86   : > { %1753 = vrot.lane.b32.xlu1 %v8487_v31, %s8129_s19  ;;  %v599_v31 = vld [vmem:[#allocation2 + $0x50] sm:$0xff] }
  0x87   : > { %1751 = vrot.lane.b32.xlu0 %v8490_v29, %s8129_s19  ;;  %v600_v28 = vsel %vm8374_vm3, %v517_v21, %v599_v31  ;;  %v1317_v29 = vpack.c.bf16 %v1293_v16, %v8587_v2  ;;  %v426_v21 = vld [vmem:[%s8283_s21 + $0xb8] sm:$0x7f]  ;;  %v8678_v31 = vld [vmem:[%s8283_s21 + $0xa1] sm:$0xff]  ;;  %v1013_v37 = vshll.u32 %v933_v59, 16 }
  0x88   : > { %601 = vst [vmem:[#allocation2 + $0x50] sm:$0xff] %v600_v28  ;;  %v759_v28 = vld [vmem:[%s8283_s21 + $0xa9] sm:$0x7f] }
  0x89   : > { %v778_v39 = vpack.c.bf16 %v759_v28, %v8678_v31 }
  0x8a   : > { %814 = vrot.lane.b32.xlu1 %v776_v19, %s8124_s23  ;;  %v1534_v19 = vor.u32 %v1532_v10, %v1531_v1 }
  0x8b   : > { %812 = vrot.lane.b32.xlu0 %v775_v20, %s8124_s23  ;;  %v425_v20 = vld [vmem:[%s8283_s21 + $0xb0] sm:$0xff] }
  0x8c   : > { %v444_v22 = vpack.c.bf16 %v426_v21, %v425_v20  ;;  %v7070_v20 = vld [vmem:[%s8283_s21 + $0xa8] sm:$0x7f] }
  0x8e   : > { %1356 = vrot.lane.b32.xlu1 %v1317_v29, %s8127_s26  ;;  %v526_v26 = vshrl.u32 %v444_v22, 16  ;;  %v8684_v29 = vld [vmem:[%s8283_s21 + $0x91] sm:$0xff]  ;;  %v529_v34 = vshll.u32 %v444_v22, 16 }
  0x8f   : > { %1354 = vrot.lane.b32.xlu0 %v1316_v33, %s8127_s26  ;;  %v7068_v22 = vld [vmem:[%s8283_s21 + $0x98] sm:$0x7f] }
  0x90   : > { %v680_v46 = vpop.permute.xlu1 %679  ;;  %v528_v33 = vrot.slane %v526_v26, 7 }
  0x91   : > { %724 = vst.msk [vmem:[#allocation2 + $0x10] sm:$0xff] %vm722_vm6, %v680_v46  ;;  %v678_v49 = vpop.permute.xlu0 %677  ;;  %v8697_v46 = vld [vmem:[%s8283_s21 + $0xb0] sm:$0xff] }
  0x92   : > { %723 = vst.msk [vmem:[#allocation2 + $0x8] sm:$0xff] %vm722_vm6, %v678_v49  ;;  %1874 = vrot.lane.b32.xlu1 %v1839_v44, %s8130_s13  ;;  %v531_v44 = vor.u32 %v529_v34, %v528_v33  ;;  %v536_v49 = vshll.u32 %v445_v30, 16 }
  0x93   : > { %1872 = vrot.lane.b32.xlu0 %v1838_v45, %s8130_s13  ;;  %v777_v45 = vpack.c.bf16 %v757_v32, %v8684_v29  ;;  %v1480_v32 = vpack.c.bf16 %v7070_v20, %v8620_v38 }
  0x94   : > { %v682_v55 = vpop.permute.xlu1 %681  ;;  %v606_v52 = vsel %vm8374_vm3, %v531_v44, %v605_v43 }
  0x95   : > { %725 = vst.msk [vmem:[#allocation2 + $0x18] sm:$0xff] %vm722_vm6, %v682_v55  ;;  %v799_v56 = vpop.permute.xlu0 %798  ;;  %v538_v55 = vor.u32 %v536_v49, %v535_v41  ;;  %607 = vst [vmem:[#allocation2 + $0x60] sm:$0xff] %v606_v52  ;;  %v1550_v49 = vshrl.u32 %v1480_v32, 16  ;;  %v1553_v53 = vshll.u32 %v1480_v32, 16  ;;  %v1299_v32 = vld [vmem:[%s8283_s21 + $0xa9] sm:$0x7f] }
  0x96   : > { %697 = vrot.lane.b32.xlu1 %v8634_v27, %s8123_s22 }
  0x97   : > { %695 = vrot.lane.b32.xlu0 %v8639_v7, %s8123_s22  ;;  %v1552_v61 = vrot.slane %v1550_v49, 7 }
  0x98   : > { %v1216_v60 = vpop.permute.xlu1 %1215 }
  0x99   : > { %v846_v12 = vld [vmem:[#allocation2 + $0x8] sm:$0xff]  ;;  %v1214_v62 = vpop.permute.xlu0 %1213 }
  0x9a   : > { %1069 = vrot.lane.b32.xlu1 %v1008_v57, %s8126_s25  ;;  %v847_v13 = vsel %vm8648_vm10, %v799_v56, %v846_v12  ;;  %v1319_v56 = vpack.c.bf16 %v1297_v42, %v8684_v29  ;;  %v934_v57 = vpack.c.bf16 %v914_v48, %v8697_v46 }
  0x9b   : > { %1067 = vrot.lane.b32.xlu0 %v1001_v58, %s8126_s25  ;;  %v7126_v58 = vld [vmem:[%s8283_s21 + $0x89] sm:$0x7f] }
  0x9c   : > { %v1054_v14 = vpop.permute.xlu1 %1053  ;;  %v852_v54 = vld [vmem:[#allocation2 + $0x18] sm:$0xff]  ;;  %v1020_v30 = vshll.u32 %v934_v57, 16 }
  0x9d   : > { %v1105_v15 = vsel %vm8654_vm11, %v1054_v14, %v847_v13  ;;  %v1052_v3 = vpop.permute.xlu0 %1051  ;;  %v1841_v14 = vpack.c.bf16 %v7126_v58, %v8583_v4 }
  0x9e   : > { %1106 = vst [vmem:[#allocation2 + $0x8] sm:$0xff] %v1105_v15  ;;  %v1102_v16 = vsel %vm8654_vm11, %v1052_v3, %v1101_v0  ;;  %1231 = vrot.lane.b32.xlu1 %v8639_v7, %s8125_s24  ;;  %v1017_v15 = vshrl.u32 %v934_v57, 16  ;;  %v1840_v3 = vpack.c.bf16 %v7124_v9, %v8587_v2  ;;  %v8786_v57 = vld [vmem:[%s8283_s21 + $0xd0] sm:$0xff]  ;;  %v8802_v9 = vld [vmem:[%s8283_s21 + $0xc1] sm:$0xff] }
  0x9f   : > { %1103 = vst [vmem:[#allocation2] sm:$0xff] %v1102_v16  ;;  %1229 = vrot.lane.b32.xlu0 %v8564_v40, %s8125_s24  ;;  %1263 = vst.msk [vmem:[#allocation2 + $0x8] sm:$0xff] %vm1261_vm12, %v1216_v60  ;;  %v8729_v16 = vld [vmem:[%s8283_s21 + $0xc0] sm:$0xff] }
  0xa0   : > { %v803_v47 = vpop.permute.xlu1 %802  ;;  %1262 = vst.msk [vmem:[#allocation2] sm:$0xff] %vm1261_vm12, %v1214_v62  ;;  %v849_v62 = vld [vmem:[#allocation2 + $0x10] sm:$0xff]  ;;  %v1019_v28 = vrot.slane %v1017_v15, 7 }
  0xa1   : > { %v801_v23 = vpop.permute.xlu0 %800  ;;  %v853_v12 = vsel %vm8648_vm10, %v803_v47, %v852_v54  ;;  %v640_v47 = vld [vmem:[%s8283_s21 + $0xb8] sm:$0xff] }
  0xa2   : > { %1605 = vrot.lane.b32.xlu1 %v1541_v6, %s8128_s10  ;;  %v850_v0 = vsel %vm8648_vm10, %v801_v23, %v849_v62  ;;  %v642_v6 = vld [vmem:[%s8283_s21 + $0xc8] sm:$0xff]  ;;  %v8756_v33 = vpack.c.bf16 %v640_v47, %v8697_v46  ;;  %v7965_v23 = vld [vmem:[%s11244_s3 + $0x50] sm:$0xff]  }
  0xa3   : > { %1603 = vrot.lane.b32.xlu0 %v1534_v19, %s8128_s10  ;;  %v1010_v19 = vshrl.u32 %v933_v59, 16  ;;  %v8751_v26 = vpack.c.bf16 %v642_v6, %v8729_v16 }
  0xa4   : > { %v8681_v24 = vpop.permute.xlu1 %1344 }
  0xa5   : > { %v8687_v35 = vpop.permute.xlu0 %1342  ;;  %v1012_v34 = vrot.slane %v1010_v19, 7 }
  0xa6   : > { %1757 = vrot.lane.b32.xlu1 %v8564_v40, %s8129_s19  ;;  %v608_v40 = vld [vmem:[#allocation2 + $0x68] sm:$0xff] }
  0xa7   : > { %1755 = vrot.lane.b32.xlu0 %v8568_v11, %s8129_s19  ;;  %v609_v60 = vsel %vm8374_vm3, %v538_v55, %v608_v40  ;;  %v1395_v4 = vld [vmem:[#allocation2 + $0x8] sm:$0xff]  ;;  %v1392_v2 = vld [vmem:[#allocation2] sm:$0xff]  ;;  %v1555_v55 = vor.u32 %v1553_v53, %v1552_v61 }
  0xa8   : > { %v686_v50 = vpop.permute.xlu1 %685  ;;  %610 = vst [vmem:[#allocation2 + $0x68] sm:$0xff] %v609_v60  ;;  %v1396_v42 = vsel %vm8737_vm15, %v8681_v24, %v1395_v4  ;;  %v1015_v24 = vor.u32 %v1013_v37, %v1012_v34 }
  0xa9   : > { %727 = vst.msk [vmem:[#allocation2 + $0x28] sm:$0xff] %vm722_vm6, %v686_v50  ;;  %v684_v11 = vpop.permute.xlu0 %683 }
  0xaa   : > { %726 = vst.msk [vmem:[#allocation2 + $0x20] sm:$0xff] %vm722_vm6, %v684_v11  ;;  %818 = vrot.lane.b32.xlu1 %v778_v39, %s8124_s23  ;;  %v1479_v39 = vpack.c.bf16 %v7068_v22, %v8592_v8  ;;  %v1022_v8 = vor.u32 %v1020_v30, %v1019_v28  ;;  %v611_v28 = vld [vmem:[#allocation2 + $0x70] sm:$0xff] }
  0xab   : > { %816 = vrot.lane.b32.xlu0 %v777_v45, %s8124_s23  ;;  %v1393_v45 = vsel %vm8737_vm15, %v8687_v35, %v1392_v2  ;;  %v1301_v2 = vld [vmem:[%s8283_s21 + $0xb9] sm:$0x7f] }
  0xac   : > { %v1058_v5 = vpop.permute.xlu1 %1057  ;;  %v1543_v35 = vshrl.u32 %v1479_v39, 16  ;;  %v1546_v52 = vshll.u32 %v1479_v39, 16  ;;  %v7130_v39 = vld [vmem:[%s8283_s21 + $0xa9] sm:$0x7f] }
  0xad   : > { %v1111_v1 = vsel %vm8654_vm11, %v1058_v5, %v853_v12  ;;  %v1056_v10 = vpop.permute.xlu0 %1055  ;;  %v1843_v61 = vpack.c.bf16 %v7130_v39, %v8678_v31  ;;  %v432_v39 = vld [vmem:[%s8283_s21 + $0xe8] sm:$0x7f] }
  0xae   : > { %1112 = vst [vmem:[#allocation2 + $0x18] sm:$0xff] %v1111_v1  ;;  %v1108_v13 = vsel %vm8654_vm11, %v1056_v10, %v850_v0  ;;  %1360 = vrot.lane.b32.xlu1 %v1319_v56, %s8127_s26  ;;  %v1545_v40 = vrot.slane %v1543_v35, 7  ;;  %v763_v0 = vld [vmem:[%s8283_s21 + $0xc9] sm:$0x7f] }
  0xaf   : > { %1109 = vst [vmem:[#allocation2 + $0x10] sm:$0xff] %v1108_v13  ;;  %1358 = vrot.lane.b32.xlu0 %v1318_v36, %s8127_s26  ;;  %v430_v36 = vld [vmem:[%s8283_s21 + $0xd8] sm:$0x7f]  ;;  %v916_v1 = vld [vmem:[%s8283_s21 + $0xc8] sm:$0x7f]  ;;  %v780_v47 = vpack.c.bf16 %v763_v0, %v8802_v9 }
  0xb0   : > { %v1220_v21 = vpop.permute.xlu1 %1219  ;;  %v1548_v56 = vor.u32 %v1546_v52, %v1545_v40  ;;  %v446_v59 = vpack.c.bf16 %v430_v36, %v8786_v57  ;;  %v8807_v13 = vld [vmem:[%s8283_s21 + $0xb1] sm:$0xff]  ;;  %v935_v22 = vpack.c.bf16 %v916_v1, %v8729_v16  ;;  %v7963_v12 = vld [vmem:[%s11244_s3 + $0x48] sm:$0xff]  }
  0xb1   : > { %1265 = vst.msk [vmem:[#allocation2 + $0x18] sm:$0xff] %vm1261_vm12, %v1220_v21  ;;  %v1218_v51 = vpop.permute.xlu0 %1217  ;;  %v1321_v37 = vpack.c.bf16 %v1301_v2, %v8807_v13  ;;  %v644_v36 = vld [vmem:[%s8283_s21 + $0xd8] sm:$0xff] }
  0xb2   : > { %1264 = vst.msk [vmem:[#allocation2 + $0x10] sm:$0xff] %vm1261_vm12, %v1218_v51  ;;  %1878 = vrot.lane.b32.xlu1 %v1841_v14, %s8130_s13  ;;  %v540_v5 = vshrl.u32 %v446_v59, 16  ;;  %v761_v14 = vld [vmem:[%s8283_s21 + $0xb9] sm:$0x7f]  ;;  %v1027_v52 = vshll.u32 %v935_v22, 16 }
  0xb3   : > { %1876 = vrot.lane.b32.xlu0 %v1840_v3, %s8130_s13  ;;  %v543_v3 = vshll.u32 %v446_v59, 16  ;;  %v779_v51 = vpack.c.bf16 %v761_v14, %v8807_v13  ;;  %v7074_v59 = vld [vmem:[%s8283_s21 + $0xc8] sm:$0x7f] }
  0xb4   : > { %v1594_v44 = vpop.permute.xlu1 %1593  ;;  %v542_v15 = vrot.slane %v540_v5, 7 }
  0xb5   : > { %v1642_v38 = vsel %vm8746_vm1, %v1594_v44, %v1396_v42  ;;  %v1592_v48 = vpop.permute.xlu0 %1591  ;;  %v1024_v42 = vshrl.u32 %v935_v22, 16  ;;  %v858_v44 = vld [vmem:[#allocation2 + $0x28] sm:$0xff] }
  0xb6   : > { %1643 = vst [vmem:[#allocation2 + $0x8] sm:$0xff] %v1642_v38  ;;  %v1639_v41 = vsel %vm8746_vm1, %v1592_v48, %v1393_v45  ;;  %701 = vrot.lane.b32.xlu1 %v8751_v26, %s8123_s22  ;;  %v545_v4 = vor.u32 %v543_v3, %v542_v15  ;;  %v1320_v45 = vpack.c.bf16 %v1299_v32, %v8678_v31  ;;  %v7072_v48 = vld [vmem:[%s8283_s21 + $0xb8] sm:$0x7f] }
  0xb7   : > { %1640 = vst [vmem:[#allocation2] sm:$0xff] %v1639_v41  ;;  %699 = vrot.lane.b32.xlu0 %v8756_v33, %s8123_s22  ;;  %v1026_v40 = vrot.slane %v1024_v42, 7 }
  0xb8   : > { %v1746_v43 = vpop.permute.xlu1 %1745  ;;  %v612_v34 = vsel %vm8374_vm3, %v545_v4, %v611_v28  ;;  %v1401_v0 = vld [vmem:[#allocation2 + $0x18] sm:$0xff] }
  0xb9   : > { %1790 = vst.msk [vmem:[#allocation2 + $0x8] sm:$0xff] %vm1788_vm5, %v1746_v43  ;;  %v1744_v50 = vpop.permute.xlu0 %1743  ;;  %613 = vst [vmem:[#allocation2 + $0x70] sm:$0xff] %v612_v34  ;;  %v1398_v15 = vld [vmem:[#allocation2 + $0x10] sm:$0xff] }
  0xba   : > { %1789 = vst.msk [vmem:[#allocation2] sm:$0xff] %vm1788_vm5, %v1744_v50  ;;  %1073 = vrot.lane.b32.xlu1 %v1022_v8, %s8126_s25  ;;  %v855_v8 = vld [vmem:[#allocation2 + $0x20] sm:$0xff] }
  0xbb   : > { %1071 = vrot.lane.b32.xlu0 %v1015_v24, %s8126_s25  ;;  %v7128_v24 = vld [vmem:[%s8283_s21 + $0x99] sm:$0x7f] }
  0xbc   : > { %v8777_v54 = vpop.permute.xlu1 %806 }
  0xbd   : > { %v8779_v11 = vpop.permute.xlu0 %804  ;;  %v859_v41 = vsel %vm8648_vm10, %v8777_v54, %v858_v44  ;;  %v1481_v54 = vpack.c.bf16 %v7072_v48, %v8697_v46  ;;  %v8860_v46 = vpack.c.bf16 %v644_v36, %v8786_v57  ;;  %v920_v44 = vld [vmem:[%s8283_s21 + $0xe8] sm:$0x7f] }
  0xbe   : > { %1235 = vrot.lane.b32.xlu1 %v8756_v33, %s8125_s24  ;;  %v856_v35 = vsel %vm8648_vm10, %v8779_v11, %v855_v8  ;;  %v1842_v11 = vpack.c.bf16 %v7128_v24, %v8684_v29 }
  0xbf   : > { %1233 = vrot.lane.b32.xlu0 %v8634_v27, %s8125_s24  ;;  %v1557_v5 = vshrl.u32 %v1481_v54, 16 }
  0xc0   : > { %v8789_v58 = vpop.permute.xlu1 %1348  ;;  %v1914_v62 = vld [vmem:[#allocation2 + $0x8] sm:$0xff] }
  0xc1   : > { %v8792_v60 = vpop.permute.xlu0 %1346  ;;  %v1911_v19 = vld [vmem:[#allocation2] sm:$0xff]  ;;  %v1402_v14 = vsel %vm8737_vm15, %v8789_v58, %v1401_v0  ;;  %v7132_v0 = vld [vmem:[%s8283_s21 + $0xb9] sm:$0x7f] }
  0xc2   : > { %1609 = vrot.lane.b32.xlu1 %v1555_v55, %s8128_s10 }
  0xc3   : > { %1607 = vrot.lane.b32.xlu0 %v1548_v56, %s8128_s10 }
  0xc4   : > { %v1867_v10 = vpop.permute.xlu1 %1866 }
  0xc5   : > { %v1915_v6 = vsel %vm8796_vm9, %v1867_v10, %v1914_v62  ;;  %v1865_v20 = vpop.permute.xlu0 %1864  ;;  %v1029_v62 = vor.u32 %v1027_v52, %v1026_v40  ;;  %v1482_v10 = vpack.c.bf16 %v7074_v59, %v8729_v16  ;;  %v1559_v16 = vrot.slane %v1557_v5, 7  ;;  %v7134_v59 = vld [vmem:[%s8283_s21 + $0xc9] sm:$0x7f] }
  0xc6   : > { %1916 = vst [vmem:[#allocation2 + $0x8] sm:$0xff] %v1915_v6  ;;  %v1912_v21 = vsel %vm8796_vm9, %v1865_v20, %v1911_v19  ;;  %1761 = vrot.lane.b32.xlu1 %v8634_v27, %s8129_s19  ;;  %v918_v27 = vld [vmem:[%s8283_s21 + $0xd8] sm:$0x7f] }
  0xc7   : > { %1913 = vst [vmem:[#allocation2] sm:$0xff] %v1912_v21  ;;  %1759 = vrot.lane.b32.xlu0 %v8639_v7, %s8129_s19  ;;  %7788 = vmatprep.mubr.msk.bf16.mxu0 %vm305_vm0, %v1912_v21  ;;  %v936_v38 = vpack.c.bf16 %v918_v27, %v8786_v57  ;;  %v1564_v22 = vshrl.u32 %v1482_v10, 16  ;;  %v1567_v28 = vshll.u32 %v1482_v10, 16  ;;  %v8887_v27 = vld [vmem:[%s8283_s21 + $0xd1] sm:$0xff] }
  0xc8   : > { %v690_v30 = vpop.permute.xlu1 %689  ;;  %7789 = vmatmul.mubr.msk.bf16.vlgmr.msra.gmra.mrb[0].mxu0 %vm305_vm0, %v1915_v6  ;;  %v1399_v6 = vsel %vm8737_vm15, %v8792_v60, %v1398_v15  ;;  %v1844_v15 = vpack.c.bf16 %v7132_v0, %v8807_v13 }
  0xc9   : > { %729 = vst.msk [vmem:[#allocation2 + $0x38] sm:$0xff] %vm722_vm6, %v690_v30  ;;  %v688_v7 = vpop.permute.xlu0 %687  ;;  %v1031_v55 = vshrl.u32 %v936_v38, 16  ;;  %v1034_v1 = vshll.u32 %v936_v38, 16  ;;  %v1566_v2 = vrot.slane %v1564_v22, 7 }
  0xca   : > { %728 = vst.msk [vmem:[#allocation2 + $0x30] sm:$0xff] %vm722_vm6, %v688_v7  ;;  %822 = vrot.lane.b32.xlu1 %v780_v47, %s8124_s23  ;;  %v1560_v47 = vshll.u32 %v1481_v54, 16  ;;  %v765_v7 = vld [vmem:[%s8283_s21 + $0xd9] sm:$0x7f] }
  0xcb   : > { %820 = vrot.lane.b32.xlu0 %v779_v51, %s8124_s23  ;;  %v1033_v29 = vrot.slane %v1031_v55, 7  ;;  %v1569_v34 = vor.u32 %v1567_v28, %v1566_v2 }
  0xcc   : > { %v1062_v49 = vpop.permute.xlu1 %1061  ;;  %v1562_v51 = vor.u32 %v1560_v47, %v1559_v16 }
  0xcd   : > { %v1117_v43 = vsel %vm8654_vm11, %v1062_v49, %v859_v41  ;;  %v1060_v50 = vpop.permute.xlu0 %1059  ;;  %v1036_v58 = vor.u32 %v1034_v1, %v1033_v29  ;;  %v781_v41 = vpack.c.bf16 %v765_v7, %v8887_v27  ;;  %v1305_v49 = vld [vmem:[%s8283_s21 + $0xd9] sm:$0x7f]  ;;  %v7078_v29 = vld [vmem:[%s8283_s21 + $0xe8] sm:$0x7f] }
  0xce   : > { %1118 = vst [vmem:[#allocation2 + $0x28] sm:$0xff] %v1117_v43  ;;  %v1114_v53 = vsel %vm8654_vm11, %v1060_v50, %v856_v35  ;;  %1364 = vrot.lane.b32.xlu1 %v1321_v37, %s8127_s26  ;;  %v1177_v37 = vld [vmem:[%s8283_s21 + $0xe0] sm:$0xff]  ;;  %v7076_v35 = vld [vmem:[%s8283_s21 + $0xd8] sm:$0x7f]  ;;  %v1303_v50 = vld [vmem:[%s8283_s21 + $0xc9] sm:$0x7f] }
  0xcf   : > { %1115 = vst [vmem:[#allocation2 + $0x20] sm:$0xff] %v1114_v53  ;;  %1362 = vrot.lane.b32.xlu0 %v1320_v45, %s8127_s26  ;;  %v447_v45 = vpack.c.bf16 %v432_v39, %v1177_v37  ;;  %v937_v24 = vpack.c.bf16 %v920_v44, %v1177_v37  ;;  %v1483_v55 = vpack.c.bf16 %v7076_v35, %v8786_v57  ;;  %v7079_v39 = vld [vmem:[%s8283_s21 + $0xf0] sm:$0xff]  ;;  %v7080_v44 = vld [vmem:[%s8283_s21 + $0xf8] sm:$0x7f] }
  0xd0   : > { %v1224_v56 = vpop.permute.xlu1 %1223  ;;  %v1322_v36 = vpack.c.bf16 %v1303_v50, %v8802_v9  ;;  %v1306_v50 = vld [vmem:[%s8283_s21 + $0xe1] sm:$0xff] }
  0xd1   : > { %1267 = vst.msk [vmem:[#allocation2 + $0x28] sm:$0xff] %vm1261_vm12, %v1224_v56  ;;  %v1222_v31 = vpop.permute.xlu0 %1221  ;;  %v547_v8 = vshrl.u32 %v447_v45, 16  ;;  %v550_v53 = vshll.u32 %v447_v45, 16  ;;  %v1571_v10 = vshrl.u32 %v1483_v55, 16  ;;  %v1041_v18 = vshll.u32 %v937_v24, 16 }
  0xd2   : > { %1266 = vst.msk [vmem:[#allocation2 + $0x20] sm:$0xff] %vm1261_vm12, %v1222_v31  ;;  %1882 = vrot.lane.b32.xlu1 %v1843_v61, %s8130_s13  ;;  %v1038_v31 = vshrl.u32 %v937_v24, 16 }
  0xd3   : > { %1880 = vrot.lane.b32.xlu0 %v1842_v11, %s8130_s13  ;;  %v549_v61 = vrot.slane %v547_v8, 7  ;;  %v1323_v11 = vpack.c.bf16 %v1305_v49, %v8887_v27 }
  0xd4   : > { %v1598_v3 = vpop.permute.xlu1 %1597 }
  0xd5   : > { %v1648_v19 = vsel %vm8746_vm1, %v1598_v3, %v1402_v14  ;;  %v1596_v20 = vpop.permute.xlu0 %1595  ;;  %v552_v56 = vor.u32 %v550_v53, %v549_v61  ;;  %v864_v14 = vld [vmem:[#allocation2 + $0x38] sm:$0xff]  ;;  %v1178_v3 = vld [vmem:[%s8283_s21 + $0xe8] sm:$0xff] }
  0xd6   : > { %1649 = vst [vmem:[#allocation2 + $0x18] sm:$0xff] %v1648_v19  ;;  %v1645_v21 = vsel %vm8746_vm1, %v1596_v20, %v1399_v6  ;;  %1075 = vrot.lane.b32.xlu1 %v1029_v62, %s8126_s25  ;;  %v614_v62 = vld [vmem:[#allocation2 + $0x78] sm:$0xff]  ;;  %v1040_v6 = vrot.slane %v1038_v31, 7  ;;  %v1484_v19 = vpack.c.bf16 %v7078_v29, %v1177_v37  ;;  %v1195_v22 = vpack.c.bf16 %v1178_v3, %v1177_v37  ;;  %v1307_v61 = vld [vmem:[%s8283_s21 + $0xe9] sm:$0x7f] }
  0xd7   : > { %1646 = vst [vmem:[#allocation2 + $0x10] sm:$0xff] %v1645_v21  ;;  %703 = vrot.lane.b32.xlu0 %v8860_v46, %s8123_s22  ;;  %v615_v57 = vsel %vm8374_vm3, %v552_v56, %v614_v62  ;;  %v861_v21 = vld [vmem:[#allocation2 + $0x30] sm:$0xff]  ;;  %v922_v53 = vld [vmem:[%s8283_s21 + $0xf8] sm:$0x7f]  ;;  %v767_v56 = vld [vmem:[%s8283_s21 + $0xe9] sm:$0x7f] }
  0xd8   : > { %v1750_v60 = vpop.permute.xlu1 %1749  ;;  %616 = vst [vmem:[#allocation2 + $0x78] sm:$0xff] %v615_v57  ;;  %v1578_v2 = vshrl.u32 %v1484_v19, 16  ;;  %v1581_v37 = vshll.u32 %v1484_v19, 16  ;;  %v7138_v29 = vld [vmem:[%s8283_s21 + $0xe9] sm:$0x7f]  ;;  %vm9190_vm3 = vmand %vm326_vm4, %vm570_vm2 }
  0xd9   : > { %1792 = vst.msk [vmem:[#allocation2 + $0x18] sm:$0xff] %vm1788_vm5, %v1750_v60  ;;  %v1748_v4 = vpop.permute.xlu0 %1747  ;;  %v1573_v60 = vrot.slane %v1571_v10, 7  ;;  %v1847_v10 = vpack.c.bf16 %v7138_v29, %v1306_v50 }
  0xda   : > { %1791 = vst.msk [vmem:[#allocation2 + $0x10] sm:$0xff] %vm1788_vm5, %v1748_v4  ;;  %1237 = vrot.lane.b32.xlu1 %v8751_v26, %s8125_s24  ;;  %v1574_v4 = vshll.u32 %v1483_v55, 16  ;;  %v1580_v7 = vrot.slane %v1578_v2, 7 }
  0xdb   : > { %1077 = vrot.lane.b32.xlu0 %v1036_v58, %s8126_s25 }
  0xdc   : > { %v8881_v30 = vpop.permute.xlu1 %810 }
  0xdd   : > { %v8883_v32 = vpop.permute.xlu0 %808  ;;  %v865_v20 = vsel %vm8648_vm10, %v8881_v30, %v864_v14 }
  0xde   : > { %1611 = vrot.lane.b32.xlu1 %v1562_v51, %s8128_s10  ;;  %v1043_v51 = vor.u32 %v1041_v18, %v1040_v6 }
  0xdf   : > { %1239 = vrot.lane.b32.xlu0 %v8860_v46, %s8125_s24 }
  0xe0   : > { %v8894_v42 = vpop.permute.xlu1 %1352  ;;  %v1920_v48 = vld [vmem:[#allocation2 + $0x18] sm:$0xff] }
  0xe1   : > { %v8897_v38 = vpop.permute.xlu0 %1350 }
  0xe2   : > { %1763 = vrot.lane.b32.xlu1 %v8756_v33, %s8129_s19  ;;  %v1917_v33 = vld [vmem:[#allocation2 + $0x10] sm:$0xff] }
  0xe3   : > { %1613 = vrot.lane.b32.xlu0 %v1569_v34, %s8128_s10  ;;  %v1407_v34 = vld [vmem:[#allocation2 + $0x28] sm:$0xff] }
  0xe4   : > { %v1871_v43 = vpop.permute.xlu1 %1870  ;;  %v1408_v45 = vsel %vm8737_vm15, %v8894_v42, %v1407_v34  ;;  %v1583_v42 = vor.u32 %v1581_v37, %v1580_v7 }
  0xe5   : > { %v1921_v40 = vsel %vm8796_vm9, %v1871_v43, %v1920_v48  ;;  %v1869_v52 = vpop.permute.xlu0 %1868  ;;  %v1404_v48 = vld [vmem:[#allocation2 + $0x20] sm:$0xff]  ;;  %v1485_v43 = vpack.c.bf16 %v7080_v44, %v7079_v39 }
  0xe6   : > { %1922 = vst [vmem:[#allocation2 + $0x18] sm:$0xff] %v1921_v40  ;;  %v1918_v54 = vsel %vm8796_vm9, %v1869_v52, %v1917_v33  ;;  %824 = vrot.lane.b32.xlu1 %v781_v41, %s8124_s23  ;;  %v1405_v8 = vsel %vm8737_vm15, %v8897_v38, %v1404_v48  ;;  %v1324_v52 = vpack.c.bf16 %v1307_v61, %v1306_v50 }
  0xe7   : > { %1919 = vst [vmem:[#allocation2 + $0x10] sm:$0xff] %v1918_v54  ;;  %1765 = vrot.lane.b32.xlu0 %v8751_v26, %s8129_s19  ;;  %7792 = vmatprep.mubr.msk.bf16.mxu0 %vm305_vm0, %v1918_v54  ;;  %v1845_v26 = vpack.c.bf16 %v7134_v59, %v8802_v9  ;;  %v862_v9 = vsel %vm8648_vm10, %v8883_v32, %v861_v21  ;;  %v1585_v33 = vshrl.u32 %v1485_v43, 16  ;;  %v7136_v54 = vld [vmem:[%s8283_s21 + $0xd9] sm:$0x7f]  ;;  %v1588_v62 = vshll.u32 %v1485_v43, 16 }
  0xe8   : > { %v694_v5 = vpop.permute.xlu1 %693  ;;  %7793 = vmatmul.mubr.msk.bf16.gmra.mrb[4].mxu0 %vm305_vm0, %v1921_v40  ;;  %v1576_v32 = vor.u32 %v1574_v4, %v1573_v60  ;;  %v1846_v59 = vpack.c.bf16 %v7136_v54, %v8887_v27 }
  0xe9   : > { %731 = vst.msk [vmem:[#allocation2 + $0x48] sm:$0xff] %vm722_vm6, %v694_v5  ;;  %v692_v1 = vpop.permute.xlu0 %691  ;;  %v1587_v31 = vrot.slane %v1585_v33, 7 }
  0xea   : > { %730 = vst.msk [vmem:[#allocation2 + $0x40] sm:$0xff] %vm722_vm6, %v692_v1  ;;  %1368 = vrot.lane.b32.xlu1 %v1323_v11, %s8127_s26  ;;  %v938_v11 = vpack.c.bf16 %v922_v53, %v7079_v39 }
  0xeb   : > { %1366 = vrot.lane.b32.xlu0 %v1322_v36, %s8127_s26 }
  0xec   : > { %v1066_v16 = vpop.permute.xlu1 %1065  ;;  %v1045_v5 = vshrl.u32 %v938_v11, 16  ;;  %v1048_v27 = vshll.u32 %v938_v11, 16 }
  0xed   : > { %v1123_v47 = vsel %vm8654_vm11, %v1066_v16, %v865_v20  ;;  %v1064_v58 = vpop.permute.xlu0 %1063 }
  0xee   : > { %1124 = vst [vmem:[#allocation2 + $0x38] sm:$0xff] %v1123_v47  ;;  %v1120_v13 = vsel %vm8654_vm11, %v1064_v58, %v862_v9  ;;  %1886 = vrot.lane.b32.xlu1 %v1845_v26, %s8130_s13  ;;  %v1590_v26 = vor.u32 %v1588_v62, %v1587_v31  ;;  %v1047_v14 = vrot.slane %v1045_v5, 7  ;;  %v7139_v9 = vld [vmem:[%s8283_s21 + $0xf1] sm:$0xff]  ;;  %v7140_v47 = vld [vmem:[%s8283_s21 + $0xf9] sm:$0x7f] }
  0xef   : > { %1121 = vst [vmem:[#allocation2 + $0x30] sm:$0xff] %v1120_v13  ;;  %1884 = vrot.lane.b32.xlu0 %v1844_v15, %s8130_s13  ;;  %v7110_v15 = vld [vmem:[%s8283_s21 + $0xf8] sm:$0xff] }
  0xf0   : > { %v1228_v28 = vpop.permute.xlu1 %1227  ;;  %v1727_v21 = vpack.c.bf16 %v7110_v15, %v7079_v39  ;;  %v1050_v16 = vor.u32 %v1048_v27, %v1047_v14  ;;  %v870_v60 = vld [vmem:[#allocation2 + $0x48] sm:$0xff] }
  0xf1   : > { %1269 = vst.msk [vmem:[#allocation2 + $0x38] sm:$0xff] %vm1261_vm12, %v1228_v28  ;;  %v1226_v30 = vpop.permute.xlu0 %1225  ;;  %v1309_v28 = vld [vmem:[%s8283_s21 + $0xf9] sm:$0x7f] }
  0xf2   : > { %1268 = vst.msk [vmem:[#allocation2 + $0x30] sm:$0xff] %vm1261_vm12, %v1226_v30  ;;  %1241 = vrot.lane.b32.xlu1 %v1195_v22, %s8125_s24  ;;  %v1325_v37 = vpack.c.bf16 %v1309_v28, %v7139_v9 }
  0xf3   : > { %1079 = vrot.lane.b32.xlu0 %v1043_v51, %s8126_s25  ;;  %v867_v51 = vld [vmem:[#allocation2 + $0x40] sm:$0xff] }
  0xf4   : > { %v1602_v41 = vpop.permute.xlu1 %1601 }
  0xf5   : > { %v1654_v49 = vsel %vm8746_vm1, %v1602_v41, %v1408_v45  ;;  %v1600_v24 = vpop.permute.xlu0 %1599 }
  0xf6   : > { %1655 = vst [vmem:[#allocation2 + $0x28] sm:$0xff] %v1654_v49  ;;  %v1651_v35 = vsel %vm8746_vm1, %v1600_v24, %v1405_v8  ;;  %1615 = vrot.lane.b32.xlu1 %v1576_v32, %s8128_s10 }
  0xf7   : > { %1652 = vst [vmem:[#allocation2 + $0x20] sm:$0xff] %v1651_v35  ;;  %705 = vrot.lane.b32.xlu0 %v1195_v22, %s8123_s22  ;;  %s8132_s22 = smov [#allocation5]  }
  0xf8   : > { %v1754_v38 = vpop.permute.xlu1 %1753  ;;  %v1413_v45 = vld [vmem:[#allocation2 + $0x38] sm:$0xff] }
  0xf9   : > { %1794 = vst.msk [vmem:[#allocation2 + $0x28] sm:$0xff] %vm1788_vm5, %v1754_v38  ;;  %v1752_v40 = vpop.permute.xlu0 %1751  ;;  %v1410_v41 = vld [vmem:[#allocation2 + $0x30] sm:$0xff] }
  0xfa   : > { %1793 = vst.msk [vmem:[#allocation2 + $0x20] sm:$0xff] %vm1788_vm5, %v1752_v40  ;;  %1767 = vrot.lane.b32.xlu1 %v8860_v46, %s8129_s19  ;;  %v782_v46 = vpack.c.bf16 %v767_v56, %v1306_v50 }
  0xfb   : > { %1617 = vrot.lane.b32.xlu0 %v1583_v42, %s8128_s10 }
  0xfc   : > { %v815_v55 = vpop.permute.xlu1 %814 }
  0xfd   : > { %v813_v36 = vpop.permute.xlu0 %812  ;;  %v871_v4 = vsel %vm8648_vm10, %v815_v55, %v870_v60 }
  0xfe   : > { %1370 = vrot.lane.b32.xlu1 %v1324_v52, %s8127_s26  ;;  %v868_v30 = vsel %vm8648_vm10, %v813_v36, %v867_v51 }
  0xff   : > { %1769 = vrot.lane.b32.xlu0 %v1195_v22, %s8129_s19  ;;  %v1848_v22 = vpack.c.bf16 %v7140_v47, %v7139_v9 }
 0x100   : > { %v1357_v0 = vpop.permute.xlu1 %1356  ;;  %v1926_v1 = vld [vmem:[#allocation2 + $0x28] sm:$0xff] }
 0x101   : > { %v1355_v57 = vpop.permute.xlu0 %1354  ;;  %v1923_v19 = vld [vmem:[#allocation2 + $0x20] sm:$0xff]  ;;  %v1414_v48 = vsel %vm8737_vm15, %v1357_v0, %v1413_v45 }
 0x102   : > { %1888 = vrot.lane.b32.xlu1 %v1846_v59, %s8130_s13  ;;  %v1411_v49 = vsel %vm8737_vm15, %v1355_v57, %v1410_v41 }
 0x103   : > { %826 = vrot.lane.b32.xlu0 %v782_v46, %s8124_s23 }
 0x104   : > { %v1875_v3 = vpop.permute.xlu1 %1874 }
 0x105   : > { %v1927_v6 = vsel %vm8796_vm9, %v1875_v3, %v1926_v1  ;;  %v1873_v18 = vpop.permute.xlu0 %1872 }
 0x106   : > { %1928 = vst [vmem:[#allocation2 + $0x28] sm:$0xff] %v1927_v6  ;;  %v1924_v20 = vsel %vm8796_vm9, %v1873_v18, %v1923_v19  ;;  %1619 = vrot.lane.b32.xlu1 %v1590_v26, %s8128_s10 }
 0x107   : > { %1925 = vst [vmem:[#allocation2 + $0x20] sm:$0xff] %v1924_v20  ;;  %1890 = vrot.lane.b32.xlu0 %v1847_v10, %s8130_s13  ;;  %7796 = vmatprep.mubr.msk.bf16.mxu0 %vm305_vm0, %v1924_v20 }
 0x108   : > { %v698_v58 = vpop.permute.xlu1 %697  ;;  %7797 = vmatmul.mubr.msk.bf16.gmra.mrb[8].mxu0 %vm305_vm0, %v1927_v6 }
 0x109   : > { %733 = vst.msk [vmem:[#allocation2 + $0x58] sm:$0xff] %vm722_vm6, %v698_v58  ;;  %v696_v13 = vpop.permute.xlu0 %695 }
 0x10a   : > { %732 = vst.msk [vmem:[#allocation2 + $0x50] sm:$0xff] %vm722_vm6, %v696_v13  ;;  %1771 = vrot.lane.b32.xlu1 %v1727_v21, %s8129_s19 }
 0x10b   : > { %1081 = vrot.lane.b32.xlu0 %v1050_v16, %s8126_s25  ;;  %s296_s25 = sand.u32 1, %s8112_s28  }
 0x10c   : > { %v1070_v2 = vpop.permute.xlu1 %1069  ;;  %s11199_s9 = scalar_lea.sflag [#allocation6], %s296_s25 }
 0x10d   : > { %v1129_v32 = vsel %vm8654_vm11, %v1070_v2, %v871_v4  ;;  %v1068_v34 = vpop.permute.xlu0 %1067 }
 0x10e   : > { %1130 = vst [vmem:[#allocation2 + $0x48] sm:$0xff] %v1129_v32  ;;  %v1126_v7 = vsel %vm8654_vm11, %v1068_v34, %v868_v30  ;;  %1892 = vrot.lane.b32.xlu1 %v1848_v22, %s8130_s13  ;;  %s11190_s13 = scalar_lea.hbm %s11249_s8, %s7274_s17 }
 0x10f   : > { %1127 = vst [vmem:[#allocation2 + $0x40] sm:$0xff] %v1126_v7  ;;  %1243 = vrot.lane.b32.xlu0 %v1727_v21, %s8125_s24 }
 0x110   : > { %v1232_v39 = vpop.permute.xlu1 %1231  ;;  %v876_v31 = vld [vmem:[#allocation2 + $0x58] sm:$0xff] }
 0x111   : > { %1271 = vst.msk [vmem:[#allocation2 + $0x48] sm:$0xff] %vm1261_vm12, %v1232_v39  ;;  %v1230_v44 = vpop.permute.xlu0 %1229  ;;  %v873_v46 = vld [vmem:[#allocation2 + $0x50] sm:$0xff] }
 0x112   : > { %1270 = vst.msk [vmem:[#allocation2 + $0x40] sm:$0xff] %vm1261_vm12, %v1230_v44 }
 0x113   : > { %1372 = vrot.lane.b32.xlu0 %v1325_v37, %s8127_s26  ;;  %s7048_s26 = sshll.u32 %s296_s25, 8 }
 0x114   : > { %v1606_v8 = vpop.permute.xlu1 %1605  ;;  %s11092_s10 = scalar_lea.vmem [#allocation5], %s7048_s26 }
 0x115   : > { %v1660_v24 = vsel %vm8746_vm1, %v1606_v8, %v1414_v48  ;;  %v1604_v35 = vpop.permute.xlu0 %1603  ;;  %s6982_s18 = sshll.u32 %s11092_s10, 4  ;;  %s11193_s18 = int_to_ptr.vmem [resolvable:$true] %s6982_s18 }
 0x116   : > { %1661 = vst [vmem:[#allocation2 + $0x38] sm:$0xff] %v1660_v24  ;;  %v1657_v43 = vsel %vm8746_vm1, %v1604_v35, %v1411_v49  ;;  %s8058_s21 = scalar_lea.vmem %s11193_s18, 4096 }
 0x117   : > { %1658 = vst [vmem:[#allocation2 + $0x30] sm:$0xff] %v1657_v43  ;;  %p8059_p11 = scmp.ne.s32.totalorder %s11193_s18, %s8058_s21 }
 0x118   : > { %v1758_v42 = vpop.permute.xlu1 %1757  ;;  %v1419_v14 = vld [vmem:[#allocation2 + $0x48] sm:$0xff] }
 0x119   : > { %1796 = vst.msk [vmem:[#allocation2 + $0x38] sm:$0xff] %vm1788_vm5, %v1758_v42  ;;  %v1756_v50 = vpop.permute.xlu0 %1755  ;;  %v1416_v15 = vld [vmem:[#allocation2 + $0x40] sm:$0xff]  ;;  %p8060_p12 = pnand %p8059_p11, %p8217_p5 }
 0x11a   : > { %1795 = vst.msk [vmem:[#allocation2 + $0x30] sm:$0xff] %vm1788_vm5, %v1756_v50 }
 0x11b   : > { %p8061_p13 = pneg %p8060_p12 }
 0x11c   : > { %v819_v61 = vpop.permute.xlu1 %818 }
 0x11d   : > { %v817_v38 = vpop.permute.xlu0 %816  ;;  %v877_v62 = vsel %vm8648_vm10, %v819_v61, %v876_v31 }
 0x11e   : > { %v874_v0 = vsel %vm8648_vm10, %v817_v38, %v873_v46 }
 0x120   : > { %v1361_v53 = vpop.permute.xlu1 %1360  ;;  %v1932_v52 = vld [vmem:[#allocation2 + $0x38] sm:$0xff] }
 0x121   : > { %v1359_v40 = vpop.permute.xlu0 %1358  ;;  %v1929_v55 = vld [vmem:[#allocation2 + $0x30] sm:$0xff]  ;;  %v1420_v27 = vsel %vm8737_vm15, %v1361_v53, %v1419_v14 }
 0x122   : > { %v1417_v6 = vsel %vm8737_vm15, %v1359_v40, %v1416_v15 }
 0x124   : > { %v1879_v33 = vpop.permute.xlu1 %1878 }
 0x125   : > { %v1933_v54 = vsel %vm8796_vm9, %v1879_v33, %v1932_v52  ;;  %v1877_v11 = vpop.permute.xlu0 %1876 }
 0x126   : > { %1934 = vst [vmem:[#allocation2 + $0x38] sm:$0xff] %v1933_v54  ;;  %v1930_v56 = vsel %vm8796_vm9, %v1877_v11, %v1929_v55 }
 0x127   : > { %1931 = vst [vmem:[#allocation2 + $0x30] sm:$0xff] %v1930_v56  ;;  %7800 = vmatprep.mubr.msk.bf16.mxu0 %vm305_vm0, %v1930_v56 }
 0x128   : > { %v702_v36 = vpop.permute.xlu1 %701  ;;  %7801 = vmatmul.mubr.msk.bf16.gmra.mrb[12].mxu0 %vm305_vm0, %v1933_v54 }
 0x129   : > { %735 = vst.msk [vmem:[#allocation2 + $0x68] sm:$0xff] %vm722_vm6, %v702_v36  ;;  %v700_v59 = vpop.permute.xlu0 %699 }
 0x12a   : > { %734 = vst.msk [vmem:[#allocation2 + $0x60] sm:$0xff] %vm722_vm6, %v700_v59 }
 0x12c   : > { %v1074_v5 = vpop.permute.xlu1 %1073 }
 0x12d   : > { %v1135_v29 = vsel %vm8654_vm11, %v1074_v5, %v877_v62  ;;  %v1072_v57 = vpop.permute.xlu0 %1071 }
 0x12e   : > { %1136 = vst [vmem:[#allocation2 + $0x58] sm:$0xff] %v1135_v29  ;;  %v1132_v1 = vsel %vm8654_vm11, %v1072_v57, %v874_v0 }
 0x12f   : > { %1133 = vst [vmem:[#allocation2 + $0x50] sm:$0xff] %v1132_v1 }
 0x130   : > { %v1236_v26 = vpop.permute.xlu1 %1235  ;;  %v882_v39 = vld [vmem:[#allocation2 + $0x68] sm:$0xff] }
 0x131   : > { %1273 = vst.msk [vmem:[#allocation2 + $0x58] sm:$0xff] %vm1261_vm12, %v1236_v26  ;;  %v1234_v10 = vpop.permute.xlu0 %1233  ;;  %v879_v30 = vld [vmem:[#allocation2 + $0x60] sm:$0xff] }
 0x132   : > { %1272 = vst.msk [vmem:[#allocation2 + $0x50] sm:$0xff] %vm1261_vm12, %v1234_v10 }
 0x134   : > { %v1610_v3 = vpop.permute.xlu1 %1609 }
 0x135   : > { %v1666_v18 = vsel %vm8746_vm1, %v1610_v3, %v1420_v27  ;;  %v1608_v19 = vpop.permute.xlu0 %1607 }
 0x136   : > { %1667 = vst [vmem:[#allocation2 + $0x48] sm:$0xff] %v1666_v18  ;;  %v1663_v20 = vsel %vm8746_vm1, %v1608_v19, %v1417_v6 }
 0x137   : > { %1664 = vst [vmem:[#allocation2 + $0x40] sm:$0xff] %v1663_v20 }
 0x138   : > { %v1762_v21 = vpop.permute.xlu1 %1761  ;;  %v1425_v42 = vld [vmem:[#allocation2 + $0x58] sm:$0xff] }
 0x139   : > { %1798 = vst.msk [vmem:[#allocation2 + $0x48] sm:$0xff] %vm1788_vm5, %v1762_v21  ;;  %v1760_v16 = vpop.permute.xlu0 %1759  ;;  %v1422_v8 = vld [vmem:[#allocation2 + $0x50] sm:$0xff] }
 0x13a   : > { %1797 = vst.msk [vmem:[#allocation2 + $0x40] sm:$0xff] %vm1788_vm5, %v1760_v16 }
 0x13c   : > { %v823_v9 = vpop.permute.xlu1 %822 }
 0x13d   : > { %v821_v47 = vpop.permute.xlu0 %820  ;;  %v883_v45 = vsel %vm8648_vm10, %v823_v9, %v882_v39 }
 0x13e   : > { %v880_v32 = vsel %vm8648_vm10, %v821_v47, %v879_v30 }
 0x140   : > { %v1365_v58 = vpop.permute.xlu1 %1364  ;;  %v1938_v22 = vld [vmem:[#allocation2 + $0x48] sm:$0xff] }
 0x141   : > { %v1363_v13 = vpop.permute.xlu0 %1362  ;;  %v1935_v2 = vld [vmem:[#allocation2 + $0x40] sm:$0xff]  ;;  %v1426_v61 = vsel %vm8737_vm15, %v1365_v58, %v1425_v42 }
 0x142   : > { %v1423_v49 = vsel %vm8737_vm15, %v1363_v13, %v1422_v8  ;;  %v7964_v8 = vld [vmem:[%s11244_s3 + $0x8] sm:$0xff]   ;;  %v9144_v42 = vld [vmem:[%s11243_s2] ss:$0 sm:$0xff] }
 0x144   : > { %v1883_v60 = vpop.permute.xlu1 %1882 }
 0x145   : > { %v1939_v4 = vsel %vm8796_vm9, %v1883_v60, %v1938_v22  ;;  %v1881_v51 = vpop.permute.xlu0 %1880 }
 0x146   : > { %1940 = vst [vmem:[#allocation2 + $0x48] sm:$0xff] %v1939_v4  ;;  %v1936_v28 = vsel %vm8796_vm9, %v1881_v51, %v1935_v2 }
 0x147   : > { %1937 = vst [vmem:[#allocation2 + $0x40] sm:$0xff] %v1936_v28  ;;  %7804 = vmatprep.mubr.msk.bf16.mxu1 %vm305_vm0, %v1936_v28 }
 0x148   : > { %v1076_v34 = vpop.permute.xlu1 %1075  ;;  %7805 = vmatmul.mubr.msk.bf16.vlgmr.msra.gmra.mrb[0].mxu1 %vm305_vm0, %v1939_v4 }
 0x149   : > { %v1138_v7 = vsel %vm8654_vm11, %v1076_v34, %v880_v32  ;;  %v704_v37 = vpop.permute.xlu0 %703 }
 0x14a   : > { %1139 = vst [vmem:[#allocation2 + $0x60] sm:$0xff] %v1138_v7  ;;  %736 = vst.msk [vmem:[#allocation2 + $0x70] sm:$0xff] %vm722_vm6, %v704_v37 }
 0x14c   : > { %v1238_v44 = vpop.permute.xlu1 %1237 }
 0x14d   : > { %1274 = vst.msk [vmem:[#allocation2 + $0x60] sm:$0xff] %vm1261_vm12, %v1238_v44  ;;  %v1078_v48 = vpop.permute.xlu0 %1077 }
 0x14e   : > { %v1141_v41 = vsel %vm8654_vm11, %v1078_v48, %v883_v45  ;;  %v7961_v45 = vld [vmem:[%s11244_s3 + $0x40] sm:$0xff]  }
 0x14f   : > { %1142 = vst [vmem:[#allocation2 + $0x68] sm:$0xff] %v1141_v41  ;;  %7294 = vmatprep.subr.bf16.mxu1 %v7961_v45 }
 0x150   : > { %v1612_v24 = vpop.permute.xlu1 %1611  ;;  %7295 = vmatpush3.bf16.msra.mxu1 %v7962_v63 }
 0x151   : > { %v1669_v35 = vsel %vm8746_vm1, %v1612_v24, %v1423_v49  ;;  %v1240_v43 = vpop.permute.xlu0 %1239  ;;  %v885_v62 = vld [vmem:[#allocation2 + $0x70] sm:$0xff]  ;;  %7296 = vmatprep.subr.bf16.mxu1 %v7963_v12  ;;  %v7967_v24 = vld [vmem:[%s11244_s3 + $0x58] sm:$0xff]  }
 0x152   : > { %1670 = vst [vmem:[#allocation2 + $0x50] sm:$0xff] %v1669_v35  ;;  %1275 = vst.msk [vmem:[#allocation2 + $0x68] sm:$0xff] %vm1261_vm12, %v1240_v43  ;;  %v7966_v49 = vld [vmem:[%s11244_s3 + $0x10] sm:$0xff]   ;;  %v7968_v35 = vld [vmem:[%s11244_s3 + $0x18] sm:$0xff]  }
 0x153   : > { %v7969_v43 = vld [vmem:[%s11244_s3 + $0x60] sm:$0xff]  }
 0x154   : > { %v1764_v50 = vpop.permute.xlu1 %1763  ;;  %v1428_v57 = vld [vmem:[#allocation2 + $0x60] sm:$0xff]  ;;  %7297 = vmatpush3.bf16.msra.mxu1 %v7964_v8 }
 0x155   : > { %1799 = vst.msk [vmem:[#allocation2 + $0x50] sm:$0xff] %vm1788_vm5, %v1764_v50  ;;  %v1614_v38 = vpop.permute.xlu0 %1613  ;;  %7298 = vmatprep.subr.bf16.mxu1 %v7965_v23  ;;  %v7970_v50 = vld [vmem:[%s11244_s3 + $0x20] sm:$0xff]  }
 0x156   : > { %v1672_v53 = vsel %vm8746_vm1, %v1614_v38, %v1426_v61 }
 0x157   : > { %1673 = vst [vmem:[#allocation2 + $0x58] sm:$0xff] %v1672_v53 }
 0x158   : > { %v825_v40 = vpop.permute.xlu1 %824  ;;  %7299 = vmatpush3.bf16.msra.mxu1 %v7966_v49 }
 0x159   : > { %v1766_v52 = vpop.permute.xlu0 %1765  ;;  %v886_v5 = vsel %vm8648_vm10, %v825_v40, %v885_v62  ;;  %v1431_v27 = vld [vmem:[#allocation2 + $0x68] sm:$0xff]  ;;  %7300 = vmatprep.subr.bf16.mxu1 %v7967_v24  ;;  %v7973_v62 = vld [vmem:[%s11244_s3 + $0x70] sm:$0xff]  }
 0x15a   : > { %1800 = vst.msk [vmem:[#allocation2 + $0x58] sm:$0xff] %vm1788_vm5, %v1766_v52  ;;  %v7971_v40 = vld [vmem:[%s11244_s3 + $0x68] sm:$0xff]  }
 0x15c   : > { %v1369_v33 = vpop.permute.xlu1 %1368  ;;  %v1941_v11 = vld [vmem:[#allocation2 + $0x50] sm:$0xff]  ;;  %7301 = vmatpush3.bf16.msra.mxu1 %v7968_v35 }
 0x15d   : > { %v1367_v54 = vpop.permute.xlu0 %1366  ;;  %v1432_v3 = vsel %vm8737_vm15, %v1369_v33, %v1431_v27  ;;  %7302 = vmatprep.subr.bf16.mxu1 %v7969_v43 }
 0x15e   : > { %v1429_v1 = vsel %vm8737_vm15, %v1367_v54, %v1428_v57  ;;  %v7972_v54 = vld [vmem:[%s11244_s3 + $0x28] sm:$0xff]  }
 0x160   : > { %v1887_v55 = vpop.permute.xlu1 %1886  ;;  %7303 = vmatpush3.bf16.msra.mxu1 %v7970_v50  ;;  %v9198_v50 = vld [vmem:[#allocation3] sm:$0xff] }
 0x161   : > { %v1944_v56 = vld [vmem:[#allocation2 + $0x58] sm:$0xff]  ;;  %v1885_v36 = vpop.permute.xlu0 %1884  ;;  %7304 = vmatprep.subr.bf16.mxu1 %v7971_v40 }
 0x162   : > { %v1945_v59 = vsel %vm8796_vm9, %v1887_v55, %v1944_v56  ;;  %v1942_v31 = vsel %vm8796_vm9, %v1885_v36, %v1941_v11 }
 0x163   : > { %1946 = vst [vmem:[#allocation2 + $0x58] sm:$0xff] %v1945_v59  ;;  %1943 = vst [vmem:[#allocation2 + $0x50] sm:$0xff] %v1942_v31  ;;  %7808 = vmatprep.mubr.msk.bf16.mxu1 %vm305_vm0, %v1942_v31 }
 0x164   : > { %v1242_v46 = vpop.permute.xlu1 %1241  ;;  %7809 = vmatmul.mubr.msk.bf16.gmra.mrb[4].mxu1 %vm305_vm0, %v1945_v59 }
 0x165   : > { %v1080_v0 = vpop.permute.xlu0 %1079  ;;  %7305 = vmatpush3.bf16.msra.mxu1 %v7972_v54 }
 0x166   : > { %v1144_v29 = vsel %vm8654_vm11, %v1080_v0, %v886_v5  ;;  %v7974_v5 = vld [vmem:[%s11244_s3 + $0x30] sm:$0xff]   ;;  %7306 = vmatprep.subr.bf16.mxu1 %v7973_v62  ;;  %v7975_v0 = vld [vmem:[%s11244_s3 + $0x78] sm:$0xff]  }
 0x167   : > { %1145 = vst [vmem:[#allocation2 + $0x70] sm:$0xff] %v1144_v29  ;;  %v7976_v29 = vld [vmem:[%s11244_s3 + $0x38] sm:$0xff]  }
 0x168   : > { %1276 = vst.msk [vmem:[#allocation2 + $0x70] sm:$0xff] %vm1261_vm12, %v1242_v46  ;;  %v1616_v26 = vpop.permute.xlu1 %1615 }
 0x169   : > { %v1675_v10 = vsel %vm8746_vm1, %v1616_v26, %v1429_v1  ;;  %v706_v14 = vpop.permute.xlu0 %705  ;;  %7307 = vmatpush3.bf16.msra.mxu1 %v7974_v5 }
 0x16a   : > { %1676 = vst [vmem:[#allocation2 + $0x60] sm:$0xff] %v1675_v10  ;;  %737 = vst.msk [vmem:[#allocation2 + $0x78] sm:$0xff] %vm722_vm6, %v706_v14  ;;  %7308 = vmatprep.subr.bf16.mxu1 %v7975_v0  ;;  %vm2594_vm6 = vcmask 1048064  }
 0x16c   : > { %v1768_v15 = vpop.permute.xlu1 %1767 }
 0x16d   : > { %1801 = vst.msk [vmem:[#allocation2 + $0x60] sm:$0xff] %vm1788_vm5, %v1768_v15  ;;  %v1618_v6 = vpop.permute.xlu0 %1617  ;;  %7309 = vmatpush3.bf16.msra.mxu1 %v7976_v29 }
 0x16e   : > { %v1678_v18 = vsel %vm8746_vm1, %v1618_v6, %v1432_v3 }
 0x16f   : > { %1679 = vst [vmem:[#allocation2 + $0x68] sm:$0xff] %v1678_v18  ;;  %v1434_v9 = vld [vmem:[#allocation2 + $0x70] sm:$0xff] }
 0x170   : > { %v1371_v19 = vpop.permute.xlu1 %1370 }
 0x171   : > { %v1770_v20 = vpop.permute.xlu0 %1769  ;;  %v1435_v13 = vsel %vm8737_vm15, %v1371_v19, %v1434_v9  ;;  %v888_v28 = vld [vmem:[#allocation2 + $0x78] sm:$0xff] }
 0x172   : > { %1802 = vst.msk [vmem:[#allocation2 + $0x68] sm:$0xff] %vm1788_vm5, %v1770_v20 }
 0x174   : > { %v1889_v21 = vpop.permute.xlu1 %1888  ;;  %v1947_v16 = vld [vmem:[#allocation2 + $0x60] sm:$0xff] }
 0x175   : > { %v827_v47 = vpop.permute.xlu0 %826  ;;  %v1948_v58 = vsel %vm8796_vm9, %v1889_v21, %v1947_v16 }
 0x176   : > { %1949 = vst [vmem:[#allocation2 + $0x60] sm:$0xff] %v1948_v58  ;;  %7812 = vmatprep.mubr.msk.bf16.mxu1 %vm305_vm0, %v1948_v58  ;;  %v889_v32 = vsel %vm8648_vm10, %v827_v47, %v888_v28  ;;  %v11270_v47 = vmov 0  ;;  %vm9339_vm10 = vmand %vm2594_vm6, %vm570_vm2 }
 0x177   : > { %vm9750_vm2 = vmand %vm2594_vm6, %vm844_vm8 }
 0x178   : > { %v1620_v22 = vpop.permute.xlu1 %1619 }
 0x179   : > { %v1891_v60 = vpop.permute.xlu0 %1890  ;;  %v1950_v4 = vld [vmem:[#allocation2 + $0x68] sm:$0xff]  ;;  %v1681_v51 = vsel %vm8746_vm1, %v1620_v22, %v1435_v13 }
 0x17a   : > { %v1951_v2 = vsel %vm8796_vm9, %v1891_v60, %v1950_v4  ;;  %1682 = vst [vmem:[#allocation2 + $0x70] sm:$0xff] %v1681_v51  ;;  %v3560_v4 = vld [vmem:[#allocation3 + $0x20] sm:$0xff] }
 0x17b   : > { %1952 = vst [vmem:[#allocation2 + $0x68] sm:$0xff] %v1951_v2  ;;  %7813 = vmatmul.mubr.msk.bf16.gmra.mrb[8].mxu1 %vm305_vm0, %v1951_v2 }
 0x17c   : > { %v1772_v30 = vpop.permute.xlu1 %1771 }
 0x17d   : > { %v1082_v34 = vpop.permute.xlu0 %1081  ;;  %1803 = vst.msk [vmem:[#allocation2 + $0x70] sm:$0xff] %vm1788_vm5, %v1772_v30 }
 0x17e   : > { %v1147_v7 = vsel %vm8654_vm11, %v1082_v34, %v889_v32 }
 0x17f   : > { %1148 = vst [vmem:[#allocation2 + $0x78] sm:$0xff] %v1147_v7 }
 0x180   : > { %v1893_v37 = vpop.permute.xlu1 %1892 }
 0x181   : > { %v1244_v25 = vpop.permute.xlu0 %1243 }
 0x182   : > { %1277 = vst.msk [vmem:[#allocation2 + $0x78] sm:$0xff] %vm1261_vm12, %v1244_v25 }
 0x184   : > { %v1953_v39 = vld [vmem:[#allocation2 + $0x70] sm:$0xff] }
 0x185   : > { %v1954_v44 = vsel %vm8796_vm9, %v1893_v37, %v1953_v39  ;;  %v1373_v17 = vpop.permute.xlu0 %1372 }
 0x186   : > { %1955 = vst [vmem:[#allocation2 + $0x70] sm:$0xff] %v1954_v44  ;;  %7816 = vmatprep.mubr.msk.bf16.mxu1 %vm305_vm0, %v1954_v44 }
 0x189   : > { %v1437_v48 = vld [vmem:[#allocation2 + $0x78] sm:$0xff] }
 0x18a   : > { %v1438_v41 = vsel %vm8737_vm15, %v1373_v17, %v1437_v48 }
 0x18b   : > { %1439 = vst [vmem:[#allocation2 + $0x78] sm:$0xff] %v1438_v41  ;;  %7817 = vmatmul.mubr.msk.bf16.gmra.mrb[12].mxu1 %vm305_vm0, %v1438_v41  ;;  %vm9184_vm0 = vmand %vm326_vm4, %vm844_vm8 }
 0x18c   : > { %v11271_v47 = vsel %vm9184_vm0, 4294967295, %v11270_v47 }
 0x18d   : > { %11272 = vst [vmem:[#allocation8_spill] sm:$0xff] %v11271_v47 }
 0x19b   : > { %v7790_v61 = vpop.f32.mrb[0].mxu0 }
 0x19c   : > { %v2094_v38 = vadd.f32 %v7790_v61, %v9144_v42  ;;  %v2085_v53 = vpop.f32.mrb[1].mxu0 }
 0x19d   : > { %v2086_v52 = vadd.f32 %v9144_v42, %v2085_v53  ;;  %v7791_v33 = vpop.f32.mrb[2].mxu0 }
 0x19e   : > { %v2214_v11 = vmax.f32 %v2094_v38, 0.0  ;;  %v2097_v55 = vadd.f32 %v7791_v33, %v9144_v42  ;;  %v2088_v56 = vpop.f32.mrb[3].mxu0 }
 0x19f   : > { %v2212_v36 = vmax.f32 %v2086_v52, 0.0  ;;  %v2089_v59 = vadd.f32 %v9144_v42, %v2088_v56 }
 0x1a0   : > { %2246 = vst.msk [vmem:[#allocation4 + $0x10] sm:$0xff] %vm326_vm4, %v2214_v11  ;;  %v2215_v31 = vmax.f32 %v2097_v55, 0.0 }
 0x1a1   : > { %2244 = vst.msk [vmem:[#allocation4] sm:$0xff] %vm326_vm4, %v2212_v36  ;;  %v2213_v46 = vmax.f32 %v2089_v59, 0.0 }
 0x1a2   : > { %2247 = vst.msk [vmem:[#allocation4 + $0x18] sm:$0xff] %vm326_vm4, %v2215_v31 }
 0x1a3   : > { %2245 = vst.msk [vmem:[#allocation4 + $0x8] sm:$0xff] %vm326_vm4, %v2213_v46 }
 0x1a7   : > { %v9175_v57 = vld [vmem:[#allocation4 + $0x10] sm:$0xff] }
 0x1a8   : > { %v2701_v26 = vld [vmem:[#allocation4] sm:$0xff]  ;;  %v3395_v37 = vld [vmem:[#allocation4 + $0x10] sm:$0xff] }
 0x1a9   : > { %v2704_v1 = vld [vmem:[#allocation4 + $0x18] sm:$0x7f]  ;;  %v2959_v63 = vld [vmem:[#allocation4] sm:$0xff]  ;;  %v2961_v41 = vld [vmem:[#allocation4 + $0x10] sm:$0xff] }
 0x1aa   : > { %v9177_v10 = vld [vmem:[#allocation4 + $0x11] sm:$0xff]  ;;  %v3516_v14 = vld [vmem:[#allocation4 + $0x19] sm:$0x7f]  ;;  %v2734_v27 = vpack.c.bf16 %v2704_v1, %v9175_v57  ;;  %v2702_v15 = vld [vmem:[#allocation4 + $0x8] sm:$0x7f] }
 0x1ab   : > { %v2733_v3 = vpack.c.bf16 %v2702_v15, %v2701_v26  ;;  %v2277_v6 = vld [vmem:[#allocation4 + $0x8] sm:$0x7f]  ;;  %v2279_v20 = vld [vmem:[#allocation4 + $0x18] sm:$0x7f]  ;;  %v3545_v21 = vpack.c.bf16 %v3516_v14, %v9177_v10 }
 0x1ac   : > { %v2757_v18 = vshrl.u32 %v2734_v27, 16  ;;  %v2306_v19 = vpack.c.bf16 %v2277_v6, %v2701_v26  ;;  %v2307_v9 = vpack.c.bf16 %v2279_v20, %v9175_v57  ;;  %v2760_v13 = vshll.u32 %v2734_v27, 16  ;;  %v3186_v28 = vld [vmem:[#allocation4 + $0x18] sm:$0x7f]  ;;  %v2960_v30 = vld [vmem:[#allocation4 + $0x8] sm:$0xff]  ;;  %v3566_v27 = vld [vmem:[#allocation3 + $0x70] sm:$0xff] }
 0x1ad   : > { %v2750_v16 = vshrl.u32 %v2733_v3, 16  ;;  %v2753_v22 = vshll.u32 %v2733_v3, 16  ;;  %v2962_v32 = vld [vmem:[#allocation4 + $0x18] sm:$0xff]  ;;  %v3215_v48 = vpack.c.bf16 %v3186_v28, %v3395_v37  ;;  %v2490_v12 = vld [vmem:[#allocation4 + $0x8] sm:$0xff]  ;;  %v2991_v23 = vpack.c.bf16 %v2960_v30, %v2959_v63 }
 0x1ae   : > { %v2759_v58 = vrot.slane %v2757_v18, 7  ;;  %v2322_v60 = vshrl.u32 %v2306_v19, 16  ;;  %v2329_v2 = vshrl.u32 %v2307_v9, 16  ;;  %v2325_v25 = vshll.u32 %v2306_v19, 16  ;;  %v2492_v33 = vld [vmem:[#allocation4 + $0x18] sm:$0xff]  ;;  %v3563_v14 = vld [vmem:[#allocation3 + $0x48] sm:$0xff] }
 0x1af   : > { %v2752_v51 = vrot.slane %v2750_v16, 7  ;;  %v2332_v45 = vshll.u32 %v2307_v9, 16  ;;  %v2992_v49 = vpack.c.bf16 %v2962_v32, %v2961_v41  ;;  %v3561_v24 = vsel %vm9184_vm0, %v3545_v21, %v3560_v4  ;;  %3007 = vst.msk [vmem:[#allocation3 + $0x10] sm:$0xff] %vm326_vm4, %v2991_v23 }
 0x1b0   : > { %v2762_v34 = vor.u32 %v2760_v13, %v2759_v58  ;;  %v2324_v7 = vrot.slane %v2322_v60, 7  ;;  %v2331_v17 = vrot.slane %v2329_v2, 7  ;;  %v3231_v43 = vshrl.u32 %v3215_v48, 16  ;;  %3562 = vst [vmem:[#allocation3 + $0x20] sm:$0xff] %v3561_v24 }
 0x1b1   : > { %v2755_v44 = vor.u32 %v2753_v22, %v2752_v51  ;;  %3008 = vst.msk [vmem:[#allocation3 + $0x38] sm:$0xff] %vm326_vm4, %v2992_v49  ;;  %v2519_v38 = vpack.c.bf16 %v2490_v12, %v2701_v26  ;;  %v3234_v52 = vshll.u32 %v3215_v48, 16  ;;  %v2520_v11 = vpack.c.bf16 %v2492_v33, %v9175_v57 }
 0x1b2   : > { %2863 = vrot.lane.b32.xlu0 %v2762_v34, %s8131_s12  ;;  %v2327_v8 = vor.u32 %v2325_v25, %v2324_v7  ;;  %v2334_v35 = vor.u32 %v2332_v45, %v2331_v17  ;;  %v3233_v40 = vrot.slane %v3231_v43, 7 }
 0x1b3   : > { %2861 = vrot.lane.b32.xlu1 %v2755_v44, %s8131_s12 }
 0x1b4   : > { %v2445_v61 = vsel %vm9190_vm3, %v2327_v8, %v9198_v50  ;;  %v2448_v53 = vsel %vm9190_vm3, %v2334_v35, %v9198_v50  ;;  %v3236_v54 = vor.u32 %v3234_v52, %v3233_v40 }
 0x1b5   : > { %2446 = vst [vmem:[#allocation3 + $0x28] sm:$0xff] %v2445_v61  ;;  %2449 = vst [vmem:[#allocation3 + $0x50] sm:$0xff] %v2448_v53 }
 0x1b6   : > { %v3351_v55 = vsel %vm9190_vm3, %v3236_v54, %v9198_v50 }
 0x1b7   : > { %2549 = vrot.lane.b32.xlu1 %v2519_v38, %s8131_s12  ;;  %3352 = vst [vmem:[#allocation3 + $0x18] sm:$0xff] %v3351_v55 }
 0x1bb   : > { %v7794_v56 = vpop.f32.mrb[4].mxu0  ;;  %2551 = vrot.lane.b32.xlu1 %v2520_v11, %s8131_s12 }
 0x1bc   : > { %v2110_v36 = vadd.f32 %v7794_v56, %v9144_v42  ;;  %v2101_v59 = vpop.f32.mrb[5].mxu0 }
 0x1bd   : > { %v2102_v31 = vadd.f32 %v9144_v42, %v2101_v59  ;;  %v7795_v62 = vpop.f32.mrb[6].mxu0 }
 0x1be   : > { %v2218_v46 = vmax.f32 %v2110_v36, 0.0  ;;  %v2113_v5 = vadd.f32 %v7795_v62, %v9144_v42  ;;  %v2104_v0 = vpop.f32.mrb[7].mxu0 }
 0x1bf   : > { %v2216_v29 = vmax.f32 %v2102_v31, 0.0  ;;  %v2105_v57 = vadd.f32 %v9144_v42, %v2104_v0 }
 0x1c0   : > { %2250 = vst.msk [vmem:[#allocation4 + $0x30] sm:$0xff] %vm326_vm4, %v2218_v46  ;;  %v2219_v1 = vmax.f32 %v2113_v5, 0.0 }
 0x1c1   : > { %2248 = vst.msk [vmem:[#allocation4 + $0x20] sm:$0xff] %vm326_vm4, %v2216_v29  ;;  %v2217_v26 = vmax.f32 %v2105_v57, 0.0 }
 0x1c2   : > { %2251 = vst.msk [vmem:[#allocation4 + $0x38] sm:$0xff] %vm326_vm4, %v2219_v1 }
 0x1c3   : > { %2249 = vst.msk [vmem:[#allocation4 + $0x28] sm:$0xff] %vm326_vm4, %v2217_v26 }
 0x1c7   : > { %v2495_v18 = vld [vmem:[#allocation4 + $0x30] sm:$0xff] }
 0x1c8   : > { %v2493_v6 = vld [vmem:[#allocation4 + $0x20] sm:$0xff]  ;;  %v3399_v40 = vld [vmem:[#allocation4 + $0x30] sm:$0xff] }
 0x1c9   : > { %v3519_v15 = vld [vmem:[#allocation4 + $0x31] sm:$0xff]  ;;  %v3520_v3 = vld [vmem:[#allocation4 + $0x39] sm:$0x7f]  ;;  %v3187_v43 = vld [vmem:[#allocation4 + $0x20] sm:$0xff] }
 0x1ca   : > { %v3547_v19 = vpack.c.bf16 %v3520_v3, %v3519_v15  ;;  %v9222_v20 = vld [vmem:[#allocation4 + $0x21] sm:$0xff]  ;;  %v3518_v21 = vld [vmem:[#allocation4 + $0x29] sm:$0x7f]  ;;  %v2708_v22 = vld [vmem:[#allocation4 + $0x38] sm:$0x7f] }
 0x1cb   : > { %v2494_v16 = vld [vmem:[#allocation4 + $0x28] sm:$0xff]  ;;  %v3546_v9 = vpack.c.bf16 %v3518_v21, %v9222_v20  ;;  %v2496_v4 = vld [vmem:[#allocation4 + $0x38] sm:$0xff]  ;;  %v2736_v2 = vpack.c.bf16 %v2708_v22, %v2495_v18  ;;  %v2965_v56 = vld [vmem:[#allocation4 + $0x30] sm:$0xff] }
 0x1cc   : > { %v9225_v58 = vpack.c.bf16 %v2494_v16, %v2493_v6  ;;  %v2706_v13 = vld [vmem:[#allocation4 + $0x28] sm:$0x7f]  ;;  %v2283_v30 = vld [vmem:[#allocation4 + $0x38] sm:$0x7f]  ;;  %v3567_v32 = vsel %vm9184_vm0, %v3547_v19, %v3566_v27  ;;  %v2522_v44 = vpack.c.bf16 %v2496_v4, %v2495_v18 }
 0x1cd   : > { %v2281_v60 = vld [vmem:[#allocation4 + $0x28] sm:$0x7f]  ;;  %v2735_v51 = vpack.c.bf16 %v2706_v13, %v2493_v6  ;;  %v3564_v34 = vsel %vm9184_vm0, %v3546_v9, %v3563_v14  ;;  %v2309_v7 = vpack.c.bf16 %v2283_v30, %v2495_v18  ;;  %3568 = vst [vmem:[#allocation3 + $0x70] sm:$0xff] %v3567_v32  ;;  %v2771_v37 = vshrl.u32 %v2736_v2, 16  ;;  %v3190_v12 = vld [vmem:[#allocation4 + $0x38] sm:$0x7f] }
 0x1ce   : > { %v2308_v28 = vpack.c.bf16 %v2281_v60, %v2493_v6  ;;  %2553 = vrot.lane.b32.xlu1 %v9225_v58, %s8131_s12  ;;  %3565 = vst [vmem:[#allocation3 + $0x48] sm:$0xff] %v3564_v34  ;;  %v3188_v41 = vld [vmem:[#allocation4 + $0x28] sm:$0x7f]  ;;  %v2966_v61 = vld [vmem:[#allocation4 + $0x38] sm:$0xff]  ;;  %v3217_v11 = vpack.c.bf16 %v3190_v12, %v3399_v40  ;;  %v2774_v36 = vshll.u32 %v2736_v2, 16  ;;  %v3572_v30 = vld [vmem:[#allocation3 + $0xc0] sm:$0xff] }
 0x1cf   : > { %v2764_v25 = vshrl.u32 %v2735_v51, 16  ;;  %v2767_v17 = vshll.u32 %v2735_v51, 16  ;;  %v2343_v48 = vshrl.u32 %v2309_v7, 16  ;;  %v2964_v8 = vld [vmem:[#allocation4 + $0x28] sm:$0xff]  ;;  %v2346_v35 = vshll.u32 %v2309_v7, 16 }
 0x1d0   : > { %v2336_v45 = vshrl.u32 %v2308_v28, 16  ;;  %v2339_v49 = vshll.u32 %v2308_v28, 16  ;;  %v2773_v53 = vrot.slane %v2771_v37, 7  ;;  %v3216_v52 = vpack.c.bf16 %v3188_v41, %v3187_v43  ;;  %v3569_v28 = vld [vmem:[#allocation3 + $0x98] sm:$0xff] }
 0x1d1   : > { %v2766_v63 = vrot.slane %v2764_v25, 7  ;;  %v2345_v24 = vrot.slane %v2343_v48, 7  ;;  %v2993_v55 = vpack.c.bf16 %v2964_v8, %v3187_v43  ;;  %v2994_v31 = vpack.c.bf16 %v2966_v61, %v2965_v56 }
 0x1d2   : > { %2555 = vrot.lane.b32.xlu1 %v2522_v44, %s8131_s12  ;;  %v2338_v23 = vrot.slane %v2336_v45, 7  ;;  %v3238_v59 = vshrl.u32 %v3216_v52, 16  ;;  %v3245_v5 = vshrl.u32 %v3217_v11, 16  ;;  %v2776_v0 = vor.u32 %v2774_v36, %v2773_v53 }
 0x1d3   : > { %v2769_v38 = vor.u32 %v2767_v17, %v2766_v63  ;;  %v2348_v54 = vor.u32 %v2346_v35, %v2345_v24  ;;  %3009 = vst.msk [vmem:[#allocation3 + $0x60] sm:$0xff] %vm326_vm4, %v2993_v55  ;;  %v3241_v57 = vshll.u32 %v3216_v52, 16  ;;  %3010 = vst.msk [vmem:[#allocation3 + $0x88] sm:$0xff] %vm326_vm4, %v2994_v31  ;;  %v3248_v26 = vshll.u32 %v3217_v11, 16 }
 0x1d4   : > { %v2341_v33 = vor.u32 %v2339_v49, %v2338_v23  ;;  %v3240_v29 = vrot.slane %v3238_v59, 7  ;;  %v3247_v1 = vrot.slane %v3245_v5, 7 }
 0x1d5   : > { %2865 = vrot.lane.b32.xlu0 %v2769_v38, %s8131_s12  ;;  %v2454_v46 = vsel %vm9190_vm3, %v2348_v54, %v9198_v50 }
 0x1d6   : > { %v2451_v62 = vsel %vm9190_vm3, %v2341_v33, %v9198_v50  ;;  %2455 = vst [vmem:[#allocation3 + $0xa0] sm:$0xff] %v2454_v46  ;;  %v3243_v14 = vor.u32 %v3241_v57, %v3240_v29  ;;  %v3250_v27 = vor.u32 %v3248_v26, %v3247_v1 }
 0x1d7   : > { %2452 = vst [vmem:[#allocation3 + $0x78] sm:$0xff] %v2451_v62 }
 0x1d8   : > { %v3354_v15 = vsel %vm9190_vm3, %v3243_v14, %v9198_v50  ;;  %v3357_v6 = vsel %vm9190_vm3, %v3250_v27, %v9198_v50 }
 0x1d9   : > { %2867 = vrot.lane.b32.xlu0 %v2776_v0, %s8131_s12  ;;  %3355 = vst [vmem:[#allocation3 + $0x40] sm:$0xff] %v3354_v15  ;;  %3358 = vst [vmem:[#allocation3 + $0x68] sm:$0xff] %v3357_v6 }
 0x1db   : > { %v7798_v3 = vpop.f32.mrb[8].mxu0 }
 0x1dc   : > { %v2126_v18 = vadd.f32 %v7798_v3, %v9144_v42  ;;  %v2117_v19 = vpop.f32.mrb[9].mxu0 }
 0x1dd   : > { %v2118_v21 = vadd.f32 %v9144_v42, %v2117_v19  ;;  %v7799_v16 = vpop.f32.mrb[10].mxu0 }
 0x1de   : > { %v2222_v9 = vmax.f32 %v2126_v18, 0.0  ;;  %v2129_v13 = vadd.f32 %v7799_v16, %v9144_v42  ;;  %v2120_v22 = vpop.f32.mrb[11].mxu0 }
 0x1df   : > { %v2220_v60 = vmax.f32 %v2118_v21, 0.0  ;;  %v2121_v4 = vadd.f32 %v9144_v42, %v2120_v22 }
 0x1e0   : > { %2254 = vst.msk [vmem:[#allocation4 + $0x50] sm:$0xff] %vm326_vm4, %v2222_v9  ;;  %v2223_v51 = vmax.f32 %v2129_v13, 0.0 }
 0x1e1   : > { %2252 = vst.msk [vmem:[#allocation4 + $0x40] sm:$0xff] %vm326_vm4, %v2220_v60  ;;  %v2221_v2 = vmax.f32 %v2121_v4, 0.0 }
 0x1e2   : > { %2255 = vst.msk [vmem:[#allocation4 + $0x58] sm:$0xff] %vm326_vm4, %v2223_v51 }
 0x1e3   : > { %2253 = vst.msk [vmem:[#allocation4 + $0x48] sm:$0xff] %vm326_vm4, %v2221_v2 }
 0x1e7   : > { %v2499_v25 = vld [vmem:[#allocation4 + $0x50] sm:$0xff] }
 0x1e8   : > { %v2497_v7 = vld [vmem:[#allocation4 + $0x40] sm:$0xff]  ;;  %v3403_v14 = vld [vmem:[#allocation4 + $0x50] sm:$0xff] }
 0x1e9   : > { %v3523_v32 = vld [vmem:[#allocation4 + $0x51] sm:$0xff]  ;;  %v3524_v34 = vld [vmem:[#allocation4 + $0x59] sm:$0x7f]  ;;  %v3191_v55 = vld [vmem:[#allocation4 + $0x40] sm:$0xff] }
 0x1ea   : > { %v3549_v37 = vpack.c.bf16 %v3524_v34, %v3523_v32  ;;  %v9258_v44 = vld [vmem:[#allocation4 + $0x41] sm:$0xff]  ;;  %v3522_v17 = vld [vmem:[#allocation4 + $0x49] sm:$0x7f]  ;;  %v2712_v12 = vld [vmem:[#allocation4 + $0x58] sm:$0x7f] }
 0x1eb   : > { %v2498_v45 = vld [vmem:[#allocation4 + $0x48] sm:$0xff]  ;;  %v3548_v48 = vpack.c.bf16 %v3522_v17, %v9258_v44  ;;  %v2500_v23 = vld [vmem:[#allocation4 + $0x58] sm:$0xff]  ;;  %v2738_v24 = vpack.c.bf16 %v2712_v12, %v2499_v25  ;;  %v2969_v19 = vld [vmem:[#allocation4 + $0x50] sm:$0xff] }
 0x1ec   : > { %v9261_v63 = vpack.c.bf16 %v2498_v45, %v2497_v7  ;;  %v2710_v41 = vld [vmem:[#allocation4 + $0x48] sm:$0x7f]  ;;  %v2287_v43 = vld [vmem:[#allocation4 + $0x58] sm:$0x7f]  ;;  %v3573_v61 = vsel %vm9184_vm0, %v3549_v37, %v3572_v30  ;;  %v2524_v33 = vpack.c.bf16 %v2500_v23, %v2499_v25 }
 0x1ed   : > { %v2285_v8 = vld [vmem:[#allocation4 + $0x48] sm:$0x7f]  ;;  %v2737_v49 = vpack.c.bf16 %v2710_v41, %v2497_v7  ;;  %v2311_v38 = vpack.c.bf16 %v2287_v43, %v2499_v25  ;;  %v3570_v53 = vsel %vm9184_vm0, %v3548_v48, %v3569_v28  ;;  %3574 = vst [vmem:[#allocation3 + $0xc0] sm:$0xff] %v3573_v61  ;;  %v2785_v52 = vshrl.u32 %v2738_v24, 16  ;;  %v3194_v31 = vld [vmem:[#allocation4 + $0x58] sm:$0x7f] }
 0x1ee   : > { %v2310_v35 = vpack.c.bf16 %v2285_v8, %v2497_v7  ;;  %2557 = vrot.lane.b32.xlu1 %v9261_v63, %s8131_s12  ;;  %3571 = vst [vmem:[#allocation3 + $0x98] sm:$0xff] %v3570_v53  ;;  %v3192_v59 = vld [vmem:[#allocation4 + $0x48] sm:$0x7f]  ;;  %v2970_v57 = vld [vmem:[#allocation4 + $0x58] sm:$0xff]  ;;  %v3219_v6 = vpack.c.bf16 %v3194_v31, %v3403_v14  ;;  %v2788_v21 = vshll.u32 %v2738_v24, 16  ;;  %v9294_v43 = vld [vmem:[%s11244_s3 + $0x100] sm:$0xff]  }
 0x1ef   : > { %v2778_v40 = vshrl.u32 %v2737_v49, 16  ;;  %v2357_v11 = vshrl.u32 %v2311_v38, 16  ;;  %v2781_v36 = vshll.u32 %v2737_v49, 16  ;;  %v2360_v0 = vshll.u32 %v2311_v38, 16  ;;  %v2968_v29 = vld [vmem:[#allocation4 + $0x48] sm:$0xff]  ;;  %7820 = vmatprep.subr.bf16.mxu1 %v9294_v43  ;;  %v3578_v53 = vld [vmem:[#allocation3 + $0x110] sm:$0xff] }
 0x1f0   : > { %v2350_v54 = vshrl.u32 %v2310_v35, 16  ;;  %v2353_v46 = vshll.u32 %v2310_v35, 16  ;;  %v2787_v26 = vrot.slane %v2785_v52, 7  ;;  %v3218_v27 = vpack.c.bf16 %v3192_v59, %v3191_v55  ;;  %v3575_v38 = vld [vmem:[#allocation3 + $0xe8] sm:$0xff] }
 0x1f1   : > { %v2780_v56 = vrot.slane %v2778_v40, 7  ;;  %v2359_v5 = vrot.slane %v2357_v11, 7  ;;  %v2995_v18 = vpack.c.bf16 %v2968_v29, %v3191_v55  ;;  %v2996_v9 = vpack.c.bf16 %v2970_v57, %v2969_v19 }
 0x1f2   : > { %2559 = vrot.lane.b32.xlu1 %v2524_v33, %s8131_s12  ;;  %v2352_v62 = vrot.slane %v2350_v54, 7  ;;  %v3252_v16 = vshrl.u32 %v3218_v27, 16  ;;  %v3259_v60 = vshrl.u32 %v3219_v6, 16  ;;  %v2790_v4 = vor.u32 %v2788_v21, %v2787_v26 }
 0x1f3   : > { %v2783_v1 = vor.u32 %v2781_v36, %v2780_v56  ;;  %v2362_v3 = vor.u32 %v2360_v0, %v2359_v5  ;;  %3011 = vst.msk [vmem:[#allocation3 + $0xb0] sm:$0xff] %vm326_vm4, %v2995_v18  ;;  %v3255_v2 = vshll.u32 %v3218_v27, 16  ;;  %3012 = vst.msk [vmem:[#allocation3 + $0xd8] sm:$0xff] %vm326_vm4, %v2996_v9  ;;  %v3262_v30 = vshll.u32 %v3219_v6, 16 }
 0x1f4   : > { %v2355_v15 = vor.u32 %v2353_v46, %v2352_v62  ;;  %v3254_v51 = vrot.slane %v3252_v16, 7  ;;  %v3261_v28 = vrot.slane %v3259_v60, 7 }
 0x1f5   : > { %2869 = vrot.lane.b32.xlu0 %v2783_v1, %s8131_s12  ;;  %v2460_v22 = vsel %vm9190_vm3, %v2362_v3, %v9198_v50 }
 0x1f6   : > { %v2457_v13 = vsel %vm9190_vm3, %v2355_v15, %v9198_v50  ;;  %2461 = vst [vmem:[#allocation3 + $0xf0] sm:$0xff] %v2460_v22  ;;  %v3257_v32 = vor.u32 %v3255_v2, %v3254_v51  ;;  %v3264_v34 = vor.u32 %v3262_v30, %v3261_v28 }
 0x1f7   : > { %2458 = vst [vmem:[#allocation3 + $0xc8] sm:$0xff] %v2457_v13 }
 0x1f8   : > { %v3360_v7 = vsel %vm9190_vm3, %v3257_v32, %v9198_v50  ;;  %v3363_v37 = vsel %vm9190_vm3, %v3264_v34, %v9198_v50 }
 0x1f9   : > { %2871 = vrot.lane.b32.xlu0 %v2790_v4, %s8131_s12  ;;  %3361 = vst [vmem:[#allocation3 + $0x90] sm:$0xff] %v3360_v7  ;;  %3364 = vst [vmem:[#allocation3 + $0xb8] sm:$0xff] %v3363_v37 }
 0x1fb   : > { %v7802_v25 = vpop.f32.mrb[12].mxu0 }
 0x1fc   : > { %v2142_v17 = vadd.f32 %v7802_v25, %v9144_v42  ;;  %v2133_v45 = vpop.f32.mrb[13].mxu0 }
 0x1fd   : > { %v2134_v48 = vadd.f32 %v9144_v42, %v2133_v45  ;;  %v7803_v41 = vpop.f32.mrb[14].mxu0 }
 0x1fe   : > { %v2226_v12 = vmax.f32 %v2142_v17, 0.0  ;;  %v2145_v8 = vadd.f32 %v7803_v41, %v9144_v42  ;;  %v2136_v23 = vpop.f32.mrb[15].mxu0 }
 0x1ff   : > { %v2224_v49 = vmax.f32 %v2134_v48, 0.0  ;;  %v2137_v24 = vadd.f32 %v9144_v42, %v2136_v23 }
 0x200   : > { %2258 = vst.msk [vmem:[#allocation4 + $0x70] sm:$0xff] %vm326_vm4, %v2226_v12  ;;  %v2227_v35 = vmax.f32 %v2145_v8, 0.0 }
 0x201   : > { %2256 = vst.msk [vmem:[#allocation4 + $0x60] sm:$0xff] %vm326_vm4, %v2224_v49  ;;  %v2225_v61 = vmax.f32 %v2137_v24, 0.0 }
 0x202   : > { %2259 = vst.msk [vmem:[#allocation4 + $0x78] sm:$0xff] %vm326_vm4, %v2227_v35 }
 0x203   : > { %2257 = vst.msk [vmem:[#allocation4 + $0x68] sm:$0xff] %vm326_vm4, %v2225_v61 }
 0x207   : > { %v2503_v54 = vld [vmem:[#allocation4 + $0x70] sm:$0xff] }
 0x208   : > { %v2501_v33 = vld [vmem:[#allocation4 + $0x60] sm:$0xff]  ;;  %v3197_v34 = vld [vmem:[#allocation4 + $0x70] sm:$0xff] }
 0x209   : > { %v3527_v40 = vld [vmem:[#allocation4 + $0x71] sm:$0xff]  ;;  %v3528_v52 = vld [vmem:[#allocation4 + $0x79] sm:$0x7f]  ;;  %v3195_v32 = vld [vmem:[#allocation4 + $0x60] sm:$0xff] }
 0x20a   : > { %v3551_v11 = vpack.c.bf16 %v3528_v52, %v3527_v40  ;;  %v3525_v55 = vld [vmem:[#allocation4 + $0x61] sm:$0xff]  ;;  %v3526_v56 = vld [vmem:[#allocation4 + $0x69] sm:$0x7f]  ;;  %v2716_v46 = vld [vmem:[#allocation4 + $0x78] sm:$0x7f] }
 0x20b   : > { %v2502_v36 = vld [vmem:[#allocation4 + $0x68] sm:$0xff]  ;;  %v3550_v59 = vpack.c.bf16 %v3526_v56, %v3525_v55  ;;  %v2504_v0 = vld [vmem:[#allocation4 + $0x78] sm:$0xff]  ;;  %v2740_v57 = vpack.c.bf16 %v2716_v46, %v2503_v54 }
 0x20c   : > { %v9300_v31 = vpack.c.bf16 %v2502_v36, %v2501_v33  ;;  %v2714_v62 = vld [vmem:[#allocation4 + $0x68] sm:$0x7f]  ;;  %v2291_v26 = vld [vmem:[#allocation4 + $0x78] sm:$0x7f]  ;;  %v3579_v14 = vsel %vm9184_vm0, %v3551_v11, %v3578_v53  ;;  %v9308_v18 = vpack.c.bf16 %v2504_v0, %v2503_v54 }
 0x20d   : > { %v2289_v5 = vld [vmem:[#allocation4 + $0x68] sm:$0x7f]  ;;  %v2739_v29 = vpack.c.bf16 %v2714_v62, %v2501_v33  ;;  %v2313_v27 = vpack.c.bf16 %v2291_v26, %v2503_v54  ;;  %v3576_v15 = vsel %vm9184_vm0, %v3550_v59, %v3575_v38  ;;  %3580 = vst [vmem:[#allocation3 + $0x110] sm:$0xff] %v3579_v14  ;;  %v2799_v6 = vshrl.u32 %v2740_v57, 16  ;;  %v3198_v60 = vld [vmem:[#allocation4 + $0x78] sm:$0x7f] }
 0x20e   : > { %v2312_v1 = vpack.c.bf16 %v2289_v5, %v2501_v33  ;;  %2561 = vrot.lane.b32.xlu1 %v9300_v31, %s8131_s12  ;;  %3577 = vst [vmem:[#allocation3 + $0xe8] sm:$0xff] %v3576_v15  ;;  %v3196_v16 = vld [vmem:[#allocation4 + $0x68] sm:$0x7f]  ;;  %v3221_v37 = vpack.c.bf16 %v3198_v60, %v3197_v34  ;;  %v2974_v17 = vld [vmem:[#allocation4 + $0x78] sm:$0xff]  ;;  %v2802_v45 = vshll.u32 %v2740_v57, 16  ;;  %v3584_v60 = vld [vmem:[#allocation3 + $0x160] sm:$0xff] }
 0x20f   : > { %v2792_v3 = vshrl.u32 %v2739_v29, 16  ;;  %v2371_v21 = vshrl.u32 %v2313_v27, 16  ;;  %v2795_v13 = vshll.u32 %v2739_v29, 16  ;;  %v2972_v4 = vld [vmem:[#allocation4 + $0x68] sm:$0xff]  ;;  %v2801_v51 = vrot.slane %v2799_v6, 7 }
 0x210   : > { %v2364_v19 = vshrl.u32 %v2312_v1, 16  ;;  %v2367_v22 = vshll.u32 %v2312_v1, 16  ;;  %v2374_v30 = vshll.u32 %v2313_v27, 16  ;;  %v3220_v25 = vpack.c.bf16 %v3196_v16, %v3195_v32  ;;  %v9330_v5 = vld [vmem:[#allocation4 + $0x1] sm:$0xff]  ;;  %v2611_v0 = vld [vmem:[#allocation4 + $0x9] sm:$0x7f] }
 0x211   : > { %v2794_v9 = vrot.slane %v2792_v3, 7  ;;  %v2373_v28 = vrot.slane %v2371_v21, 7  ;;  %v2997_v12 = vpack.c.bf16 %v2972_v4, %v3195_v32  ;;  %v3273_v23 = vshrl.u32 %v3221_v37, 16 }
 0x212   : > { %2563 = vrot.lane.b32.xlu1 %v9308_v18, %s8131_s12  ;;  %v2366_v2 = vrot.slane %v2364_v19, 7  ;;  %v3266_v8 = vshrl.u32 %v3220_v25, 16  ;;  %v2804_v49 = vor.u32 %v2802_v45, %v2801_v51  ;;  %v2998_v61 = vpack.c.bf16 %v2974_v17, %v3197_v34 }
 0x213   : > { %v2797_v7 = vor.u32 %v2795_v13, %v2794_v9  ;;  %v2376_v41 = vor.u32 %v2374_v30, %v2373_v28  ;;  %3013 = vst.msk [vmem:[#allocation3 + $0x100] sm:$0xff] %vm326_vm4, %v2997_v12  ;;  %v3269_v53 = vshll.u32 %v3220_v25, 16  ;;  %v3275_v40 = vrot.slane %v3273_v23, 7 }
 0x214   : > { %v2369_v48 = vor.u32 %v2367_v22, %v2366_v2  ;;  %v3268_v38 = vrot.slane %v3266_v8, 7  ;;  %v3276_v52 = vshll.u32 %v3221_v37, 16  ;;  %3014 = vst.msk [vmem:[#allocation3 + $0x128] sm:$0xff] %vm326_vm4, %v2998_v61  ;;  %v2640_v15 = vpack.c.bf16 %v2611_v0, %v9330_v5  ;;  %v7978_v22 = vld [vmem:[%s11244_s3 + $0x108] sm:$0xff]  }
 0x215   : > { %2873 = vrot.lane.b32.xlu0 %v2797_v7, %s8131_s12  ;;  %v2466_v35 = vsel %vm9190_vm3, %v2376_v41, %v9198_v50  ;;  %v11275_v6 = vmov 0 }
 0x216   : > { %v2463_v24 = vsel %vm9190_vm3, %v2369_v48, %v9198_v50  ;;  %2467 = vst [vmem:[#allocation3 + $0x140] sm:$0xff] %v2466_v35  ;;  %v3271_v33 = vor.u32 %v3269_v53, %v3268_v38  ;;  %v3278_v54 = vor.u32 %v3276_v52, %v3275_v40  ;;  %v11276_v6 = vsel %vm9339_vm10, 4294967295, %v11275_v6 }
 0x217   : > { %2464 = vst [vmem:[#allocation3 + $0x118] sm:$0xff] %v2463_v24  ;;  %11277 = vst [vmem:[#allocation9_spill] sm:$0xff] %v11276_v6  ;;  %v2657_v21 = vsel %vm9184_vm0, %v2640_v15, %v9198_v50 }
 0x218   : > { %v3366_v11 = vsel %vm9190_vm3, %v3271_v33, %v9198_v50  ;;  %v3369_v55 = vsel %vm9190_vm3, %v3278_v54, %v9198_v50 }
 0x219   : > { %2875 = vrot.lane.b32.xlu0 %v2804_v49, %s8131_s12  ;;  %3367 = vst [vmem:[#allocation3 + $0xe0] sm:$0xff] %v3366_v11  ;;  %3370 = vst [vmem:[#allocation3 + $0x108] sm:$0xff] %v3369_v55 }
 0x21b   : > { %v7806_v56 = vpop.f32.mrb[0].mxu1 }
 0x21c   : > { %v2158_v36 = vadd.f32 %v7806_v56, %v9144_v42  ;;  %v2149_v59 = vpop.f32.mrb[1].mxu1 }
 0x21d   : > { %v2150_v62 = vadd.f32 %v9144_v42, %v2149_v59  ;;  %v7807_v46 = vpop.f32.mrb[2].mxu1 }
 0x21e   : > { %v2230_v29 = vmax.f32 %v2158_v36, 0.0  ;;  %v2161_v57 = vadd.f32 %v7807_v46, %v9144_v42  ;;  %v2152_v1 = vpop.f32.mrb[3].mxu1 }
 0x21f   : > { %v2228_v26 = vmax.f32 %v2150_v62, 0.0  ;;  %v2153_v14 = vadd.f32 %v9144_v42, %v2152_v1 }
 0x220   : > { %2262 = vst.msk [vmem:[#allocation4 + $0x90] sm:$0xff] %vm326_vm4, %v2230_v29  ;;  %v2231_v27 = vmax.f32 %v2161_v57, 0.0 }
 0x221   : > { %2260 = vst.msk [vmem:[#allocation4 + $0x80] sm:$0xff] %vm326_vm4, %v2228_v26  ;;  %v2229_v3 = vmax.f32 %v2153_v14, 0.0 }
 0x222   : > { %2263 = vst.msk [vmem:[#allocation4 + $0x98] sm:$0xff] %vm326_vm4, %v2231_v27 }
 0x223   : > { %2261 = vst.msk [vmem:[#allocation4 + $0x88] sm:$0xff] %vm326_vm4, %v2229_v3 }
 0x224   : > { %v2864_v19 = vpop.permute.xlu0 %2863 }
 0x225   : > { %v2915_v16 = vsel %vm9339_vm10, %v2864_v19, %v2657_v21  ;;  %v2862_v9 = vpop.permute.xlu1 %2861  ;;  %v3581_v19 = vld [vmem:[#allocation3 + $0x138] sm:$0xff] }
 0x226   : > { %2916 = vst [vmem:[#allocation3 + $0x30] sm:$0xff] %v2915_v16  ;;  %v2912_v13 = vsel %vm9339_vm10, %v2862_v9, %v9198_v50 }
 0x227   : > { %2913 = vst [vmem:[#allocation3 + $0x8] sm:$0xff] %v2912_v13  ;;  %4053 = vmatprep.mubr.bf16.mxu1 %v2912_v13  ;;  %v2507_v28 = vld [vmem:[#allocation4 + $0x90] sm:$0xff] }
 0x228   : > { %4054 = vmatmul.mubr.bf16.vlgmr.msra.gmra.mrb[16].mxu1 %v9198_v50  ;;  %v2505_v32 = vld [vmem:[#allocation4 + $0x80] sm:$0xff]  ;;  %v3201_v55 = vld [vmem:[#allocation4 + $0x90] sm:$0xff] }
 0x229   : > { %v9357_v4 = vld [vmem:[#allocation4 + $0x91] sm:$0xff]  ;;  %v3532_v51 = vld [vmem:[#allocation4 + $0x99] sm:$0x7f]  ;;  %v2550_v2 = vpop.permute.xlu1 %2549  ;;  %4061 = vmatprep.mubr.bf16.mxu1 %v2915_v16  ;;  %7821 = vmatpush3.bf16.msra.mxu1 %v9294_v43  ;;  %v3199_v54 = vld [vmem:[#allocation4 + $0x80] sm:$0xff] }
 0x22a   : > { %v3553_v30 = vpack.c.bf16 %v3532_v51, %v9357_v4  ;;  %2595 = vst.msk [vmem:[#allocation3 + $0x28] sm:$0xff] %vm2594_vm6, %v2550_v2  ;;  %v2506_v34 = vld [vmem:[#allocation4 + $0x88] sm:$0xff]  ;;  %v2508_v7 = vld [vmem:[#allocation4 + $0x98] sm:$0xff]  ;;  %7822 = vmatprep.subr.bf16.mxu1 %v7978_v22 }
 0x22b   : > { %v9362_v25 = vld [vmem:[#allocation4 + $0x81] sm:$0xff]  ;;  %v9364_v37 = vpack.c.bf16 %v2506_v34, %v2505_v32  ;;  %v2720_v45 = vld [vmem:[#allocation4 + $0x98] sm:$0x7f]  ;;  %v3530_v48 = vld [vmem:[#allocation4 + $0x89] sm:$0x7f]  ;;  %v9372_v40 = vpack.c.bf16 %v2508_v7, %v2507_v28 }
 0x22c   : > { %v2718_v17 = vld [vmem:[#allocation4 + $0x88] sm:$0x7f]  ;;  %v2742_v12 = vpack.c.bf16 %v2720_v45, %v2507_v28  ;;  %v2295_v23 = vld [vmem:[#allocation4 + $0x98] sm:$0x7f]  ;;  %v3585_v43 = vsel %vm9184_vm0, %v3553_v30, %v3584_v60  ;;  %v3552_v53 = vpack.c.bf16 %v3530_v48, %v9362_v25 }
 0x22d   : > { %v2741_v41 = vpack.c.bf16 %v2718_v17, %v2505_v32  ;;  %v2293_v8 = vld [vmem:[#allocation4 + $0x88] sm:$0x7f]  ;;  %2565 = vrot.lane.b32.xlu1 %v9364_v37, %s8131_s12  ;;  %v2552_v49 = vpop.permute.xlu1 %2551  ;;  %7823 = vmatpush3.bf16.msra.mxu1 %v7978_v22  ;;  %v2315_v35 = vpack.c.bf16 %v2295_v23, %v2507_v28  ;;  %3586 = vst [vmem:[#allocation3 + $0x160] sm:$0xff] %v3585_v43  ;;  %v3202_v46 = vld [vmem:[#allocation4 + $0x98] sm:$0x7f] }
 0x22e   : > { %v2314_v24 = vpack.c.bf16 %v2293_v8, %v2505_v32  ;;  %2596 = vst.msk [vmem:[#allocation3 + $0x50] sm:$0xff] %vm2594_vm6, %v2552_v49  ;;  %v2813_v38 = vshrl.u32 %v2742_v12, 16  ;;  %v3200_v11 = vld [vmem:[#allocation4 + $0x88] sm:$0x7f]  ;;  %v3223_v26 = vpack.c.bf16 %v3202_v46, %v3201_v55  ;;  %v2978_v27 = vld [vmem:[#allocation4 + $0x98] sm:$0xff]  ;;  %v2816_v21 = vshll.u32 %v2742_v12, 16 }
 0x22f   : > { %v2806_v61 = vshrl.u32 %v2741_v41, 16  ;;  %v2385_v33 = vshrl.u32 %v2315_v35, 16  ;;  %v2809_v36 = vshll.u32 %v2741_v41, 16  ;;  %v2388_v62 = vshll.u32 %v2315_v35, 16  ;;  %v2976_v14 = vld [vmem:[#allocation4 + $0x88] sm:$0xff] }
 0x230   : > { %v2378_v52 = vshrl.u32 %v2314_v24, 16  ;;  %v2381_v59 = vshll.u32 %v2314_v24, 16  ;;  %v3222_v1 = vpack.c.bf16 %v3200_v11, %v3199_v54  ;;  %v2815_v3 = vrot.slane %v2813_v38, 7 }
 0x231   : > { %v2808_v56 = vrot.slane %v2806_v61, 7  ;;  %2567 = vrot.lane.b32.xlu1 %v9372_v40, %s8131_s12  ;;  %v3610_v0 = vld [vmem:[#allocation3 + $0x28] sm:$0xff]  ;;  %v2387_v57 = vrot.slane %v2385_v33, 7  ;;  %v3287_v60 = vshrl.u32 %v3223_v26, 16  ;;  %v2999_v51 = vpack.c.bf16 %v2976_v14, %v3199_v54 }
 0x232   : > { %v2380_v29 = vrot.slane %v2378_v52, 7  ;;  %4062 = vmatmul.mubr.bf16.gmra.mrb[20].mxu1 %v3610_v0  ;;  %v3280_v13 = vshrl.u32 %v3222_v1, 16  ;;  %v3283_v22 = vshll.u32 %v3222_v1, 16  ;;  %v3000_v2 = vpack.c.bf16 %v2978_v27, %v3201_v55 }
 0x233   : > { %v2811_v15 = vor.u32 %v2809_v36, %v2808_v56  ;;  %v2390_v9 = vor.u32 %v2388_v62, %v2387_v57  ;;  %v3582_v34 = vsel %vm9184_vm0, %v3552_v53, %v3581_v19  ;;  %v2818_v7 = vor.u32 %v2816_v21, %v2815_v3  ;;  %3015 = vst.msk [vmem:[#allocation3 + $0x150] sm:$0xff] %vm326_vm4, %v2999_v51  ;;  %v2613_v56 = vld [vmem:[#allocation4 + $0x19] sm:$0x7f]  ;;  %v2615_v62 = vld [vmem:[#allocation4 + $0x29] sm:$0x7f] }
 0x234   : > { %v2383_v16 = vor.u32 %v2381_v59, %v2380_v29  ;;  %v3282_v32 = vrot.slane %v3280_v13, 7  ;;  %v3289_v17 = vrot.slane %v3287_v60, 7  ;;  %v3290_v45 = vshll.u32 %v3223_v26, 16  ;;  %3016 = vst.msk [vmem:[#allocation3 + $0x178] sm:$0xff] %vm326_vm4, %v3000_v2  ;;  %3583 = vst [vmem:[#allocation3 + $0x138] sm:$0xff] %v3582_v34  ;;  %v3590_v29 = vld [vmem:[#allocation3 + $0x1b0] sm:$0xff] }
 0x235   : > { %2877 = vrot.lane.b32.xlu0 %v2811_v15, %s8131_s12  ;;  %v2472_v30 = vsel %vm9190_vm3, %v2390_v9, %v9198_v50  ;;  %v2641_v36 = vpack.c.bf16 %v2613_v56, %v9177_v10  ;;  %v2642_v10 = vpack.c.bf16 %v2615_v62, %v9222_v20 }
 0x236   : > { %v2469_v28 = vsel %vm9190_vm3, %v2383_v16, %v9198_v50  ;;  %2473 = vst [vmem:[#allocation3 + $0x190] sm:$0xff] %v2472_v30  ;;  %v3285_v41 = vor.u32 %v3283_v22, %v3282_v32  ;;  %v3292_v23 = vor.u32 %v3290_v45, %v3289_v17  ;;  %v3615_v22 = vld [vmem:[#allocation3 + $0x50] sm:$0xff] }
 0x237   : > { %2470 = vst [vmem:[#allocation3 + $0x168] sm:$0xff] %v2469_v28  ;;  %v7810_v48 = vpop.f32.mrb[4].mxu1  ;;  %v2660_v1 = vsel %vm9184_vm0, %v2641_v36, %v9198_v50  ;;  %v2663_v32 = vsel %vm9184_vm0, %v2642_v10, %v9198_v50 }
 0x238   : > { %v2174_v12 = vadd.f32 %v7810_v48, %v9144_v42  ;;  %v2165_v8 = vpop.f32.mrb[5].mxu1  ;;  %v3372_v24 = vsel %vm9190_vm3, %v3285_v41, %v9198_v50  ;;  %v3375_v53 = vsel %vm9190_vm3, %v3292_v23, %v9198_v50 }
 0x239   : > { %2879 = vrot.lane.b32.xlu0 %v2818_v7, %s8131_s12  ;;  %v2166_v43 = vadd.f32 %v9144_v42, %v2165_v8  ;;  %v7811_v49 = vpop.f32.mrb[6].mxu1  ;;  %3373 = vst [vmem:[#allocation3 + $0x130] sm:$0xff] %v3372_v24  ;;  %3376 = vst [vmem:[#allocation3 + $0x158] sm:$0xff] %v3375_v53 }
 0x23a   : > { %v2234_v35 = vmax.f32 %v2174_v12, 0.0  ;;  %v2177_v61 = vadd.f32 %v7811_v49, %v9144_v42  ;;  %v2168_v38 = vpop.f32.mrb[7].mxu1 }
 0x23b   : > { %v2232_v52 = vmax.f32 %v2166_v43, 0.0  ;;  %v2169_v33 = vadd.f32 %v9144_v42, %v2168_v38  ;;  %v7979_v42 = vld [vmem:[%s11244_s3 + $0x110] sm:$0xff]  }
 0x23c   : > { %2266 = vst.msk [vmem:[#allocation4 + $0xb0] sm:$0xff] %vm326_vm4, %v2234_v35  ;;  %v2235_v54 = vmax.f32 %v2177_v61, 0.0  ;;  %7824 = vmatprep.subr.bf16.mxu1 %v7979_v42 }
 0x23d   : > { %2264 = vst.msk [vmem:[#allocation4 + $0xa0] sm:$0xff] %vm326_vm4, %v2232_v52  ;;  %v2233_v11 = vmax.f32 %v2169_v33, 0.0  ;;  %7825 = vmatpush3.bf16.msra.mxu1 %v7979_v42  ;;  %v9441_v42 = vld [vmem:[%s11243_s2] ss:$0 sm:$0xff] }
 0x23e   : > { %2267 = vst.msk [vmem:[#allocation4 + $0xb8] sm:$0xff] %vm326_vm4, %v2235_v54 }
 0x23f   : > { %2265 = vst.msk [vmem:[#allocation4 + $0xa8] sm:$0xff] %vm326_vm4, %v2233_v11 }
 0x240   : > { %v2554_v55 = vpop.permute.xlu1 %2553 }
 0x241   : > { %2597 = vst.msk [vmem:[#allocation3 + $0x78] sm:$0xff] %vm2594_vm6, %v2554_v55 }
 0x243   : > { %v2511_v19 = vld [vmem:[#allocation4 + $0xb0] sm:$0xff] }
 0x244   : > { %v2556_v59 = vpop.permute.xlu1 %2555  ;;  %v2509_v14 = vld [vmem:[#allocation4 + $0xa0] sm:$0xff]  ;;  %v3205_v10 = vld [vmem:[#allocation4 + $0xb0] sm:$0xff] }
 0x245   : > { %2598 = vst.msk [vmem:[#allocation3 + $0xa0] sm:$0xff] %vm2594_vm6, %v2556_v59  ;;  %v9408_v46 = vld [vmem:[#allocation4 + $0xb1] sm:$0xff]  ;;  %v3536_v0 = vld [vmem:[#allocation4 + $0xb9] sm:$0x7f]  ;;  %v3203_v61 = vld [vmem:[#allocation4 + $0xa0] sm:$0xff] }
 0x246   : > { %v3555_v57 = vpack.c.bf16 %v3536_v0, %v9408_v46  ;;  %v2510_v27 = vld [vmem:[#allocation4 + $0xa8] sm:$0xff]  ;;  %v2724_v16 = vld [vmem:[#allocation4 + $0xb8] sm:$0x7f] }
 0x247   : > { %v2866_v26 = vpop.permute.xlu0 %2865  ;;  %v9417_v3 = vpack.c.bf16 %v2510_v27, %v2509_v14  ;;  %v2722_v21 = vld [vmem:[#allocation4 + $0xa8] sm:$0x7f]  ;;  %v2512_v9 = vld [vmem:[#allocation4 + $0xb8] sm:$0xff]  ;;  %v2744_v60 = vpack.c.bf16 %v2724_v16, %v2511_v19 }
 0x248   : > { %v2918_v15 = vsel %vm9339_vm10, %v2866_v26, %v2660_v1  ;;  %v2743_v13 = vpack.c.bf16 %v2722_v21, %v2509_v14  ;;  %v2297_v51 = vld [vmem:[#allocation4 + $0xa8] sm:$0x7f]  ;;  %v3591_v20 = vsel %vm9184_vm0, %v3555_v57, %v3590_v29  ;;  %v2299_v28 = vld [vmem:[#allocation4 + $0xb8] sm:$0x7f]  ;;  %v9432_v41 = vpack.c.bf16 %v2512_v9, %v2511_v19 }
 0x249   : > { %2919 = vst [vmem:[#allocation3 + $0x58] sm:$0xff] %v2918_v15  ;;  %4069 = vmatprep.mubr.bf16.mxu1 %v2918_v15  ;;  %2569 = vrot.lane.b32.xlu1 %v9417_v3, %s8131_s12  ;;  %v2316_v2 = vpack.c.bf16 %v2297_v51, %v2509_v14  ;;  %3592 = vst [vmem:[#allocation3 + $0x1b0] sm:$0xff] %v3591_v20  ;;  %v2827_v7 = vshrl.u32 %v2744_v60, 16  ;;  %v9426_v17 = vld [vmem:[#allocation4 + $0xa1] sm:$0xff]  ;;  %v9428_v45 = vld [vmem:[#allocation4 + $0xa9] sm:$0x7f]  ;;  %v2317_v8 = vpack.c.bf16 %v2299_v28, %v2511_v19 }
 0x24a   : > { %4070 = vmatmul.mubr.bf16.gmra.mrb[24].mxu1 %v3615_v22  ;;  %v2820_v34 = vshrl.u32 %v2743_v13, 16  ;;  %v3204_v23 = vld [vmem:[#allocation4 + $0xa8] sm:$0x7f]  ;;  %v2823_v49 = vshll.u32 %v2743_v13, 16  ;;  %v2830_v35 = vshll.u32 %v2744_v60, 16  ;;  %v3554_v55 = vpack.c.bf16 %v9428_v45, %v9426_v17  ;;  %v3620_v15 = vld [vmem:[#allocation3 + $0x78] sm:$0xff] }
 0x24b   : > { %v2868_v30 = vpop.permute.xlu0 %2867  ;;  %v2392_v12 = vshrl.u32 %v2316_v2, 16  ;;  %v2829_v24 = vrot.slane %v2827_v7, 7  ;;  %v2395_v53 = vshll.u32 %v2316_v2, 16  ;;  %v2399_v52 = vshrl.u32 %v2317_v8, 16  ;;  %v3206_v54 = vld [vmem:[#allocation4 + $0xb8] sm:$0x7f] }
 0x24c   : > { %v2921_v48 = vsel %vm9339_vm10, %v2868_v30, %v2663_v32  ;;  %v2822_v43 = vrot.slane %v2820_v34, 7  ;;  %v3224_v33 = vpack.c.bf16 %v3204_v23, %v3203_v61  ;;  %v2980_v11 = vld [vmem:[#allocation4 + $0xa8] sm:$0xff]  ;;  %v2402_v62 = vshll.u32 %v2317_v8, 16  ;;  %v2982_v9 = vld [vmem:[#allocation4 + $0xb8] sm:$0xff]  ;;  %v9453_v45 = vld [vmem:[#allocation3] sm:$0xff] }
 0x24d   : > { %2922 = vst [vmem:[#allocation3 + $0x80] sm:$0xff] %v2921_v48  ;;  %4077 = vmatprep.mubr.bf16.mxu1 %v2921_v48  ;;  %2571 = vrot.lane.b32.xlu1 %v9432_v41, %s8131_s12  ;;  %v2394_v38 = vrot.slane %v2392_v12, 7  ;;  %v2832_v59 = vor.u32 %v2830_v35, %v2829_v24  ;;  %v2401_v1 = vrot.slane %v2399_v52, 7  ;;  %v3225_v21 = vpack.c.bf16 %v3206_v54, %v3205_v10  ;;  %v3587_v2 = vld [vmem:[#allocation3 + $0x188] sm:$0xff]  ;;  %v9477_v52 = vld [vmem:[#allocation4 + $0x39] sm:$0x7f] }
 0x24e   : > { %v7814_v56 = vpop.f32.mrb[8].mxu1  ;;  %v2825_v36 = vor.u32 %v2823_v49, %v2822_v43  ;;  %v3294_v26 = vshrl.u32 %v3224_v33, 16  ;;  %v3297_v19 = vshll.u32 %v3224_v33, 16  ;;  %v3001_v16 = vpack.c.bf16 %v2980_v11, %v3203_v61  ;;  %v7980_v61 = vld [vmem:[%s11244_s3 + $0xc0] sm:$0xff]  }
 0x24f   : > { %v2190_v0 = vadd.f32 %v9441_v42, %v7814_v56  ;;  %v2181_v29 = vpop.f32.mrb[9].mxu1  ;;  %v2397_v57 = vor.u32 %v2395_v53, %v2394_v38  ;;  %v2404_v20 = vor.u32 %v2402_v62, %v2401_v1  ;;  %v3301_v34 = vshrl.u32 %v3225_v21, 16  ;;  %v7981_v53 = vld [vmem:[%s11244_s3 + $0x80] sm:$0xff]   ;;  %7406 = vmatprep.subr.bf16.mxu0 %v7980_v61 }
 0x250   : > { %v2182_v14 = vadd.f32 %v9441_v42, %v2181_v29  ;;  %2881 = vrot.lane.b32.xlu0 %v2825_v36, %s8131_s12  ;;  %v7815_v27 = vpop.f32.mrb[10].mxu1  ;;  %v3296_v32 = vrot.slane %v3294_v26, 7  ;;  %3017 = vst.msk [vmem:[#allocation3 + $0x1a0] sm:$0xff] %vm326_vm4, %v3001_v16  ;;  %v3002_v12 = vpack.c.bf16 %v2982_v9, %v3205_v10  ;;  %v3588_v49 = vsel %vm9184_vm0, %v3554_v55, %v3587_v2  ;;  %v3596_v33 = vld [vmem:[#allocation3 + $0x200] sm:$0xff]  ;;  %v7982_v26 = vld [vmem:[%s11244_s3 + $0xc8] sm:$0xff]   ;;  %v7984_v2 = vld [vmem:[%s11244_s3 + $0xd0] sm:$0xff]  }
 0x251   : > { %v2238_v13 = vmax.f32 %v2190_v0, 0.0  ;;  %v2193_v22 = vadd.f32 %v9441_v42, %v7815_v27  ;;  %v2184_v60 = vpop.f32.mrb[11].mxu1  ;;  %v2475_v51 = vsel %vm9190_vm3, %v2397_v57, %v9198_v50  ;;  %v2478_v48 = vsel %vm9190_vm3, %v2404_v20, %v9453_v45  ;;  %3589 = vst [vmem:[#allocation3 + $0x188] sm:$0xff] %v3588_v49  ;;  %7407 = vmatpush3.bf16.msra.mxu0 %v7981_v53  ;;  %v7985_v49 = vld [vmem:[%s11244_s3 + $0x118] sm:$0xff]   ;;  %v2619_v53 = vld [vmem:[#allocation4 + $0x49] sm:$0x7f] }
 0x252   : > { %4078 = vmatmul.mubr.bf16.gmra.mrb[28].mxu1 %v3620_v15  ;;  %v2236_v28 = vmax.f32 %v2182_v14, 0.0  ;;  %v2185_v30 = vadd.f32 %v9441_v42, %v2184_v60  ;;  %2476 = vst [vmem:[#allocation3 + $0x1b8] sm:$0xff] %v2475_v51  ;;  %v3304_v50 = vshll.u32 %v3225_v21, 16  ;;  %2479 = vst [vmem:[#allocation3 + $0x1e0] sm:$0xff] %v2478_v48  ;;  %v3299_v23 = vor.u32 %v3297_v19, %v3296_v32  ;;  %v7983_v21 = vld [vmem:[%s11244_s3 + $0x88] sm:$0xff]  }
 0x253   : > { %2270 = vst.msk [vmem:[#allocation4 + $0xd0] sm:$0xff] %vm326_vm4, %v2238_v13  ;;  %v2239_v7 = vmax.f32 %v2193_v22, 0.0  ;;  %v3303_v43 = vrot.slane %v3301_v34, 7  ;;  %3018 = vst.msk [vmem:[#allocation3 + $0x1c8] sm:$0xff] %vm326_vm4, %v3002_v12  ;;  %v8036_v22 = vld [vmem:[#allocation4 + $0x31] sm:$0xff]  ;;  %7408 = vmatprep.subr.bf16.mxu0 %v7982_v26  ;;  %7826 = vmatprep.subr.bf16.mxu1 %v7985_v49 }
 0x254   : > { %2268 = vst.msk [vmem:[#allocation4 + $0xc0] sm:$0xff] %vm326_vm4, %v2236_v28  ;;  %v2237_v8 = vmax.f32 %v2185_v30, 0.0  ;;  %2883 = vrot.lane.b32.xlu0 %v2832_v59, %s8131_s12  ;;  %v3378_v24 = vsel %vm9190_vm3, %v3299_v23, %v9453_v45  ;;  %v2643_v60 = vpack.c.bf16 %v9477_v52, %v8036_v22  ;;  %7827 = vmatpush3.bf16.msra.mxu1 %v7985_v49  ;;  %v7990_v49 = vld [vmem:[%s11244_s3 + $0xa0] sm:$0xff]  }
 0x255   : > { %2271 = vst.msk [vmem:[#allocation4 + $0xd8] sm:$0xff] %vm326_vm4, %v2239_v7  ;;  %v3306_v35 = vor.u32 %v3304_v50, %v3303_v43  ;;  %3379 = vst [vmem:[#allocation3 + $0x180] sm:$0xff] %v3378_v24  ;;  %7409 = vmatpush3.bf16.msra.mxu0 %v7983_v21  ;;  %v7986_v24 = vld [vmem:[%s11244_s3 + $0x90] sm:$0xff]   ;;  %v2644_v21 = vpack.c.bf16 %v2619_v53, %v9258_v44  ;;  %v7989_v44 = vld [vmem:[%s11244_s3 + $0xe0] sm:$0xff]  }
 0x256   : > { %2269 = vst.msk [vmem:[#allocation4 + $0xc8] sm:$0xff] %vm326_vm4, %v2237_v8  ;;  %7410 = vmatprep.subr.bf16.mxu0 %v7984_v2 }
 0x257   : > { %v3381_v38 = vsel %vm9190_vm3, %v3306_v35, %v9453_v45 }
 0x258   : > { %3382 = vst [vmem:[#allocation3 + $0x1a8] sm:$0xff] %v3381_v38 }
 0x259   : > { %7411 = vmatpush3.bf16.msra.mxu0 %v7986_v24 }
 0x25a   : > { %v2515_v55 = vld [vmem:[#allocation4 + $0xd0] sm:$0xff] }
 0x25b   : > { %v2513_v36 = vld [vmem:[#allocation4 + $0xc0] sm:$0xff] }
 0x25c   : > { %v9479_v54 = vld [vmem:[#allocation4 + $0xd1] sm:$0xff]  ;;  %v3540_v11 = vld [vmem:[#allocation4 + $0xd9] sm:$0x7f] }
 0x25d   : > { %v3557_v56 = vpack.c.bf16 %v3540_v11, %v9479_v54  ;;  %v2514_v59 = vld [vmem:[#allocation4 + $0xc8] sm:$0xff]  ;;  %v2516_v62 = vld [vmem:[#allocation4 + $0xd8] sm:$0xff] }
 0x25e   : > { %v7818_v0 = vpop.f32.mrb[12].mxu1  ;;  %v9482_v29 = vpack.c.bf16 %v2514_v59, %v2513_v36  ;;  %v2726_v57 = vld [vmem:[#allocation4 + $0xc8] sm:$0x7f]  ;;  %v2728_v1 = vld [vmem:[#allocation4 + $0xd8] sm:$0x7f]  ;;  %v9511_v48 = vpack.c.bf16 %v2516_v62, %v2515_v55 }
 0x25f   : > { %v2206_v10 = vadd.f32 %v9441_v42, %v7818_v0  ;;  %v2197_v14 = vpop.f32.mrb[13].mxu1  ;;  %v2745_v15 = vpack.c.bf16 %v2726_v57, %v2513_v36  ;;  %v9488_v19 = vpack.c.bf16 %v2728_v1, %v2515_v55  ;;  %v9495_v16 = vsel %vm9184_vm0, %v3557_v56, %v3596_v33  ;;  %v2301_v51 = vld [vmem:[#allocation4 + $0xc8] sm:$0x7f]  ;;  %v2303_v20 = vld [vmem:[#allocation4 + $0xd8] sm:$0x7f] }
 0x260   : > { %v2558_v27 = vpop.permute.xlu1 %2557  ;;  %v2198_v9 = vadd.f32 %v9441_v42, %v2197_v14  ;;  %v7819_v13 = vpop.f32.mrb[14].mxu1  ;;  %2573 = vrot.lane.b32.xlu1 %v9482_v29, %s8131_s12  ;;  %3598 = vst [vmem:[#allocation3 + $0x200] sm:$0xff] %v9495_v16  ;;  %v9506_v28 = vld [vmem:[#allocation4 + $0xc1] sm:$0xff]  ;;  %v9508_v30 = vld [vmem:[#allocation4 + $0xc9] sm:$0x7f]  ;;  %v2318_v52 = vpack.c.bf16 %v2301_v51, %v2513_v36  ;;  %v7987_v33 = vld [vmem:[%s11244_s3 + $0xd8] sm:$0xff]   ;;  %v2666_v36 = vsel %vm9184_vm0, %v2643_v60, %v9453_v45 }
 0x261   : > { %2599 = vst.msk [vmem:[#allocation3 + $0xc8] sm:$0xff] %vm2594_vm6, %v2558_v27  ;;  %v2242_v32 = vmax.f32 %v2206_v10, 0.0  ;;  %v2209_v34 = vadd.f32 %v9441_v42, %v7819_v13  ;;  %v2200_v7 = vpop.f32.mrb[15].mxu1  ;;  %v2834_v50 = vshrl.u32 %v2745_v15, 16  ;;  %v2837_v23 = vshll.u32 %v2745_v15, 16  ;;  %v3593_v62 = vld [vmem:[#allocation3 + $0x1d8] sm:$0xff]  ;;  %7412 = vmatprep.subr.bf16.mxu0 %v7987_v33 }
 0x262   : > { %v2240_v12 = vmax.f32 %v2198_v9, 0.0  ;;  %v2201_v8 = vadd.f32 %v9441_v42, %v2200_v7  ;;  %v2841_v43 = vshrl.u32 %v9488_v19, 16  ;;  %v2319_v42 = vpack.c.bf16 %v2303_v20, %v2515_v55  ;;  %v3208_v55 = vld [vmem:[#allocation4 + $0xc8] sm:$0x7f]  ;;  %v3210_v59 = vld [vmem:[#allocation4 + $0xd8] sm:$0x7f] }
 0x263   : > { %2274 = vst.msk [vmem:[#allocation4 + $0xf0] sm:$0xff] %vm326_vm4, %v2242_v32  ;;  %v2243_v35 = vmax.f32 %v2209_v34, 0.0  ;;  %v2836_v38 = vrot.slane %v2834_v50, 7  ;;  %v3556_v11 = vpack.c.bf16 %v9508_v30, %v9506_v28  ;;  %v2406_v1 = vshrl.u32 %v2318_v52, 16  ;;  %v7988_v10 = vld [vmem:[%s11244_s3 + $0x98] sm:$0xff]   ;;  %v2984_v14 = vld [vmem:[#allocation4 + $0xc8] sm:$0xff] }
 0x264   : > { %v2560_v61 = vpop.permute.xlu1 %2559  ;;  %2272 = vst.msk [vmem:[#allocation4 + $0xe0] sm:$0xff] %vm326_vm4, %v2240_v12  ;;  %v2241_v56 = vmax.f32 %v2201_v8, 0.0  ;;  %2575 = vrot.lane.b32.xlu1 %v9511_v48, %s8131_s12  ;;  %v2843_v57 = vrot.slane %v2841_v43, 7  ;;  %v2413_v26 = vshrl.u32 %v2319_v42, 16  ;;  %v2986_v27 = vld [vmem:[#allocation4 + $0xd8] sm:$0xff]  ;;  %v2844_v9 = vshll.u32 %v9488_v19, 16  ;;  %7413 = vmatpush3.bf16.msra.mxu0 %v7988_v10 }
 0x265   : > { %2600 = vst.msk [vmem:[#allocation3 + $0xf0] sm:$0xff] %vm2594_vm6, %v2560_v61  ;;  %v2839_v0 = vor.u32 %v2837_v23, %v2836_v38  ;;  %v2409_v13 = vshll.u32 %v2318_v52, 16  ;;  %v2416_v22 = vshll.u32 %v2319_v42, 16  ;;  %v3207_v60 = vld [vmem:[#allocation4 + $0xc0] sm:$0xff]  ;;  %v2408_v20 = vrot.slane %v2406_v1, 7  ;;  %v3209_v32 = vld [vmem:[#allocation4 + $0xd0] sm:$0xff]  ;;  %7414 = vmatprep.subr.bf16.mxu0 %v7989_v44 }
 0x266   : > { %2275 = vst.msk [vmem:[#allocation4 + $0xf8] sm:$0xff] %vm326_vm4, %v2243_v35  ;;  %2273 = vst.msk [vmem:[#allocation4 + $0xe8] sm:$0xff] %vm326_vm4, %v2241_v56  ;;  %v2415_v2 = vrot.slane %v2413_v26, 7  ;;  %v3226_v30 = vpack.c.bf16 %v3208_v55, %v3207_v60  ;;  %v3625_v34 = vld [vmem:[#allocation3 + $0xa0] sm:$0xff]  ;;  %v3227_v19 = vpack.c.bf16 %v3210_v59, %v3209_v32  ;;  %v3003_v7 = vpack.c.bf16 %v2984_v14, %v3207_v60  ;;  %v3602_v44 = vld [vmem:[#allocation3 + $0x250] sm:$0xff] }
 0x267   : > { %v2870_v15 = vpop.permute.xlu0 %2869  ;;  %2885 = vrot.lane.b32.xlu0 %v2839_v0, %s8131_s12  ;;  %v3004_v50 = vpack.c.bf16 %v2986_v27, %v3209_v32  ;;  %v9549_v12 = vsel %vm9184_vm0, %v3556_v11, %v3593_v62  ;;  %v2846_v8 = vor.u32 %v2844_v9, %v2843_v57  ;;  %v2411_v23 = vor.u32 %v2409_v13, %v2408_v20  ;;  %v3599_v20 = vld [vmem:[#allocation3 + $0x228] sm:$0xff] }
 0x268   : > { %v2924_v51 = vsel %vm9339_vm10, %v2870_v15, %v2666_v36  ;;  %v2418_v43 = vor.u32 %v2416_v22, %v2415_v2  ;;  %v3308_v24 = vshrl.u32 %v3226_v30, 16  ;;  %3595 = vst [vmem:[#allocation3 + $0x1d8] sm:$0xff] %v9549_v12  ;;  %v2669_v35 = vsel %vm9184_vm0, %v2644_v21, %v9453_v45  ;;  %3019 = vst.msk [vmem:[#allocation3 + $0x1f0] sm:$0xff] %vm326_vm4, %v3003_v7  ;;  %v3396_v36 = vld [vmem:[#allocation4 + $0x18] sm:$0xff]  ;;  %v3630_v2 = vld [vmem:[#allocation3 + $0xc8] sm:$0xff] }
 0x269   : > { %2925 = vst [vmem:[#allocation3 + $0xa8] sm:$0xff] %v2924_v51  ;;  %4085 = vmatprep.mubr.bf16.mxu1 %v2924_v51  ;;  %v3311_v38 = vshll.u32 %v3226_v30, 16  ;;  %v3315_v53 = vshrl.u32 %v3227_v19, 16  ;;  %3020 = vst.msk [vmem:[#allocation3 + $0x218] sm:$0xff] %vm326_vm4, %v3004_v50  ;;  %v2481_v42 = vsel %vm9190_vm3, %v2411_v23, %v9453_v45  ;;  %v3318_v0 = vshll.u32 %v3227_v19, 16  ;;  %7415 = vmatpush3.bf16.msra.mxu0 %v7990_v49  ;;  %v7991_v32 = vld [vmem:[%s11244_s3 + $0xe8] sm:$0xff]  }
 0x26a   : > { %4086 = vmatmul.mubr.bf16.gmra.mrb[32].mxu1 %v3625_v34  ;;  %v2484_v33 = vsel %vm9190_vm3, %v2418_v43, %v9453_v45  ;;  %v3310_v11 = vrot.slane %v3308_v24, 7  ;;  %v9569_v55 = vld [vmem:[#allocation4 + $0xf0] sm:$0xff]  ;;  %2482 = vst [vmem:[#allocation3 + $0x208] sm:$0xff] %v2481_v42  ;;  %v7992_v43 = vld [vmem:[%s11244_s3 + $0xa8] sm:$0xff]   ;;  %7416 = vmatprep.subr.bf16.mxu0 %v7991_v32  ;;  %v3400_v32 = vld [vmem:[#allocation4 + $0x38] sm:$0xff] }
 0x26b   : > { %v2872_v61 = vpop.permute.xlu0 %2871  ;;  %2887 = vrot.lane.b32.xlu0 %v2846_v8, %s8131_s12  ;;  %v2517_v56 = vld [vmem:[#allocation4 + $0xe0] sm:$0xff]  ;;  %2485 = vst [vmem:[#allocation3 + $0x230] sm:$0xff] %v2484_v33  ;;  %v3317_v62 = vrot.slane %v3315_v53, 7  ;;  %v8037_v7 = vld [vmem:[#allocation4 + $0x10] sm:$0xff] }
 0x26c   : > { %v2927_v52 = vsel %vm9339_vm10, %v2872_v61, %v2669_v35  ;;  %v3313_v14 = vor.u32 %v3311_v38, %v3310_v11  ;;  %v3425_v50 = vpack.c.bf16 %v3396_v36, %v8037_v7  ;;  %v7993_v49 = vld [vmem:[%s11244_s3 + $0xf0] sm:$0xff]  }
 0x26d   : > { %2928 = vst [vmem:[#allocation3 + $0xd0] sm:$0xff] %v2927_v52  ;;  %4093 = vmatprep.mubr.bf16.mxu1 %v2927_v52  ;;  %v2732_v59 = vld [vmem:[#allocation4 + $0xf8] sm:$0x7f]  ;;  %v9571_v57 = vld [vmem:[#allocation4 + $0xe1] sm:$0xff]  ;;  %v3542_v1 = vld [vmem:[#allocation4 + $0xe9] sm:$0x7f]  ;;  %v3320_v22 = vor.u32 %v3318_v0, %v3317_v62  ;;  %7417 = vmatpush3.bf16.msra.mxu0 %v7992_v43 }
 0x26e   : > { %v2518_v26 = vld [vmem:[#allocation4 + $0xe8] sm:$0xff]  ;;  %v9574_v10 = vpack.c.bf16 %v2732_v59, %v9569_v55  ;;  %v9576_v27 = vld [vmem:[#allocation4 + $0xf1] sm:$0xff]  ;;  %v3544_v15 = vld [vmem:[#allocation4 + $0xf9] sm:$0x7f]  ;;  %v3558_v21 = vpack.c.bf16 %v3542_v1, %v9571_v57  ;;  %v3384_v34 = vsel %vm9190_vm3, %v3313_v14, %v9453_v45  ;;  %7418 = vmatprep.subr.bf16.mxu0 %v7993_v49 }
 0x26f   : > { %v9579_v9 = vpack.c.bf16 %v2518_v26, %v2517_v56  ;;  %v2730_v13 = vld [vmem:[#allocation4 + $0xe8] sm:$0x7f]  ;;  %v3559_v19 = vpack.c.bf16 %v3544_v15, %v9576_v27  ;;  %3385 = vst [vmem:[#allocation3 + $0x1d0] sm:$0xff] %v3384_v34  ;;  %v3213_v24 = vld [vmem:[#allocation4 + $0xf0] sm:$0xff]  ;;  %v3387_v53 = vsel %vm9190_vm3, %v3320_v22, %v9453_v45  ;;  %v3211_v52 = vld [vmem:[#allocation4 + $0xe0] sm:$0xff] }
 0x270   : > { %v2747_v60 = vpack.c.bf16 %v2730_v13, %v2517_v56  ;;  %v2305_v51 = vld [vmem:[#allocation4 + $0xe8] sm:$0x7f]  ;;  %v2855_v23 = vshrl.u32 %v9574_v10, 16  ;;  %v7994_v38 = vld [vmem:[%s11244_s3 + $0xb0] sm:$0xff]   ;;  %v9605_v33 = vsel %vm9184_vm0, %v3558_v21, %v3599_v20  ;;  %3388 = vst [vmem:[#allocation3 + $0x1f8] sm:$0xff] %v3387_v53  ;;  %v2990_v0 = vld [vmem:[#allocation4 + $0xf8] sm:$0xff] }
 0x271   : > { %2577 = vrot.lane.b32.xlu1 %v9579_v9, %s8131_s12  ;;  %v2320_v30 = vpack.c.bf16 %v2305_v51, %v2517_v56  ;;  %v3212_v42 = vld [vmem:[#allocation4 + $0xe8] sm:$0x7f]  ;;  %v3214_v59 = vld [vmem:[#allocation4 + $0xf8] sm:$0x7f]  ;;  %3601 = vst [vmem:[#allocation3 + $0x228] sm:$0xff] %v9605_v33  ;;  %v3006_v15 = vpack.c.bf16 %v2990_v0, %v3213_v24  ;;  %v9614_v51 = vsel %vm9184_vm0, %v3559_v19, %v3602_v44  ;;  %v8038_v43 = vld [vmem:[#allocation4 + $0x30] sm:$0xff] }
 0x272   : > { %v2848_v8 = vshrl.u32 %v2747_v60, 16  ;;  %4094 = vmatmul.mubr.bf16.gmra.mrb[36].mxu1 %v3630_v2  ;;  %v2851_v35 = vshll.u32 %v2747_v60, 16  ;;  %v3228_v36 = vpack.c.bf16 %v3212_v42, %v3211_v52  ;;  %v2988_v62 = vld [vmem:[#allocation4 + $0xe8] sm:$0xff]  ;;  %v3229_v26 = vpack.c.bf16 %v3214_v59, %v3213_v24  ;;  %v7995_v22 = vld [vmem:[%s11244_s3 + $0xf8] sm:$0xff]   ;;  %3604 = vst [vmem:[#allocation3 + $0x250] sm:$0xff] %v9614_v51  ;;  %7419 = vmatpush3.bf16.msra.mxu0 %v7994_v38 }
 0x273   : > { %v2420_v61 = vshrl.u32 %v2320_v30, 16  ;;  %v2423_v56 = vshll.u32 %v2320_v30, 16  ;;  %v3005_v14 = vpack.c.bf16 %v2988_v62, %v3211_v52  ;;  %v2857_v21 = vrot.slane %v2855_v23, 7  ;;  %3022 = vst.msk [vmem:[#allocation3 + $0x268] sm:$0xff] %vm326_vm4, %v3006_v15  ;;  %v7996_v34 = vld [vmem:[%s11244_s3 + $0xb8] sm:$0xff]   ;;  %7420 = vmatprep.subr.bf16.mxu0 %v7995_v22  ;;  %v8039_v62 = vld [vmem:[#allocation4 + $0x50] sm:$0xff] }
 0x274   : > { %v2850_v11 = vrot.slane %v2848_v8, 7  ;;  %v3322_v60 = vshrl.u32 %v3228_v36, 16  ;;  %v3329_v2 = vshrl.u32 %v3229_v26, 16  ;;  %v2858_v30 = vshll.u32 %v9574_v10, 16  ;;  %v3024_v24 = vld [vmem:[#allocation4 + $0x9] sm:$0x7f] }
 0x275   : > { %3455 = vrot.lane.b32.xlu1 %v3425_v50, %s8131_s12  ;;  %v2422_v1 = vrot.slane %v2420_v61, 7  ;;  %3021 = vst.msk [vmem:[#allocation3 + $0x240] sm:$0xff] %vm326_vm4, %v3005_v14  ;;  %v3325_v19 = vshll.u32 %v3228_v36, 16  ;;  %v3332_v8 = vshll.u32 %v3229_v26, 16  ;;  %v3427_v49 = vpack.c.bf16 %v3400_v32, %v8038_v43  ;;  %v3025_v53 = vld [vmem:[#allocation4 + $0x11] sm:$0xff]  ;;  %v3027_v26 = vld [vmem:[#allocation4 + $0x21] sm:$0xff] }
 0x276   : > { %v2853_v13 = vor.u32 %v2851_v35, %v2850_v11  ;;  %v3324_v44 = vrot.slane %v3322_v60, 7  ;;  %v3331_v50 = vrot.slane %v3329_v2, 7  ;;  %v2860_v23 = vor.u32 %v2858_v30, %v2857_v21  ;;  %7421 = vmatpush3.bf16.msra.mxu0 %v7996_v34  ;;  %v3026_v52 = vld [vmem:[#allocation4 + $0x19] sm:$0x7f]  ;;  %v2623_v15 = vld [vmem:[#allocation4 + $0x69] sm:$0x7f] }
 0x277   : > { %v2425_v20 = vor.u32 %v2423_v56, %v2422_v1  ;;  %v3055_v38 = vpack.c.bf16 %v3024_v24, %v9330_v5  ;;  %v3404_v11 = vld [vmem:[#allocation4 + $0x58] sm:$0xff]  ;;  %v3056_v59 = vpack.c.bf16 %v3026_v52, %v3025_v53  ;;  %v3028_v5 = vld [vmem:[#allocation4 + $0x29] sm:$0x7f]  ;;  %v8040_v22 = vld [vmem:[#allocation4 + $0x61] sm:$0xff] }
 0x278   : > { %2889 = vrot.lane.b32.xlu0 %v2853_v13, %s8131_s12  ;;  %v3327_v10 = vor.u32 %v3325_v19, %v3324_v44  ;;  %v3334_v35 = vor.u32 %v3332_v8, %v3331_v50  ;;  %v2620_v56 = vld [vmem:[#allocation4 + $0x51] sm:$0xff]  ;;  %v2621_v36 = vld [vmem:[#allocation4 + $0x59] sm:$0x7f]  ;;  %v3429_v0 = vpack.c.bf16 %v3404_v11, %v8039_v62  ;;  %v3057_v13 = vpack.c.bf16 %v3028_v5, %v3027_v26  ;;  %v3032_v50 = vld [vmem:[#allocation4 + $0x49] sm:$0x7f] }
 0x279   : > { %3457 = vrot.lane.b32.xlu1 %v9225_v58, %s8131_s12  ;;  %v2487_v7 = vsel %vm9190_vm3, %v2425_v20, %v9453_v45  ;;  %v2645_v1 = vpack.c.bf16 %v2621_v36, %v2620_v56  ;;  %v2646_v60 = vpack.c.bf16 %v2623_v15, %v8040_v22  ;;  %v3029_v20 = vld [vmem:[#allocation4 + $0x31] sm:$0xff]  ;;  %v3030_v2 = vld [vmem:[#allocation4 + $0x39] sm:$0x7f]  ;;  %v3036_v24 = vld [vmem:[#allocation4 + $0x69] sm:$0x7f] }
 0x27a   : > { %2488 = vst [vmem:[#allocation3 + $0x258] sm:$0xff] %v2487_v7  ;;  %v3390_v58 = vsel %vm9190_vm3, %v3327_v10, %v9453_v45  ;;  %v3393_v61 = vsel %vm9190_vm3, %v3334_v35, %v9453_v45  ;;  %v3635_v32 = vld [vmem:[#allocation3 + $0xf0] sm:$0xff]  ;;  %v3058_v34 = vpack.c.bf16 %v3030_v2, %v3029_v20  ;;  %v3031_v7 = vld [vmem:[#allocation4 + $0x41] sm:$0xff]  ;;  %v3042_v53 = vld [vmem:[#allocation4 + $0x99] sm:$0x7f] }
 0x27b   : > { %3391 = vst [vmem:[#allocation3 + $0x220] sm:$0xff] %v3390_v58  ;;  %3394 = vst [vmem:[#allocation3 + $0x248] sm:$0xff] %v3393_v61  ;;  %v2672_v21 = vsel %vm9184_vm0, %v2645_v1, %v9453_v45  ;;  %v2675_v44 = vsel %vm9184_vm0, %v2646_v60, %v9453_v45  ;;  %v3038_v58 = vld [vmem:[#allocation4 + $0x79] sm:$0x7f]  ;;  %v3044_v11 = vld [vmem:[#allocation4 + $0xa9] sm:$0x7f] }
 0x27c   : > { %2891 = vrot.lane.b32.xlu0 %v2860_v23, %s8131_s12  ;;  %v3034_v23 = vld [vmem:[#allocation4 + $0x59] sm:$0x7f]  ;;  %v2627_v36 = vld [vmem:[#allocation4 + $0x89] sm:$0x7f] }
 0x27d   : > { %3459 = vrot.lane.b32.xlu1 %v3427_v49, %s8131_s12  ;;  %v3060_v43 = vpack.c.bf16 %v3034_v23, %v2620_v56  ;;  %v3035_v49 = vld [vmem:[#allocation4 + $0x61] sm:$0xff]  ;;  %v2625_v52 = vld [vmem:[#allocation4 + $0x79] sm:$0x7f] }
 0x27e   : > { %v3061_v35 = vpack.c.bf16 %v3036_v24, %v3035_v49  ;;  %v3046_v62 = vld [vmem:[#allocation4 + $0xb9] sm:$0x7f]  ;;  %v2632_v49 = vld [vmem:[#allocation4 + $0xb1] sm:$0xff] }
 0x27f   : > { %v3424_v1 = vld [vmem:[#allocation4 + $0xf8] sm:$0xff]  ;;  %v3066_v26 = vpack.c.bf16 %v3046_v62, %v9408_v46 }
 0x280   : > { %3087 = vrot.lane.b32.xlu0 %v3055_v38, %s8131_s12  ;;  %v2562_v42 = vpop.permute.xlu1 %2561  ;;  %v3439_v15 = vpack.c.bf16 %v3424_v1, %v9569_v55  ;;  %v3052_v55 = vld [vmem:[#allocation4 + $0xe9] sm:$0x7f]  ;;  %v3054_v20 = vld [vmem:[#allocation4 + $0xf9] sm:$0x7f] }
 0x281   : > { %2601 = vst.msk [vmem:[#allocation3 + $0x118] sm:$0xff] %vm2594_vm6, %v2562_v42  ;;  %3461 = vrot.lane.b32.xlu1 %v9261_v63, %s8131_s12  ;;  %v3069_v60 = vpack.c.bf16 %v3052_v55, %v9571_v57  ;;  %v3070_v2 = vpack.c.bf16 %v3054_v20, %v9576_v27  ;;  %v2633_v24 = vld [vmem:[#allocation4 + $0xb9] sm:$0x7f] }
 0x282   : > { %v3139_v20 = vld [vmem:[#allocation3 + $0x38] sm:$0xff] }
 0x284   : > { %3089 = vrot.lane.b32.xlu0 %v3056_v59, %s8131_s12  ;;  %v2564_v14 = vpop.permute.xlu1 %2563 }
 0x285   : > { %2602 = vst.msk [vmem:[#allocation3 + $0x140] sm:$0xff] %vm2594_vm6, %v2564_v14  ;;  %3463 = vrot.lane.b32.xlu1 %v3429_v0, %s8131_s12 }
 0x287   : > { %v2874_v63 = vpop.permute.xlu0 %2873 }
 0x288   : > { %v2930_v30 = vsel %vm9339_vm10, %v2874_v63, %v2672_v21  ;;  %3091 = vrot.lane.b32.xlu0 %v3057_v13, %s8131_s12  ;;  %v3640_v10 = vld [vmem:[#allocation3 + $0x118] sm:$0xff]  ;;  %v3048_v13 = vld [vmem:[#allocation4 + $0xc9] sm:$0x7f] }
 0x289   : > { %2931 = vst [vmem:[#allocation3 + $0xf8] sm:$0xff] %v2930_v30  ;;  %3465 = vrot.lane.b32.xlu1 %v9300_v31, %s8131_s12  ;;  %4101 = vmatprep.mubr.bf16.mxu1 %v2930_v30  ;;  %v3059_v31 = vpack.c.bf16 %v3032_v50, %v3031_v7  ;;  %v3067_v46 = vpack.c.bf16 %v3048_v13, %v9506_v28 }
 0x28a   : > { %4102 = vmatmul.mubr.bf16.gmra.mrb[40].mxu1 %v3635_v32  ;;  %v2628_v32 = vld [vmem:[#allocation4 + $0x91] sm:$0xff] }
 0x28b   : > { %v2876_v19 = vpop.permute.xlu0 %2875 }
 0x28c   : > { %v2933_v8 = vsel %vm9339_vm10, %v2876_v19, %v2675_v44  ;;  %3093 = vrot.lane.b32.xlu0 %v3058_v34, %s8131_s12  ;;  %v2629_v34 = vld [vmem:[#allocation4 + $0x99] sm:$0x7f]  ;;  %v2631_v19 = vld [vmem:[#allocation4 + $0xa9] sm:$0x7f] }
 0x28d   : > { %2934 = vst [vmem:[#allocation3 + $0x120] sm:$0xff] %v2933_v8  ;;  %3467 = vrot.lane.b32.xlu1 %v9308_v18, %s8131_s12  ;;  %4109 = vmatprep.mubr.bf16.mxu1 %v2933_v8  ;;  %v3037_v18 = vld [vmem:[#allocation4 + $0x71] sm:$0xff]  ;;  %v2649_v44 = vpack.c.bf16 %v2629_v34, %v2628_v32  ;;  %v2650_v50 = vpack.c.bf16 %v2631_v19, %v9426_v17 }
 0x28e   : > { %v3062_v61 = vpack.c.bf16 %v3038_v58, %v3037_v18  ;;  %v2647_v42 = vpack.c.bf16 %v2625_v52, %v3037_v18  ;;  %v2635_v58 = vld [vmem:[#allocation4 + $0xc9] sm:$0x7f] }
 0x28f   : > { %v2684_v57 = vsel %vm9184_vm0, %v2649_v44, %v9453_v45  ;;  %v3142_v44 = vld [vmem:[#allocation3 + $0x60] sm:$0xff] }
 0x290   : > { %3095 = vrot.lane.b32.xlu0 %v3059_v31, %s8131_s12  ;;  %v2687_v31 = vsel %vm9184_vm0, %v2650_v50, %v9453_v45  ;;  %v3614_v50 = vld [vmem:[#allocation3 + $0x48] sm:$0xff] }
 0x291   : > { %3469 = vrot.lane.b32.xlu1 %v9364_v37, %s8131_s12  ;;  %v3040_v37 = vld [vmem:[#allocation4 + $0x89] sm:$0x7f] }
 0x292   : > { %4110 = vmatmul.mubr.bf16.gmra.mrb[44].mxu1 %v3640_v10  ;;  %v3063_v38 = vpack.c.bf16 %v3040_v37, %v9362_v25  ;;  %v3065_v25 = vpack.c.bf16 %v3044_v11, %v9426_v17 }
 0x294   : > { %3097 = vrot.lane.b32.xlu0 %v3060_v43, %s8131_s12 }
 0x295   : > { %3471 = vrot.lane.b32.xlu1 %v9372_v40, %s8131_s12 }
 0x298   : > { %3099 = vrot.lane.b32.xlu0 %v3061_v35, %s8131_s12  ;;  %v2651_v35 = vpack.c.bf16 %v2633_v24, %v2632_v49 }
 0x299   : > { %3473 = vrot.lane.b32.xlu1 %v9417_v3, %s8131_s12  ;;  %v3064_v3 = vpack.c.bf16 %v3042_v53, %v9357_v4 }
 0x29c   : > { %3101 = vrot.lane.b32.xlu0 %v3062_v61, %s8131_s12  ;;  %v2690_v61 = vsel %vm9184_vm0, %v2651_v35, %v9453_v45 }
 0x29d   : > { %3475 = vrot.lane.b32.xlu1 %v9432_v41, %s8131_s12  ;;  %v2626_v41 = vld [vmem:[#allocation4 + $0x81] sm:$0xff] }
 0x29e   : > { %v2648_v4 = vpack.c.bf16 %v2627_v36, %v2626_v41 }
 0x29f   : > { %v2566_v40 = vpop.permute.xlu1 %2565 }
 0x2a0   : > { %3103 = vrot.lane.b32.xlu0 %v3063_v38, %s8131_s12  ;;  %2603 = vst.msk [vmem:[#allocation3 + $0x168] sm:$0xff] %vm2594_vm6, %v2566_v40  ;;  %v2681_v5 = vsel %vm9184_vm0, %v2648_v4, %v9453_v45  ;;  %v2652_v38 = vpack.c.bf16 %v2635_v58, %v9506_v28  ;;  %v2637_v28 = vld [vmem:[#allocation4 + $0xd9] sm:$0x7f]  ;;  %v3148_v58 = vld [vmem:[#allocation3 + $0xb0] sm:$0xff] }
 0x2a1   : > { %3477 = vrot.lane.b32.xlu1 %v9482_v29, %s8131_s12  ;;  %v2678_v29 = vsel %vm9184_vm0, %v2647_v42, %v9453_v45 }
 0x2a2   : > { %v2693_v52 = vsel %vm9184_vm0, %v2652_v38, %v9453_v45 }
 0x2a3   : > { %v2568_v56 = vpop.permute.xlu1 %2567 }
 0x2a4   : > { %3105 = vrot.lane.b32.xlu0 %v3064_v3, %s8131_s12  ;;  %2604 = vst.msk [vmem:[#allocation3 + $0x190] sm:$0xff] %vm2594_vm6, %v2568_v56  ;;  %v2636_v56 = vld [vmem:[#allocation4 + $0xd1] sm:$0xff] }
 0x2a5   : > { %3479 = vrot.lane.b32.xlu1 %v9511_v48, %s8131_s12  ;;  %v3645_v48 = vld [vmem:[#allocation3 + $0x140] sm:$0xff]  ;;  %v2653_v36 = vpack.c.bf16 %v2637_v28, %v2636_v56 }
 0x2a7   : > { %v2878_v59 = vpop.permute.xlu0 %2877  ;;  %v3650_v63 = vld [vmem:[#allocation3 + $0x168] sm:$0xff]  ;;  %v2696_v4 = vsel %vm9184_vm0, %v2653_v36, %v9453_v45 }
 0x2a8   : > { %v2936_v0 = vsel %vm9339_vm10, %v2878_v59, %v2678_v29  ;;  %3107 = vrot.lane.b32.xlu0 %v3065_v25, %s8131_s12  ;;  %v2638_v29 = vld [vmem:[#allocation4 + $0xe1] sm:$0xff]  ;;  %v2639_v59 = vld [vmem:[#allocation4 + $0xe9] sm:$0x7f] }
 0x2a9   : > { %2937 = vst [vmem:[#allocation3 + $0x148] sm:$0xff] %v2936_v0  ;;  %3481 = vrot.lane.b32.xlu1 %v9579_v9, %s8131_s12  ;;  %4117 = vmatprep.mubr.bf16.mxu1 %v2936_v0  ;;  %v3050_v9 = vld [vmem:[#allocation4 + $0xd9] sm:$0x7f]  ;;  %v2654_v0 = vpack.c.bf16 %v2639_v59, %v2638_v29  ;;  %v3154_v59 = vld [vmem:[#allocation3 + $0x100] sm:$0xff] }
 0x2aa   : > { %4118 = vmatmul.mubr.bf16.gmra.mrb[48].mxu1 %v3645_v48  ;;  %v3068_v22 = vpack.c.bf16 %v3050_v9, %v9479_v54 }
 0x2ab   : > { %v2880_v14 = vpop.permute.xlu0 %2879  ;;  %v3655_v8 = vld [vmem:[#allocation3 + $0x190] sm:$0xff] }
 0x2ac   : > { %v2939_v21 = vsel %vm9339_vm10, %v2880_v14, %v2681_v5  ;;  %3109 = vrot.lane.b32.xlu0 %v3066_v26, %s8131_s12  ;;  %v2699_v5 = vsel %vm9184_vm0, %v2654_v0, %v9453_v45 }
 0x2ad   : > { %2940 = vst [vmem:[#allocation3 + $0x170] sm:$0xff] %v2939_v21  ;;  %3483 = vrot.lane.b32.xlu1 %v3439_v15, %s8131_s12  ;;  %4125 = vmatprep.mubr.bf16.mxu1 %v2939_v21 }
 0x2b0   : > { %3111 = vrot.lane.b32.xlu0 %v3067_v46, %s8131_s12  ;;  %v11278_v46 = vmov 0 }
 0x2b1   : > { %v11279_v46 = vsel %vm9750_vm2, 4294967295, %v11278_v46 }
 0x2b2   : > { %4126 = vmatmul.mubr.bf16.gmra.mrb[52].mxu1 %v3650_v63  ;;  %11280 = vst [vmem:[#allocation10_spill] sm:$0xff] %v11279_v46  ;;  %v3136_v63 = vld [vmem:[#allocation3 + $0x10] sm:$0xff] }
 0x2b4   : > { %3113 = vrot.lane.b32.xlu0 %v3068_v22, %s8131_s12 }
 0x2b8   : > { %3115 = vrot.lane.b32.xlu0 %v3069_v60, %s8131_s12 }
 0x2bb   : > { %v2570_v30 = vpop.permute.xlu1 %2569 }
 0x2bc   : > { %3117 = vrot.lane.b32.xlu0 %v3070_v2, %s8131_s12  ;;  %2605 = vst.msk [vmem:[#allocation3 + $0x1b8] sm:$0xff] %vm2594_vm6, %v2570_v30  ;;  %v8041_v30 = vld [vmem:[#allocation3 + $0x20] sm:$0xff] }
 0x2bf   : > { %v2572_v54 = vpop.permute.xlu1 %2571 }
 0x2c0   : > { %2606 = vst.msk [vmem:[#allocation3 + $0x1e0] sm:$0xff] %vm2594_vm6, %v2572_v54 }
 0x2c2   : > { %v2882_v7 = vpop.permute.xlu0 %2881 }
 0x2c3   : > { %v2942_v27 = vsel %vm9339_vm10, %v2882_v7, %v2684_v57  ;;  %v3660_v43 = vld [vmem:[#allocation3 + $0x1b8] sm:$0xff] }
 0x2c4   : > { %2943 = vst [vmem:[#allocation3 + $0x198] sm:$0xff] %v2942_v27  ;;  %4133 = vmatprep.mubr.bf16.mxu1 %v2942_v27 }
 0x2c5   : > { %4134 = vmatmul.mubr.bf16.gmra.mrb[56].mxu1 %v3655_v8 }
 0x2c6   : > { %v2884_v23 = vpop.permute.xlu0 %2883 }
 0x2c7   : > { %v2945_v10 = vsel %vm9339_vm10, %v2884_v23, %v2687_v31  ;;  %v3665_v40 = vld [vmem:[#allocation3 + $0x1e0] sm:$0xff]  ;;  %v3145_v31 = vld [vmem:[#allocation3 + $0x88] sm:$0xff] }
 0x2c8   : > { %2946 = vst [vmem:[#allocation3 + $0x1c0] sm:$0xff] %v2945_v10  ;;  %4141 = vmatprep.mubr.bf16.mxu1 %v2945_v10  ;;  %v8042_v10 = vld [vmem:[#allocation3 + $0x70] sm:$0xff] }
 0x2cd   : > { %4142 = vmatmul.mubr.bf16.gmra.mrb[60].mxu1 %v3660_v43 }
 0x2d2   : > { %v2574_v17 = vpop.permute.xlu1 %2573 }
 0x2d3   : > { %2607 = vst.msk [vmem:[#allocation3 + $0x208] sm:$0xff] %vm2594_vm6, %v2574_v17 }
 0x2d6   : > { %v2576_v18 = vpop.permute.xlu1 %2575 }
 0x2d7   : > { %2608 = vst.msk [vmem:[#allocation3 + $0x230] sm:$0xff] %vm2594_vm6, %v2576_v18 }
 0x2d9   : > { %v2886_v37 = vpop.permute.xlu0 %2885 }
 0x2da   : > { %v2948_v53 = vsel %vm9339_vm10, %v2886_v37, %v2690_v61  ;;  %v3670_v41 = vld [vmem:[#allocation3 + $0x208] sm:$0xff] }
 0x2db   : > { %2949 = vst [vmem:[#allocation3 + $0x1e8] sm:$0xff] %v2948_v53  ;;  %4149 = vmatprep.mubr.bf16.mxu1 %v2948_v53 }
 0x2dc   : > { %4150 = vmatmul.mubr.bf16.gmra.mrb[64].mxu1 %v3665_v40  ;;  %v8043_v40 = vld [vmem:[#allocation3 + $0x98] sm:$0xff] }
 0x2dd   : > { %v2888_v3 = vpop.permute.xlu0 %2887 }
 0x2de   : > { %v2951_v42 = vsel %vm9339_vm10, %v2888_v3, %v2693_v52  ;;  %v3675_v26 = vld [vmem:[#allocation3 + $0x230] sm:$0xff]  ;;  %v3151_v52 = vld [vmem:[#allocation3 + $0xd8] sm:$0xff] }
 0x2df   : > { %2952 = vst [vmem:[#allocation3 + $0x210] sm:$0xff] %v2951_v42  ;;  %4157 = vmatprep.mubr.bf16.mxu1 %v2951_v42 }
 0x2e3   : > { %v2578_v11 = vpop.permute.xlu1 %2577 }
 0x2e4   : > { %2609 = vst.msk [vmem:[#allocation3 + $0x258] sm:$0xff] %vm2594_vm6, %v2578_v11  ;;  %4158 = vmatmul.mubr.bf16.gmra.mrb[68].mxu1 %v3670_v41  ;;  %v8044_v11 = vld [vmem:[#allocation3 + $0xc0] sm:$0xff] }
 0x2e7   : > { %v3456_v25 = vpop.permute.xlu1 %3455 }
 0x2e8   : > { %3500 = vst.msk [vmem:[#allocation3 + $0x18] sm:$0xff] %vm2594_vm6, %v3456_v25 }
 0x2ea   : > { %v2890_v62 = vpop.permute.xlu0 %2889 }
 0x2eb   : > { %v2954_v1 = vsel %vm9339_vm10, %v2890_v62, %v2696_v4  ;;  %v3458_v48 = vpop.permute.xlu1 %3457  ;;  %v3680_v60 = vld [vmem:[#allocation3 + $0x258] sm:$0xff] }
 0x2ec   : > { %2955 = vst [vmem:[#allocation3 + $0x238] sm:$0xff] %v2954_v1  ;;  %3501 = vst.msk [vmem:[#allocation3 + $0x40] sm:$0xff] %vm2594_vm6, %v3458_v48  ;;  %4165 = vmatprep.mubr.bf16.mxu1 %v2954_v1 }
 0x2ed   : > { %4166 = vmatmul.mubr.bf16.gmra.mrb[72].mxu1 %v3675_v26  ;;  %v8045_v26 = vld [vmem:[#allocation3 + $0xe8] sm:$0xff] }
 0x2ee   : > { %v2892_v14 = vpop.permute.xlu0 %2891 }
 0x2ef   : > { %v2957_v15 = vsel %vm9339_vm10, %v2892_v14, %v2699_v5  ;;  %v3460_v13 = vpop.permute.xlu1 %3459  ;;  %v3608_v21 = vld [vmem:[#allocation3 + $0x18] sm:$0xff]  ;;  %v3157_v5 = vld [vmem:[#allocation3 + $0x128] sm:$0xff] }
 0x2f0   : > { %2958 = vst [vmem:[#allocation3 + $0x260] sm:$0xff] %v2957_v15  ;;  %3502 = vst.msk [vmem:[#allocation3 + $0x68] sm:$0xff] %vm2594_vm6, %v3460_v13  ;;  %4214 = vmatprep.mubr.bf16.mxu0 %v3608_v21  ;;  %4173 = vmatprep.mubr.bf16.mxu1 %v2957_v15  ;;  %v8046_v15 = vld [vmem:[#allocation3 + $0x110] sm:$0xff] }
 0x2f2   : > { %v3088_v9 = vpop.permute.xlu0 %3087 }
 0x2f3   : > { %v3137_v45 = vsel %vm9750_vm2, %v3088_v9, %v3136_v63  ;;  %v3462_v22 = vpop.permute.xlu1 %3461  ;;  %v3613_v55 = vld [vmem:[#allocation3 + $0x40] sm:$0xff]  ;;  %v3160_v9 = vld [vmem:[#allocation3 + $0x150] sm:$0xff] }
 0x2f4   : > { %3138 = vst [vmem:[#allocation3 + $0x10] sm:$0xff] %v3137_v45  ;;  %3503 = vst.msk [vmem:[#allocation3 + $0x90] sm:$0xff] %vm2594_vm6, %v3462_v22  ;;  %4215 = vmatmul.mubr.bf16.vlgmr.msra.gmra.mrb[16].mxu0 %v3137_v45 }
 0x2f5   : > { %4174 = vmatmul.mubr.bf16.gmra.mrb[76].mxu1 %v3680_v60  ;;  %4222 = vmatprep.mubr.bf16.mxu0 %v3613_v55  ;;  %v8047_v60 = vld [vmem:[#allocation3 + $0x138] sm:$0xff] }
 0x2f6   : > { %v3090_v2 = vpop.permute.xlu0 %3089  ;;  %7828 = vmatprep.mubr.msk.bf16.mxu1 %vm326_vm4, %v8041_v30  ;;  %v8048_v30 = vld [vmem:[#allocation3 + $0x160] sm:$0xff] }
 0x2f7   : > { %v3140_v32 = vsel %vm9750_vm2, %v3090_v2, %v3139_v20  ;;  %v3464_v34 = vpop.permute.xlu1 %3463  ;;  %v3618_v7 = vld [vmem:[#allocation3 + $0x68] sm:$0xff]  ;;  %v3163_v20 = vld [vmem:[#allocation3 + $0x178] sm:$0xff] }
 0x2f8   : > { %3141 = vst [vmem:[#allocation3 + $0x38] sm:$0xff] %v3140_v32  ;;  %3504 = vst.msk [vmem:[#allocation3 + $0xb8] sm:$0xff] %vm2594_vm6, %v3464_v34 }
 0x2fa   : > { %v3092_v54 = vpop.permute.xlu0 %3091 }
 0x2fb   : > { %v3143_v19 = vsel %vm9750_vm2, %v3092_v54, %v3142_v44  ;;  %v3466_v57 = vpop.permute.xlu1 %3465  ;;  %v7310_v27 = vpop.f32.mrb[16].mxu1  ;;  %v3623_v53 = vld [vmem:[#allocation3 + $0x90] sm:$0xff]  ;;  %v3166_v44 = vld [vmem:[#allocation3 + $0x1a0] sm:$0xff] }
 0x2fc   : > { %3144 = vst [vmem:[#allocation3 + $0x60] sm:$0xff] %v3143_v19  ;;  %3505 = vst.msk [vmem:[#allocation3 + $0xe0] sm:$0xff] %vm2594_vm6, %v3466_v57  ;;  %4223 = vmatmul.mubr.bf16.gmra.mrb[20].mxu0 %v3140_v32  ;;  %v7311_v8 = vpop.f32.mrb[17].mxu1 }
 0x2fd   : > { %4230 = vmatprep.mubr.bf16.mxu0 %v3618_v7  ;;  %7829 = vmatmul.mubr.msk.bf16.vlgmr.msra.gmra.mrb[80].mxu1 %vm326_vm4, %v3614_v50  ;;  %v9767_v43 = vadd.f32 %v7311_v8, %v7310_v27  ;;  %v7313_v17 = vpop.f32.mrb[18].mxu1  ;;  %v8049_v27 = vld [vmem:[#allocation3 + $0x188] sm:$0xff] }
 0x2fe   : > { %v3094_v23 = vpop.permute.xlu0 %3093  ;;  %7832 = vmatprep.mubr.msk.bf16.mxu1 %vm326_vm4, %v8042_v10  ;;  %v7314_v35 = vpop.f32.mrb[19].mxu1  ;;  %v3169_v8 = vld [vmem:[#allocation3 + $0x1c8] sm:$0xff]  ;;  %v8050_v10 = vld [vmem:[#allocation3 + $0x1b0] sm:$0xff] }
 0x2ff   : > { %v3146_v49 = vsel %vm9750_vm2, %v3094_v23, %v3145_v31  ;;  %v3468_v24 = vpop.permute.xlu1 %3467  ;;  %v9772_v18 = vadd.f32 %v7314_v35, %v7313_v17  ;;  %v3628_v48 = vld [vmem:[#allocation3 + $0xb8] sm:$0xff] }
 0x300   : > { %3147 = vst [vmem:[#allocation3 + $0x88] sm:$0xff] %v3146_v49  ;;  %3506 = vst.msk [vmem:[#allocation3 + $0x108] sm:$0xff] %vm2594_vm6, %v3468_v24 }
 0x302   : > { %v3096_v61 = vpop.permute.xlu0 %3095 }
 0x303   : > { %v3149_v37 = vsel %vm9750_vm2, %v3096_v61, %v3148_v58  ;;  %v3470_v38 = vpop.permute.xlu1 %3469  ;;  %v3633_v55 = vld [vmem:[#allocation3 + $0xe0] sm:$0xff] }
 0x304   : > { %3150 = vst [vmem:[#allocation3 + $0xb0] sm:$0xff] %v3149_v37  ;;  %3507 = vst.msk [vmem:[#allocation3 + $0x130] sm:$0xff] %vm2594_vm6, %v3470_v38  ;;  %4231 = vmatmul.mubr.bf16.gmra.mrb[24].mxu0 %v3143_v19 }
 0x305   : > { %4238 = vmatprep.mubr.bf16.mxu0 %v3623_v53  ;;  %7833 = vmatmul.mubr.msk.bf16.gmra.mrb[84].mxu1 %vm326_vm4, %v8043_v40  ;;  %v7316_v42 = vpop.f32.mrb[20].mxu1 }
 0x306   : > { %v3098_v3 = vpop.permute.xlu0 %3097  ;;  %7836 = vmatprep.mubr.msk.bf16.mxu1 %vm326_vm4, %v8044_v11  ;;  %v7317_v41 = vpop.f32.mrb[21].mxu1 }
 0x307   : > { %v3152_v56 = vsel %vm9750_vm2, %v3098_v3, %v3151_v52  ;;  %v3472_v28 = vpop.permute.xlu1 %3471  ;;  %v9782_v36 = vadd.f32 %v7317_v41, %v7316_v42  ;;  %v7319_v25 = vpop.f32.mrb[22].mxu1  ;;  %v3638_v7 = vld [vmem:[#allocation3 + $0x108] sm:$0xff]  ;;  %v3175_v3 = vld [vmem:[#allocation3 + $0x218] sm:$0xff] }
 0x308   : > { %3153 = vst [vmem:[#allocation3 + $0xd8] sm:$0xff] %v3152_v56  ;;  %3508 = vst.msk [vmem:[#allocation3 + $0x158] sm:$0xff] %vm2594_vm6, %v3472_v28  ;;  %v7320_v29 = vpop.f32.mrb[23].mxu1 }
 0x309   : > { %v9784_v62 = vadd.f32 %v7320_v29, %v7319_v25 }
 0x30a   : > { %v3100_v4 = vpop.permute.xlu0 %3099 }
 0x30b   : > { %v9788_v0 = vsel %vm9750_vm2, %v3100_v4, %v3154_v59  ;;  %v3474_v1 = vpop.permute.xlu1 %3473  ;;  %v3643_v40 = vld [vmem:[#allocation3 + $0x130] sm:$0xff]  ;;  %v3178_v59 = vld [vmem:[#allocation3 + $0x240] sm:$0xff] }
 0x30c   : > { %3156 = vst [vmem:[#allocation3 + $0x100] sm:$0xff] %v9788_v0  ;;  %3509 = vst.msk [vmem:[#allocation3 + $0x180] sm:$0xff] %vm2594_vm6, %v3474_v1  ;;  %4239 = vmatmul.mubr.bf16.gmra.mrb[28].mxu0 %v3146_v49 }
 0x30d   : > { %4246 = vmatprep.mubr.bf16.mxu0 %v3628_v48  ;;  %7837 = vmatmul.mubr.msk.bf16.gmra.mrb[88].mxu1 %vm326_vm4, %v8045_v26  ;;  %v3684_v26 = vld [vmem:[#allocation3 + $0x278] sm:$0xff] }
 0x30e   : > { %v3102_v14 = vpop.permute.xlu0 %3101  ;;  %7840 = vmatprep.mubr.msk.bf16.mxu1 %vm326_vm4, %v8046_v15 }
 0x30f   : > { %v9796_v13 = vsel %vm9750_vm2, %v3102_v14, %v3157_v5  ;;  %v3476_v21 = vpop.permute.xlu1 %3475 }
 0x310   : > { %3159 = vst [vmem:[#allocation3 + $0x128] sm:$0xff] %v9796_v13  ;;  %3510 = vst.msk [vmem:[#allocation3 + $0x1a8] sm:$0xff] %vm2594_vm6, %v3476_v21 }
 0x312   : > { %v3104_v63 = vpop.permute.xlu0 %3103 }
 0x313   : > { %v9802_v45 = vsel %vm9750_vm2, %v3104_v63, %v3160_v9  ;;  %v3478_v22 = vpop.permute.xlu1 %3477  ;;  %v3653_v5 = vld [vmem:[#allocation3 + $0x180] sm:$0xff] }
 0x314   : > { %3162 = vst [vmem:[#allocation3 + $0x150] sm:$0xff] %v9802_v45  ;;  %3511 = vst.msk [vmem:[#allocation3 + $0x1d0] sm:$0xff] %vm2594_vm6, %v3478_v22  ;;  %4247 = vmatmul.mubr.bf16.gmra.mrb[32].mxu0 %v3149_v37  ;;  %v3172_v37 = vld [vmem:[#allocation3 + $0x1f0] sm:$0xff] }
 0x315   : > { %4254 = vmatprep.mubr.bf16.mxu0 %v3633_v55  ;;  %7841 = vmatmul.mubr.msk.bf16.gmra.mrb[92].mxu1 %vm326_vm4, %v8047_v60 }
 0x316   : > { %v3106_v2 = vpop.permute.xlu0 %3105  ;;  %7844 = vmatprep.mubr.msk.bf16.mxu1 %vm326_vm4, %v8048_v30 }
 0x317   : > { %v9810_v32 = vsel %vm9750_vm2, %v3106_v2, %v3163_v20  ;;  %v3480_v34 = vpop.permute.xlu1 %3479  ;;  %v3658_v14 = vld [vmem:[#allocation3 + $0x1a8] sm:$0xff] }
 0x318   : > { %3165 = vst [vmem:[#allocation3 + $0x178] sm:$0xff] %v9810_v32  ;;  %3512 = vst.msk [vmem:[#allocation3 + $0x1f8] sm:$0xff] %vm2594_vm6, %v3480_v34 }
 0x31a   : > { %v3108_v54 = vpop.permute.xlu0 %3107 }
 0x31b   : > { %v9816_v19 = vsel %vm9750_vm2, %v3108_v54, %v3166_v44  ;;  %v3482_v57 = vpop.permute.xlu1 %3481  ;;  %v3663_v63 = vld [vmem:[#allocation3 + $0x1d0] sm:$0xff] }
 0x31c   : > { %3168 = vst [vmem:[#allocation3 + $0x1a0] sm:$0xff] %v9816_v19  ;;  %3513 = vst.msk [vmem:[#allocation3 + $0x220] sm:$0xff] %vm2594_vm6, %v3482_v57  ;;  %4255 = vmatmul.mubr.bf16.gmra.mrb[36].mxu0 %v3152_v56 }
 0x31d   : > { %v7322_v50 = vpop.f32.mrb[24].mxu1  ;;  %4262 = vmatprep.mubr.bf16.mxu0 %v3638_v7  ;;  %7845 = vmatmul.mubr.msk.bf16.gmra.mrb[96].mxu1 %vm326_vm4, %v8049_v27 }
 0x31e   : > { %v3110_v31 = vpop.permute.xlu0 %3109  ;;  %v7323_v23 = vpop.f32.mrb[25].mxu1  ;;  %7848 = vmatprep.mubr.msk.bf16.mxu1 %vm326_vm4, %v8050_v10 }
 0x31f   : > { %v9824_v17 = vsel %vm9750_vm2, %v3110_v31, %v3169_v8  ;;  %v3484_v49 = vpop.permute.xlu1 %3483  ;;  %v9826_v24 = vadd.f32 %v7323_v23, %v7322_v50  ;;  %v7325_v35 = vpop.f32.mrb[26].mxu1  ;;  %v3668_v30 = vld [vmem:[#allocation3 + $0x1f8] sm:$0xff]  ;;  %v8051_v8 = vld [vmem:[#allocation3] sm:$0xff] }
 0x320   : > { %3171 = vst [vmem:[#allocation3 + $0x1c8] sm:$0xff] %v9824_v17  ;;  %3514 = vst.msk [vmem:[#allocation3 + $0x248] sm:$0xff] %vm2594_vm6, %v3484_v49  ;;  %v7326_v58 = vpop.f32.mrb[27].mxu1 }
 0x321   : > { %v9830_v61 = vadd.f32 %v7326_v58, %v7325_v35  ;;  %v7997_v35 = vld [vmem:[%s11247_s6 + $0x40] sm:$0xff]  }
 0x322   : > { %v3112_v38 = vpop.permute.xlu0 %3111  ;;  %v7998_v58 = vld [vmem:[%s11247_s6] sm:$0xff]   ;;  %7538 = vmatprep.subr.bf16.mxu0 %v7997_v35 }
 0x323   : > { %v3173_v53 = vsel %vm9750_vm2, %v3112_v38, %v3172_v37  ;;  %7539 = vmatpush3.bf16.msra.mxu0 %v7998_v58 }
 0x324   : > { %3174 = vst [vmem:[#allocation3 + $0x1f0] sm:$0xff] %v3173_v53  ;;  %4263 = vmatmul.mubr.bf16.gmra.mrb[40].mxu0 %v9788_v0  ;;  %v3648_v0 = vld [vmem:[#allocation3 + $0x158] sm:$0xff] }
 0x325   : > { %v7328_v52 = vpop.f32.mrb[28].mxu1  ;;  %4270 = vmatprep.mubr.bf16.mxu0 %v3643_v40  ;;  %7849 = vmatmul.mubr.msk.bf16.gmra.mrb[100].mxu1 %vm326_vm4, %v9549_v12 }
 0x326   : > { %v3114_v42 = vpop.permute.xlu0 %3113  ;;  %v7329_v11 = vpop.f32.mrb[29].mxu1  ;;  %7852 = vmatprep.mubr.msk.bf16.mxu1 %vm326_vm4, %v9495_v16  ;;  %v3181_v16 = vld [vmem:[#allocation3 + $0x268] sm:$0xff] }
 0x327   : > { %v3176_v56 = vsel %vm9750_vm2, %v3114_v42, %v3175_v3  ;;  %v9841_v28 = vadd.f32 %v7329_v11, %v7328_v52  ;;  %v7331_v41 = vpop.f32.mrb[30].mxu1  ;;  %v3678_v34 = vld [vmem:[#allocation3 + $0x248] sm:$0xff] }
 0x328   : > { %3177 = vst [vmem:[#allocation3 + $0x218] sm:$0xff] %v3176_v56  ;;  %v7332_v25 = vpop.f32.mrb[31].mxu1 }
 0x329   : > { %v9843_v29 = vadd.f32 %v7332_v25, %v7331_v41 }
 0x32a   : > { %v3116_v4 = vpop.permute.xlu0 %3115 }
 0x32b   : > { %v3179_v12 = vsel %vm9750_vm2, %v3116_v4, %v3178_v59  ;;  %v7999_v4 = vld [vmem:[%s11247_s6 + $0x48] sm:$0xff]  }
 0x32c   : > { %3180 = vst [vmem:[#allocation3 + $0x240] sm:$0xff] %v3179_v12  ;;  %4271 = vmatmul.mubr.bf16.gmra.mrb[44].mxu0 %v9796_v13  ;;  %7540 = vmatprep.subr.bf16.mxu0 %v7999_v4 }
 0x32d   : > { %4278 = vmatprep.mubr.bf16.mxu0 %v3648_v0  ;;  %7853 = vmatmul.mubr.msk.bf16.gmra.mrb[104].mxu1 %vm326_vm4, %v9605_v33 }
 0x32e   : > { %v3118_v1 = vpop.permute.xlu0 %3117  ;;  %7856 = vmatprep.mubr.msk.bf16.mxu1 %vm326_vm4, %v9614_v51 }
 0x32f   : > { %v3182_v48 = vsel %vm9750_vm2, %v3118_v1, %v3181_v16  ;;  %v8001_v16 = vld [vmem:[%s11247_s6 + $0x50] sm:$0xff]  }
 0x330   : > { %3183 = vst [vmem:[#allocation3 + $0x268] sm:$0xff] %v3182_v48  ;;  %v8002_v1 = vld [vmem:[%s11247_s6 + $0x10] sm:$0xff]  }
 0x334   : > { %4279 = vmatmul.mubr.bf16.gmra.mrb[48].mxu0 %v9802_v45 }
 0x335   : > { %4286 = vmatprep.mubr.bf16.mxu0 %v3653_v5  ;;  %7857 = vmatmul.mubr.msk.bf16.gmra.mrb[108].mxu1 %vm326_vm4, %v3684_v26 }
 0x33c   : > { %4287 = vmatmul.mubr.bf16.gmra.mrb[52].mxu0 %v9810_v32  ;;  %v3673_v32 = vld [vmem:[#allocation3 + $0x220] sm:$0xff] }
 0x33d   : > { %v7334_v33 = vpop.f32.mrb[32].mxu1  ;;  %4294 = vmatprep.mubr.bf16.mxu0 %v3658_v14 }
 0x33e   : > { %v7335_v15 = vpop.f32.mrb[33].mxu1 }
 0x33f   : > { %v9857_v13 = vadd.f32 %v7335_v15, %v7334_v33  ;;  %v7337_v51 = vpop.f32.mrb[34].mxu1 }
 0x340   : > { %v7338_v21 = vpop.f32.mrb[35].mxu1 }
 0x341   : > { %v9859_v9 = vadd.f32 %v7338_v21, %v7337_v51 }
 0x344   : > { %4295 = vmatmul.mubr.bf16.gmra.mrb[56].mxu0 %v9816_v19 }
 0x345   : > { %v7340_v45 = vpop.f32.mrb[36].mxu1  ;;  %4302 = vmatprep.mubr.bf16.mxu0 %v3663_v63 }
 0x346   : > { %v7341_v22 = vpop.f32.mrb[37].mxu1 }
 0x347   : > { %v9862_v55 = vadd.f32 %v7341_v22, %v7340_v45  ;;  %v7343_v60 = vpop.f32.mrb[38].mxu1 }
 0x348   : > { %v7344_v20 = vpop.f32.mrb[39].mxu1 }
 0x349   : > { %v9864_v2 = vadd.f32 %v7344_v20, %v7343_v60  ;;  %v8003_v60 = vld [vmem:[%s11247_s6 + $0x58] sm:$0xff]  }
 0x34a   : > { %v8004_v20 = vld [vmem:[%s11247_s6 + $0x18] sm:$0xff]  }
 0x34c   : > { %4303 = vmatmul.mubr.bf16.gmra.mrb[60].mxu0 %v9824_v17 }
 0x34d   : > { %4310 = vmatprep.mubr.bf16.mxu0 %v3668_v30 }
 0x354   : > { %4311 = vmatmul.mubr.bf16.gmra.mrb[64].mxu0 %v3173_v53 }
 0x355   : > { %4318 = vmatprep.mubr.bf16.mxu0 %v3673_v32 }
 0x35c   : > { %4319 = vmatmul.mubr.bf16.gmra.mrb[68].mxu0 %v3176_v56 }
 0x35d   : > { %v7346_v44 = vpop.f32.mrb[40].mxu1  ;;  %4326 = vmatprep.mubr.bf16.mxu0 %v3678_v34 }
 0x35e   : > { %v7347_v54 = vpop.f32.mrb[41].mxu1 }
 0x35f   : > { %v9867_v19 = vadd.f32 %v7347_v54, %v7346_v44  ;;  %v7349_v57 = vpop.f32.mrb[42].mxu1 }
 0x360   : > { %v7350_v7 = vpop.f32.mrb[43].mxu1 }
 0x361   : > { %v9869_v50 = vadd.f32 %v7350_v7, %v7349_v57 }
 0x364   : > { %4327 = vmatmul.mubr.bf16.gmra.mrb[72].mxu0 %v3179_v12  ;;  %v8000_v12 = vld [vmem:[%s11247_s6 + $0x8] sm:$0xff]  }
 0x365   : > { %v7352_v27 = vpop.f32.mrb[44].mxu1  ;;  %4334 = vmatprep.mubr.bf16.mxu0 %v8051_v8  ;;  %7541 = vmatpush3.bf16.msra.mxu0 %v8000_v12  ;;  %v8005_v8 = vld [vmem:[%s11247_s6 + $0x60] sm:$0xff]  }
 0x366   : > { %v7353_v31 = vpop.f32.mrb[45].mxu1  ;;  %7542 = vmatprep.subr.bf16.mxu0 %v8001_v16 }
 0x367   : > { %v9871_v23 = vadd.f32 %v7353_v31, %v7352_v27  ;;  %v7355_v10 = vpop.f32.mrb[46].mxu1  ;;  %v8006_v31 = vld [vmem:[%s11247_s6 + $0x20] sm:$0xff]  }
 0x368   : > { %v7356_v17 = vpop.f32.mrb[47].mxu1 }
 0x369   : > { %v9873_v49 = vadd.f32 %v7356_v17, %v7355_v10  ;;  %7543 = vmatpush3.bf16.msra.mxu0 %v8002_v1 }
 0x36a   : > { %7544 = vmatprep.subr.bf16.mxu0 %v8003_v60 }
 0x36c   : > { %4335 = vmatmul.mubr.bf16.gmra.mrb[76].mxu0 %v3182_v48 }
 0x36d   : > { %7545 = vmatpush3.bf16.msra.mxu0 %v8004_v20 }
 0x36e   : > { %7546 = vmatprep.subr.bf16.mxu0 %v8005_v8 }
 0x371   : > { %7547 = vmatpush3.bf16.msra.mxu0 %v8006_v31  ;;  %v8009_v31 = vld [vmem:[%s11247_s6 + $0x70] sm:$0xff]  }
 0x37d   : > { %v7358_v37 = vpop.f32.mrb[48].mxu1 }
 0x37e   : > { %v7359_v38 = vpop.f32.mrb[49].mxu1 }
 0x37f   : > { %v9881_v53 = vadd.f32 %v7359_v38, %v7358_v37  ;;  %v7361_v40 = vpop.f32.mrb[50].mxu1 }
 0x380   : > { %v7362_v52 = vpop.f32.mrb[51].mxu1 }
 0x381   : > { %v9883_v3 = vadd.f32 %v7362_v52, %v7361_v40  ;;  %v8007_v40 = vld [vmem:[%s11247_s6 + $0x68] sm:$0xff]  }
 0x382   : > { %v8008_v52 = vld [vmem:[%s11247_s6 + $0x28] sm:$0xff]   ;;  %7548 = vmatprep.subr.bf16.mxu0 %v8007_v40 }
 0x383   : > { %7549 = vmatpush3.bf16.msra.mxu0 %v8008_v52 }
 0x384   : > { %7550 = vmatprep.subr.bf16.mxu0 %v8009_v31 }
 0x385   : > { %v7364_v42 = vpop.f32.mrb[52].mxu1 }
 0x386   : > { %v7365_v11 = vpop.f32.mrb[53].mxu1 }
 0x387   : > { %v9885_v56 = vadd.f32 %v7365_v11, %v7364_v42  ;;  %v7367_v41 = vpop.f32.mrb[54].mxu1 }
 0x388   : > { %v7368_v25 = vpop.f32.mrb[55].mxu1 }
 0x389   : > { %v9887_v59 = vadd.f32 %v7368_v25, %v7367_v41 }
 0x398   : > { %v7370_v0 = vpop.f32.mrb[56].mxu1 }
 0x399   : > { %v7371_v48 = vpop.f32.mrb[57].mxu1 }
 0x39a   : > { %v9901_v26 = vadd.f32 %v7371_v48, %v7370_v0  ;;  %v7373_v5 = vpop.f32.mrb[58].mxu1 }
 0x39b   : > { %v7374_v14 = vpop.f32.mrb[59].mxu1 }
 0x39c   : > { %v9903_v33 = vadd.f32 %v7374_v14, %v7373_v5 }
 0x3a0   : > { %v7376_v15 = vpop.f32.mrb[60].mxu1 }
 0x3a1   : > { %v7377_v51 = vpop.f32.mrb[61].mxu1 }
 0x3a2   : > { %v9905_v21 = vadd.f32 %v7377_v51, %v7376_v15  ;;  %v7379_v63 = vpop.f32.mrb[62].mxu1 }
 0x3a3   : > { %v7380_v45 = vpop.f32.mrb[63].mxu1 }
 0x3a4   : > { %v9907_v22 = vadd.f32 %v7380_v45, %v7379_v63 }
 0x3af   : > { %v7382_v30 = vpop.f32.mrb[64].mxu1 }
 0x3b0   : > { %v7383_v32 = vpop.f32.mrb[65].mxu1 }
 0x3b1   : > { %v9915_v34 = vadd.f32 %v7383_v32, %v7382_v30  ;;  %v7385_v44 = vpop.f32.mrb[66].mxu1 }
 0x3b2   : > { %v7386_v54 = vpop.f32.mrb[67].mxu1 }
 0x3b3   : > { %v9917_v57 = vadd.f32 %v7386_v54, %v7385_v44 }
 0x3b7   : > { %v7388_v7 = vpop.f32.mrb[68].mxu1 }
 0x3b8   : > { %v7389_v27 = vpop.f32.mrb[69].mxu1 }
 0x3b9   : > { %v9925_v10 = vadd.f32 %v7389_v27, %v7388_v7  ;;  %v7391_v17 = vpop.f32.mrb[70].mxu1  ;;  %v9948_v7 = vld [vmem:[%s11245_s4] ss:$0 sm:$0xff] }
 0x3ba   : > { %v7392_v35 = vpop.f32.mrb[71].mxu1 }
 0x3bb   : > { %v9927_v58 = vadd.f32 %v7392_v35, %v7391_v17 }
 0x3c0   : > { %v7394_v37 = vpop.f32.mrb[72].mxu1 }
 0x3c1   : > { %v7395_v38 = vpop.f32.mrb[73].mxu1 }
 0x3c2   : > { %v9935_v42 = vadd.f32 %v7395_v38, %v7394_v37  ;;  %v7397_v11 = vpop.f32.mrb[74].mxu1  ;;  %v9960_v38 = vld [vmem:[%s11246_s5] ss:$0 sm:$0xff] }
 0x3c3   : > { %v7398_v41 = vpop.f32.mrb[75].mxu1 }
 0x3c4   : > { %v9937_v25 = vadd.f32 %v7398_v41, %v7397_v11 }
 0x3c7   : > { %v7422_v4 = vpop.f32.mrb[16].mxu0 }
 0x3c8   : > { %v7400_v12 = vpop.f32.mrb[76].mxu1  ;;  %v7423_v0 = vpop.f32.mrb[17].mxu0 }
 0x3c9   : > { %v7424_v16 = vadd.f32 %v7423_v0, %v7422_v4  ;;  %v7401_v1 = vpop.f32.mrb[77].mxu1  ;;  %v7425_v48 = vpop.f32.mrb[18].mxu0 }
 0x3ca   : > { %v9939_v5 = vadd.f32 %v7401_v1, %v7400_v12  ;;  %v7403_v14 = vpop.f32.mrb[78].mxu1  ;;  %v7426_v15 = vpop.f32.mrb[19].mxu0 }
 0x3cb   : > { %v7427_v51 = vadd.f32 %v7426_v15, %v7425_v48  ;;  %v7404_v63 = vpop.f32.mrb[79].mxu1  ;;  %v4217_v45 = vadd.f32 %v7424_v16, %v9767_v43  ;;  %v8010_v43 = vld [vmem:[%s11247_s6 + $0x30] sm:$0xff]  }
 0x3cc   : > { %v9942_v60 = vadd.f32 %v7404_v63, %v7403_v14  ;;  %7551 = vmatpush3.bf16.msra.mxu0 %v8010_v43  ;;  %v8011_v43 = vld [vmem:[%s11247_s6 + $0x78] sm:$0xff]  }
 0x3cd   : > { %v4220_v20 = vadd.f32 %v7427_v51, %v9772_v18  ;;  %7552 = vmatprep.subr.bf16.mxu0 %v8011_v43 }
 0x3ce   : > { %11281 = vst [vmem:[#allocation11_spill] sm:$0xff] %v9942_v60 }
 0x3cf   : > { %v7428_v30 = vpop.f32.mrb[20].mxu0 }
 0x3d0   : > { %v7429_v32 = vpop.f32.mrb[21].mxu0  ;;  %v7830_v44 = vpop.f32.mrb[80].mxu1 }
 0x3d1   : > { %v7430_v54 = vadd.f32 %v7429_v32, %v7428_v30  ;;  %v7431_v27 = vpop.f32.mrb[22].mxu0  ;;  %v4377_v8 = vpop.f32.mrb[81].mxu1 }
 0x3d2   : > { %v4378_v18 = vadd.f32 %v4377_v8, %v4217_v45  ;;  %v7432_v17 = vpop.f32.mrb[23].mxu0  ;;  %v7831_v35 = vpop.f32.mrb[82].mxu1 }
 0x3d3   : > { %v4225_v37 = vadd.f32 %v7430_v54, %v9782_v36  ;;  %v7433_v40 = vadd.f32 %v7432_v17, %v7431_v27  ;;  %v4380_v52 = vpop.f32.mrb[83].mxu1 }
 0x3d4   : > { %v4511_v11 = vmul.f32 %v9948_v7, %v4378_v18  ;;  %v4381_v41 = vadd.f32 %v4380_v52, %v4220_v20  ;;  %v4582_v20 = vld [vmem:[#allocation4] sm:$0xff]  ;;  %v8012_v18 = vld [vmem:[%s11247_s6 + $0x38] sm:$0xff]  }
 0x3d5   : > { %v4386_v4 = vadd.f32 %v7830_v44, %v4225_v37  ;;  %v4228_v12 = vadd.f32 %v7433_v40, %v9784_v62  ;;  %v4583_v37 = vld [vmem:[#allocation4 + $0x8] sm:$0xff]  ;;  %7553 = vmatpush3.bf16.msra.mxu0 %v8012_v18 }
 0x3d6   : > { %v4550_v0 = vadd.f32 %v9960_v38, %v4511_v11  ;;  %v4512_v16 = vmul.f32 %v9948_v7, %v4381_v41 }
 0x3d7   : > { %v4513_v36 = vmul.f32 %v9948_v7, %v4386_v4  ;;  %v4389_v1 = vadd.f32 %v7831_v35, %v4228_v12  ;;  %v7434_v48 = vpop.f32.mrb[24].mxu0  ;;  %v8052_v4 = vld [vmem:[#allocation4 + $0x10] sm:$0xff] }
 0x3d8   : > { %v4614_v14 = vmax.f32 %v4550_v0, 0.0  ;;  %v4551_v15 = vadd.f32 %v9960_v38, %v4512_v16  ;;  %v7435_v51 = vpop.f32.mrb[25].mxu0  ;;  %v7834_v63 = vpop.f32.mrb[84].mxu1 }
 0x3d9   : > { %v4552_v45 = vadd.f32 %v9960_v38, %v4513_v36  ;;  %v4514_v30 = vmul.f32 %v9948_v7, %v4389_v1  ;;  %v7436_v32 = vadd.f32 %v7435_v51, %v7434_v48  ;;  %v7437_v62 = vpop.f32.mrb[26].mxu0  ;;  %v4393_v44 = vpop.f32.mrb[85].mxu1  ;;  %v4585_v1 = vld [vmem:[#allocation4 + $0x18] sm:$0xff] }
 0x3da   : > { %v4646_v54 = vadd.f32 %v4614_v14, %v4582_v20  ;;  %v4615_v27 = vmax.f32 %v4551_v15, 0.0  ;;  %v7438_v8 = vpop.f32.mrb[27].mxu0  ;;  %v7835_v31 = vpop.f32.mrb[86].mxu1 }
 0x3db   : > { %v4616_v17 = vmax.f32 %v4552_v45, 0.0  ;;  %v4553_v35 = vadd.f32 %v9960_v38, %v4514_v30  ;;  %v4233_v40 = vadd.f32 %v7436_v32, %v9826_v24  ;;  %v7439_v52 = vadd.f32 %v7438_v8, %v7437_v62  ;;  %v4396_v11 = vpop.f32.mrb[87].mxu1 }
 0x3dc   : > { %4678 = vst.msk [vmem:[#allocation4] sm:$0xff] %vm326_vm4, %v4646_v54  ;;  %v4647_v41 = vadd.f32 %v4615_v27, %v4583_v37 }
 0x3dd   : > { %v4648_v12 = vadd.f32 %v8052_v4, %v4616_v17  ;;  %v4617_v0 = vmax.f32 %v4553_v35, 0.0  ;;  %v4394_v16 = vadd.f32 %v4393_v44, %v4233_v40  ;;  %v4236_v36 = vadd.f32 %v7439_v52, %v9830_v61  ;;  %v4586_v35 = vld [vmem:[#allocation4 + $0x20] sm:$0xff] }
 0x3de   : > { %4679 = vst.msk [vmem:[#allocation4 + $0x8] sm:$0xff] %vm326_vm4, %v4647_v41 }
 0x3df   : > { %4680 = vst.msk [vmem:[#allocation4 + $0x10] sm:$0xff] %vm326_vm4, %v4648_v12  ;;  %v4649_v48 = vadd.f32 %v4617_v0, %v4585_v1  ;;  %v4515_v24 = vmul.f32 %v9948_v7, %v4394_v16  ;;  %v4397_v14 = vadd.f32 %v4396_v11, %v4236_v36  ;;  %v7440_v15 = vpop.f32.mrb[28].mxu0  ;;  %v4587_v12 = vld [vmem:[#allocation4 + $0x28] sm:$0xff] }
 0x3e0   : > { %v7441_v51 = vpop.f32.mrb[29].mxu0  ;;  %v9983_v45 = vpop.f32.mrb[88].mxu1 }
 0x3e1   : > { %4681 = vst.msk [vmem:[#allocation4 + $0x18] sm:$0xff] %vm326_vm4, %v4649_v48  ;;  %v4554_v20 = vadd.f32 %v9960_v38, %v4515_v24  ;;  %v4516_v61 = vmul.f32 %v9948_v7, %v4397_v14  ;;  %v7442_v30 = vadd.f32 %v7441_v51, %v7440_v15  ;;  %v7443_v32 = vpop.f32.mrb[30].mxu0  ;;  %v4409_v62 = vpop.f32.mrb[89].mxu1 }
 0x3e2   : > { %v7444_v44 = vpop.f32.mrb[31].mxu0  ;;  %v9988_v54 = vpop.f32.mrb[90].mxu1 }
 0x3e3   : > { %v4618_v27 = vmax.f32 %v4554_v20, 0.0  ;;  %v4555_v8 = vadd.f32 %v9960_v38, %v4516_v61  ;;  %v4241_v43 = vadd.f32 %v7442_v30, %v9841_v28  ;;  %v7445_v18 = vadd.f32 %v7444_v44, %v7443_v32  ;;  %v9992_v17 = vpop.f32.mrb[91].mxu1  ;;  %v9995_v41 = vld [vmem:[#allocation4] sm:$0xff] }
 0x3e4   : > { %v9998_v16 = vld [vmem:[#allocation4] sm:$0xff] }
 0x3e5   : > { %v4650_v37 = vadd.f32 %v4618_v27, %v4586_v35  ;;  %v4619_v40 = vmax.f32 %v4555_v8, 0.0  ;;  %v4402_v52 = vadd.f32 %v7834_v63, %v4241_v43  ;;  %v4244_v11 = vadd.f32 %v7445_v18, %v9843_v29  ;;  %v5131_v4 = vld [vmem:[#allocation4 + $0x8] sm:$0x7f]  ;;  %v8013_v29 = vld [vmem:[%s11247_s6 + $0xc0] sm:$0xff]  }
 0x3e6   : > { %v5162_v0 = vpack.c.bf16 %v5131_v4, %v9995_v41  ;;  %v4711_v24 = vld [vmem:[#allocation4 + $0x8] sm:$0x7f]  ;;  %v8014_v63 = vld [vmem:[%s11247_s6 + $0x80] sm:$0xff]   ;;  %v10010_v20 = vld [vmem:[#allocation4 + $0x10] sm:$0xff]  ;;  %7650 = vmatprep.subr.bf16.mxu1 %v8013_v29 }
 0x3e7   : > { %4682 = vst.msk [vmem:[#allocation4 + $0x20] sm:$0xff] %vm326_vm4, %v4650_v37  ;;  %v4651_v28 = vadd.f32 %v4619_v40, %v4587_v12  ;;  %v4517_v36 = vmul.f32 %v9948_v7, %v4402_v52  ;;  %v4405_v1 = vadd.f32 %v7835_v31, %v4244_v11  ;;  %v7446_v48 = vpop.f32.mrb[32].mxu0  ;;  %v4740_v30 = vpack.c.bf16 %v4711_v24, %v9998_v16 }
 0x3e8   : > { %v7447_v14 = vpop.f32.mrb[33].mxu0  ;;  %v10008_v15 = vpop.f32.mrb[92].mxu1  ;;  %v5179_v51 = vshrl.u32 %v5162_v0, 16  ;;  %v5133_v61 = vld [vmem:[#allocation4 + $0x18] sm:$0x7f]  ;;  %v5182_v40 = vshll.u32 %v5162_v0, 16  ;;  %7651 = vmatpush3.bf16.msra.mxu1 %v8014_v63 }
 0x3e9   : > { %4683 = vst.msk [vmem:[#allocation4 + $0x28] sm:$0xff] %vm326_vm4, %v4651_v28  ;;  %v4556_v31 = vadd.f32 %v9960_v38, %v4517_v36  ;;  %v4518_v32 = vmul.f32 %v9948_v7, %v4405_v1  ;;  %v7448_v44 = vadd.f32 %v7447_v14, %v7446_v48  ;;  %v7449_v27 = vpop.f32.mrb[34].mxu0  ;;  %v10016_v8 = vpop.f32.mrb[93].mxu1  ;;  %v5163_v43 = vpack.c.bf16 %v5133_v61, %v10010_v20  ;;  %v4713_v36 = vld [vmem:[#allocation4 + $0x18] sm:$0x7f]  ;;  %v8015_v1 = vld [vmem:[%s11247_s6 + $0x100] sm:$0xff]  }
 0x3ea   : > { %v7450_v18 = vpop.f32.mrb[35].mxu0  ;;  %v10019_v35 = vpop.f32.mrb[94].mxu1  ;;  %v5181_v37 = vrot.slane %v5179_v51, 7  ;;  %v4588_v48 = vld [vmem:[#allocation4 + $0x30] sm:$0xff]  ;;  %v4756_v51 = vshrl.u32 %v4740_v30, 16  ;;  %7860 = vmatprep.subr.bf16.mxu0 %v8015_v1  ;;  %v4759_v6 = vshll.u32 %v4740_v30, 16 }
 0x3eb   : > { %v4620_v52 = vmax.f32 %v4556_v31, 0.0  ;;  %v4557_v11 = vadd.f32 %v9960_v38, %v4518_v32  ;;  %v4249_v4 = vadd.f32 %v7448_v44, %v9857_v13  ;;  %v7451_v12 = vadd.f32 %v7450_v18, %v7449_v27  ;;  %v10023_v28 = vpop.f32.mrb[95].mxu1  ;;  %v4921_v32 = vld [vmem:[#allocation4 + $0x8] sm:$0xff]  ;;  %v10029_v13 = vld [vmem:[#allocation4 + $0x10] sm:$0xff]  ;;  %v4589_v27 = vld [vmem:[#allocation4 + $0x38] sm:$0xff] }
 0x3ec   : > { %v5184_v24 = vor.u32 %v5182_v40, %v5181_v37  ;;  %v5186_v29 = vshrl.u32 %v5163_v43, 16  ;;  %v5189_v14 = vshll.u32 %v5163_v43, 16  ;;  %v5387_v44 = vld [vmem:[#allocation4 + $0x8] sm:$0xff]  ;;  %v4758_v46 = vrot.slane %v4756_v51, 7 }
 0x3ed   : > { %v4652_v0 = vadd.f32 %v4620_v52, %v4588_v48  ;;  %v4621_v63 = vmax.f32 %v4557_v11, 0.0  ;;  %v4410_v61 = vadd.f32 %v4409_v62, %v4249_v4  ;;  %v4252_v31 = vadd.f32 %v7451_v12, %v9859_v9  ;;  %v8016_v43 = vld [vmem:[%s11247_s6 + $0xc8] sm:$0xff]  }
 0x3ee   : > { %5290 = vrot.lane.b32.xlu1 %v5184_v24, %s8131_s12  ;;  %v5188_v18 = vrot.slane %v5186_v29, 7  ;;  %v4741_v37 = vpack.c.bf16 %v4713_v36, %v10029_v13  ;;  %v8017_v11 = vld [vmem:[%s11247_s6 + $0x88] sm:$0xff]   ;;  %v4950_v36 = vpack.c.bf16 %v4921_v32, %v9995_v41  ;;  %v5134_v1 = vld [vmem:[#allocation4 + $0x20] sm:$0xff]  ;;  %v4761_v24 = vor.u32 %v4759_v6, %v4758_v46  ;;  %7652 = vmatprep.subr.bf16.mxu1 %v8016_v43 }
 0x3ef   : > { %4684 = vst.msk [vmem:[#allocation4 + $0x30] sm:$0xff] %vm326_vm4, %v4652_v0  ;;  %v4653_v9 = vadd.f32 %v4621_v63, %v4589_v27  ;;  %v4519_v62 = vmul.f32 %v9948_v7, %v4410_v61  ;;  %v4413_v40 = vadd.f32 %v9992_v17, %v4252_v31  ;;  %v7452_v52 = vpop.f32.mrb[36].mxu0  ;;  %v5418_v29 = vpack.c.bf16 %v5387_v44, %v9998_v16  ;;  %v4923_v31 = vld [vmem:[#allocation4 + $0x18] sm:$0xff]  ;;  %v4875_v27 = vld [vmem:[#allocation3 + $0x28] sm:$0xff] }
 0x3f0   : > { %v7453_v4 = vpop.f32.mrb[37].mxu0  ;;  %v10042_v30 = vpop.f32.mrb[96].mxu1  ;;  %v5191_v12 = vor.u32 %v5189_v14, %v5188_v18  ;;  %v5135_v48 = vld [vmem:[#allocation4 + $0x28] sm:$0x7f]  ;;  %7653 = vmatpush3.bf16.msra.mxu1 %v8017_v11  ;;  %v4876_v41 = vsel %vm9190_vm3, %v4761_v24, %v4875_v27  ;;  %v4763_v16 = vshrl.u32 %v4741_v37, 16 }
 0x3f1   : > { %4685 = vst.msk [vmem:[#allocation4 + $0x38] sm:$0xff] %vm326_vm4, %v4653_v9  ;;  %v4558_v17 = vadd.f32 %v9960_v38, %v4519_v62  ;;  %v4520_v51 = vmul.f32 %v9948_v7, %v4413_v40  ;;  %v7454_v0 = vadd.f32 %v7453_v4, %v7452_v52  ;;  %v7455_v63 = vpop.f32.mrb[38].mxu0  ;;  %v10049_v61 = vpop.f32.mrb[97].mxu1  ;;  %v5164_v14 = vpack.c.bf16 %v5135_v48, %v5134_v1  ;;  %v4715_v62 = vld [vmem:[#allocation4 + $0x28] sm:$0x7f]  ;;  %v4590_v40 = vld [vmem:[#allocation4 + $0x40] sm:$0xff] }
 0x3f2   : > { %5292 = vrot.lane.b32.xlu0 %v5191_v12, %s8131_s12  ;;  %v7456_v6 = vpop.f32.mrb[39].mxu0  ;;  %v10052_v46 = vpop.f32.mrb[98].mxu1  ;;  %4980 = vrot.lane.b32.xlu1 %v4950_v36, %s8131_s12  ;;  %5434 = vst.msk [vmem:[#allocation3 + $0x10] sm:$0xff] %vm326_vm4, %v5418_v29  ;;  %4877 = vst [vmem:[#allocation3 + $0x28] sm:$0xff] %v4876_v41  ;;  %v10063_v52 = vpack.c.bf16 %v4923_v31, %v10010_v20  ;;  %v4765_v4 = vrot.slane %v4763_v16, 7  ;;  %v4766_v12 = vshll.u32 %v4741_v37, 16 }
 0x3f3   : > { %v4622_v32 = vmax.f32 %v4558_v17, 0.0  ;;  %v4559_v44 = vadd.f32 %v9960_v38, %v4520_v51  ;;  %v4257_v18 = vadd.f32 %v7454_v0, %v9862_v55  ;;  %v7457_v43 = vadd.f32 %v7456_v6, %v7455_v63  ;;  %v10060_v9 = vpop.f32.mrb[99].mxu1  ;;  %v4925_v17 = vld [vmem:[#allocation4 + $0x28] sm:$0xff]  ;;  %v10067_v55 = vld [vmem:[#allocation4 + $0x20] sm:$0xff]  ;;  %v5389_v51 = vld [vmem:[#allocation4 + $0x18] sm:$0xff] }
 0x3f4   : > { %v5193_v11 = vshrl.u32 %v5164_v14, 16  ;;  %v4591_v0 = vld [vmem:[#allocation4 + $0x48] sm:$0xff]  ;;  %v5196_v20 = vshll.u32 %v5164_v14, 16  ;;  %v4768_v31 = vor.u32 %v4766_v12, %v4765_v4  ;;  %v4742_v27 = vpack.c.bf16 %v4715_v62, %v10067_v55  ;;  %v8018_v37 = vld [vmem:[%s11247_s6 + $0xd0] sm:$0xff]  }
 0x3f5   : > { %v4654_v36 = vadd.f32 %v4622_v32, %v4590_v40  ;;  %v4623_v48 = vmax.f32 %v4559_v44, 0.0  ;;  %v4418_v24 = vadd.f32 %v9983_v45, %v4257_v18  ;;  %v4260_v29 = vadd.f32 %v7457_v43, %v9864_v2  ;;  %v4878_v16 = vld [vmem:[#allocation3 + $0x50] sm:$0xff]  ;;  %7654 = vmatprep.subr.bf16.mxu1 %v8018_v37 }
 0x3f6   : > { %4982 = vrot.lane.b32.xlu1 %v10063_v52, %s8131_s12  ;;  %v5195_v63 = vrot.slane %v5193_v11, 7  ;;  %v8019_v14 = vld [vmem:[%s11247_s6 + $0x90] sm:$0xff]   ;;  %v10083_v43 = vpack.c.bf16 %v4925_v17, %v5134_v1  ;;  %v4879_v11 = vsel %vm9190_vm3, %v4768_v31, %v4878_v16 }
 0x3f7   : > { %4686 = vst.msk [vmem:[#allocation4 + $0x40] sm:$0xff] %vm326_vm4, %v4654_v36  ;;  %v4655_v2 = vadd.f32 %v4623_v48, %v4591_v0  ;;  %v4521_v45 = vmul.f32 %v9948_v7, %v4418_v24  ;;  %v4421_v6 = vadd.f32 %v9988_v54, %v4260_v29  ;;  %v7458_v41 = vpop.f32.mrb[40].mxu0  ;;  %v5419_v54 = vpack.c.bf16 %v5389_v51, %v10029_v13  ;;  %v4926_v1 = vld [vmem:[#allocation4 + $0x30] sm:$0xff] }
 0x3f8   : > { %v7459_v32 = vpop.f32.mrb[41].mxu0  ;;  %v10081_v44 = vpop.f32.mrb[100].mxu1  ;;  %v5198_v18 = vor.u32 %v5196_v20, %v5195_v63  ;;  %v4927_v62 = vld [vmem:[#allocation4 + $0x38] sm:$0xff]  ;;  %4880 = vst [vmem:[#allocation3 + $0x50] sm:$0xff] %v4879_v11  ;;  %7655 = vmatpush3.bf16.msra.mxu1 %v8019_v14  ;;  %v4770_v20 = vshrl.u32 %v4742_v27, 16  ;;  %v4592_v16 = vld [vmem:[#allocation4 + $0x50] sm:$0xff] }
 0x3f9   : > { %v5137_v40 = vld [vmem:[#allocation4 + $0x38] sm:$0x7f]  ;;  %4687 = vst.msk [vmem:[#allocation4 + $0x48] sm:$0xff] %vm326_vm4, %v4655_v2  ;;  %v4560_v4 = vadd.f32 %v9960_v38, %v4521_v45  ;;  %v4522_v12 = vmul.f32 %v9948_v7, %v4421_v6  ;;  %v7460_v36 = vadd.f32 %v7459_v32, %v7458_v41  ;;  %v7461_v48 = vpop.f32.mrb[42].mxu0  ;;  %v10091_v24 = vpop.f32.mrb[101].mxu1  ;;  %v10098_v51 = vpack.c.bf16 %v4927_v62, %v4926_v1  ;;  %v10105_v41 = vld [vmem:[#allocation4 + $0x30] sm:$0xff] }
 0x3fa   : > { %v4717_v29 = vld [vmem:[#allocation4 + $0x38] sm:$0x7f]  ;;  %5294 = vrot.lane.b32.xlu0 %v5198_v18, %s8131_s12  ;;  %v7462_v17 = vpop.f32.mrb[43].mxu0  ;;  %v10094_v0 = vpop.f32.mrb[102].mxu1  ;;  %4984 = vrot.lane.b32.xlu1 %v10083_v43, %s8131_s12  ;;  %v5165_v63 = vpack.c.bf16 %v5137_v40, %v4926_v1  ;;  %5435 = vst.msk [vmem:[#allocation3 + $0x38] sm:$0xff] %vm326_vm4, %v5419_v54  ;;  %v4772_v32 = vrot.slane %v4770_v20, 7 }
 0x3fb   : > { %v4624_v31 = vmax.f32 %v4560_v4, 0.0  ;;  %v4561_v37 = vadd.f32 %v9960_v38, %v4522_v12  ;;  %v4265_v2 = vadd.f32 %v7460_v36, %v9867_v19  ;;  %v7463_v45 = vadd.f32 %v7462_v17, %v7461_v48  ;;  %v10103_v6 = vpop.f32.mrb[103].mxu1  ;;  %v4593_v12 = vld [vmem:[#allocation4 + $0x58] sm:$0xff] }
 0x3fc   : > { %v5200_v14 = vshrl.u32 %v5165_v63, 16  ;;  %v4773_v18 = vshll.u32 %v4742_v27, 16  ;;  %v4743_v62 = vpack.c.bf16 %v4717_v29, %v10105_v41  ;;  %v5203_v36 = vshll.u32 %v5165_v63, 16  ;;  %v8020_v27 = vld [vmem:[%s11247_s6 + $0xd8] sm:$0xff]  }
 0x3fd   : > { %v4656_v40 = vadd.f32 %v4624_v31, %v4592_v16  ;;  %v4625_v11 = vmax.f32 %v4561_v37, 0.0  ;;  %v4426_v54 = vadd.f32 %v10016_v8, %v4265_v2  ;;  %v4268_v4 = vadd.f32 %v7463_v45, %v9869_v50  ;;  %v4881_v20 = vld [vmem:[#allocation3 + $0x78] sm:$0xff]  ;;  %7656 = vmatprep.subr.bf16.mxu1 %v8020_v27 }
 0x3fe   : > { %4986 = vrot.lane.b32.xlu1 %v10098_v51, %s8131_s12  ;;  %v5202_v19 = vrot.slane %v5200_v14, 7  ;;  %v4775_v48 = vor.u32 %v4773_v18, %v4772_v32  ;;  %v4777_v1 = vshrl.u32 %v4743_v62, 16  ;;  %v8021_v31 = vld [vmem:[%s11247_s6 + $0x98] sm:$0xff]   ;;  %v4928_v45 = vld [vmem:[#allocation4 + $0x40] sm:$0xff] }
 0x3ff   : > { %4688 = vst.msk [vmem:[#allocation4 + $0x50] sm:$0xff] %vm326_vm4, %v4656_v40  ;;  %v4657_v29 = vadd.f32 %v4625_v11, %v4593_v12  ;;  %v4523_v17 = vmul.f32 %v9948_v7, %v4426_v54  ;;  %v4429_v8 = vadd.f32 %v10023_v28, %v4268_v4  ;;  %v7464_v50 = vpop.f32.mrb[44].mxu0  ;;  %v10132_v12 = vld [vmem:[#allocation4 + $0x40] sm:$0xff]  ;;  %7657 = vmatpush3.bf16.msra.mxu1 %v8021_v31 }
 0x400   : > { %v7465_v63 = vpop.f32.mrb[45].mxu0  ;;  %v10121_v37 = vpop.f32.mrb[104].mxu1  ;;  %v5205_v2 = vor.u32 %v5203_v36, %v5202_v19  ;;  %v4929_v16 = vld [vmem:[#allocation4 + $0x48] sm:$0xff]  ;;  %v4882_v32 = vsel %vm9190_vm3, %v4775_v48, %v4881_v20  ;;  %v4594_v31 = vld [vmem:[#allocation4 + $0x60] sm:$0xff] }
 0x401   : > { %v5139_v14 = vld [vmem:[#allocation4 + $0x48] sm:$0x7f]  ;;  %4689 = vst.msk [vmem:[#allocation4 + $0x58] sm:$0xff] %vm326_vm4, %v4657_v29  ;;  %v4562_v28 = vadd.f32 %v9960_v38, %v4523_v17  ;;  %v4524_v18 = vmul.f32 %v9948_v7, %v4429_v8  ;;  %v7466_v40 = vadd.f32 %v7465_v63, %v7464_v50  ;;  %v7467_v11 = vpop.f32.mrb[46].mxu0  ;;  %v10128_v54 = vpop.f32.mrb[105].mxu1  ;;  %v10130_v4 = vpack.c.bf16 %v4929_v16, %v4928_v45 }
 0x402   : > { %4883 = vst [vmem:[#allocation3 + $0x78] sm:$0xff] %v4882_v32  ;;  %v4719_v19 = vld [vmem:[#allocation4 + $0x48] sm:$0x7f]  ;;  %5296 = vrot.lane.b32.xlu0 %v5205_v2, %s8131_s12  ;;  %v7468_v36 = vpop.f32.mrb[47].mxu0  ;;  %v10135_v48 = vpop.f32.mrb[106].mxu1  ;;  %v5166_v27 = vpack.c.bf16 %v5139_v14, %v4928_v45  ;;  %v4779_v29 = vrot.slane %v4777_v1, 7 }
 0x403   : > { %v4780_v17 = vshll.u32 %v4743_v62, 16  ;;  %v4744_v8 = vpack.c.bf16 %v4719_v19, %v10132_v12  ;;  %v4626_v50 = vmax.f32 %v4562_v28, 0.0  ;;  %v4563_v20 = vadd.f32 %v9960_v38, %v4524_v18  ;;  %v10140_v32 = vpop.f32.mrb[107].mxu1  ;;  %4988 = vrot.lane.b32.xlu1 %v10130_v4, %s8131_s12  ;;  %v4884_v18 = vld [vmem:[#allocation3 + $0xa0] sm:$0xff]  ;;  %v4595_v19 = vld [vmem:[#allocation4 + $0x68] sm:$0xff] }
 0x404   : > { %v4273_v63 = vadd.f32 %v7466_v40, %v9871_v23  ;;  %v7469_v16 = vadd.f32 %v7468_v36, %v7467_v11  ;;  %v5207_v2 = vshrl.u32 %v5166_v27, 16  ;;  %v5210_v47 = vshll.u32 %v5166_v27, 16  ;;  %v8022_v27 = vld [vmem:[%s11247_s6 + $0xe0] sm:$0xff]  }
 0x405   : > { %v4782_v60 = vor.u32 %v4780_v17, %v4779_v29  ;;  %v4784_v45 = vshrl.u32 %v4744_v8, 16  ;;  %v4658_v1 = vadd.f32 %v4626_v50, %v4594_v31  ;;  %v4627_v62 = vmax.f32 %v4563_v20, 0.0  ;;  %v8023_v50 = vld [vmem:[%s11247_s6 + $0xa0] sm:$0xff]   ;;  %7658 = vmatprep.subr.bf16.mxu1 %v8022_v27 }
 0x406   : > { %v4434_v14 = vadd.f32 %v10008_v15, %v4273_v63  ;;  %v4276_v28 = vadd.f32 %v7469_v16, %v9873_v49  ;;  %v5209_v23 = vrot.slane %v5207_v2, 7  ;;  %v4787_v36 = vshll.u32 %v4744_v8, 16  ;;  %v4930_v63 = vld [vmem:[#allocation4 + $0x50] sm:$0xff]  ;;  %7659 = vmatpush3.bf16.msra.mxu1 %v8023_v50 }
 0x407   : > { %v4885_v40 = vsel %vm9190_vm3, %v4782_v60, %v4884_v18  ;;  %v4786_v11 = vrot.slane %v4784_v45, 7  ;;  %4690 = vst.msk [vmem:[#allocation4 + $0x60] sm:$0xff] %vm326_vm4, %v4658_v1  ;;  %v4659_v29 = vadd.f32 %v4627_v62, %v4595_v19  ;;  %v7470_v49 = vpop.f32.mrb[48].mxu0  ;;  %v5611_v60 = vld [vmem:[#allocation4 + $0x18] sm:$0x7f]  ;;  %v10166_v19 = vld [vmem:[#allocation4 + $0x50] sm:$0xff] }
 0x408   : > { %v4525_v17 = vmul.f32 %v9948_v7, %v4434_v14  ;;  %v4437_v15 = vadd.f32 %v10019_v35, %v4276_v28  ;;  %4886 = vst [vmem:[#allocation3 + $0xa0] sm:$0xff] %v4885_v40  ;;  %v7471_v20 = vpop.f32.mrb[49].mxu0  ;;  %v5212_v8 = vor.u32 %v5210_v47, %v5209_v23  ;;  %v4931_v16 = vld [vmem:[#allocation4 + $0x58] sm:$0xff]  ;;  %v10157_v2 = vpop.f32.mrb[108].mxu1  ;;  %v4887_v47 = vld [vmem:[#allocation3 + $0xc8] sm:$0xff] }
 0x409   : > { %v5141_v31 = vld [vmem:[#allocation4 + $0x58] sm:$0x7f]  ;;  %v4789_v45 = vor.u32 %v4787_v36, %v4786_v11  ;;  %4691 = vst.msk [vmem:[#allocation4 + $0x68] sm:$0xff] %vm326_vm4, %v4659_v29  ;;  %v7472_v62 = vadd.f32 %v7471_v20, %v7470_v49  ;;  %v7473_v14 = vpop.f32.mrb[50].mxu0  ;;  %v10162_v28 = vpack.c.bf16 %v4931_v16, %v4930_v63  ;;  %v10164_v18 = vpop.f32.mrb[109].mxu1 }
 0x40a   : > { %v4564_v35 = vadd.f32 %v9960_v38, %v4525_v17  ;;  %v4526_v1 = vmul.f32 %v9948_v7, %v4437_v15  ;;  %v4721_v23 = vld [vmem:[#allocation4 + $0x58] sm:$0x7f]  ;;  %5298 = vrot.lane.b32.xlu0 %v5212_v8, %s8131_s12  ;;  %v7474_v40 = vpop.f32.mrb[51].mxu0  ;;  %v5167_v11 = vpack.c.bf16 %v5141_v31, %v4930_v63  ;;  %v10169_v36 = vpop.f32.mrb[110].mxu1  ;;  %v10175_v17 = vpack.c.bf16 %v5611_v60, %v10029_v13  ;;  %v4596_v63 = vld [vmem:[#allocation4 + $0x70] sm:$0xff] }
 0x40b   : > { %11282 = vst [vmem:[#allocation12_spill] sm:$0xff] %v10169_v36  ;;  %v4888_v27 = vsel %vm9190_vm3, %v4789_v45, %v4887_v47  ;;  %v4745_v29 = vpack.c.bf16 %v4721_v23, %v10166_v19  ;;  %v4281_v20 = vadd.f32 %v7472_v62, %v9881_v53  ;;  %v7475_v50 = vadd.f32 %v7474_v40, %v7473_v14  ;;  %v10181_v8 = vpop.f32.mrb[111].mxu1 }
 0x40c   : > { %v4628_v15 = vmax.f32 %v4564_v35, 0.0  ;;  %v4565_v49 = vadd.f32 %v9960_v38, %v4526_v1  ;;  %4990 = vrot.lane.b32.xlu1 %v10162_v28, %s8131_s12  ;;  %4889 = vst [vmem:[#allocation3 + $0xc8] sm:$0xff] %v4888_v27  ;;  %v5214_v16 = vshrl.u32 %v5167_v11, 16  ;;  %v5217_v31 = vshll.u32 %v5167_v11, 16  ;;  %v5613_v35 = vld [vmem:[#allocation4 + $0x28] sm:$0x7f] }
 0x40d   : > { %v4791_v45 = vshrl.u32 %v4745_v29, 16  ;;  %v4442_v13 = vadd.f32 %v10049_v61, %v4281_v20  ;;  %v4284_v60 = vadd.f32 %v7475_v50, %v9883_v3  ;;  %v4597_v1 = vld [vmem:[#allocation4 + $0x78] sm:$0xff]  ;;  %v4794_v14 = vshll.u32 %v4745_v29, 16  ;;  %v8025_v27 = vld [vmem:[%s11247_s6 + $0xe8] sm:$0xff]  }
 0x40e   : > { %v4660_v47 = vadd.f32 %v4628_v15, %v4596_v63  ;;  %v4629_v23 = vmax.f32 %v4565_v49, 0.0  ;;  %v5216_v53 = vrot.slane %v5214_v16, 7  ;;  %v5656_v40 = vshrl.u32 %v10175_v17, 16  ;;  %v8026_v3 = vld [vmem:[%s11247_s6 + $0xa8] sm:$0xff]   ;;  %v4932_v50 = vld [vmem:[#allocation4 + $0x60] sm:$0xff]  ;;  %7660 = vmatprep.subr.bf16.mxu1 %v8025_v27 }
 0x40f   : > { %v4793_v62 = vrot.slane %v4791_v45, 7  ;;  %v4527_v15 = vmul.f32 %v9948_v7, %v4442_v13  ;;  %v4445_v61 = vadd.f32 %v10060_v9, %v4284_v60  ;;  %v7476_v49 = vpop.f32.mrb[52].mxu0  ;;  %v10196_v36 = vpack.c.bf16 %v5613_v35, %v10067_v55  ;;  %7661 = vmatpush3.bf16.msra.mxu1 %v8026_v3  ;;  %v4598_v3 = vld [vmem:[#allocation4 + $0x80] sm:$0xff] }
 0x410   : > { %4692 = vst.msk [vmem:[#allocation4 + $0x70] sm:$0xff] %vm326_vm4, %v4660_v47  ;;  %v4661_v11 = vadd.f32 %v4629_v23, %v4597_v1  ;;  %v7477_v20 = vpop.f32.mrb[53].mxu0  ;;  %v5219_v29 = vor.u32 %v5217_v31, %v5216_v53  ;;  %v4933_v63 = vld [vmem:[#allocation4 + $0x68] sm:$0xff]  ;;  %v4890_v1 = vld [vmem:[#allocation3 + $0xf0] sm:$0xff]  ;;  %v10203_v31 = vld [vmem:[#allocation4 + $0x60] sm:$0xff] }
 0x411   : > { %v5143_v16 = vld [vmem:[#allocation4 + $0x68] sm:$0x7f]  ;;  %v4796_v45 = vor.u32 %v4794_v14, %v4793_v62  ;;  %v4566_v47 = vadd.f32 %v9960_v38, %v4527_v15  ;;  %v4528_v9 = vmul.f32 %v9948_v7, %v4445_v61  ;;  %v7478_v23 = vadd.f32 %v7477_v20, %v7476_v49  ;;  %v7479_v13 = vpop.f32.mrb[54].mxu0 }
 0x412   : > { %4693 = vst.msk [vmem:[#allocation4 + $0x78] sm:$0xff] %vm326_vm4, %v4661_v11  ;;  %v10201_v60 = vpack.c.bf16 %v4933_v63, %v4932_v50  ;;  %v4723_v53 = vld [vmem:[#allocation4 + $0x68] sm:$0x7f]  ;;  %5300 = vrot.lane.b32.xlu0 %v5219_v29, %s8131_s12  ;;  %v7480_v62 = vpop.f32.mrb[55].mxu0  ;;  %v5168_v35 = vpack.c.bf16 %v5143_v16, %v4932_v50  ;;  %v5658_v11 = vrot.slane %v5656_v40, 7  ;;  %v5659_v16 = vshll.u32 %v10175_v17, 16 }
 0x413   : > { %v4891_v14 = vsel %vm9190_vm3, %v4796_v45, %v4890_v1  ;;  %v4746_v27 = vpack.c.bf16 %v4723_v53, %v10203_v31  ;;  %v4630_v15 = vmax.f32 %v4566_v47, 0.0  ;;  %v4567_v61 = vadd.f32 %v9960_v38, %v4528_v9  ;;  %v5615_v9 = vld [vmem:[#allocation4 + $0x38] sm:$0x7f]  ;;  %v4599_v53 = vld [vmem:[#allocation4 + $0x88] sm:$0xff] }
 0x414   : > { %v4289_v49 = vadd.f32 %v7478_v23, %v9885_v56  ;;  %v7481_v20 = vadd.f32 %v7480_v62, %v7479_v13  ;;  %4992 = vrot.lane.b32.xlu1 %v10201_v60, %s8131_s12  ;;  %4892 = vst [vmem:[#allocation3 + $0xf0] sm:$0xff] %v4891_v14  ;;  %v5221_v29 = vshrl.u32 %v5168_v35, 16  ;;  %v5224_v63 = vshll.u32 %v5168_v35, 16  ;;  %v8027_v14 = vld [vmem:[%s11247_s6 + $0xf0] sm:$0xff]  }
 0x415   : > { %v4798_v50 = vshrl.u32 %v4746_v27, 16  ;;  %v4662_v45 = vadd.f32 %v4630_v15, %v4598_v3  ;;  %v4631_v1 = vmax.f32 %v4567_v61, 0.0  ;;  %v4801_v13 = vshll.u32 %v4746_v27, 16  ;;  %v8028_v27 = vld [vmem:[%s11247_s6 + $0xb0] sm:$0xff]   ;;  %7662 = vmatprep.subr.bf16.mxu1 %v8027_v14 }
 0x416   : > { %v4450_v40 = vadd.f32 %v10042_v30, %v4289_v49  ;;  %v4292_v47 = vadd.f32 %v7481_v20, %v9887_v59  ;;  %v5223_v56 = vrot.slane %v5221_v29, 7  ;;  %v5661_v62 = vor.u32 %v5659_v16, %v5658_v11  ;;  %v5775_v59 = vld [vmem:[#allocation3 + $0x18] sm:$0xff]  ;;  %7663 = vmatpush3.bf16.msra.mxu1 %v8028_v27 }
 0x417   : > { %v4800_v23 = vrot.slane %v4798_v50, 7  ;;  %4694 = vst.msk [vmem:[#allocation4 + $0x80] sm:$0xff] %vm326_vm4, %v4662_v45  ;;  %v4663_v35 = vadd.f32 %v4631_v1, %v4599_v53  ;;  %v7482_v30 = vpop.f32.mrb[56].mxu0  ;;  %v4934_v49 = vld [vmem:[#allocation4 + $0x70] sm:$0xff] }
 0x418   : > { %v4529_v17 = vmul.f32 %v9948_v7, %v4450_v40  ;;  %v4453_v15 = vadd.f32 %v10052_v46, %v4292_v47  ;;  %5880 = vrot.lane.b32.xlu1 %v10063_v52, %s8131_s12  ;;  %v7483_v11 = vpop.f32.mrb[57].mxu0  ;;  %v5226_v61 = vor.u32 %v5224_v63, %v5223_v56  ;;  %v5776_v50 = vsel %vm9190_vm3, %v5661_v62, %v5775_v59  ;;  %v4893_v40 = vld [vmem:[#allocation3 + $0x118] sm:$0xff]  ;;  %v10237_v47 = vld [vmem:[#allocation4 + $0x70] sm:$0xff] }
 0x419   : > { %v4935_v20 = vld [vmem:[#allocation4 + $0x78] sm:$0xff]  ;;  %v4803_v29 = vor.u32 %v4801_v13, %v4800_v23  ;;  %v10230_v46 = vpack.c.bf16 %v5615_v9, %v10105_v41  ;;  %4695 = vst.msk [vmem:[#allocation4 + $0x88] sm:$0xff] %vm326_vm4, %v4663_v35  ;;  %v7484_v45 = vadd.f32 %v7483_v11, %v7482_v30  ;;  %v7485_v1 = vpop.f32.mrb[58].mxu0  ;;  %5777 = vst [vmem:[#allocation3 + $0x18] sm:$0xff] %v5776_v50  ;;  %v5663_v62 = vshrl.u32 %v10196_v36, 16  ;;  %v4600_v30 = vld [vmem:[#allocation4 + $0x90] sm:$0xff] }
 0x41a   : > { %v5145_v3 = vld [vmem:[#allocation4 + $0x78] sm:$0x7f]  ;;  %v4568_v52 = vadd.f32 %v9960_v38, %v4529_v17  ;;  %v4530_v16 = vmul.f32 %v9948_v7, %v4453_v15  ;;  %v10235_v63 = vpack.c.bf16 %v4935_v20, %v4934_v49  ;;  %5302 = vrot.lane.b32.xlu0 %v5226_v61, %s8131_s12  ;;  %v7486_v9 = vpop.f32.mrb[59].mxu0  ;;  %v5666_v61 = vshll.u32 %v10196_v36, 16 }
 0x41b   : > { %v4725_v53 = vld [vmem:[#allocation4 + $0x78] sm:$0x7f]  ;;  %v5169_v56 = vpack.c.bf16 %v5145_v3, %v4934_v49  ;;  %v4894_v23 = vsel %vm9190_vm3, %v4803_v29, %v4893_v40  ;;  %v4297_v17 = vadd.f32 %v7484_v45, %v9901_v26  ;;  %v7487_v15 = vadd.f32 %v7486_v9, %v7485_v1 }
 0x41c   : > { %v4747_v13 = vpack.c.bf16 %v4725_v53, %v10237_v47  ;;  %v4632_v14 = vmax.f32 %v4568_v52, 0.0  ;;  %v4569_v35 = vadd.f32 %v9960_v38, %v4530_v16  ;;  %4994 = vrot.lane.b32.xlu1 %v10235_v63, %s8131_s12  ;;  %4895 = vst [vmem:[#allocation3 + $0x118] sm:$0xff] %v4894_v23  ;;  %v4601_v50 = vld [vmem:[#allocation4 + $0x98] sm:$0xff]  ;;  %v5665_v45 = vrot.slane %v5663_v62, 7 }
 0x41d   : > { %v5228_v59 = vshrl.u32 %v5169_v56, 16  ;;  %v5231_v27 = vshll.u32 %v5169_v56, 16  ;;  %v4458_v3 = vadd.f32 %v10091_v24, %v4297_v17  ;;  %v4300_v29 = vadd.f32 %v7487_v15, %v9903_v33  ;;  %v8029_v1 = vld [vmem:[%s11247_s6 + $0xf8] sm:$0xff]   ;;  %v4896_v33 = vld [vmem:[#allocation3 + $0x140] sm:$0xff] }
 0x41e   : > { %v4805_v11 = vshrl.u32 %v4747_v13, 16  ;;  %v4664_v49 = vadd.f32 %v4632_v14, %v4600_v30  ;;  %v4633_v20 = vmax.f32 %v4569_v35, 0.0  ;;  %v4808_v16 = vshll.u32 %v4747_v13, 16  ;;  %v5778_v24 = vld [vmem:[#allocation3 + $0x40] sm:$0xff]  ;;  %v8030_v56 = vld [vmem:[%s11247_s6 + $0xb8] sm:$0xff]   ;;  %7664 = vmatprep.subr.bf16.mxu1 %v8029_v1 }
 0x41f   : > { %v5230_v52 = vrot.slane %v5228_v59, 7  ;;  %v4531_v36 = vmul.f32 %v9948_v7, %v4458_v3  ;;  %v4461_v53 = vadd.f32 %v10103_v6, %v4300_v29  ;;  %v7488_v9 = vpop.f32.mrb[60].mxu0  ;;  %v4936_v62 = vld [vmem:[#allocation4 + $0x80] sm:$0xff]  ;;  %v5668_v15 = vor.u32 %v5666_v61, %v5665_v45  ;;  %7665 = vmatpush3.bf16.msra.mxu1 %v8030_v56 }
 0x420   : > { %v4807_v26 = vrot.slane %v4805_v11, 7  ;;  %4696 = vst.msk [vmem:[#allocation4 + $0x90] sm:$0xff] %vm326_vm4, %v4664_v49  ;;  %v4665_v40 = vadd.f32 %v4633_v20, %v4601_v50  ;;  %5882 = vrot.lane.b32.xlu1 %v10083_v43, %s8131_s12  ;;  %v7489_v23 = vpop.f32.mrb[61].mxu0  ;;  %v4937_v14 = vld [vmem:[#allocation4 + $0x88] sm:$0xff]  ;;  %v5670_v30 = vshrl.u32 %v10230_v46, 16  ;;  %v10279_v1 = vld [vmem:[#allocation4 + $0x80] sm:$0xff] }
 0x421   : > { %v5233_v13 = vor.u32 %v5231_v27, %v5230_v52  ;;  %v5147_v35 = vld [vmem:[#allocation4 + $0x88] sm:$0x7f]  ;;  %v4570_v43 = vadd.f32 %v9960_v38, %v4531_v36  ;;  %v4532_v6 = vmul.f32 %v9948_v7, %v4461_v53  ;;  %v7490_v59 = vadd.f32 %v7489_v23, %v7488_v9  ;;  %v7491_v11 = vpop.f32.mrb[62].mxu0 }
 0x422   : > { %v4810_v17 = vor.u32 %v4808_v16, %v4807_v26  ;;  %4697 = vst.msk [vmem:[#allocation4 + $0x98] sm:$0xff] %vm326_vm4, %v4665_v40  ;;  %v10266_v49 = vpack.c.bf16 %v4937_v14, %v4936_v62  ;;  %v10268_v20 = vld [vmem:[#allocation4 + $0x1] sm:$0xff]  ;;  %v5451_v27 = vld [vmem:[#allocation4 + $0x9] sm:$0x7f]  ;;  %v7492_v61 = vpop.f32.mrb[63].mxu0  ;;  %v5170_v29 = vpack.c.bf16 %v5147_v35, %v4936_v62  ;;  %v5779_v52 = vsel %vm9190_vm3, %v5668_v15, %v5778_v24 }
 0x423   : > { %v4727_v3 = vld [vmem:[#allocation4 + $0x88] sm:$0x7f]  ;;  %5304 = vrot.lane.b32.xlu0 %v5233_v13, %s8131_s12  ;;  %v4634_v7 = vmax.f32 %v4570_v43, 0.0  ;;  %v4571_v26 = vadd.f32 %v9960_v38, %v4532_v6  ;;  %v4305_v16 = vadd.f32 %v7490_v59, %v9905_v21  ;;  %v7493_v45 = vadd.f32 %v7492_v61, %v7491_v11  ;;  %5780 = vst [vmem:[#allocation3 + $0x40] sm:$0xff] %v5779_v52  ;;  %v4602_v40 = vld [vmem:[#allocation4 + $0xa0] sm:$0xff] }
 0x424   : > { %v4897_v50 = vsel %vm9190_vm3, %v4810_v17, %v4896_v33  ;;  %4996 = vrot.lane.b32.xlu1 %v10266_v49, %s8131_s12  ;;  %v5482_v36 = vpack.c.bf16 %v5451_v27, %v10268_v20  ;;  %v5235_v53 = vshrl.u32 %v5170_v29, 16  ;;  %v4748_v9 = vpack.c.bf16 %v4727_v3, %v10279_v1  ;;  %v4603_v23 = vld [vmem:[#allocation4 + $0xa8] sm:$0xff]  ;;  %v10291_v15 = vld [vmem:[%s11245_s4] ss:$0 sm:$0xff] }
 0x425   : > { %4898 = vst [vmem:[#allocation3 + $0x140] sm:$0xff] %v4897_v50  ;;  %v5672_v33 = vrot.slane %v5670_v30, 7  ;;  %v4666_v24 = vadd.f32 %v4634_v7, %v4602_v40  ;;  %v4635_v56 = vmax.f32 %v4571_v26, 0.0  ;;  %v4466_v38 = vadd.f32 %v10081_v44, %v4305_v16  ;;  %v5617_v6 = vld [vmem:[#allocation4 + $0x48] sm:$0x7f]  ;;  %v10307_v16 = vld [vmem:[#allocation4 + $0x11] sm:$0xff] }
 0x426   : > { %v4308_v21 = vadd.f32 %v7493_v45, %v9907_v22  ;;  %v5237_v13 = vrot.slane %v5235_v53, 7  ;;  %v5238_v62 = vshll.u32 %v5170_v29, 16  ;;  %v4812_v14 = vshrl.u32 %v4748_v9, 16  ;;  %v10301_v50 = vld [vmem:[%s11246_s5] ss:$0 sm:$0xff]  ;;  %v5781_v40 = vld [vmem:[#allocation3 + $0x68] sm:$0xff] }
 0x427   : > { %5514 = vrot.lane.b32.xlu0 %v5482_v36, %s8131_s12  ;;  %v5673_v35 = vshll.u32 %v10230_v46, 16  ;;  %4698 = vst.msk [vmem:[#allocation4 + $0xa0] sm:$0xff] %vm326_vm4, %v4666_v24  ;;  %v4667_v17 = vadd.f32 %v4635_v56, %v4603_v23  ;;  %v4533_v44 = vmul.f32 %v10291_v15, %v4466_v38  ;;  %v7494_v30 = vpop.f32.mrb[64].mxu0  ;;  %v4938_v43 = vld [vmem:[#allocation4 + $0x90] sm:$0xff]  ;;  %v4815_v61 = vshll.u32 %v4748_v9, 16 }
 0x428   : > { %v4469_v22 = vadd.f32 %v10094_v0, %v4308_v21  ;;  %5884 = vrot.lane.b32.xlu1 %v10098_v51, %s8131_s12  ;;  %v7495_v59 = vpop.f32.mrb[65].mxu0  ;;  %v5240_v46 = vor.u32 %v5238_v62, %v5237_v13  ;;  %v4814_v3 = vrot.slane %v4812_v14, 7  ;;  %v5453_v45 = vld [vmem:[#allocation4 + $0x19] sm:$0x7f]  ;;  %v10313_v56 = vpack.c.bf16 %v5617_v6, %v10132_v12  ;;  %v10319_v62 = vld [vmem:[#allocation4 + $0x21] sm:$0xff] }
 0x429   : > { %v4939_v11 = vld [vmem:[#allocation4 + $0x98] sm:$0xff]  ;;  %v5675_v29 = vor.u32 %v5673_v35, %v5672_v33  ;;  %4699 = vst.msk [vmem:[#allocation4 + $0xa8] sm:$0xff] %vm326_vm4, %v4667_v17  ;;  %v4572_v0 = vadd.f32 %v10301_v50, %v4533_v44  ;;  %v7496_v52 = vadd.f32 %v7495_v59, %v7494_v30  ;;  %v7497_v7 = vpop.f32.mrb[66].mxu0  ;;  %v4899_v33 = vld [vmem:[#allocation3 + $0x168] sm:$0xff]  ;;  %v4604_v17 = vld [vmem:[#allocation4 + $0xb0] sm:$0xff]  ;;  %v5483_v44 = vpack.c.bf16 %v5453_v45, %v10307_v16 }
 0x42a   : > { %v5149_v27 = vld [vmem:[#allocation4 + $0x98] sm:$0x7f]  ;;  %v4534_v51 = vmul.f32 %v10291_v15, %v4469_v22  ;;  %v10305_v26 = vpack.c.bf16 %v4939_v11, %v4938_v43  ;;  %v7498_v36 = vpop.f32.mrb[67].mxu0  ;;  %v4817_v9 = vor.u32 %v4815_v61, %v4814_v3  ;;  %v10321_v14 = vld [vmem:[#allocation4 + $0x29] sm:$0x7f]  ;;  %v5677_v45 = vshrl.u32 %v10313_v56, 16 }
 0x42b   : > { %5306 = vrot.lane.b32.xlu0 %v5240_v46, %s8131_s12  ;;  %v5171_v53 = vpack.c.bf16 %v5149_v27, %v4938_v43  ;;  %v5782_v24 = vsel %vm9190_vm3, %v5675_v29, %v5781_v40  ;;  %v4636_v38 = vmax.f32 %v4572_v0, 0.0  ;;  %v4313_v23 = vadd.f32 %v7496_v52, %v9915_v34  ;;  %v4729_v35 = vld [vmem:[#allocation4 + $0x98] sm:$0x7f]  ;;  %v10328_v46 = vld [vmem:[#allocation4 + $0x90] sm:$0xff]  ;;  %v5391_v11 = vld [vmem:[#allocation4 + $0x28] sm:$0xff] }
 0x42c   : > { %v4573_v21 = vadd.f32 %v10301_v50, %v4534_v51  ;;  %v7499_v13 = vadd.f32 %v7498_v36, %v7497_v7  ;;  %4998 = vrot.lane.b32.xlu1 %v10305_v26, %s8131_s12  ;;  %5783 = vst [vmem:[#allocation3 + $0x68] sm:$0xff] %v5782_v24  ;;  %v4900_v30 = vsel %vm9190_vm3, %v4817_v9, %v4899_v33  ;;  %v4605_v27 = vld [vmem:[#allocation4 + $0xb8] sm:$0xff] }
 0x42d   : > { %v5242_v22 = vshrl.u32 %v5171_v53, 16  ;;  %v4668_v43 = vadd.f32 %v4636_v38, %v4604_v17  ;;  %v4474_v34 = vadd.f32 %v10128_v54, %v4313_v23  ;;  %4901 = vst [vmem:[#allocation3 + $0x168] sm:$0xff] %v4900_v30  ;;  %v5245_v61 = vshll.u32 %v5171_v53, 16  ;;  %v5619_v40 = vld [vmem:[#allocation4 + $0x58] sm:$0x7f] }
 0x42e   : > { %v4637_v6 = vmax.f32 %v4573_v21, 0.0  ;;  %v4316_v59 = vadd.f32 %v7499_v13, %v9917_v57  ;;  %v5484_v29 = vpack.c.bf16 %v10321_v14, %v10319_v62  ;;  %v4749_v0 = vpack.c.bf16 %v4729_v35, %v10328_v46  ;;  %v4940_v7 = vld [vmem:[#allocation4 + $0xa0] sm:$0xff] }
 0x42f   : > { %5516 = vrot.lane.b32.xlu0 %v5483_v44, %s8131_s12  ;;  %v5244_v3 = vrot.slane %v5242_v22, 7  ;;  %4700 = vst.msk [vmem:[#allocation4 + $0xb0] sm:$0xff] %vm326_vm4, %v4668_v43  ;;  %v4535_v54 = vmul.f32 %v10291_v15, %v4474_v34  ;;  %v7500_v52 = vpop.f32.mrb[68].mxu0  ;;  %v5680_v38 = vshll.u32 %v10313_v56, 16  ;;  %v5420_v21 = vpack.c.bf16 %v5391_v11, %v10067_v55  ;;  %v4606_v34 = vld [vmem:[#allocation4 + $0xc0] sm:$0xff] }
 0x430   : > { %v4669_v51 = vadd.f32 %v4637_v6, %v4605_v27  ;;  %v4477_v57 = vadd.f32 %v10140_v32, %v4316_v59  ;;  %5886 = vrot.lane.b32.xlu1 %v10130_v4, %s8131_s12  ;;  %v7501_v36 = vpop.f32.mrb[69].mxu0  ;;  %v4941_v9 = vld [vmem:[#allocation4 + $0xa8] sm:$0xff]  ;;  %v4819_v24 = vshrl.u32 %v4749_v0, 16  ;;  %v4822_v44 = vshll.u32 %v4749_v0, 16 }
 0x431   : > { %v5247_v53 = vor.u32 %v5245_v61, %v5244_v3  ;;  %v5151_v33 = vld [vmem:[#allocation4 + $0xa8] sm:$0x7f]  ;;  %v4574_v32 = vadd.f32 %v10301_v50, %v4535_v54  ;;  %v7502_v4 = vadd.f32 %v7501_v36, %v7500_v52  ;;  %v7503_v13 = vpop.f32.mrb[70].mxu0  ;;  %v10345_v62 = vpack.c.bf16 %v4941_v9, %v4940_v7  ;;  %5436 = vst.msk [vmem:[#allocation3 + $0x60] sm:$0xff] %vm326_vm4, %v5420_v21  ;;  %v10358_v52 = vld [vmem:[#allocation4 + $0xa0] sm:$0xff] }
 0x432   : > { %4701 = vst.msk [vmem:[#allocation4 + $0xb8] sm:$0xff] %vm326_vm4, %v4669_v51  ;;  %v4536_v23 = vmul.f32 %v10291_v15, %v4477_v57  ;;  %v7504_v14 = vpop.f32.mrb[71].mxu0  ;;  %v5172_v35 = vpack.c.bf16 %v5151_v33, %v4940_v7  ;;  %v4821_v17 = vrot.slane %v4819_v24, 7  ;;  %v10350_v55 = vpack.c.bf16 %v5619_v40, %v10166_v19  ;;  %v4731_v6 = vld [vmem:[#allocation4 + $0xa8] sm:$0x7f]  ;;  %v4902_v57 = vld [vmem:[#allocation3 + $0x190] sm:$0xff] }
 0x433   : > { %5308 = vrot.lane.b32.xlu0 %v5247_v53, %s8131_s12  ;;  %v4638_v56 = vmax.f32 %v4574_v32, 0.0  ;;  %v4321_v30 = vadd.f32 %v7502_v4, %v9925_v10  ;;  %v7505_v43 = vadd.f32 %v7504_v14, %v7503_v13  ;;  %v5679_v3 = vrot.slane %v5677_v45, 7  ;;  %v4607_v10 = vld [vmem:[#allocation4 + $0xc8] sm:$0xff] }
 0x434   : > { %v4575_v22 = vadd.f32 %v10301_v50, %v4536_v23  ;;  %5000 = vrot.lane.b32.xlu1 %v10345_v62, %s8131_s12  ;;  %v5249_v59 = vshrl.u32 %v5172_v35, 16  ;;  %v5252_v11 = vshll.u32 %v5172_v35, 16  ;;  %v4824_v27 = vor.u32 %v4822_v44, %v4821_v17  ;;  %v10377_v44 = vld [vmem:[#allocation4 + $0x31] sm:$0xff] }
 0x435   : > { %v4670_v61 = vadd.f32 %v4638_v56, %v4606_v34  ;;  %v4482_v51 = vadd.f32 %v10121_v37, %v4321_v30  ;;  %v4324_v54 = vadd.f32 %v7505_v43, %v9927_v58  ;;  %v5682_v36 = vor.u32 %v5680_v38, %v5679_v3  ;;  %v5457_v56 = vld [vmem:[#allocation4 + $0x39] sm:$0x7f]  ;;  %v4608_v3 = vld [vmem:[#allocation4 + $0xd0] sm:$0xff] }
 0x436   : > { %v4639_v0 = vmax.f32 %v4575_v22, 0.0  ;;  %v5251_v7 = vrot.slane %v5249_v59, 7  ;;  %v4903_v40 = vsel %vm9190_vm3, %v4824_v27, %v4902_v57  ;;  %v4750_v53 = vpack.c.bf16 %v4731_v6, %v10358_v52  ;;  %v4942_v33 = vld [vmem:[#allocation4 + $0xb0] sm:$0xff] }
 0x437   : > { %5518 = vrot.lane.b32.xlu0 %v5484_v29, %s8131_s12  ;;  %4702 = vst.msk [vmem:[#allocation4 + $0xc0] sm:$0xff] %vm326_vm4, %v4670_v61  ;;  %v4537_v37 = vmul.f32 %v10291_v15, %v4482_v51  ;;  %v4485_v58 = vadd.f32 %v10135_v48, %v4324_v54  ;;  %v7506_v9 = vpop.f32.mrb[72].mxu0  ;;  %4904 = vst [vmem:[#allocation3 + $0x190] sm:$0xff] %v4903_v40  ;;  %v5784_v29 = vld [vmem:[#allocation3 + $0x90] sm:$0xff]  ;;  %v5684_v13 = vshrl.u32 %v10350_v55, 16 }
 0x438   : > { %v4671_v45 = vadd.f32 %v4639_v0, %v4607_v10  ;;  %5888 = vrot.lane.b32.xlu1 %v10162_v28, %s8131_s12  ;;  %v7507_v24 = vpop.f32.mrb[73].mxu0  ;;  %v5254_v21 = vor.u32 %v5252_v11, %v5251_v7  ;;  %v5785_v23 = vsel %vm9190_vm3, %v5682_v36, %v5784_v29  ;;  %v4826_v4 = vshrl.u32 %v4750_v53, 16  ;;  %v10391_v29 = vld [vmem:[#allocation4 + $0xb0] sm:$0xff] }
 0x439   : > { %v4943_v32 = vld [vmem:[#allocation4 + $0xb8] sm:$0xff]  ;;  %v4576_v48 = vadd.f32 %v10301_v50, %v4537_v37  ;;  %v4538_v14 = vmul.f32 %v10291_v15, %v4485_v58  ;;  %v7508_v28 = vadd.f32 %v7507_v24, %v7506_v9  ;;  %v7509_v35 = vpop.f32.mrb[74].mxu0  ;;  %5786 = vst [vmem:[#allocation3 + $0x90] sm:$0xff] %v5785_v23  ;;  %v4829_v6 = vshll.u32 %v4750_v53, 16 }
 0x43a   : > { %v5153_v38 = vld [vmem:[#allocation4 + $0xb8] sm:$0x7f]  ;;  %4703 = vst.msk [vmem:[#allocation4 + $0xc8] sm:$0xff] %vm326_vm4, %v4671_v45  ;;  %v10375_v17 = vpack.c.bf16 %v4943_v32, %v4942_v33  ;;  %v7510_v22 = vpop.f32.mrb[75].mxu0  ;;  %v4828_v43 = vrot.slane %v4826_v4, 7  ;;  %v5485_v61 = vpack.c.bf16 %v5457_v56, %v10377_v44  ;;  %v5686_v54 = vrot.slane %v5684_v13, 7 }
 0x43b   : > { %5310 = vrot.lane.b32.xlu0 %v5254_v21, %s8131_s12  ;;  %v5173_v30 = vpack.c.bf16 %v5153_v38, %v4942_v33  ;;  %v4640_v34 = vmax.f32 %v4576_v48, 0.0  ;;  %v4577_v59 = vadd.f32 %v10301_v50, %v4538_v14  ;;  %v7511_v11 = vadd.f32 %v7510_v22, %v7509_v35  ;;  %v4733_v57 = vld [vmem:[#allocation4 + $0xb8] sm:$0x7f]  ;;  %v5621_v38 = vld [vmem:[#allocation4 + $0x68] sm:$0x7f] }
 0x43c   : > { %5002 = vrot.lane.b32.xlu1 %v10375_v17, %s8131_s12  ;;  %v4329_v27 = vadd.f32 %v7508_v28, %v9935_v42  ;;  %v4831_v51 = vor.u32 %v4829_v6, %v4828_v43  ;;  %v4905_v53 = vld [vmem:[#allocation3 + $0x1b8] sm:$0xff]  ;;  %v5687_v33 = vshll.u32 %v10350_v55, 16  ;;  %v4751_v32 = vpack.c.bf16 %v4733_v57, %v10391_v29  ;;  %v5459_v43 = vld [vmem:[#allocation4 + $0x49] sm:$0x7f] }
 0x43d   : > { %v5256_v0 = vshrl.u32 %v5173_v30, 16  ;;  %v4672_v10 = vadd.f32 %v4640_v34, %v4608_v3  ;;  %v4641_v7 = vmax.f32 %v4577_v59, 0.0  ;;  %v4332_v36 = vadd.f32 %v7511_v11, %v9937_v25  ;;  %v5393_v45 = vld [vmem:[#allocation4 + $0x38] sm:$0xff] }
 0x43e   : > { %v4490_v40 = vadd.f32 %v10164_v18, %v4329_v27  ;;  %v4609_v37 = vld [vmem:[#allocation4 + $0xd8] sm:$0xff]  ;;  %v5259_v42 = vshll.u32 %v5173_v30, 16  ;;  %v4906_v9 = vsel %vm9190_vm3, %v4831_v51, %v4905_v53  ;;  %v4944_v55 = vld [vmem:[#allocation4 + $0xc0] sm:$0xff]  ;;  %v5689_v14 = vor.u32 %v5687_v33, %v5686_v54 }
 0x43f   : > { %5520 = vrot.lane.b32.xlu0 %v5485_v61, %s8131_s12  ;;  %v5258_v58 = vrot.slane %v5256_v0, 7  ;;  %4704 = vst.msk [vmem:[#allocation4 + $0xd0] sm:$0xff] %vm326_vm4, %v4672_v10  ;;  %v4673_v24 = vadd.f32 %v4641_v7, %v4609_v37  ;;  %v4493_v25 = vadd.f32 %v10181_v8, %v4332_v36  ;;  %v7512_v21 = vpop.f32.mrb[76].mxu0  ;;  %4907 = vst [vmem:[#allocation3 + $0x1b8] sm:$0xff] %v4906_v9  ;;  %v10405_v30 = vld [vmem:[#allocation4 + $0x41] sm:$0xff]  ;;  %v5787_v6 = vld [vmem:[#allocation3 + $0xb8] sm:$0xff] }
 0x440   : > { %v4539_v18 = vmul.f32 %v10291_v15, %v4490_v40  ;;  %5890 = vrot.lane.b32.xlu1 %v10201_v60, %s8131_s12  ;;  %v7513_v23 = vpop.f32.mrb[77].mxu0  ;;  %v5421_v28 = vpack.c.bf16 %v5393_v45, %v10105_v41  ;;  %v5788_v41 = vsel %vm9190_vm3, %v5689_v14, %v5787_v6  ;;  %v4833_v11 = vshrl.u32 %v4751_v32, 16  ;;  %v4610_v54 = vld [vmem:[#allocation4 + $0xe0] sm:$0xff]  ;;  %v11283_v37 = vld [vmem:[#allocation11_spill] sm:$0xff]  ;;  %v4611_v9 = vld [vmem:[#allocation4 + $0xe8] sm:$0xff] }
 0x441   : > { %v5261_v4 = vor.u32 %v5259_v42, %v5258_v58  ;;  %v4945_v13 = vld [vmem:[#allocation4 + $0xc8] sm:$0xff]  ;;  %4705 = vst.msk [vmem:[#allocation4 + $0xd8] sm:$0xff] %vm326_vm4, %v4673_v24  ;;  %v4540_v35 = vmul.f32 %v10291_v15, %v4493_v25  ;;  %v7514_v56 = vadd.f32 %v7513_v23, %v7512_v21  ;;  %v7515_v60 = vpop.f32.mrb[78].mxu0  ;;  %v5645_v27 = vpack.c.bf16 %v5621_v38, %v10203_v31  ;;  %v11284_v38 = vld [vmem:[#allocation12_spill] sm:$0xff] }
 0x442   : > { %v5155_v48 = vld [vmem:[#allocation4 + $0xc8] sm:$0x7f]  ;;  %v4578_v8 = vadd.f32 %v10301_v50, %v4539_v18  ;;  %v10403_v22 = vpack.c.bf16 %v4945_v13, %v4944_v55  ;;  %v7516_v34 = vpop.f32.mrb[79].mxu0  ;;  %5437 = vst.msk [vmem:[#allocation3 + $0x88] sm:$0xff] %vm326_vm4, %v5421_v28  ;;  %5789 = vst [vmem:[#allocation3 + $0xb8] sm:$0xff] %v5788_v41  ;;  %v5486_v57 = vpack.c.bf16 %v5459_v43, %v10405_v30  ;;  %v4835_v7 = vrot.slane %v4833_v11, 7 }
 0x443   : > { %5312 = vrot.lane.b32.xlu0 %v5261_v4, %s8131_s12  ;;  %v5174_v59 = vpack.c.bf16 %v5155_v48, %v4944_v55  ;;  %v4579_v61 = vadd.f32 %v10301_v50, %v4540_v35  ;;  %v4337_v0 = vadd.f32 %v7514_v56, %v9939_v5  ;;  %v7517_v51 = vadd.f32 %v7516_v34, %v7515_v60  ;;  %v4735_v42 = vld [vmem:[#allocation4 + $0xc8] sm:$0x7f]  ;;  %v4908_v18 = vld [vmem:[#allocation3 + $0x1e0] sm:$0xff]  ;;  %v5461_v4 = vld [vmem:[#allocation4 + $0x59] sm:$0x7f] }
 0x444   : > { %v4642_v3 = vmax.f32 %v4578_v8, 0.0  ;;  %5004 = vrot.lane.b32.xlu1 %v10403_v22, %s8131_s12  ;;  %v4836_v40 = vshll.u32 %v4751_v32, 16  ;;  %v5691_v25 = vshrl.u32 %v5645_v27, 16  ;;  %v5694_v55 = vshll.u32 %v5645_v27, 16  ;;  %v10427_v13 = vld [vmem:[#allocation4 + $0xc0] sm:$0xff] }
 0x445   : > { %v5263_v10 = vshrl.u32 %v5174_v59, 16  ;;  %v4643_v53 = vmax.f32 %v4579_v61, 0.0  ;;  %v4498_v45 = vadd.f32 %v10157_v2, %v4337_v0  ;;  %v4340_v58 = vadd.f32 %v7517_v51, %v11283_v37  ;;  %v10425_v2 = vld [vmem:[#allocation4 + $0x51] sm:$0xff]  ;;  %v5790_v27 = vld [vmem:[#allocation3 + $0xe0] sm:$0xff] }
 0x446   : > { %v4674_v36 = vadd.f32 %v4642_v3, %v4610_v54  ;;  %v5266_v33 = vshll.u32 %v5174_v59, 16  ;;  %v4838_v24 = vor.u32 %v4836_v40, %v4835_v7  ;;  %v4946_v14 = vld [vmem:[#allocation4 + $0xd0] sm:$0xff]  ;;  %v5693_v56 = vrot.slane %v5691_v25, 7  ;;  %v5395_v59 = vld [vmem:[#allocation4 + $0x48] sm:$0xff]  ;;  %v5623_v61 = vld [vmem:[#allocation4 + $0x78] sm:$0x7f] }
 0x447   : > { %5522 = vrot.lane.b32.xlu0 %v5486_v57, %s8131_s12  ;;  %v5265_v5 = vrot.slane %v5263_v10, 7  ;;  %v4675_v21 = vadd.f32 %v4643_v53, %v4611_v9  ;;  %v4541_v32 = vmul.f32 %v10291_v15, %v4498_v45  ;;  %v4501_v23 = vadd.f32 %v11284_v38, %v4340_v58  ;;  %v5397_v10 = vld [vmem:[#allocation4 + $0x58] sm:$0xff]  ;;  %v4612_v7 = vld [vmem:[#allocation4 + $0xf0] sm:$0xff]  ;;  %v10445_v9 = vld [vmem:[#allocation4 + $0x9] sm:$0x7f] }
 0x448   : > { %4706 = vst.msk [vmem:[#allocation4 + $0xe0] sm:$0xff] %vm326_vm4, %v4674_v36  ;;  %5892 = vrot.lane.b32.xlu1 %v10235_v63, %s8131_s12  ;;  %v4947_v28 = vld [vmem:[#allocation4 + $0xd8] sm:$0xff]  ;;  %v4909_v35 = vsel %vm9190_vm3, %v4838_v24, %v4908_v18  ;;  %v4752_v60 = vpack.c.bf16 %v4735_v42, %v10427_v13  ;;  %v5487_v41 = vpack.c.bf16 %v5461_v4, %v10425_v2  ;;  %v4911_v18 = vld [vmem:[#allocation3 + $0x208] sm:$0xff] }
 0x449   : > { %v5268_v48 = vor.u32 %v5266_v33, %v5265_v5  ;;  %v5157_v8 = vld [vmem:[#allocation4 + $0xd8] sm:$0x7f]  ;;  %4707 = vst.msk [vmem:[#allocation4 + $0xe8] sm:$0xff] %vm326_vm4, %v4675_v21  ;;  %v4580_v63 = vadd.f32 %v10301_v50, %v4541_v32  ;;  %v4542_v43 = vmul.f32 %v10291_v15, %v4501_v23  ;;  %v10435_v6 = vpack.c.bf16 %v4947_v28, %v4946_v14  ;;  %v10448_v5 = vld [vmem:[#allocation4 + $0xd0] sm:$0xff]  ;;  %v5625_v21 = vld [vmem:[#allocation4 + $0x88] sm:$0x7f] }
 0x44a   : > { %v5175_v34 = vpack.c.bf16 %v5157_v8, %v4946_v14  ;;  %4910 = vst [vmem:[#allocation3 + $0x1e0] sm:$0xff] %v4909_v35  ;;  %v5696_v11 = vor.u32 %v5694_v55, %v5693_v56  ;;  %v4840_v3 = vshrl.u32 %v4752_v60, 16  ;;  %v4737_v57 = vld [vmem:[#allocation4 + $0xd8] sm:$0x7f]  ;;  %v4843_v53 = vshll.u32 %v4752_v60, 16  ;;  %v10457_v23 = vld [vmem:[#allocation4 + $0x61] sm:$0xff] }
 0x44b   : > { %5314 = vrot.lane.b32.xlu0 %v5268_v48, %s8131_s12  ;;  %v4644_v0 = vmax.f32 %v4580_v63, 0.0  ;;  %v4581_v51 = vadd.f32 %v10301_v50, %v4542_v43  ;;  %v5422_v45 = vpack.c.bf16 %v5395_v59, %v10132_v12  ;;  %v5646_v50 = vpack.c.bf16 %v5623_v61, %v10237_v47  ;;  %v4613_v33 = vld [vmem:[#allocation4 + $0xf8] sm:$0xff]  ;;  %v5463_v4 = vld [vmem:[#allocation4 + $0x69] sm:$0x7f] }
 0x44c   : > { %5006 = vrot.lane.b32.xlu1 %v10435_v6, %s8131_s12  ;;  %v5270_v15 = vshrl.u32 %v5175_v34, 16  ;;  %v5273_v54 = vshll.u32 %v5175_v34, 16  ;;  %v5791_v40 = vsel %vm9190_vm3, %v5696_v11, %v5790_v27  ;;  %v4842_v36 = vrot.slane %v4840_v3, 7  ;;  %v10459_v55 = vld [vmem:[#allocation4 + $0x19] sm:$0x7f] }
 0x44d   : > { %v4676_v37 = vadd.f32 %v4644_v0, %v4612_v7  ;;  %v4645_v58 = vmax.f32 %v4581_v51, 0.0  ;;  %5792 = vst [vmem:[#allocation3 + $0xe0] sm:$0xff] %v5791_v40  ;;  %5438 = vst.msk [vmem:[#allocation3 + $0xb0] sm:$0xff] %vm326_vm4, %v5422_v45  ;;  %v4753_v25 = vpack.c.bf16 %v4737_v57, %v10448_v5  ;;  %v5423_v12 = vpack.c.bf16 %v5397_v10, %v10166_v19  ;;  %v5399_v10 = vld [vmem:[#allocation4 + $0x68] sm:$0xff]  ;;  %v5627_v7 = vld [vmem:[#allocation4 + $0x98] sm:$0x7f] }
 0x44e   : > { %v5272_v42 = vrot.slane %v5270_v15, 7  ;;  %v4845_v24 = vor.u32 %v4843_v53, %v4842_v36  ;;  %v5698_v48 = vshrl.u32 %v5646_v50, 16  ;;  %v5070_v19 = vpack.c.bf16 %v10445_v9, %v10268_v20  ;;  %v5793_v15 = vld [vmem:[#allocation3 + $0x108] sm:$0xff]  ;;  %v10479_v36 = vld [vmem:[#allocation4 + $0x71] sm:$0xff]  ;;  %v10481_v9 = vld [vmem:[#allocation4 + $0x79] sm:$0x7f] }
 0x44f   : > { %5524 = vrot.lane.b32.xlu0 %v5487_v41, %s8131_s12  ;;  %4708 = vst.msk [vmem:[#allocation4 + $0xf0] sm:$0xff] %vm326_vm4, %v4676_v37  ;;  %v4677_v32 = vadd.f32 %v4645_v58, %v4613_v33  ;;  %v4948_v14 = vld [vmem:[#allocation4 + $0xe0] sm:$0xff]  ;;  %v5701_v56 = vshll.u32 %v5646_v50, 16  ;;  %v4847_v60 = vshrl.u32 %v4753_v25, 16  ;;  %5439 = vst.msk [vmem:[#allocation3 + $0xd8] sm:$0xff] %vm326_vm4, %v5423_v12  ;;  %v5647_v34 = vpack.c.bf16 %v5625_v21, %v10279_v1  ;;  %v5088_v50 = vld [vmem:[#allocation3 + $0x58] sm:$0xff] }
 0x450   : > { %5894 = vrot.lane.b32.xlu1 %v10266_v49, %s8131_s12  ;;  %v5275_v38 = vor.u32 %v5273_v54, %v5272_v42  ;;  %v4949_v28 = vld [vmem:[#allocation4 + $0xe8] sm:$0xff]  ;;  %v4912_v35 = vsel %vm9190_vm3, %v4845_v24, %v4911_v18  ;;  %v5700_v43 = vrot.slane %v5698_v48, 7  ;;  %v10470_v59 = vld [vmem:[#allocation4 + $0xe0] sm:$0xff]  ;;  %v5071_v20 = vpack.c.bf16 %v10459_v55, %v10307_v16  ;;  %v4914_v54 = vld [vmem:[#allocation3 + $0x230] sm:$0xff] }
 0x451   : > { %v5159_v8 = vld [vmem:[#allocation4 + $0xe8] sm:$0x7f]  ;;  %4709 = vst.msk [vmem:[#allocation4 + $0xf8] sm:$0xff] %vm326_vm4, %v4677_v32  ;;  %v10467_v49 = vpack.c.bf16 %v4949_v28, %v4948_v14  ;;  %4913 = vst [vmem:[#allocation3 + $0x208] sm:$0xff] %v4912_v35  ;;  %v4849_v11 = vrot.slane %v4847_v60, 7  ;;  %v4850_v27 = vshll.u32 %v4753_v25, 16  ;;  %v5488_v61 = vpack.c.bf16 %v5463_v4, %v10457_v23 }
 0x452   : > { %v5176_v63 = vpack.c.bf16 %v5159_v8, %v4948_v14  ;;  %v4739_v41 = vld [vmem:[#allocation4 + $0xe8] sm:$0x7f]  ;;  %v5703_v51 = vor.u32 %v5701_v56, %v5700_v43  ;;  %v5705_v57 = vshrl.u32 %v5647_v34, 16  ;;  %v5085_v16 = vld [vmem:[#allocation3 + $0x30] sm:$0xff]  ;;  %v5708_v45 = vshll.u32 %v5647_v34, 16  ;;  %v5401_v25 = vld [vmem:[#allocation4 + $0x78] sm:$0xff] }
 0x453   : > { %5316 = vrot.lane.b32.xlu0 %v5275_v38, %s8131_s12  ;;  %v4754_v3 = vpack.c.bf16 %v4739_v41, %v10470_v59  ;;  %v4852_v53 = vor.u32 %v4850_v27, %v4849_v11  ;;  %v5629_v58 = vld [vmem:[#allocation4 + $0xa8] sm:$0x7f]  ;;  %v10490_v32 = vld [vmem:[#allocation4 + $0x91] sm:$0xff]  ;;  %v5424_v48 = vpack.c.bf16 %v5399_v10, %v10203_v31  ;;  %v5648_v14 = vpack.c.bf16 %v5627_v7, %v10328_v46  ;;  %v10502_v56 = vld [vmem:[#allocation4 + $0x99] sm:$0x7f] }
 0x454   : > { %5008 = vrot.lane.b32.xlu1 %v10467_v49, %s8131_s12  ;;  %v5277_v0 = vshrl.u32 %v5176_v63, 16  ;;  %v5280_v40 = vshll.u32 %v5176_v63, 16  ;;  %v5794_v33 = vsel %vm9190_vm3, %v5703_v51, %v5793_v15  ;;  %v5707_v24 = vrot.slane %v5705_v57, 7  ;;  %v10486_v12 = vld [vmem:[#allocation4 + $0x81] sm:$0xff]  ;;  %v10488_v21 = vld [vmem:[#allocation4 + $0x89] sm:$0x7f] }
 0x455   : > { %v4854_v37 = vshrl.u32 %v4754_v3, 16  ;;  %v4857_v18 = vshll.u32 %v4754_v3, 16  ;;  %5795 = vst [vmem:[#allocation3 + $0x108] sm:$0xff] %v5794_v33  ;;  %v4915_v38 = vsel %vm9190_vm3, %v4852_v53, %v4914_v54  ;;  %v5796_v4 = vld [vmem:[#allocation3 + $0x130] sm:$0xff]  ;;  %v10500_v35 = vsel %vm9184_vm0, %v5070_v19, %v5085_v16  ;;  %v10504_v60 = vld [vmem:[#allocation4 + $0xa1] sm:$0xff]  ;;  %5440 = vst.msk [vmem:[#allocation3 + $0x100] sm:$0xff] %vm326_vm4, %v5424_v48 }
 0x456   : > { %v5279_v42 = vrot.slane %v5277_v0, 7  ;;  %v10506_v63 = vld [vmem:[#allocation4 + $0xa9] sm:$0x7f]  ;;  %4916 = vst [vmem:[#allocation3 + $0x230] sm:$0xff] %v4915_v38  ;;  %v5710_v43 = vor.u32 %v5708_v45, %v5707_v24  ;;  %v5649_v31 = vpack.c.bf16 %v5629_v58, %v10358_v52  ;;  %v10509_v34 = vld [vmem:[#allocation4 + $0xf0] sm:$0xff]  ;;  %v5712_v19 = vshrl.u32 %v5648_v14, 16 }
 0x457   : > { %5526 = vrot.lane.b32.xlu0 %v5488_v61, %s8131_s12  ;;  %v4856_v55 = vrot.slane %v4854_v37, 7  ;;  %v5425_v27 = vpack.c.bf16 %v5401_v25, %v10237_v47  ;;  %v5631_v3 = vld [vmem:[#allocation4 + $0xb8] sm:$0x7f]  ;;  %v5489_v61 = vpack.c.bf16 %v10481_v9, %v10479_v36  ;;  %v5490_v51 = vpack.c.bf16 %v10488_v21, %v10486_v12  ;;  %v5633_v54 = vld [vmem:[#allocation4 + $0xc8] sm:$0x7f] }
 0x458   : > { %5896 = vrot.lane.b32.xlu1 %v10305_v26, %s8131_s12  ;;  %v5282_v28 = vor.u32 %v5280_v40, %v5279_v42  ;;  %v5161_v41 = vld [vmem:[#allocation4 + $0xf8] sm:$0x7f]  ;;  %v10513_v26 = vsel %vm9184_vm0, %v5071_v20, %v5088_v50  ;;  %v5797_v15 = vsel %vm9190_vm3, %v5710_v43, %v5796_v4  ;;  %v5714_v57 = vrot.slane %v5712_v19, 7  ;;  %v5403_v40 = vld [vmem:[#allocation4 + $0x88] sm:$0xff] }
 0x459   : > { %v4859_v11 = vor.u32 %v4857_v18, %v4856_v55  ;;  %v5177_v0 = vpack.c.bf16 %v5161_v41, %v10509_v34  ;;  %v4917_v20 = vld [vmem:[#allocation3 + $0x258] sm:$0xff]  ;;  %5798 = vst [vmem:[#allocation3 + $0x130] sm:$0xff] %v5797_v15  ;;  %v5715_v10 = vshll.u32 %v5648_v14, 16  ;;  %v5719_v7 = vshrl.u32 %v5649_v31, 16  ;;  %5441 = vst.msk [vmem:[#allocation3 + $0x128] sm:$0xff] %vm326_vm4, %v5425_v27  ;;  %v5805_v15 = vld [vmem:[#allocation3 + $0x1a8] sm:$0xff] }
 0x45a   : > { %v5491_v53 = vpack.c.bf16 %v10502_v56, %v10490_v32  ;;  %v5492_v45 = vpack.c.bf16 %v10506_v63, %v10504_v60  ;;  %v5650_v37 = vpack.c.bf16 %v5631_v3, %v10391_v29  ;;  %v5799_v42 = vld [vmem:[#allocation3 + $0x158] sm:$0xff]  ;;  %v5722_v50 = vshll.u32 %v5649_v31, 16  ;;  %v5637_v55 = vld [vmem:[#allocation4 + $0xe8] sm:$0x7f] }
 0x45b   : > { %5318 = vrot.lane.b32.xlu0 %v5282_v28, %s8131_s12  ;;  %v4918_v47 = vsel %vm9190_vm3, %v4859_v11, %v4917_v20  ;;  %v5284_v16 = vshrl.u32 %v5177_v0, 16  ;;  %v5717_v58 = vor.u32 %v5715_v10, %v5714_v57  ;;  %v5721_v9 = vrot.slane %v5719_v7, 7  ;;  %v5635_v24 = vld [vmem:[#allocation4 + $0xd8] sm:$0x7f]  ;;  %v5338_v31 = vld [vmem:[#allocation3 + $0x8] sm:$0xff]  ;;  %v5802_v11 = vld [vmem:[#allocation3 + $0x180] sm:$0xff] }
 0x45c   : > { %5898 = vrot.lane.b32.xlu1 %v10345_v62, %s8131_s12  ;;  %4919 = vst [vmem:[#allocation3 + $0x258] sm:$0xff] %v4918_v47  ;;  %v5651_v33 = vpack.c.bf16 %v5633_v54, %v10427_v13  ;;  %v5287_v25 = vshll.u32 %v5177_v0, 16  ;;  %v5726_v62 = vshrl.u32 %v5650_v37, 16  ;;  %v5426_v38 = vpack.c.bf16 %v5403_v40, %v10279_v1  ;;  %v5405_v4 = vld [vmem:[#allocation4 + $0x98] sm:$0xff]  ;;  %v5407_v3 = vld [vmem:[#allocation4 + $0xa8] sm:$0xff] }
 0x45d   : > { %v5286_v18 = vrot.slane %v5284_v16, 7  ;;  %v5800_v48 = vsel %vm9190_vm3, %v5717_v58, %v5799_v42  ;;  %v5724_v14 = vor.u32 %v5722_v50, %v5721_v9  ;;  %v5729_v28 = vshll.u32 %v5650_v37, 16  ;;  %v5639_v47 = vld [vmem:[#allocation4 + $0xf8] sm:$0x7f]  ;;  %v10559_v16 = vld [vmem:[%s11247_s6 + $0x108] sm:$0xff]   ;;  %v5808_v58 = vld [vmem:[#allocation3 + $0x1d0] sm:$0xff] }
 0x45e   : > { %v5733_v43 = vshrl.u32 %v5651_v33, 16  ;;  %5801 = vst [vmem:[#allocation3 + $0x158] sm:$0xff] %v5800_v48  ;;  %v5728_v19 = vrot.slane %v5726_v62, 7  ;;  %v5736_v27 = vshll.u32 %v5651_v33, 16  ;;  %5442 = vst.msk [vmem:[#allocation3 + $0x150] sm:$0xff] %vm326_vm4, %v5426_v38  ;;  %v10544_v1 = vpack.c.bf16 %v5635_v24, %v10448_v5  ;;  %v5409_v57 = vld [vmem:[#allocation4 + $0xb8] sm:$0xff] }
 0x45f   : > { %5528 = vrot.lane.b32.xlu0 %v5489_v61, %s8131_s12  ;;  %v5289_v41 = vor.u32 %v5287_v25, %v5286_v18  ;;  %v5803_v0 = vsel %vm9190_vm3, %v5724_v14, %v5802_v11  ;;  %v10550_v54 = vpack.c.bf16 %v5637_v55, %v10470_v59  ;;  %v10552_v10 = vld [vmem:[#allocation4 + $0x11] sm:$0xff]  ;;  %v5941_v9 = vld [vmem:[#allocation4 + $0x19] sm:$0x7f]  ;;  %v5411_v50 = vld [vmem:[#allocation4 + $0xc8] sm:$0xff]  ;;  %v5428_v62 = vpack.c.bf16 %v5407_v3, %v10358_v52 }
 0x460   : > { %5900 = vrot.lane.b32.xlu1 %v10375_v17, %s8131_s12  ;;  %v5291_v61 = vpop.permute.xlu1 %5290  ;;  %v5735_v20 = vrot.slane %v5733_v43, 7  ;;  %v5427_v17 = vpack.c.bf16 %v5405_v4, %v10328_v46  ;;  %5804 = vst [vmem:[#allocation3 + $0x180] sm:$0xff] %v5803_v0  ;;  %v5731_v37 = vor.u32 %v5729_v28, %v5728_v19  ;;  %v5740_v46 = vshrl.u32 %v10544_v1, 16  ;;  %v10564_v33 = vld [vmem:[#allocation4 + $0xf8] sm:$0xff]  ;;  %v10570_v38 = vld [vmem:[#allocation4 + $0xf0] sm:$0xff]  ;;  %v10572_v4 = vld [vmem:[#allocation4 + $0x21] sm:$0xff] }
 0x461   : > { %v5339_v40 = vsel %vm9339_vm10, %v5291_v61, %v5338_v31  ;;  %v5743_v42 = vshll.u32 %v10544_v1, 16  ;;  %v5747_v18 = vshrl.u32 %v10550_v54, 16  ;;  %v5750_v25 = vshll.u32 %v10550_v54, 16  ;;  %v10574_v55 = vld [vmem:[#allocation4 + $0x29] sm:$0x7f]  ;;  %v10576_v48 = vld [vmem:[#allocation4 + $0x31] sm:$0xff] }
 0x462   : > { %5340 = vst [vmem:[#allocation3 + $0x8] sm:$0xff] %v5339_v40  ;;  %6485 = vmatprep.mubr.bf16.mxu0 %v5339_v40  ;;  %v5738_v24 = vor.u32 %v5736_v27, %v5735_v20  ;;  %5443 = vst.msk [vmem:[#allocation3 + $0x178] sm:$0xff] %vm326_vm4, %v5427_v17  ;;  %v10580_v14 = vld [vmem:[#allocation3] sm:$0xff]  ;;  %v5806_v28 = vsel %vm9190_vm3, %v5731_v37, %v5805_v15  ;;  %v5742_v43 = vrot.slane %v5740_v46, 7  ;;  %v5413_v11 = vld [vmem:[#allocation4 + $0xd8] sm:$0xff] }
 0x463   : > { %5320 = vrot.lane.b32.xlu0 %v5289_v41, %s8131_s12  ;;  %6486 = vmatmul.mubr.bf16.vlgmr.msra.gmra.mrb[80].mxu0 %v10580_v14  ;;  %v10586_v52 = vpack.c.bf16 %v5639_v47, %v10570_v38  ;;  %v5429_v31 = vpack.c.bf16 %v5409_v57, %v10391_v29  ;;  %v5985_v41 = vld [vmem:[#allocation3 + $0x20] sm:$0xff]  ;;  %v10589_v19 = vld [vmem:[#allocation4 + $0x39] sm:$0x7f]  ;;  %5807 = vst [vmem:[#allocation3 + $0x1a8] sm:$0xff] %v5806_v28  ;;  %v5749_v15 = vrot.slane %v5747_v18, 7  ;;  %5444 = vst.msk [vmem:[#allocation3 + $0x1a0] sm:$0xff] %vm326_vm4, %v5428_v62 }
 0x464   : > { %5902 = vrot.lane.b32.xlu1 %v10403_v22, %s8131_s12  ;;  %v10591_v27 = vld [vmem:[#allocation4 + $0x41] sm:$0xff]  ;;  %v5293_v22 = vpop.permute.xlu0 %5292  ;;  %v4981_v1 = vpop.permute.xlu1 %4980  ;;  %v5809_v61 = vsel %vm9190_vm3, %v5738_v24, %v5808_v58  ;;  %v5811_v0 = vld [vmem:[#allocation3 + $0x1f8] sm:$0xff]  ;;  %v5970_v29 = vpack.c.bf16 %v5941_v9, %v10552_v10  ;;  %v5430_v20 = vpack.c.bf16 %v5411_v50, %v10427_v13  ;;  %v10601_v17 = vld [vmem:[#allocation4 + $0x49] sm:$0x7f]  ;;  %v5864_v40 = vpack.c.bf16 %v10564_v33, %v10509_v34 }
 0x465   : > { %v8056_v3 = vld [vmem:[%s11247_s6 + $0x100] sm:$0xff]   ;;  %v10603_v54 = vld [vmem:[#allocation4 + $0x51] sm:$0xff]  ;;  %v10605_v47 = vld [vmem:[#allocation4 + $0x59] sm:$0x7f]  ;;  %v5342_v57 = vsel %vm9339_vm10, %v5293_v22, %v10500_v35  ;;  %5025 = vst.msk [vmem:[#allocation3 + $0x28] sm:$0xff] %vm2594_vm6, %v4981_v1  ;;  %v5745_v10 = vor.u32 %v5743_v42, %v5742_v43  ;;  %v5754_v58 = vshrl.u32 %v10586_v52, 16  ;;  %v5752_v50 = vor.u32 %v5750_v25, %v5749_v15 }
 0x466   : > { %7861 = vmatpush3.bf16.msra.mxu0 %v8056_v3  ;;  %v10617_v13 = vld [vmem:[%s11247_s6 + $0x110] sm:$0xff]   ;;  %5810 = vst [vmem:[#allocation3 + $0x1d0] sm:$0xff] %v5809_v61  ;;  %v5814_v37 = vld [vmem:[#allocation3 + $0x220] sm:$0xff]  ;;  %5445 = vst.msk [vmem:[#allocation3 + $0x1c8] sm:$0xff] %vm326_vm4, %v5429_v31  ;;  %6493 = vmatprep.mubr.bf16.mxu0 %v5342_v57  ;;  %v5757_v24 = vshll.u32 %v10586_v52, 16  ;;  %v10630_v42 = vsel %vm9184_vm0, %v5970_v29, %v5985_v41  ;;  %v5431_v18 = vpack.c.bf16 %v5413_v11, %v10448_v5 }
 0x467   : > { %7862 = vmatprep.subr.bf16.mxu0 %v10559_v16  ;;  %v5415_v35 = vld [vmem:[#allocation4 + $0xe8] sm:$0xff]  ;;  %v5417_v46 = vld [vmem:[#allocation4 + $0xf8] sm:$0xff]  ;;  %5343 = vst [vmem:[#allocation3 + $0x30] sm:$0xff] %v5342_v57  ;;  %5530 = vrot.lane.b32.xlu0 %v5490_v51, %s8131_s12  ;;  %5446 = vst.msk [vmem:[#allocation3 + $0x1f0] sm:$0xff] %vm326_vm4, %v5430_v20  ;;  %v5812_v51 = vsel %vm9190_vm3, %v5745_v10, %v5811_v0  ;;  %v5756_v25 = vrot.slane %v5754_v58, 7  ;;  %v5971_v5 = vpack.c.bf16 %v10574_v55, %v10572_v4 }
 0x468   : > { %v10621_v9 = vld [vmem:[#allocation4 + $0x61] sm:$0xff]  ;;  %v5991_v28 = vld [vmem:[#allocation3 + $0x70] sm:$0xff]  ;;  %v10634_v43 = vld [vmem:[#allocation4 + $0x69] sm:$0x7f]  ;;  %5904 = vrot.lane.b32.xlu1 %v10435_v6, %s8131_s12  ;;  %5987 = vst [vmem:[#allocation3 + $0x20] sm:$0xff] %v10630_v42  ;;  %v5972_v52 = vpack.c.bf16 %v10589_v19, %v10576_v48  ;;  %v4983_v3 = vpop.permute.xlu1 %4982  ;;  %v5815_v6 = vsel %vm9190_vm3, %v5752_v50, %v5814_v37  ;;  %v5432_v4 = vpack.c.bf16 %v5415_v35, %v10470_v59 }
 0x469   : > { %v5988_v62 = vld [vmem:[#allocation3 + $0x48] sm:$0xff]  ;;  %v10636_v31 = vld [vmem:[#allocation4 + $0x71] sm:$0xff]  ;;  %v10638_v21 = vld [vmem:[#allocation4 + $0x79] sm:$0x7f]  ;;  %5813 = vst [vmem:[#allocation3 + $0x1f8] sm:$0xff] %v5812_v51  ;;  %v5433_v55 = vpack.c.bf16 %v5417_v46, %v10570_v38  ;;  %v5973_v48 = vpack.c.bf16 %v10601_v17, %v10591_v27  ;;  %v5759_v38 = vor.u32 %v5757_v24, %v5756_v25  ;;  %v5974_v20 = vpack.c.bf16 %v10605_v47, %v10603_v54 }
 0x46a   : > { %v5994_v41 = vld [vmem:[#allocation3 + $0x98] sm:$0xff]  ;;  %v10649_v11 = vld [vmem:[#allocation4 + $0x81] sm:$0xff]  ;;  %v5955_v22 = vld [vmem:[#allocation4 + $0x89] sm:$0x7f]  ;;  %7863 = vmatpush3.bf16.msra.mxu0 %v10559_v16  ;;  %5447 = vst.msk [vmem:[#allocation3 + $0x218] sm:$0xff] %vm326_vm4, %v5431_v18  ;;  %v10676_v27 = vsel %vm9184_vm0, %v5971_v5, %v5988_v62  ;;  %v10680_v29 = vsel %vm9184_vm0, %v5972_v52, %v5991_v28  ;;  %v5975_v47 = vpack.c.bf16 %v10634_v43, %v10621_v9 }
 0x46b   : > { %v10651_v1 = vld [vmem:[#allocation4 + $0x91] sm:$0xff]  ;;  %v5817_v61 = vld [vmem:[#allocation3 + $0x248] sm:$0xff]  ;;  %v5997_v19 = vld [vmem:[#allocation3 + $0xc0] sm:$0xff]  ;;  %5026 = vst.msk [vmem:[#allocation3 + $0x50] sm:$0xff] %vm2594_vm6, %v4983_v3  ;;  %7864 = vmatprep.subr.bf16.mxu0 %v10617_v13  ;;  %5532 = vrot.lane.b32.xlu0 %v5491_v53, %s8131_s12  ;;  %v10696_v54 = vsel %vm9184_vm0, %v5973_v48, %v5994_v41  ;;  %v5976_v56 = vpack.c.bf16 %v10638_v21, %v10636_v31 }
 0x46c   : > { %v10661_v0 = vld [vmem:[#allocation4 + $0x99] sm:$0x7f]  ;;  %v10663_v15 = vld [vmem:[#allocation4 + $0xa1] sm:$0xff]  ;;  %v10665_v16 = vld [vmem:[#allocation4 + $0xa9] sm:$0x7f]  ;;  %5816 = vst [vmem:[#allocation3 + $0x220] sm:$0xff] %v5815_v6  ;;  %v5977_v53 = vpack.c.bf16 %v5955_v22, %v10649_v11  ;;  %5906 = vrot.lane.b32.xlu1 %v10467_v49, %s8131_s12  ;;  %v5818_v28 = vsel %vm9190_vm3, %v5759_v38, %v5817_v61  ;;  %v10712_v9 = vsel %vm9184_vm0, %v5974_v20, %v5997_v19  ;;  %v5295_v25 = vpop.permute.xlu0 %5294  ;;  %v4985_v5 = vpop.permute.xlu1 %4984 }
 0x46d   : > { %v10672_v59 = vld [vmem:[%s11247_s6 + $0x118] sm:$0xff]   ;;  %v6000_v17 = vld [vmem:[#allocation3 + $0xe8] sm:$0xff]  ;;  %v6003_v57 = vld [vmem:[#allocation3 + $0x110] sm:$0xff]  ;;  %5990 = vst [vmem:[#allocation3 + $0x48] sm:$0xff] %v10676_v27  ;;  %v5978_v43 = vpack.c.bf16 %v10661_v0, %v10651_v1  ;;  %v5979_v31 = vpack.c.bf16 %v10665_v16, %v10663_v15 }
 0x46e   : > { %v6006_v10 = vld [vmem:[#allocation3 + $0x138] sm:$0xff]  ;;  %5993 = vst [vmem:[#allocation3 + $0x70] sm:$0xff] %v10680_v29  ;;  %5448 = vst.msk [vmem:[#allocation3 + $0x240] sm:$0xff] %vm326_vm4, %v5432_v4  ;;  %v6009_v46 = vld [vmem:[#allocation3 + $0x160] sm:$0xff]  ;;  %7865 = vmatpush3.bf16.msra.mxu0 %v10617_v13  ;;  %v10722_v39 = vsel %vm9184_vm0, %v5975_v47, %v6000_v17  ;;  %v10726_v41 = vsel %vm9184_vm0, %v5976_v56, %v6003_v57  ;;  %v5345_v13 = vsel %vm9339_vm10, %v5295_v25, %v10513_v26 }
 0x46f   : > { %v5960_v37 = vld [vmem:[#allocation4 + $0xb1] sm:$0xff]  ;;  %v5961_v58 = vld [vmem:[#allocation4 + $0xb9] sm:$0x7f]  ;;  %5449 = vst.msk [vmem:[#allocation3 + $0x268] sm:$0xff] %vm326_vm4, %v5433_v55  ;;  %v6012_v50 = vld [vmem:[#allocation3 + $0x188] sm:$0xff]  ;;  %v10730_v11 = vsel %vm9184_vm0, %v5977_v53, %v6006_v10  ;;  %7866 = vmatprep.subr.bf16.mxu0 %v10672_v59  ;;  %v10744_v55 = vsel %vm9184_vm0, %v5978_v43, %v6009_v46  ;;  %5534 = vrot.lane.b32.xlu0 %v5492_v45, %s8131_s12 }
 0x470   : > { %v10688_v35 = vld [vmem:[#allocation4 + $0xd1] sm:$0xff]  ;;  %v5962_v24 = vld [vmem:[#allocation4 + $0xc1] sm:$0xff]  ;;  %v5963_v18 = vld [vmem:[#allocation4 + $0xc9] sm:$0x7f]  ;;  %5996 = vst [vmem:[#allocation3 + $0x98] sm:$0xff] %v10696_v54  ;;  %v5980_v22 = vpack.c.bf16 %v5961_v58, %v5960_v37  ;;  %v10748_v26 = vsel %vm9184_vm0, %v5979_v31, %v6012_v50  ;;  %5908 = vrot.lane.b32.xlu1 %v5864_v40, %s8131_s12  ;;  %v4987_v38 = vpop.permute.xlu1 %4986 }
 0x471   : > { %v10705_v62 = vld [vmem:[#allocation4 + $0xe1] sm:$0xff]  ;;  %v6015_v21 = vld [vmem:[#allocation3 + $0x1b0] sm:$0xff]  ;;  %v5965_v51 = vld [vmem:[#allocation4 + $0xd9] sm:$0x7f]  ;;  %5819 = vst [vmem:[#allocation3 + $0x248] sm:$0xff] %v5818_v28  ;;  %v5981_v19 = vpack.c.bf16 %v5963_v18, %v5962_v24 }
 0x472   : > { %v5967_v49 = vld [vmem:[#allocation4 + $0xe9] sm:$0x7f]  ;;  %5999 = vst [vmem:[#allocation3 + $0xc0] sm:$0xff] %v10712_v9  ;;  %v5968_v1 = vld [vmem:[#allocation4 + $0xf1] sm:$0xff]  ;;  %v5969_v3 = vld [vmem:[#allocation4 + $0xf9] sm:$0x7f]  ;;  %v10758_v48 = vsel %vm9184_vm0, %v5980_v22, %v6015_v21  ;;  %v5982_v0 = vpack.c.bf16 %v5965_v51, %v10688_v35  ;;  %7867 = vmatpush3.bf16.msra.mxu0 %v10672_v59 }
 0x473   : > { %v6035_v52 = vld [vmem:[#allocation3 + $0x28] sm:$0xff]  ;;  %5027 = vst.msk [vmem:[#allocation3 + $0x78] sm:$0xff] %vm2594_vm6, %v4985_v5  ;;  %v10736_v6 = vld [vmem:[#allocation4 + $0xb1] sm:$0xff]  ;;  %v5473_v61 = vld [vmem:[#allocation4 + $0xb9] sm:$0x7f]  ;;  %v5983_v15 = vpack.c.bf16 %v5967_v49, %v10705_v62  ;;  %v5984_v16 = vpack.c.bf16 %v5969_v3, %v5968_v1 }
 0x474   : > { %6494 = vmatmul.mubr.bf16.gmra.mrb[84].mxu0 %v6035_v52  ;;  %v5045_v4 = vld [vmem:[#allocation4 + $0x29] sm:$0x7f]  ;;  %6002 = vst [vmem:[#allocation3 + $0xe8] sm:$0xff] %v10722_v39  ;;  %6005 = vst [vmem:[#allocation3 + $0x110] sm:$0xff] %v10726_v41  ;;  %v6018_v63 = vld [vmem:[#allocation3 + $0x1d8] sm:$0xff]  ;;  %v5493_v20 = vpack.c.bf16 %v5473_v61, %v10736_v6  ;;  %v5297_v46 = vpop.permute.xlu0 %5296 }
 0x475   : > { %6008 = vst [vmem:[#allocation3 + $0x138] sm:$0xff] %v10730_v11  ;;  %5346 = vst [vmem:[#allocation3 + $0x58] sm:$0xff] %v5345_v13  ;;  %6501 = vmatprep.mubr.bf16.mxu0 %v5345_v13  ;;  %v6021_v45 = vld [vmem:[#allocation3 + $0x200] sm:$0xff]  ;;  %v10771_v10 = vsel %vm9184_vm0, %v5981_v19, %v6018_v63  ;;  %v6024_v33 = vld [vmem:[#allocation3 + $0x228] sm:$0xff]  ;;  %v4989_v28 = vpop.permute.xlu1 %4988 }
 0x476   : > { %6011 = vst [vmem:[#allocation3 + $0x160] sm:$0xff] %v10744_v55  ;;  %6014 = vst [vmem:[#allocation3 + $0x188] sm:$0xff] %v10748_v26  ;;  %v8057_v17 = vld [vmem:[#allocation4 + $0x21] sm:$0xff]  ;;  %v10775_v34 = vsel %vm9184_vm0, %v5982_v0, %v6021_v45  ;;  %v6027_v40 = vld [vmem:[#allocation3 + $0x250] sm:$0xff]  ;;  %v10784_v59 = vsel %vm9184_vm0, %v5983_v15, %v6024_v33  ;;  %5536 = vrot.lane.b32.xlu0 %v5493_v20, %s8131_s12 }
 0x477   : > { %6017 = vst [vmem:[#allocation3 + $0x1b0] sm:$0xff] %v10758_v48  ;;  %v5072_v57 = vpack.c.bf16 %v5045_v4, %v8057_v17  ;;  %5028 = vst.msk [vmem:[#allocation3 + $0xa0] sm:$0xff] %vm2594_vm6, %v4987_v38  ;;  %v10778_v37 = vld [vmem:[#allocation4 + $0xc1] sm:$0xff]  ;;  %v5475_v58 = vld [vmem:[#allocation4 + $0xc9] sm:$0x7f]  ;;  %v10788_v47 = vsel %vm9184_vm0, %v5984_v16, %v6027_v40 }
 0x478   : > { %6020 = vst [vmem:[#allocation3 + $0x1d8] sm:$0xff] %v10771_v10  ;;  %6023 = vst [vmem:[#allocation3 + $0x200] sm:$0xff] %v10775_v34  ;;  %v5091_v56 = vld [vmem:[#allocation3 + $0x80] sm:$0xff]  ;;  %v5494_v50 = vpack.c.bf16 %v5475_v58, %v10778_v37  ;;  %v6040_v24 = vld [vmem:[#allocation3 + $0x50] sm:$0xff] }
 0x479   : > { %6026 = vst [vmem:[#allocation3 + $0x228] sm:$0xff] %v10784_v59  ;;  %6029 = vst [vmem:[#allocation3 + $0x250] sm:$0xff] %v10788_v47  ;;  %v5092_v53 = vsel %vm9184_vm0, %v5072_v57, %v5091_v56  ;;  %v5476_v43 = vld [vmem:[#allocation4 + $0xd1] sm:$0xff]  ;;  %v5477_v31 = vld [vmem:[#allocation4 + $0xd9] sm:$0x7f] }
 0x47a   : > { %v5348_v18 = vsel %vm9339_vm10, %v5297_v46, %v5092_v53  ;;  %v5047_v21 = vld [vmem:[#allocation4 + $0x39] sm:$0x7f]  ;;  %5538 = vrot.lane.b32.xlu0 %v5494_v50, %s8131_s12  ;;  %5029 = vst.msk [vmem:[#allocation3 + $0xc8] sm:$0xff] %vm2594_vm6, %v4989_v28  ;;  %v5495_v51 = vpack.c.bf16 %v5477_v31, %v5476_v43  ;;  %v5478_v25 = vld [vmem:[#allocation4 + $0xe1] sm:$0xff]  ;;  %v5479_v5 = vld [vmem:[#allocation4 + $0xe9] sm:$0x7f] }
 0x47b   : > { %5349 = vst [vmem:[#allocation3 + $0x80] sm:$0xff] %v5348_v18  ;;  %v5073_v49 = vpack.c.bf16 %v5047_v21, %v10377_v44  ;;  %v5094_v52 = vld [vmem:[#allocation3 + $0xa8] sm:$0xff]  ;;  %v5496_v3 = vpack.c.bf16 %v5479_v5, %v5478_v25  ;;  %v6045_v13 = vld [vmem:[#allocation3 + $0x78] sm:$0xff]  ;;  %v5097_v15 = vld [vmem:[#allocation3 + $0xd0] sm:$0xff] }
 0x47c   : > { %6502 = vmatmul.mubr.bf16.gmra.mrb[88].mxu0 %v6040_v24  ;;  %v5299_v1 = vpop.permute.xlu0 %5298  ;;  %v5480_v19 = vld [vmem:[#allocation4 + $0xf1] sm:$0xff]  ;;  %v5481_v0 = vld [vmem:[#allocation4 + $0xf9] sm:$0x7f]  ;;  %v5049_v63 = vld [vmem:[#allocation4 + $0x49] sm:$0x7f] }
 0x47d   : > { %6509 = vmatprep.mubr.bf16.mxu0 %v5348_v18  ;;  %v5095_v22 = vsel %vm9184_vm0, %v5073_v49, %v5094_v52  ;;  %v5497_v44 = vpack.c.bf16 %v5481_v0, %v5480_v19  ;;  %v5074_v45 = vpack.c.bf16 %v5049_v63, %v10405_v30  ;;  %v5051_v33 = vld [vmem:[#allocation4 + $0x59] sm:$0x7f]  ;;  %v5053_v18 = vld [vmem:[#allocation4 + $0x69] sm:$0x7f]  ;;  %v5103_v31 = vld [vmem:[#allocation3 + $0x120] sm:$0xff] }
 0x47e   : > { %5540 = vrot.lane.b32.xlu0 %v5495_v51, %s8131_s12  ;;  %v5351_v61 = vsel %vm9339_vm10, %v5299_v1, %v5095_v22  ;;  %v4991_v4 = vpop.permute.xlu1 %4990  ;;  %v6050_v20 = vld [vmem:[#allocation3 + $0xa0] sm:$0xff]  ;;  %v5075_v30 = vpack.c.bf16 %v5051_v33, %v10425_v2  ;;  %v5100_v58 = vld [vmem:[#allocation3 + $0xf8] sm:$0xff]  ;;  %v5076_v2 = vpack.c.bf16 %v5053_v18, %v10457_v23  ;;  %v5562_v23 = vld [vmem:[#allocation3 + $0x10] sm:$0xff] }
 0x47f   : > { %5352 = vst [vmem:[#allocation3 + $0xa8] sm:$0xff] %v5351_v61  ;;  %5030 = vst.msk [vmem:[#allocation3 + $0xf0] sm:$0xff] %vm2594_vm6, %v4991_v4  ;;  %v5098_v16 = vsel %vm9184_vm0, %v5074_v45, %v5097_v15  ;;  %v5055_v52 = vld [vmem:[#allocation4 + $0x79] sm:$0x7f]  ;;  %v5106_v19 = vld [vmem:[#allocation3 + $0x148] sm:$0xff] }
 0x480   : > { %v5101_v56 = vsel %vm9184_vm0, %v5075_v30, %v5100_v58  ;;  %v5104_v21 = vsel %vm9184_vm0, %v5076_v2, %v5103_v31  ;;  %v5077_v1 = vpack.c.bf16 %v5055_v52, %v10479_v36  ;;  %v5057_v15 = vld [vmem:[#allocation4 + $0x89] sm:$0x7f]  ;;  %v5109_v30 = vld [vmem:[#allocation3 + $0x170] sm:$0xff]  ;;  %v5112_v31 = vld [vmem:[#allocation3 + $0x198] sm:$0xff] }
 0x481   : > { %v6055_v46 = vld [vmem:[#allocation3 + $0xc8] sm:$0xff]  ;;  %v5589_v7 = vld [vmem:[#allocation3 + $0x178] sm:$0xff] }
 0x482   : > { %5542 = vrot.lane.b32.xlu0 %v5496_v3, %s8131_s12  ;;  %v5107_v0 = vsel %vm9184_vm0, %v5077_v1, %v5106_v19  ;;  %v5571_v52 = vld [vmem:[#allocation3 + $0x88] sm:$0xff] }
 0x484   : > { %6510 = vmatmul.mubr.bf16.gmra.mrb[92].mxu0 %v6045_v13  ;;  %v5301_v38 = vpop.permute.xlu0 %5300 }
 0x485   : > { %6517 = vmatprep.mubr.bf16.mxu0 %v5351_v61  ;;  %v5354_v17 = vsel %vm9339_vm10, %v5301_v38, %v5098_v16  ;;  %v5565_v16 = vld [vmem:[#allocation3 + $0x38] sm:$0xff] }
 0x486   : > { %5544 = vrot.lane.b32.xlu0 %v5497_v44, %s8131_s12  ;;  %v4993_v57 = vpop.permute.xlu1 %4992  ;;  %5355 = vst [vmem:[#allocation3 + $0xd0] sm:$0xff] %v5354_v17  ;;  %v6060_v49 = vld [vmem:[#allocation3 + $0xf0] sm:$0xff]  ;;  %s8062_s12 = sshll.u32 %s8132_s22, 4  ;;  %s8063_s12 = int_to_ptr.vmem [resolvable:$false] %s8062_s12 }
 0x487   : > { %5031 = vst.msk [vmem:[#allocation3 + $0x118] sm:$0xff] %vm2594_vm6, %v4993_v57  ;;  %s8064_s24 = scalar_lea.vmem %s8063_s12, 8192  ;;  %p8065_p0 = scmp.lt.s32.totalorder %s11193_s18, %s8063_s12 }
 0x488   : > { %p8066_p1 = scmp.lt.s32.totalorder %s8064_s24, %s8058_s21 }
 0x48a   : > { %v5881_v40 = vpop.permute.xlu1 %5880  ;;  %p8067_p2 = por %p8066_p1, %p8065_p0 }
 0x48b   : > { %5925 = vst.msk [vmem:[#allocation3 + $0x18] sm:$0xff] %vm2594_vm6, %v5881_v40 }
 0x48c   : > { %6518 = vmatmul.mubr.bf16.gmra.mrb[96].mxu0 %v6050_v20  ;;  %v5303_v53 = vpop.permute.xlu0 %5302  ;;  %v5078_v20 = vpack.c.bf16 %v5057_v15, %v10486_v12  ;;  %p8068_p3 = pnand %p8067_p2, %p8061_p13 }
 0x48d   : > { %6525 = vmatprep.mubr.bf16.mxu0 %v5354_v17  ;;  %v5357_v50 = vsel %vm9339_vm10, %v5303_v53, %v5101_v56 }
 0x48e   : > { %v4995_v24 = vpop.permute.xlu1 %4994  ;;  %5358 = vst [vmem:[#allocation3 + $0xf8] sm:$0xff] %v5357_v50  ;;  %v6065_v44 = vld [vmem:[#allocation3 + $0x118] sm:$0xff]  ;;  %v5110_v40 = vsel %vm9184_vm0, %v5078_v20, %v5109_v30 }
 0x48f   : > { %5032 = vst.msk [vmem:[#allocation3 + $0x140] sm:$0xff] %vm2594_vm6, %v4995_v24 }
 0x492   : > { %v5883_v28 = vpop.permute.xlu1 %5882  ;;  %v6033_v43 = vld [vmem:[#allocation3 + $0x18] sm:$0xff] }
 0x493   : > { %5926 = vst.msk [vmem:[#allocation3 + $0x40] sm:$0xff] %vm2594_vm6, %v5883_v28  ;;  %6646 = vmatprep.mubr.bf16.mxu1 %v6033_v43 }
 0x494   : > { %6526 = vmatmul.mubr.bf16.gmra.mrb[100].mxu0 %v6055_v46  ;;  %v5059_v46 = vld [vmem:[#allocation4 + $0x99] sm:$0x7f] }
 0x495   : > { %6533 = vmatprep.mubr.bf16.mxu0 %v5357_v50  ;;  %v5305_v51 = vpop.permute.xlu0 %5304  ;;  %v5568_v50 = vld [vmem:[#allocation3 + $0x60] sm:$0xff]  ;;  %v5079_v18 = vpack.c.bf16 %v5059_v46, %v10490_v32 }
 0x496   : > { %v5360_v25 = vsel %vm9339_vm10, %v5305_v51, %v5104_v21  ;;  %v4997_v5 = vpop.permute.xlu1 %4996  ;;  %v6070_v56 = vld [vmem:[#allocation3 + $0x140] sm:$0xff] }
 0x497   : > { %5361 = vst [vmem:[#allocation3 + $0x120] sm:$0xff] %v5360_v25  ;;  %5033 = vst.msk [vmem:[#allocation3 + $0x168] sm:$0xff] %vm2594_vm6, %v4997_v5  ;;  %v5113_v21 = vsel %vm9184_vm0, %v5079_v18, %v5112_v31  ;;  %v5061_v5 = vld [vmem:[#allocation4 + $0xa9] sm:$0x7f] }
 0x499   : > { %v5515_v22 = vpop.permute.xlu0 %5514 }
 0x49a   : > { %v5563_v13 = vsel %vm9750_vm2, %v5515_v22, %v5562_v23  ;;  %v5885_v61 = vpop.permute.xlu1 %5884  ;;  %v6038_v4 = vld [vmem:[#allocation3 + $0x40] sm:$0xff]  ;;  %v5080_v22 = vpack.c.bf16 %v5061_v5, %v10504_v60 }
 0x49b   : > { %5564 = vst [vmem:[#allocation3 + $0x10] sm:$0xff] %v5563_v13  ;;  %5927 = vst.msk [vmem:[#allocation3 + $0x68] sm:$0xff] %vm2594_vm6, %v5885_v61  ;;  %6647 = vmatmul.mubr.bf16.vlgmr.msra.gmra.mrb[112].mxu1 %v5563_v13 }
 0x49c   : > { %6534 = vmatmul.mubr.bf16.gmra.mrb[104].mxu0 %v6060_v49  ;;  %6654 = vmatprep.mubr.bf16.mxu1 %v6038_v4  ;;  %v5115_v4 = vld [vmem:[#allocation3 + $0x1c0] sm:$0xff] }
 0x49d   : > { %6541 = vmatprep.mubr.bf16.mxu0 %v5360_v25  ;;  %v5307_v63 = vpop.permute.xlu0 %5306  ;;  %v5116_v19 = vsel %vm9184_vm0, %v5080_v22, %v5115_v4  ;;  %v5124_v22 = vld [vmem:[#allocation3 + $0x238] sm:$0xff] }
 0x49e   : > { %v5363_v45 = vsel %vm9339_vm10, %v5307_v63, %v5107_v0  ;;  %v4999_v36 = vpop.permute.xlu1 %4998  ;;  %v6075_v49 = vld [vmem:[#allocation3 + $0x168] sm:$0xff] }
 0x49f   : > { %5364 = vst [vmem:[#allocation3 + $0x148] sm:$0xff] %v5363_v45  ;;  %5034 = vst.msk [vmem:[#allocation3 + $0x190] sm:$0xff] %vm2594_vm6, %v4999_v36  ;;  %v5574_v36 = vld [vmem:[#allocation3 + $0xb0] sm:$0xff] }
 0x4a1   : > { %v5517_v38 = vpop.permute.xlu0 %5516 }
 0x4a2   : > { %v5566_v17 = vsel %vm9750_vm2, %v5517_v38, %v5565_v16  ;;  %v5887_v57 = vpop.permute.xlu1 %5886  ;;  %v6043_v33 = vld [vmem:[#allocation3 + $0x68] sm:$0xff] }
 0x4a3   : > { %5567 = vst [vmem:[#allocation3 + $0x38] sm:$0xff] %v5566_v17  ;;  %5928 = vst.msk [vmem:[#allocation3 + $0x90] sm:$0xff] %vm2594_vm6, %v5887_v57  ;;  %6655 = vmatmul.mubr.bf16.gmra.mrb[116].mxu1 %v5566_v17  ;;  %v5118_v57 = vld [vmem:[#allocation3 + $0x1e8] sm:$0xff] }
 0x4a4   : > { %6542 = vmatmul.mubr.bf16.gmra.mrb[108].mxu0 %v6065_v44  ;;  %6662 = vmatprep.mubr.bf16.mxu1 %v6043_v33 }
 0x4a5   : > { %6549 = vmatprep.mubr.bf16.mxu0 %v5363_v45  ;;  %v5309_v58 = vpop.permute.xlu0 %5308  ;;  %v5063_v45 = vld [vmem:[#allocation4 + $0xb9] sm:$0x7f] }
 0x4a6   : > { %v5366_v53 = vsel %vm9339_vm10, %v5309_v58, %v5110_v40  ;;  %v5001_v12 = vpop.permute.xlu1 %5000  ;;  %v6080_v63 = vld [vmem:[#allocation3 + $0x190] sm:$0xff]  ;;  %v5081_v16 = vpack.c.bf16 %v5063_v45, %v10736_v6 }
 0x4a7   : > { %5367 = vst [vmem:[#allocation3 + $0x170] sm:$0xff] %v5366_v53  ;;  %5035 = vst.msk [vmem:[#allocation3 + $0x1b8] sm:$0xff] %vm2594_vm6, %v5001_v12 }
 0x4a8   : > { %v5119_v33 = vsel %vm9184_vm0, %v5081_v16, %v5118_v57  ;;  %v5586_v57 = vld [vmem:[#allocation3 + $0x150] sm:$0xff] }
 0x4a9   : > { %v5519_v24 = vpop.permute.xlu0 %5518 }
 0x4aa   : > { %v5569_v2 = vsel %vm9750_vm2, %v5519_v24, %v5568_v50  ;;  %v5889_v28 = vpop.permute.xlu1 %5888  ;;  %v6048_v43 = vld [vmem:[#allocation3 + $0x90] sm:$0xff] }
 0x4ab   : > { %5570 = vst [vmem:[#allocation3 + $0x60] sm:$0xff] %v5569_v2  ;;  %5929 = vst.msk [vmem:[#allocation3 + $0xb8] sm:$0xff] %vm2594_vm6, %v5889_v28  ;;  %6663 = vmatmul.mubr.bf16.gmra.mrb[120].mxu1 %v5569_v2  ;;  %v5121_v2 = vld [vmem:[#allocation3 + $0x210] sm:$0xff] }
 0x4ac   : > { %6550 = vmatmul.mubr.bf16.gmra.mrb[112].mxu0 %v6070_v56  ;;  %6670 = vmatprep.mubr.bf16.mxu1 %v6048_v43  ;;  %v5065_v56 = vld [vmem:[#allocation4 + $0xc9] sm:$0x7f] }
 0x4ad   : > { %6557 = vmatprep.mubr.bf16.mxu0 %v5366_v53  ;;  %v5311_v51 = vpop.permute.xlu0 %5310  ;;  %v5577_v53 = vld [vmem:[#allocation3 + $0xd8] sm:$0xff]  ;;  %v5082_v46 = vpack.c.bf16 %v5065_v56, %v10778_v37 }
 0x4ae   : > { %v5369_v25 = vsel %vm9339_vm10, %v5311_v51, %v5113_v21  ;;  %v5003_v32 = vpop.permute.xlu1 %5002  ;;  %v6085_v40 = vld [vmem:[#allocation3 + $0x1b8] sm:$0xff] }
 0x4af   : > { %5370 = vst [vmem:[#allocation3 + $0x198] sm:$0xff] %v5369_v25  ;;  %5036 = vst.msk [vmem:[#allocation3 + $0x1e0] sm:$0xff] %vm2594_vm6, %v5003_v32  ;;  %v5122_v28 = vsel %vm9184_vm0, %v5082_v46, %v5121_v2  ;;  %v5067_v51 = vld [vmem:[#allocation4 + $0xd9] sm:$0x7f]  ;;  %v5595_v2 = vld [vmem:[#allocation3 + $0x1c8] sm:$0xff] }
 0x4b0   : > { %v5083_v32 = vpack.c.bf16 %v5067_v51, %v10688_v35  ;;  %v5601_v51 = vld [vmem:[#allocation3 + $0x218] sm:$0xff] }
 0x4b1   : > { %v5521_v23 = vpop.permute.xlu0 %5520 }
 0x4b2   : > { %v5572_v1 = vsel %vm9750_vm2, %v5521_v23, %v5571_v52  ;;  %v5891_v13 = vpop.permute.xlu1 %5890  ;;  %v6053_v61 = vld [vmem:[#allocation3 + $0xb8] sm:$0xff] }
 0x4b3   : > { %5573 = vst [vmem:[#allocation3 + $0x88] sm:$0xff] %v5572_v1  ;;  %5930 = vst.msk [vmem:[#allocation3 + $0xe0] sm:$0xff] %vm2594_vm6, %v5891_v13  ;;  %6671 = vmatmul.mubr.bf16.gmra.mrb[124].mxu1 %v5572_v1  ;;  %v5125_v1 = vsel %vm9184_vm0, %v5083_v32, %v5124_v22 }
 0x4b4   : > { %6558 = vmatmul.mubr.bf16.gmra.mrb[116].mxu0 %v6075_v49  ;;  %6678 = vmatprep.mubr.bf16.mxu1 %v6053_v61  ;;  %v5580_v49 = vld [vmem:[#allocation3 + $0x100] sm:$0xff] }
 0x4b5   : > { %6565 = vmatprep.mubr.bf16.mxu0 %v5369_v25  ;;  %v5313_v0 = vpop.permute.xlu0 %5312 }
 0x4b6   : > { %v5372_v44 = vsel %vm9339_vm10, %v5313_v0, %v5116_v19  ;;  %v5005_v60 = vpop.permute.xlu1 %5004  ;;  %v6090_v31 = vld [vmem:[#allocation3 + $0x1e0] sm:$0xff]  ;;  %v5069_v19 = vld [vmem:[#allocation4 + $0xe9] sm:$0x7f] }
 0x4b7   : > { %5373 = vst [vmem:[#allocation3 + $0x1c0] sm:$0xff] %v5372_v44  ;;  %5037 = vst.msk [vmem:[#allocation3 + $0x208] sm:$0xff] %vm2594_vm6, %v5005_v60  ;;  %v5583_v0 = vld [vmem:[#allocation3 + $0x128] sm:$0xff] }
 0x4b9   : > { %v5523_v15 = vpop.permute.xlu0 %5522 }
 0x4ba   : > { %v5575_v38 = vsel %vm9750_vm2, %v5523_v15, %v5574_v36  ;;  %v5893_v20 = vpop.permute.xlu1 %5892  ;;  %v6058_v17 = vld [vmem:[#allocation3 + $0xe0] sm:$0xff] }
 0x4bb   : > { %5576 = vst [vmem:[#allocation3 + $0xb0] sm:$0xff] %v5575_v38  ;;  %5931 = vst.msk [vmem:[#allocation3 + $0x108] sm:$0xff] %vm2594_vm6, %v5893_v20  ;;  %6679 = vmatmul.mubr.bf16.gmra.mrb[128].mxu1 %v5575_v38  ;;  %v5127_v15 = vld [vmem:[#allocation3 + $0x260] sm:$0xff] }
 0x4bc   : > { %6566 = vmatmul.mubr.bf16.gmra.mrb[120].mxu0 %v6080_v63  ;;  %6686 = vmatprep.mubr.bf16.mxu1 %v6058_v17 }
 0x4bd   : > { %6573 = vmatprep.mubr.bf16.mxu0 %v5372_v44  ;;  %v5315_v30 = vpop.permute.xlu0 %5314  ;;  %v5084_v44 = vpack.c.bf16 %v5069_v19, %v10705_v62 }
 0x4be   : > { %v5375_v58 = vsel %vm9339_vm10, %v5315_v30, %v5119_v33  ;;  %v5007_v6 = vpop.permute.xlu1 %5006  ;;  %v6095_v61 = vld [vmem:[#allocation3 + $0x208] sm:$0xff] }
 0x4bf   : > { %5376 = vst [vmem:[#allocation3 + $0x1e8] sm:$0xff] %v5375_v58  ;;  %5038 = vst.msk [vmem:[#allocation3 + $0x230] sm:$0xff] %vm2594_vm6, %v5007_v6  ;;  %v5128_v16 = vsel %vm9184_vm0, %v5084_v44, %v5127_v15 }
 0x4c1   : > { %v5525_v12 = vpop.permute.xlu0 %5524 }
 0x4c2   : > { %v5578_v50 = vsel %vm9750_vm2, %v5525_v12, %v5577_v53  ;;  %v5895_v24 = vpop.permute.xlu1 %5894  ;;  %v6063_v18 = vld [vmem:[#allocation3 + $0x108] sm:$0xff]  ;;  %v5592_v12 = vld [vmem:[#allocation3 + $0x1a0] sm:$0xff] }
 0x4c3   : > { %5579 = vst [vmem:[#allocation3 + $0xd8] sm:$0xff] %v5578_v50  ;;  %5932 = vst.msk [vmem:[#allocation3 + $0x130] sm:$0xff] %vm2594_vm6, %v5895_v24  ;;  %6687 = vmatmul.mubr.bf16.gmra.mrb[132].mxu1 %v5578_v50 }
 0x4c4   : > { %6574 = vmatmul.mubr.bf16.gmra.mrb[124].mxu0 %v6085_v40  ;;  %6694 = vmatprep.mubr.bf16.mxu1 %v6063_v18 }
 0x4c5   : > { %6581 = vmatprep.mubr.bf16.mxu0 %v5375_v58  ;;  %v5317_v43 = vpop.permute.xlu0 %5316 }
 0x4c6   : > { %v5378_v21 = vsel %vm9339_vm10, %v5317_v43, %v5122_v28  ;;  %v5009_v37 = vpop.permute.xlu1 %5008  ;;  %v6100_v20 = vld [vmem:[#allocation3 + $0x230] sm:$0xff] }
 0x4c7   : > { %5379 = vst [vmem:[#allocation3 + $0x210] sm:$0xff] %v5378_v21  ;;  %5039 = vst.msk [vmem:[#allocation3 + $0x258] sm:$0xff] %vm2594_vm6, %v5009_v37 }
 0x4c9   : > { %v5527_v25 = vpop.permute.xlu0 %5526 }
 0x4ca   : > { %v5581_v5 = vsel %vm9750_vm2, %v5527_v25, %v5580_v49  ;;  %v5897_v52 = vpop.permute.xlu1 %5896  ;;  %v6068_v23 = vld [vmem:[#allocation3 + $0x130] sm:$0xff] }
 0x4cb   : > { %5582 = vst [vmem:[#allocation3 + $0x100] sm:$0xff] %v5581_v5  ;;  %5933 = vst.msk [vmem:[#allocation3 + $0x158] sm:$0xff] %vm2594_vm6, %v5897_v52  ;;  %6695 = vmatmul.mubr.bf16.gmra.mrb[136].mxu1 %v5581_v5  ;;  %v5607_v52 = vld [vmem:[#allocation3 + $0x268] sm:$0xff] }
 0x4cc   : > { %6582 = vmatmul.mubr.bf16.gmra.mrb[128].mxu0 %v6090_v31  ;;  %6702 = vmatprep.mubr.bf16.mxu1 %v6068_v23 }
 0x4cd   : > { %6589 = vmatprep.mubr.bf16.mxu0 %v5378_v21  ;;  %v5319_v13 = vpop.permute.xlu0 %5318 }
 0x4ce   : > { %v5381_v4 = vsel %vm9339_vm10, %v5319_v13, %v5125_v1  ;;  %v5899_v35 = vpop.permute.xlu1 %5898  ;;  %v6105_v6 = vld [vmem:[#allocation3 + $0x258] sm:$0xff] }
 0x4cf   : > { %5382 = vst [vmem:[#allocation3 + $0x238] sm:$0xff] %v5381_v4  ;;  %5934 = vst.msk [vmem:[#allocation3 + $0x180] sm:$0xff] %vm2594_vm6, %v5899_v35 }
 0x4d1   : > { %v5529_v63 = vpop.permute.xlu0 %5528 }
 0x4d2   : > { %v5584_v60 = vsel %vm9750_vm2, %v5529_v63, %v5583_v0  ;;  %v5901_v45 = vpop.permute.xlu1 %5900  ;;  %v6073_v36 = vld [vmem:[#allocation3 + $0x158] sm:$0xff] }
 0x4d3   : > { %5585 = vst [vmem:[#allocation3 + $0x128] sm:$0xff] %v5584_v60  ;;  %5935 = vst.msk [vmem:[#allocation3 + $0x1a8] sm:$0xff] %vm2594_vm6, %v5901_v45  ;;  %6703 = vmatmul.mubr.bf16.gmra.mrb[140].mxu1 %v5584_v60 }
 0x4d4   : > { %6590 = vmatmul.mubr.bf16.gmra.mrb[132].mxu0 %v6095_v61  ;;  %6710 = vmatprep.mubr.bf16.mxu1 %v6073_v36 }
 0x4d5   : > { %6597 = vmatprep.mubr.bf16.mxu0 %v5381_v4  ;;  %v5321_v38 = vpop.permute.xlu0 %5320 }
 0x4d6   : > { %v5384_v17 = vsel %vm9339_vm10, %v5321_v38, %v5128_v16  ;;  %v5903_v62 = vpop.permute.xlu1 %5902  ;;  %v6078_v8 = vld [vmem:[#allocation3 + $0x180] sm:$0xff] }
 0x4d7   : > { %5385 = vst [vmem:[#allocation3 + $0x260] sm:$0xff] %v5384_v17  ;;  %5936 = vst.msk [vmem:[#allocation3 + $0x1d0] sm:$0xff] %vm2594_vm6, %v5903_v62 }
 0x4d9   : > { %v5531_v33 = vpop.permute.xlu0 %5530 }
 0x4da   : > { %v5587_v30 = vsel %vm9750_vm2, %v5531_v33, %v5586_v57  ;;  %v5905_v40 = vpop.permute.xlu1 %5904  ;;  %v6083_v18 = vld [vmem:[#allocation3 + $0x1a8] sm:$0xff] }
 0x4db   : > { %5588 = vst [vmem:[#allocation3 + $0x150] sm:$0xff] %v5587_v30  ;;  %5937 = vst.msk [vmem:[#allocation3 + $0x1f8] sm:$0xff] %vm2594_vm6, %v5905_v40  ;;  %6711 = vmatmul.mubr.bf16.gmra.mrb[144].mxu1 %v5587_v30 }
 0x4dc   : > { %6598 = vmatmul.mubr.bf16.gmra.mrb[136].mxu0 %v6100_v20  ;;  %6718 = vmatprep.mubr.bf16.mxu1 %v6078_v8 }
 0x4dd   : > { %6605 = vmatprep.mubr.bf16.mxu0 %v5384_v17  ;;  %v5533_v58 = vpop.permute.xlu0 %5532 }
 0x4de   : > { %v5590_v56 = vsel %vm9750_vm2, %v5533_v58, %v5589_v7  ;;  %v5907_v53 = vpop.permute.xlu1 %5906  ;;  %v6088_v37 = vld [vmem:[#allocation3 + $0x1d0] sm:$0xff] }
 0x4df   : > { %5591 = vst [vmem:[#allocation3 + $0x178] sm:$0xff] %v5590_v56  ;;  %5938 = vst.msk [vmem:[#allocation3 + $0x220] sm:$0xff] %vm2594_vm6, %v5907_v53 }
 0x4e1   : > { %v5535_v46 = vpop.permute.xlu0 %5534 }
 0x4e2   : > { %v5593_v50 = vsel %vm9750_vm2, %v5535_v46, %v5592_v12  ;;  %v5909_v24 = vpop.permute.xlu1 %5908  ;;  %v6093_v5 = vld [vmem:[#allocation3 + $0x1f8] sm:$0xff] }
 0x4e3   : > { %5594 = vst [vmem:[#allocation3 + $0x1a0] sm:$0xff] %v5593_v50  ;;  %5939 = vst.msk [vmem:[#allocation3 + $0x248] sm:$0xff] %vm2594_vm6, %v5909_v24  ;;  %6719 = vmatmul.mubr.bf16.gmra.mrb[148].mxu1 %v5590_v56 }
 0x4e4   : > { %6606 = vmatmul.mubr.bf16.gmra.mrb[140].mxu0 %v6105_v6  ;;  %6726 = vmatprep.mubr.bf16.mxu1 %v6083_v18 }
 0x4e5   : > { %7868 = vmatprep.mubr.msk.bf16.mxu0 %vm326_vm4, %v10630_v42  ;;  %v5598_v42 = vld [vmem:[#allocation3 + $0x1f0] sm:$0xff] }
 0x4e8   : > { %v5537_v28 = vpop.permute.xlu0 %5536 }
 0x4e9   : > { %v5596_v43 = vsel %vm9750_vm2, %v5537_v28, %v5595_v2 }
 0x4ea   : > { %5597 = vst [vmem:[#allocation3 + $0x1c8] sm:$0xff] %v5596_v43 }
 0x4eb   : > { %6727 = vmatmul.mubr.bf16.gmra.mrb[152].mxu1 %v5593_v50  ;;  %v10973_v50 = vld [vmem:[%s11248_s7] ss:$0 sm:$0xff] }
 0x4ec   : > { %7869 = vmatmul.mubr.msk.bf16.vlgmr.msra.gmra.mrb[144].mxu0 %vm326_vm4, %v10676_v27  ;;  %v5539_v31 = vpop.permute.xlu0 %5538  ;;  %6734 = vmatprep.mubr.bf16.mxu1 %v6088_v37  ;;  %v5604_v27 = vld [vmem:[#allocation3 + $0x240] sm:$0xff] }
 0x4ed   : > { %7872 = vmatprep.mubr.msk.bf16.mxu0 %vm326_vm4, %v10680_v29  ;;  %v5599_v21 = vsel %vm9750_vm2, %v5539_v31, %v5598_v42 }
 0x4ee   : > { %5600 = vst [vmem:[#allocation3 + $0x1f0] sm:$0xff] %v5599_v21 }
 0x4f0   : > { %v5541_v49 = vpop.permute.xlu0 %5540 }
 0x4f1   : > { %v5602_v25 = vsel %vm9750_vm2, %v5541_v49, %v5601_v51 }
 0x4f2   : > { %5603 = vst [vmem:[#allocation3 + $0x218] sm:$0xff] %v5602_v25 }
 0x4f3   : > { %6735 = vmatmul.mubr.bf16.gmra.mrb[156].mxu1 %v5596_v43 }
 0x4f4   : > { %7873 = vmatmul.mubr.msk.bf16.gmra.mrb[148].mxu0 %vm326_vm4, %v10696_v54  ;;  %v5543_v29 = vpop.permute.xlu0 %5542  ;;  %6742 = vmatprep.mubr.bf16.mxu1 %v6093_v5  ;;  %v6098_v54 = vld [vmem:[#allocation3 + $0x220] sm:$0xff] }
 0x4f5   : > { %7876 = vmatprep.mubr.msk.bf16.mxu0 %vm326_vm4, %v10712_v9  ;;  %v5605_v32 = vsel %vm9750_vm2, %v5543_v29, %v5604_v27  ;;  %v6103_v9 = vld [vmem:[#allocation3 + $0x248] sm:$0xff] }
 0x4f6   : > { %5606 = vst [vmem:[#allocation3 + $0x240] sm:$0xff] %v5605_v32 }
 0x4f8   : > { %v5545_v23 = vpop.permute.xlu0 %5544 }
 0x4f9   : > { %v5608_v22 = vsel %vm9750_vm2, %v5545_v23, %v5607_v52 }
 0x4fa   : > { %5609 = vst [vmem:[#allocation3 + $0x268] sm:$0xff] %v5608_v22 }
 0x4fb   : > { %6743 = vmatmul.mubr.bf16.gmra.mrb[160].mxu1 %v5599_v21 }
 0x4fc   : > { %7877 = vmatmul.mubr.msk.bf16.gmra.mrb[152].mxu0 %vm326_vm4, %v10722_v39  ;;  %6750 = vmatprep.mubr.bf16.mxu1 %v6098_v54  ;;  %v6109_v39 = vld [vmem:[#allocation3 + $0x278] sm:$0xff] }
 0x4fd   : > { %7880 = vmatprep.mubr.msk.bf16.mxu0 %vm326_vm4, %v10726_v41 }
 0x503   : > { %6751 = vmatmul.mubr.bf16.gmra.mrb[164].mxu1 %v5602_v25 }
 0x504   : > { %7881 = vmatmul.mubr.msk.bf16.gmra.mrb[156].mxu0 %vm326_vm4, %v10730_v11  ;;  %6758 = vmatprep.mubr.bf16.mxu1 %v6103_v9 }
 0x505   : > { %7884 = vmatprep.mubr.msk.bf16.mxu0 %vm326_vm4, %v10744_v55 }
 0x50b   : > { %6759 = vmatmul.mubr.bf16.gmra.mrb[168].mxu1 %v5605_v32 }
 0x50c   : > { %7885 = vmatmul.mubr.msk.bf16.gmra.mrb[160].mxu0 %vm326_vm4, %v10748_v26  ;;  %6766 = vmatprep.mubr.bf16.mxu1 %v10580_v14 }
 0x50d   : > { %7888 = vmatprep.mubr.msk.bf16.mxu0 %vm326_vm4, %v10758_v48 }
 0x513   : > { %6767 = vmatmul.mubr.bf16.gmra.mrb[172].mxu1 %v5608_v22 }
 0x514   : > { %7889 = vmatmul.mubr.msk.bf16.gmra.mrb[164].mxu0 %vm326_vm4, %v10771_v10 }
 0x515   : > { %7892 = vmatprep.mubr.msk.bf16.mxu0 %vm326_vm4, %v10775_v34 }
 0x51c   : > { %7893 = vmatmul.mubr.msk.bf16.gmra.mrb[168].mxu0 %vm326_vm4, %v10784_v59 }
 0x51d   : > { %7896 = vmatprep.mubr.msk.bf16.mxu0 %vm326_vm4, %v10788_v47 }
 0x524   : > { %7897 = vmatmul.mubr.msk.bf16.gmra.mrb[172].mxu0 %vm326_vm4, %v6109_v39 }
 0x536   : > { %v7554_v41 = vpop.f32.mrb[80].mxu0 }
 0x537   : > { %v7555_v11 = vpop.f32.mrb[81].mxu0 }
 0x538   : > { %v7556_v55 = vadd.f32 %v7555_v11, %v7554_v41  ;;  %v7557_v14 = vpop.f32.mrb[82].mxu0 }
 0x539   : > { %v7558_v26 = vpop.f32.mrb[83].mxu0 }
 0x53a   : > { %v7559_v48 = vadd.f32 %v7558_v26, %v7557_v14  ;;  %v6488_v28 = vadd.f32 %v7556_v55, %v10973_v50 }
 0x53c   : > { %v6491_v37 = vadd.f32 %v7559_v48, %v10973_v50 }
 0x547   : > { %v7560_v10 = vpop.f32.mrb[84].mxu0 }
 0x548   : > { %v7561_v3 = vpop.f32.mrb[85].mxu0 }
 0x549   : > { %v7562_v1 = vadd.f32 %v7561_v3, %v7560_v10  ;;  %v7563_v34 = vpop.f32.mrb[86].mxu0 }
 0x54a   : > { %v7564_v13 = vpop.f32.mrb[87].mxu0 }
 0x54b   : > { %v7565_v61 = vadd.f32 %v7564_v13, %v7563_v34  ;;  %v6496_v54 = vadd.f32 %v7562_v1, %v10973_v50 }
 0x54d   : > { %v6499_v55 = vadd.f32 %v7565_v61, %v10973_v50 }
 0x54f   : > { %v7566_v4 = vpop.f32.mrb[88].mxu0 }
 0x550   : > { %v7567_v59 = vpop.f32.mrb[89].mxu0 }
 0x551   : > { %v10952_v35 = vadd.f32 %v7567_v59, %v7566_v4  ;;  %v7569_v47 = vpop.f32.mrb[90].mxu0 }
 0x552   : > { %v7570_v19 = vpop.f32.mrb[91].mxu0 }
 0x553   : > { %v10954_v0 = vadd.f32 %v7570_v19, %v7569_v47  ;;  %v6504_v47 = vadd.f32 %v10952_v35, %v10973_v50 }
 0x557   : > { %v7572_v63 = vpop.f32.mrb[92].mxu0 }
 0x558   : > { %v7573_v44 = vpop.f32.mrb[93].mxu0 }
 0x559   : > { %v10956_v60 = vadd.f32 %v7573_v44, %v7572_v63  ;;  %v7575_v45 = vpop.f32.mrb[94].mxu0 }
 0x55a   : > { %v7576_v36 = vpop.f32.mrb[95].mxu0 }
 0x55b   : > { %v10958_v15 = vadd.f32 %v7576_v36, %v7575_v45  ;;  %v6507_v45 = vadd.f32 %v10954_v0, %v10973_v50 }
 0x55f   : > { %v7578_v16 = vpop.f32.mrb[96].mxu0 }
 0x560   : > { %v7579_v38 = vpop.f32.mrb[97].mxu0 }
 0x561   : > { %v10960_v20 = vadd.f32 %v7579_v38, %v7578_v16  ;;  %v7581_v17 = vpop.f32.mrb[98].mxu0 }
 0x562   : > { %v7582_v62 = vpop.f32.mrb[99].mxu0 }
 0x563   : > { %v10962_v57 = vadd.f32 %v7582_v62, %v7581_v17 }
 0x567   : > { %v7584_v33 = vpop.f32.mrb[100].mxu0 }
 0x568   : > { %v7585_v30 = vpop.f32.mrb[101].mxu0 }
 0x569   : > { %v10964_v40 = vadd.f32 %v7585_v30, %v7584_v33  ;;  %v7587_v8 = vpop.f32.mrb[102].mxu0 }
 0x56a   : > { %v7588_v7 = vpop.f32.mrb[103].mxu0 }
 0x56b   : > { %v10966_v58 = vadd.f32 %v7588_v7, %v7587_v8 }
 0x56e   : > { %v7666_v18 = vpop.f32.mrb[112].mxu1 }
 0x56f   : > { %v7590_v6 = vpop.f32.mrb[104].mxu0  ;;  %v7667_v2 = vpop.f32.mrb[113].mxu1 }
 0x570   : > { %v7591_v56 = vpop.f32.mrb[105].mxu0  ;;  %v7668_v43 = vadd.f32 %v7667_v2, %v7666_v18  ;;  %v7669_v42 = vpop.f32.mrb[114].mxu1  ;;  %v6515_v18 = vadd.f32 %v10958_v15, %v10973_v50 }
 0x571   : > { %v10968_v53 = vadd.f32 %v7591_v56, %v7590_v6  ;;  %v7593_v12 = vpop.f32.mrb[106].mxu0  ;;  %v7670_v21 = vpop.f32.mrb[115].mxu1  ;;  %v6512_v6 = vadd.f32 %v10956_v60, %v10973_v50 }
 0x572   : > { %v7594_v46 = vpop.f32.mrb[107].mxu0  ;;  %v7671_v49 = vadd.f32 %v7670_v21, %v7669_v42  ;;  %v10979_v25 = vadd.f32 %v7668_v43, %v6488_v28 }
 0x573   : > { %v10975_v24 = vadd.f32 %v7594_v46, %v7593_v12 }
 0x574   : > { %v10983_v5 = vadd.f32 %v7671_v49, %v6491_v37 }
 0x576   : > { %v7672_v23 = vpop.f32.mrb[116].mxu1 }
 0x577   : > { %v7596_v31 = vpop.f32.mrb[108].mxu0  ;;  %v7673_v22 = vpop.f32.mrb[117].mxu1 }
 0x578   : > { %v7597_v51 = vpop.f32.mrb[109].mxu0  ;;  %v7674_v9 = vadd.f32 %v7673_v22, %v7672_v23  ;;  %v7675_v39 = vpop.f32.mrb[118].mxu1 }
 0x579   : > { %v10981_v27 = vadd.f32 %v7597_v51, %v7596_v31  ;;  %v7599_v29 = vpop.f32.mrb[110].mxu0  ;;  %v7676_v11 = vpop.f32.mrb[119].mxu1 }
 0x57a   : > { %v7600_v32 = vpop.f32.mrb[111].mxu0  ;;  %v7677_v26 = vadd.f32 %v7676_v11, %v7675_v39  ;;  %v10989_v48 = vadd.f32 %v7674_v9, %v6496_v54  ;;  %v6523_v54 = vadd.f32 %v10962_v57, %v10973_v50 }
 0x57b   : > { %v10985_v52 = vadd.f32 %v7600_v32, %v7599_v29  ;;  %v6520_v29 = vadd.f32 %v10960_v20, %v10973_v50 }
 0x57c   : > { %v10993_v13 = vadd.f32 %v7677_v26, %v6499_v55 }
 0x57e   : > { %v7678_v59 = vpop.f32.mrb[120].mxu1 }
 0x57f   : > { %v7602_v41 = vpop.f32.mrb[112].mxu0  ;;  %v7679_v1 = vpop.f32.mrb[121].mxu1 }
 0x580   : > { %v7603_v14 = vpop.f32.mrb[113].mxu0  ;;  %v7680_v19 = vadd.f32 %v7679_v1, %v7678_v59  ;;  %v7681_v63 = vpop.f32.mrb[122].mxu1  ;;  %v6528_v59 = vadd.f32 %v10964_v40, %v10973_v50 }
 0x581   : > { %v10991_v10 = vadd.f32 %v7603_v14, %v7602_v41  ;;  %v7605_v3 = vpop.f32.mrb[114].mxu0  ;;  %v7682_v44 = vpop.f32.mrb[123].mxu1 }
 0x582   : > { %v7606_v34 = vpop.f32.mrb[115].mxu0  ;;  %v7683_v16 = vadd.f32 %v7682_v44, %v7681_v63  ;;  %v11001_v38 = vadd.f32 %v7680_v19, %v6504_v47  ;;  %v6531_v63 = vadd.f32 %v10966_v58, %v10973_v50 }
 0x583   : > { %v10995_v4 = vadd.f32 %v7606_v34, %v7605_v3 }
 0x584   : > { %v11005_v30 = vadd.f32 %v7683_v16, %v6507_v45 }
 0x586   : > { %v7684_v35 = vpop.f32.mrb[124].mxu1 }
 0x587   : > { %v7608_v61 = vpop.f32.mrb[116].mxu0  ;;  %v7685_v7 = vpop.f32.mrb[125].mxu1 }
 0x588   : > { %v7609_v36 = vpop.f32.mrb[117].mxu0  ;;  %v7686_v56 = vadd.f32 %v7685_v7, %v7684_v35  ;;  %v7687_v12 = vpop.f32.mrb[126].mxu1 }
 0x589   : > { %v11003_v17 = vadd.f32 %v7609_v36, %v7608_v61  ;;  %v7611_v62 = vpop.f32.mrb[118].mxu0  ;;  %v7688_v46 = vpop.f32.mrb[127].mxu1 }
 0x58a   : > { %v7612_v33 = vpop.f32.mrb[119].mxu0  ;;  %v7689_v28 = vadd.f32 %v7688_v46, %v7687_v12  ;;  %v11013_v43 = vadd.f32 %v7686_v56, %v6512_v6  ;;  %v6536_v6 = vadd.f32 %v10968_v53, %v10973_v50  ;;  %v6539_v46 = vadd.f32 %v10975_v24, %v10973_v50 }
 0x58b   : > { %v11007_v8 = vadd.f32 %v7612_v33, %v7611_v62 }
 0x58c   : > { %v11017_v37 = vadd.f32 %v7689_v28, %v6515_v18 }
 0x58e   : > { %v7690_v60 = vpop.f32.mrb[128].mxu1 }
 0x58f   : > { %v7614_v0 = vpop.f32.mrb[120].mxu0  ;;  %v7691_v49 = vpop.f32.mrb[129].mxu1 }
 0x590   : > { %v7615_v2 = vpop.f32.mrb[121].mxu0  ;;  %v7692_v32 = vadd.f32 %v7691_v49, %v7690_v60  ;;  %v7693_v23 = vpop.f32.mrb[130].mxu1 }
 0x591   : > { %v11015_v42 = vadd.f32 %v7615_v2, %v7614_v0  ;;  %v7617_v31 = vpop.f32.mrb[122].mxu0  ;;  %v7694_v22 = vpop.f32.mrb[131].mxu1 }
 0x592   : > { %v7618_v21 = vpop.f32.mrb[123].mxu0  ;;  %v7695_v39 = vadd.f32 %v7694_v22, %v7693_v23  ;;  %v11025_v41 = vadd.f32 %v7692_v32, %v6520_v29  ;;  %v6544_v23 = vadd.f32 %v10981_v27, %v10973_v50 }
 0x593   : > { %v11019_v51 = vadd.f32 %v7618_v21, %v7617_v31 }
 0x594   : > { %v11029_v26 = vadd.f32 %v7695_v39, %v6523_v54 }
 0x596   : > { %v7696_v20 = vpop.f32.mrb[132].mxu1 }
 0x597   : > { %v7620_v15 = vpop.f32.mrb[124].mxu0  ;;  %v7697_v34 = vpop.f32.mrb[133].mxu1 }
 0x598   : > { %v7621_v9 = vpop.f32.mrb[125].mxu0  ;;  %v7698_v1 = vadd.f32 %v7697_v34, %v7696_v20  ;;  %v7699_v47 = vpop.f32.mrb[134].mxu1 }
 0x599   : > { %v11027_v11 = vadd.f32 %v7621_v9, %v7620_v15  ;;  %v7623_v55 = vpop.f32.mrb[126].mxu0  ;;  %v7700_v19 = vpop.f32.mrb[135].mxu1  ;;  %v6547_v9 = vadd.f32 %v10985_v52, %v10973_v50 }
 0x59a   : > { %v7624_v14 = vpop.f32.mrb[127].mxu0  ;;  %v7701_v44 = vadd.f32 %v7700_v19, %v7699_v47  ;;  %v11037_v45 = vadd.f32 %v7698_v1, %v6528_v59  ;;  %v6552_v19 = vadd.f32 %v10991_v10, %v10973_v50 }
 0x59b   : > { %v11031_v3 = vadd.f32 %v7624_v14, %v7623_v55 }
 0x59c   : > { %v11041_v33 = vadd.f32 %v7701_v44, %v6531_v63 }
 0x59e   : > { %v7702_v40 = vpop.f32.mrb[136].mxu1 }
 0x59f   : > { %v7626_v57 = vpop.f32.mrb[128].mxu0  ;;  %v7703_v7 = vpop.f32.mrb[137].mxu1 }
 0x5a0   : > { %v7627_v61 = vpop.f32.mrb[129].mxu0  ;;  %v7704_v56 = vadd.f32 %v7703_v7, %v7702_v40  ;;  %v7705_v12 = vpop.f32.mrb[138].mxu1 }
 0x5a1   : > { %v11039_v36 = vadd.f32 %v7627_v61, %v7626_v57  ;;  %v7629_v16 = vpop.f32.mrb[130].mxu0  ;;  %v7706_v0 = vpop.f32.mrb[139].mxu1 }
 0x5a2   : > { %v7630_v62 = vpop.f32.mrb[131].mxu0  ;;  %v7707_v2 = vadd.f32 %v7706_v0, %v7705_v12  ;;  %v11049_v28 = vadd.f32 %v7704_v56, %v6536_v6 }
 0x5a3   : > { %v11043_v35 = vadd.f32 %v7630_v62, %v7629_v16  ;;  %v6555_v16 = vadd.f32 %v10995_v4, %v10973_v50  ;;  %v6560_v4 = vadd.f32 %v11003_v17, %v10973_v50 }
 0x5a4   : > { %v11053_v49 = vadd.f32 %v7707_v2, %v6539_v46 }
 0x5a6   : > { %v7708_v53 = vpop.f32.mrb[140].mxu1 }
 0x5a7   : > { %v7632_v58 = vpop.f32.mrb[132].mxu0  ;;  %v7709_v32 = vpop.f32.mrb[141].mxu1 }
 0x5a8   : > { %v7633_v18 = vpop.f32.mrb[133].mxu0  ;;  %v7710_v15 = vadd.f32 %v7709_v32, %v7708_v53  ;;  %v7711_v22 = vpop.f32.mrb[142].mxu1  ;;  %v6563_v53 = vadd.f32 %v11007_v8, %v10973_v50 }
 0x5a9   : > { %v11051_v31 = vadd.f32 %v7633_v18, %v7632_v58  ;;  %v7635_v21 = vpop.f32.mrb[134].mxu0  ;;  %v7712_v54 = vpop.f32.mrb[143].mxu1 }
 0x5aa   : > { %v7636_v60 = vpop.f32.mrb[135].mxu0  ;;  %v7713_v55 = vadd.f32 %v7712_v54, %v7711_v22  ;;  %v11061_v14 = vadd.f32 %v7710_v15, %v6544_v23 }
 0x5ab   : > { %v11055_v29 = vadd.f32 %v7636_v60, %v7635_v21 }
 0x5ac   : > { %v11065_v1 = vadd.f32 %v7713_v55, %v6547_v9  ;;  %v6568_v55 = vadd.f32 %v11015_v42, %v10973_v50 }
 0x5ae   : > { %v7714_v27 = vpop.f32.mrb[144].mxu1 }
 0x5af   : > { %v7638_v24 = vpop.f32.mrb[136].mxu0  ;;  %v7715_v57 = vpop.f32.mrb[145].mxu1 }
 0x5b0   : > { %v7639_v39 = vpop.f32.mrb[137].mxu0  ;;  %v7716_v52 = vadd.f32 %v7715_v57, %v7714_v27  ;;  %v7717_v63 = vpop.f32.mrb[146].mxu1  ;;  %v6571_v57 = vadd.f32 %v11019_v51, %v10973_v50 }
 0x5b1   : > { %v11063_v20 = vadd.f32 %v7639_v39, %v7638_v24  ;;  %v7641_v34 = vpop.f32.mrb[138].mxu0  ;;  %v7718_v44 = vpop.f32.mrb[147].mxu1 }
 0x5b2   : > { %v7642_v59 = vpop.f32.mrb[139].mxu0  ;;  %v7719_v40 = vadd.f32 %v7718_v44, %v7717_v63  ;;  %v11073_v7 = vadd.f32 %v7716_v52, %v6552_v19 }
 0x5b3   : > { %v11067_v47 = vadd.f32 %v7642_v59, %v7641_v34 }
 0x5b4   : > { %v11078_v58 = vadd.f32 %v7719_v40, %v6555_v16 }
 0x5b6   : > { %v7720_v0 = vpop.f32.mrb[148].mxu1 }
 0x5b7   : > { %v7644_v61 = vpop.f32.mrb[140].mxu0  ;;  %v7721_v46 = vpop.f32.mrb[149].mxu1 }
 0x5b8   : > { %v7645_v62 = vpop.f32.mrb[141].mxu0  ;;  %v7722_v18 = vadd.f32 %v7721_v46, %v7720_v0  ;;  %v7723_v2 = vpop.f32.mrb[150].mxu1  ;;  %v6579_v46 = vadd.f32 %v11031_v3, %v10973_v50 }
 0x5b9   : > { %v11075_v6 = vadd.f32 %v7645_v62, %v7644_v61  ;;  %v7647_v56 = vpop.f32.mrb[142].mxu0  ;;  %v7724_v60 = vpop.f32.mrb[151].mxu1 }
 0x5ba   : > { %v7648_v12 = vpop.f32.mrb[143].mxu0  ;;  %v7725_v23 = vadd.f32 %v7724_v60, %v7723_v2  ;;  %v11089_v22 = vadd.f32 %v7722_v18, %v6560_v4 }
 0x5bb   : > { %v11080_v10 = vadd.f32 %v7648_v12, %v7647_v56  ;;  %v6576_v56 = vadd.f32 %v11027_v11, %v10973_v50 }
 0x5bc   : > { %v11096_v8 = vadd.f32 %v7725_v23, %v6563_v53 }
 0x5be   : > { %v7726_v39 = vpop.f32.mrb[152].mxu1 }
 0x5bf   : > { %v7870_v21 = vpop.f32.mrb[144].mxu0 }
 0x5c0   : > { %v6818_v32 = vadd.f32 %v7870_v21, %v10989_v48  ;;  %v6809_v15 = vpop.f32.mrb[145].mxu0 }
 0x5c1   : > { %v6810_v24 = vadd.f32 %v6809_v15, %v10979_v25  ;;  %v7871_v54 = vpop.f32.mrb[146].mxu0  ;;  %v7727_v25 = vpop.f32.mrb[153].mxu1  ;;  %v6584_v15 = vadd.f32 %v11039_v36, %v10973_v50 }
 0x5c2   : > { %6938 = vst [vmem:[%s11092_s10 + $0x10] sm:$0xff] %v6818_v32  ;;  %v6821_v17 = vadd.f32 %v7871_v54, %v10993_v13  ;;  %v6812_v9 = vpop.f32.mrb[147].mxu0  ;;  %v7728_v34 = vadd.f32 %v7727_v25, %v7726_v39  ;;  %v7729_v59 = vpop.f32.mrb[154].mxu1 }
 0x5c3   : > { %6936 = vst [vmem:[%s11092_s10] sm:$0xff] %v6810_v24  ;;  %v6813_v48 = vadd.f32 %v6812_v9, %v10983_v5  ;;  %v7730_v13 = vpop.f32.mrb[155].mxu1 }
 0x5c4   : > { %6939 = vst [vmem:[%s11092_s10 + $0x18] sm:$0xff] %v6821_v17  ;;  %v7731_v19 = vadd.f32 %v7730_v13, %v7729_v59  ;;  %v11107_v63 = vadd.f32 %v7728_v34, %v6568_v55  ;;  %v6587_v17 = vadd.f32 %v11043_v35, %v10973_v50  ;;  %v6592_v13 = vadd.f32 %v11051_v31, %v10973_v50 }
 0x5c5   : > { %6937 = vst [vmem:[%s11092_s10 + $0x8] sm:$0xff] %v6813_v48 }
 0x5c6   : > { %v11112_v62 = vadd.f32 %v7731_v19, %v6571_v57  ;;  %v7732_v51 = vpop.f32.mrb[156].mxu1  ;;  %v6595_v19 = vadd.f32 %v11055_v29, %v10973_v50 }
 0x5c7   : > { %v7874_v27 = vpop.f32.mrb[148].mxu0 }
 0x5c8   : > { %v6834_v5 = vadd.f32 %v7874_v27, %v11013_v43  ;;  %v6825_v52 = vpop.f32.mrb[149].mxu0  ;;  %v7733_v43 = vpop.f32.mrb[157].mxu1 }
 0x5c9   : > { %v6826_v61 = vadd.f32 %v6825_v52, %v11001_v38  ;;  %v7875_v44 = vpop.f32.mrb[150].mxu0  ;;  %v7734_v38 = vadd.f32 %v7733_v43, %v7732_v51  ;;  %v7735_v12 = vpop.f32.mrb[158].mxu1 }
 0x5ca   : > { %6942 = vst [vmem:[%s11092_s10 + $0x30] sm:$0xff] %v6834_v5  ;;  %v6837_v42 = vadd.f32 %v7875_v44, %v11017_v37  ;;  %v6828_v16 = vpop.f32.mrb[151].mxu0  ;;  %v7736_v37 = vpop.f32.mrb[159].mxu1 }
 0x5cb   : > { %6940 = vst [vmem:[%s11092_s10 + $0x20] sm:$0xff] %v6826_v61  ;;  %v6829_v40 = vadd.f32 %v6828_v16, %v11005_v30  ;;  %v7737_v4 = vadd.f32 %v7736_v37, %v7735_v12  ;;  %v11123_v2 = vadd.f32 %v7734_v38, %v6576_v56 }
 0x5cc   : > { %6943 = vst [vmem:[%s11092_s10 + $0x38] sm:$0xff] %v6837_v42 }
 0x5cd   : > { %6941 = vst [vmem:[%s11092_s10 + $0x28] sm:$0xff] %v6829_v40  ;;  %v11128_v32 = vadd.f32 %v7737_v4, %v6579_v46 }
 0x5ce   : > { %v7738_v3 = vpop.f32.mrb[160].mxu1 }
 0x5cf   : > { %v7878_v0 = vpop.f32.mrb[152].mxu0 }
 0x5d0   : > { %v6850_v30 = vadd.f32 %v7878_v0, %v11037_v45  ;;  %v6841_v18 = vpop.f32.mrb[153].mxu0  ;;  %v7739_v45 = vpop.f32.mrb[161].mxu1 }
 0x5d1   : > { %v6842_v21 = vadd.f32 %v6841_v18, %v11025_v41  ;;  %v7879_v60 = vpop.f32.mrb[154].mxu0  ;;  %v7740_v41 = vadd.f32 %v7739_v45, %v7738_v3  ;;  %v7741_v24 = vpop.f32.mrb[162].mxu1  ;;  %v6611_v45 = vadd.f32 %v11080_v10, %v10973_v50 }
 0x5d2   : > { %6946 = vst [vmem:[%s11092_s10 + $0x50] sm:$0xff] %v6850_v30  ;;  %v6853_v11 = vadd.f32 %v7879_v60, %v11041_v33  ;;  %v6844_v53 = vpop.f32.mrb[155].mxu0  ;;  %v7742_v33 = vpop.f32.mrb[163].mxu1 }
 0x5d3   : > { %6944 = vst [vmem:[%s11092_s10 + $0x40] sm:$0xff] %v6842_v21  ;;  %v6845_v23 = vadd.f32 %v6844_v53, %v11029_v26  ;;  %v7743_v9 = vadd.f32 %v7742_v33, %v7741_v24  ;;  %v11139_v39 = vadd.f32 %v7740_v41, %v6584_v15 }
 0x5d4   : > { %6947 = vst [vmem:[%s11092_s10 + $0x58] sm:$0xff] %v6853_v11 }
 0x5d5   : > { %6945 = vst [vmem:[%s11092_s10 + $0x48] sm:$0xff] %v6845_v23  ;;  %v11144_v59 = vadd.f32 %v7743_v9, %v6587_v17 }
 0x5d6   : > { %v7744_v35 = vpop.f32.mrb[164].mxu1 }
 0x5d7   : > { %v7882_v54 = vpop.f32.mrb[156].mxu0 }
 0x5d8   : > { %v6866_v26 = vadd.f32 %v7882_v54, %v11061_v14  ;;  %v6857_v48 = vpop.f32.mrb[157].mxu0  ;;  %v7745_v14 = vpop.f32.mrb[165].mxu1 }
 0x5d9   : > { %v6858_v25 = vadd.f32 %v6857_v48, %v11049_v28  ;;  %v7883_v55 = vpop.f32.mrb[158].mxu0  ;;  %v7746_v28 = vadd.f32 %v7745_v14, %v7744_v35  ;;  %v7747_v57 = vpop.f32.mrb[166].mxu1 }
 0x5da   : > { %6950 = vst [vmem:[%s11092_s10 + $0x70] sm:$0xff] %v6866_v26  ;;  %v6869_v36 = vadd.f32 %v7883_v55, %v11065_v1  ;;  %v6860_v34 = vpop.f32.mrb[159].mxu0  ;;  %v7748_v1 = vpop.f32.mrb[167].mxu1 }
 0x5db   : > { %6948 = vst [vmem:[%s11092_s10 + $0x60] sm:$0xff] %v6858_v25  ;;  %v6861_v27 = vadd.f32 %v6860_v34, %v11053_v49  ;;  %v7749_v52 = vadd.f32 %v7748_v1, %v7747_v57  ;;  %v6753_v44 = vadd.f32 %v7746_v28, %v6592_v13 }
 0x5dc   : > { %6951 = vst [vmem:[%s11092_s10 + $0x78] sm:$0xff] %v6869_v36 }
 0x5dd   : > { %6949 = vst [vmem:[%s11092_s10 + $0x68] sm:$0xff] %v6861_v27  ;;  %v6756_v51 = vadd.f32 %v7749_v52, %v6595_v19 }
 0x5de   : > { %v7750_v56 = vpop.f32.mrb[168].mxu1 }
 0x5df   : > { %v7886_v5 = vpop.f32.mrb[160].mxu0  ;;  %v7751_v29 = vpop.f32.mrb[169].mxu1 }
 0x5e0   : > { %v6882_v49 = vadd.f32 %v7886_v5, %v11089_v22  ;;  %v6873_v61 = vpop.f32.mrb[161].mxu0  ;;  %v6600_v22 = vadd.f32 %v11063_v20, %v10973_v50  ;;  %v7752_v38 = vadd.f32 %v7751_v29, %v7750_v56 }
 0x5e1   : > { %v6874_v42 = vadd.f32 %v6873_v61, %v11073_v7  ;;  %v7887_v16 = vpop.f32.mrb[162].mxu0  ;;  %v7753_v7 = vpop.f32.mrb[170].mxu1 }
 0x5e2   : > { %6954 = vst [vmem:[%s11092_s10 + $0x90] sm:$0xff] %v6882_v49  ;;  %v6885_v31 = vadd.f32 %v7887_v16, %v11096_v8  ;;  %v6876_v40 = vpop.f32.mrb[163].mxu0  ;;  %v7754_v0 = vpop.f32.mrb[171].mxu1  ;;  %v6603_v8 = vadd.f32 %v11067_v47, %v10973_v50  ;;  %v6761_v30 = vadd.f32 %v7752_v38, %v6600_v22 }
 0x5e3   : > { %6952 = vst [vmem:[%s11092_s10 + $0x80] sm:$0xff] %v6874_v42  ;;  %v6877_v43 = vadd.f32 %v6876_v40, %v11078_v58  ;;  %v7755_v37 = vadd.f32 %v7754_v0, %v7753_v7 }
 0x5e4   : > { %6955 = vst [vmem:[%s11092_s10 + $0x98] sm:$0xff] %v6885_v31 }
 0x5e5   : > { %6953 = vst [vmem:[%s11092_s10 + $0x88] sm:$0xff] %v6877_v43  ;;  %v6764_v60 = vadd.f32 %v7755_v37, %v6603_v8 }
 0x5e6   : > { %v7756_v53 = vpop.f32.mrb[172].mxu1 }
 0x5e7   : > { %v7890_v12 = vpop.f32.mrb[164].mxu0  ;;  %v7757_v47 = vpop.f32.mrb[173].mxu1 }
 0x5e8   : > { %v6898_v58 = vadd.f32 %v7890_v12, %v11123_v2  ;;  %v6889_v46 = vpop.f32.mrb[165].mxu0  ;;  %v6608_v2 = vadd.f32 %v11075_v6, %v10973_v50  ;;  %v7758_v23 = vadd.f32 %v7757_v47, %v7756_v53 }
 0x5e9   : > { %v6890_v4 = vadd.f32 %v6889_v46, %v11107_v63  ;;  %v7891_v18 = vpop.f32.mrb[166].mxu0  ;;  %v7759_v63 = vpop.f32.mrb[174].mxu1 }
 0x5ea   : > { %6958 = vst [vmem:[%s11092_s10 + $0xb0] sm:$0xff] %v6898_v58  ;;  %v6901_v20 = vadd.f32 %v7891_v18, %v11128_v32  ;;  %v6892_v21 = vpop.f32.mrb[167].mxu0  ;;  %v7760_v32 = vpop.f32.mrb[175].mxu1  ;;  %v6769_v24 = vadd.f32 %v7758_v23, %v6608_v2 }
 0x5eb   : > { %6956 = vst [vmem:[%s11092_s10 + $0xa0] sm:$0xff] %v6890_v4  ;;  %v6893_v11 = vadd.f32 %v6892_v21, %v11112_v62  ;;  %v7761_v15 = vadd.f32 %v7760_v32, %v7759_v63 }
 0x5ec   : > { %6959 = vst [vmem:[%s11092_s10 + $0xb8] sm:$0xff] %v6901_v20 }
 0x5ed   : > { %6957 = vst [vmem:[%s11092_s10 + $0xa8] sm:$0xff] %v6893_v11  ;;  %v6772_v26 = vadd.f32 %v7761_v15, %v6611_v45 }
 0x5ef   : > { %v7894_v3 = vpop.f32.mrb[168].mxu0 }
 0x5f0   : > { %v6914_v62 = vadd.f32 %v7894_v3, %v6753_v44  ;;  %v6905_v41 = vpop.f32.mrb[169].mxu0 }
 0x5f1   : > { %v6906_v54 = vadd.f32 %v6905_v41, %v11139_v39  ;;  %v7895_v33 = vpop.f32.mrb[170].mxu0 }
 0x5f2   : > { %6962 = vst [vmem:[%s11092_s10 + $0xd0] sm:$0xff] %v6914_v62  ;;  %v6917_v6 = vadd.f32 %v7895_v33, %v6756_v51  ;;  %v6908_v17 = vpop.f32.mrb[171].mxu0 }
 0x5f3   : > { %6960 = vst [vmem:[%s11092_s10 + $0xc0] sm:$0xff] %v6906_v54  ;;  %v6909_v9 = vadd.f32 %v6908_v17, %v11144_v59 }
 0x5f4   : > { %6963 = vst [vmem:[%s11092_s10 + $0xd8] sm:$0xff] %v6917_v6 }
 0x5f5   : > { %6961 = vst [vmem:[%s11092_s10 + $0xc8] sm:$0xff] %v6909_v9 }
 0x5f7   : > { %v7898_v50 = vpop.f32.mrb[172].mxu0 }
 0x5f8   : > { %v6930_v10 = vadd.f32 %v7898_v50, %v6769_v24  ;;  %v6921_v48 = vpop.f32.mrb[173].mxu0 }
 0x5f9   : > { %v6922_v39 = vadd.f32 %v6921_v48, %v6761_v30  ;;  %v7899_v25 = vpop.f32.mrb[174].mxu0 }
 0x5fa   : > { %6966 = vst [vmem:[%s11092_s10 + $0xf0] sm:$0xff] %v6930_v10  ;;  %v6933_v55 = vadd.f32 %v7899_v25, %v6772_v26  ;;  %v6924_v36 = vpop.f32.mrb[175].mxu0 }
 0x5fb   : > { %6964 = vst [vmem:[%s11092_s10 + $0xe0] sm:$0xff] %v6922_v39  ;;  %v6925_v34 = vadd.f32 %v6924_v36, %v6764_v60 }
 0x5fc   : > { %6967 = vst [vmem:[%s11092_s10 + $0xf8] sm:$0xff] %v6933_v55 }
 0x5fd   : > { %6965 = vst [vmem:[%s11092_s10 + $0xe8] sm:$0xff] %v6925_v34 }
 0x5fe   : > { %8071 = shalt.err (!%p8068_p3)
}
 0x5ff   : > { %s8072_s25 = scalar_lea.hbm %s11190_s13, 4096  ;;  %s8076_s17 = scalar_lea.hbm %s11249_s8, 8192 }
 0x600   : > { %p8073_p4 = scmp.ne.s32.totalorder %s11190_s13, %s8072_s25  ;;  %p8077_p9 = scmp.lt.u32.totalorder %s11190_s13, %s11249_s8 }
 0x601   : > { %p8078_p10 = scmp.lt.u32.totalorder %s8076_s17, %s8072_s25  ;;  %p8080_p12 = scmp.lt.u32.totalorder %s8072_s25, %s11190_s13 }
 0x602   : > { %p8074_p7 = pnand %p8073_p4, %p8217_p5 }
 0x603   : > { %p8079_p11 = por %p8078_p10, %p8077_p9 }
 0x604   : > { %p8075_p8 = pneg %p8074_p7 }
 0x605   : > { %p8081_p13 = por %p8080_p12, %p8079_p11 }
 0x607   : > { %p8082_p0 = pnand %p8081_p13, %p8075_p8 }
 0x609   : > { %8085 = shalt.err (!%p8082_p0)
}
 0x60a   : > { %s8133_s21 = smov 128  }
 0x60b   : > { %7908 = dma.vmem_to_hbm [thread:$0]  (%p8217_p5), %s11193_s18, 4096, %s11190_s13, %s11199_s9, %s8133_s21, %s8133_s21, %s8124_s23  }
 0x60c PF: > { %p7914_p1 = scmp.ge.s32.totalorder %s8120_s30, 2  ;;  %s6997_s22 = sand.u32 1, %s8108_s27  }
 0x60d   : > { %s6998_s12 = scalar_lea.sflag [#allocation6], %s6997_s22 }
 0x60e   : > { %p7911_p2 = pnand %p7914_p1, %p8221_p6 }
 0x610   : > { %8103 = dma.done.wait (!%p7911_p2), %s6998_s12, 4096  }
 0x611   : > { %8105 = vsyncadd (!%p7911_p2), %s6998_s12, 4294963200  ;;  %p18_p3 = scmp.ge.s32.totalorder %s8204_s11, 4   ;;  %s11288_s27 = smov %s8112_s28 }
 0x612   : > { %s11289_s28 = smov %s8116_s29  ;;  %s11290_s29 = smov %s8215_s14 }
 0x613   : > { %s11291_s30 = smov %s8204_s11  ;;  %20 = sbr.rel (!%p18_p3) target bundleno = 3 (0x3), region = 91 }
 0x61a   :  { %7003 = vsyncpa [#allocation6], 1 }
 0x61b   :  { %7005 = vsyncpa [#allocation6 + $0x1], 1 }

</bundles_post_ra>
